<compile_context>
chip_gen: v6e
topology: v6e:2x2x1
jax: 0.10.0
libtpu: 0.0.40
codegen_flags: <defaults>
</compile_context>

<pallas_src>
import functools

import jax
import jax.numpy as jnp
from jax.experimental import pallas as pl
from jax.experimental.pallas import tpu as pltpu

LANE = 128
SUBLANE = 8

ENCODER_DIMS = [784, 1024, 512, 256, 128, 64, 32, 10]
DECODER_DIMS = [10, 32, 64, 128, 256, 512, 1024, 784]
N_ENC = len(ENCODER_DIMS) - 1
N_DEC = len(DECODER_DIMS) - 1
N_LAYERS = N_ENC + N_DEC


def _round_up(x, m):
    return (x + m - 1) // m * m


# ----------------------------------------------------------------------------
# Fused Pallas kernel: the whole encoder + decoder chain in one body.
# ----------------------------------------------------------------------------
def _autoencoder_kernel(x_ref, *refs, n_enc, n_layers):
    # refs: w_0..w_{L-1} (bf16, padded), b_0..b_{L-1} (f32, (1, Dout_pad)),
    #       decoded_out_ref (f32), encoded_out_ref (f32)
    w_refs = refs[:n_layers]
    b_refs = refs[n_layers:2 * n_layers]
    dec_ref = refs[2 * n_layers]
    enc_ref = refs[2 * n_layers + 1]

    h = x_ref[...]  # (B_pad, 896) bf16
    for i in range(n_layers):
        # MXU matmul in bf16 with f32 accumulation; bias/activation in f32.
        y = jnp.dot(h, w_refs[i][...], preferred_element_type=jnp.float32)
        y = y + b_refs[i][...]
        if i == n_layers - 1:
            # Final decoder layer: Tanh, write decoded output in f32.
            dec_ref[...] = jnp.tanh(y).astype(dec_ref.dtype)
        elif i == n_enc - 1:
            # Encoder bottleneck (32 -> 10): no activation, write encoded output.
            enc_ref[...] = y.astype(enc_ref.dtype)
            h = y.astype(jnp.bfloat16)
        else:
            h = jnp.maximum(y, 0.0).astype(jnp.bfloat16)


def autoencoder_fused(x_pad, ws, bs):
    """Run the fused forward. x_pad: (B_pad, 896) bf16; ws/bs: padded params."""
    b_pad_rows = x_pad.shape[0]
    d_enc_pad = bs[N_ENC - 1].shape[1]  # 128 (10 padded)
    d_out_pad = bs[-1].shape[1]         # 896 (784 padded)

    kernel = functools.partial(_autoencoder_kernel, n_enc=N_ENC, n_layers=N_LAYERS)
    n_inputs = 1 + 2 * N_LAYERS
    vmem = pl.BlockSpec(memory_space=pltpu.MemorySpace.VMEM)

    decoded_pad, encoded_pad = pl.pallas_call(
        kernel,
        out_shape=(
            jax.ShapeDtypeStruct((b_pad_rows, d_out_pad), jnp.float32),
            jax.ShapeDtypeStruct((b_pad_rows, d_enc_pad), jnp.float32),
        ),
        in_specs=[vmem] * n_inputs,
        out_specs=(vmem, vmem),
        compiler_params=pltpu.CompilerParams(
            vmem_limit_bytes=32 << 20,  # need ~7 MiB; leave headroom, never ask for all VMEM
        ),
    )(x_pad, *ws, *bs)
    return decoded_pad, encoded_pad


# ----------------------------------------------------------------------------
# Parameters: PyTorch-style init, then pad to lane multiples + cast to bf16.
# ----------------------------------------------------------------------------
def _init_linear(key, din, dout):
    # nn.Linear default: U(-1/sqrt(din), 1/sqrt(din)) for weight and bias.
    kw, kb = jax.random.split(key)
    bound = 1.0 / jnp.sqrt(jnp.float32(din))
    w = jax.random.uniform(kw, (din, dout), jnp.float32, -bound, bound)
    b = jax.random.uniform(kb, (dout,), jnp.float32, -bound, bound)
    return w, b


def init_params(key):
    dims = (list(zip(ENCODER_DIMS[:-1], ENCODER_DIMS[1:]))
            + list(zip(DECODER_DIMS[:-1], DECODER_DIMS[1:])))
    keys = jax.random.split(key, N_LAYERS)
    return [_init_linear(k, din, dout) for k, (din, dout) in zip(keys, dims)]


def prepare_params(layers):
    """Zero-pad feature dims to multiples of 128; weights -> bf16, biases -> f32 (1, Dout_pad)."""
    ws, bs = [], []
    for w, b in layers:
        din, dout = w.shape
        dinp, doutp = _round_up(din, LANE), _round_up(dout, LANE)
        w_pad = jnp.zeros((dinp, doutp), jnp.float32).at[:din, :dout].set(w)
        b_pad = jnp.zeros((1, doutp), jnp.float32).at[0, :dout].set(b)
        ws.append(w_pad.astype(jnp.bfloat16))
        bs.append(b_pad)
    return ws, bs


# ----------------------------------------------------------------------------
# Forward pass (mirrors AutoEncoder.forward)
# ----------------------------------------------------------------------------
def autoencoder_forward(ws, bs, x):
    # x: (B, 1, 28, 28) -> flatten(1) -> (B, 784)
    B = x.shape[0]
    h = x.reshape(B, -1).astype(jnp.float32)
    d_in = h.shape[1]

    b_pad_rows = _round_up(max(B, SUBLANE), SUBLANE)
    d_in_pad = _round_up(d_in, LANE)
    x_pad = (jnp.zeros((b_pad_rows, d_in_pad), jnp.bfloat16)
             .at[:B, :d_in].set(h.astype(jnp.bfloat16)))

    decoded_pad, encoded_pad = autoencoder_fused(x_pad, ws, bs)

    decoded = decoded_pad[:B, :DECODER_DIMS[-1]].reshape(-1, 1, 28, 28)
    encoded = encoded_pad[:B, :ENCODER_DIMS[-1]]
    return decoded, encoded


# ----------------------------------------------------------------------------
# Main
# ----------------------------------------------------------------------------
if __name__ == "__main__":
    key = jax.random.PRNGKey(0)
    k_params, k_x = jax.random.split(key)

    params = init_params(k_params)
    ws, bs = prepare_params(params)

    B = 2
    x = jax.random.normal(k_x, (B, 1, 28, 28), dtype=jnp.float32)

    fwd = jax.jit(autoencoder_forward)
    decoded, encoded = fwd(ws, bs, x)
    jax.block_until_ready((decoded, encoded))

    assert decoded.shape == (B, 1, 28, 28), decoded.shape
    assert encoded.shape == (B, 10), encoded.shape
    assert decoded.dtype == jnp.float32 and encoded.dtype == jnp.float32
    # tanh output must be in [-1, 1]
    assert float(jnp.max(jnp.abs(decoded))) <= 1.0 + 1e-6

    print("KERNEL_OK")
</pallas_src>

<mosaic_0001>
module attributes {stable_mosaic.version = 11 : i64} {
  func.func @_autoencoder_kernel(%arg0: memref<8x896xbf16, #tpu.memory_space<vmem>>, %arg1: memref<896x1024xbf16, #tpu.memory_space<vmem>>, %arg2: memref<1024x512xbf16, #tpu.memory_space<vmem>>, %arg3: memref<512x256xbf16, #tpu.memory_space<vmem>>, %arg4: memref<256x128xbf16, #tpu.memory_space<vmem>>, %arg5: memref<128x128xbf16, #tpu.memory_space<vmem>>, %arg6: memref<128x128xbf16, #tpu.memory_space<vmem>>, %arg7: memref<128x128xbf16, #tpu.memory_space<vmem>>, %arg8: memref<128x128xbf16, #tpu.memory_space<vmem>>, %arg9: memref<128x128xbf16, #tpu.memory_space<vmem>>, %arg10: memref<128x128xbf16, #tpu.memory_space<vmem>>, %arg11: memref<128x256xbf16, #tpu.memory_space<vmem>>, %arg12: memref<256x512xbf16, #tpu.memory_space<vmem>>, %arg13: memref<512x1024xbf16, #tpu.memory_space<vmem>>, %arg14: memref<1024x896xbf16, #tpu.memory_space<vmem>>, %arg15: memref<1x1024xf32, #tpu.memory_space<vmem>>, %arg16: memref<1x512xf32, #tpu.memory_space<vmem>>, %arg17: memref<1x256xf32, #tpu.memory_space<vmem>>, %arg18: memref<1x128xf32, #tpu.memory_space<vmem>>, %arg19: memref<1x128xf32, #tpu.memory_space<vmem>>, %arg20: memref<1x128xf32, #tpu.memory_space<vmem>>, %arg21: memref<1x128xf32, #tpu.memory_space<vmem>>, %arg22: memref<1x128xf32, #tpu.memory_space<vmem>>, %arg23: memref<1x128xf32, #tpu.memory_space<vmem>>, %arg24: memref<1x128xf32, #tpu.memory_space<vmem>>, %arg25: memref<1x256xf32, #tpu.memory_space<vmem>>, %arg26: memref<1x512xf32, #tpu.memory_space<vmem>>, %arg27: memref<1x1024xf32, #tpu.memory_space<vmem>>, %arg28: memref<1x896xf32, #tpu.memory_space<vmem>>, %arg29: memref<8x896xf32, #tpu.memory_space<vmem>>, %arg30: memref<8x128xf32, #tpu.memory_space<vmem>>) attributes {dimension_semantics = [], scalar_prefetch = 0 : i64, scratch_operands = 0 : i64, tpu.core_type = #tpu.core_type<tc>} {
    %c0 = arith.constant 0 : index
    %c0_0 = arith.constant 0 : index
    %0 = vector.load %arg0[%c0, %c0_0] : memref<8x896xbf16, #tpu.memory_space<vmem>>, vector<8x896xbf16>
    %c0_1 = arith.constant 0 : index
    %c0_2 = arith.constant 0 : index
    %1 = vector.load %arg1[%c0_1, %c0_2] : memref<896x1024xbf16, #tpu.memory_space<vmem>>, vector<896x1024xbf16>
    %cst = arith.constant dense<0.000000e+00> : vector<8x1024xf32>
    %2 = tpu.matmul %0, %1, %cst {dimension_numbers = #tpu.dot_dimension_numbers<[1], [0], [0], [1], [0, 0, 1, 1], [], []>} : vector<8x896xbf16>, vector<896x1024xbf16>, vector<8x1024xf32> -> vector<8x1024xf32>
    %c0_3 = arith.constant 0 : index
    %c0_4 = arith.constant 0 : index
    %3 = vector.load %arg15[%c0_3, %c0_4] : memref<1x1024xf32, #tpu.memory_space<vmem>>, vector<1x1024xf32>
    %4 = vector.broadcast %3 : vector<1x1024xf32> to vector<8x1024xf32>
    %5 = arith.addf %2, %4 : vector<8x1024xf32>
    %cst_5 = arith.constant 0.000000e+00 : f32
    %6 = vector.broadcast %cst_5 : f32 to vector<8x1024xf32>
    %7 = arith.maximumf %5, %6 : vector<8x1024xf32>
    %8 = arith.truncf %7 : vector<8x1024xf32> to vector<8x1024xbf16>
    %c0_6 = arith.constant 0 : index
    %c0_7 = arith.constant 0 : index
    %9 = vector.load %arg2[%c0_6, %c0_7] : memref<1024x512xbf16, #tpu.memory_space<vmem>>, vector<1024x512xbf16>
    %cst_8 = arith.constant dense<0.000000e+00> : vector<8x512xf32>
    %10 = tpu.matmul %8, %9, %cst_8 {dimension_numbers = #tpu.dot_dimension_numbers<[1], [0], [0], [1], [0, 0, 1, 1], [], []>} : vector<8x1024xbf16>, vector<1024x512xbf16>, vector<8x512xf32> -> vector<8x512xf32>
    %c0_9 = arith.constant 0 : index
    %c0_10 = arith.constant 0 : index
    %11 = vector.load %arg16[%c0_9, %c0_10] : memref<1x512xf32, #tpu.memory_space<vmem>>, vector<1x512xf32>
    %12 = vector.broadcast %11 : vector<1x512xf32> to vector<8x512xf32>
    %13 = arith.addf %10, %12 : vector<8x512xf32>
    %cst_11 = arith.constant 0.000000e+00 : f32
    %14 = vector.broadcast %cst_11 : f32 to vector<8x512xf32>
    %15 = arith.maximumf %13, %14 : vector<8x512xf32>
    %16 = arith.truncf %15 : vector<8x512xf32> to vector<8x512xbf16>
    %c0_12 = arith.constant 0 : index
    %c0_13 = arith.constant 0 : index
    %17 = vector.load %arg3[%c0_12, %c0_13] : memref<512x256xbf16, #tpu.memory_space<vmem>>, vector<512x256xbf16>
    %cst_14 = arith.constant dense<0.000000e+00> : vector<8x256xf32>
    %18 = tpu.matmul %16, %17, %cst_14 {dimension_numbers = #tpu.dot_dimension_numbers<[1], [0], [0], [1], [0, 0, 1, 1], [], []>} : vector<8x512xbf16>, vector<512x256xbf16>, vector<8x256xf32> -> vector<8x256xf32>
    %c0_15 = arith.constant 0 : index
    %c0_16 = arith.constant 0 : index
    %19 = vector.load %arg17[%c0_15, %c0_16] : memref<1x256xf32, #tpu.memory_space<vmem>>, vector<1x256xf32>
    %20 = vector.broadcast %19 : vector<1x256xf32> to vector<8x256xf32>
    %21 = arith.addf %18, %20 : vector<8x256xf32>
    %cst_17 = arith.constant 0.000000e+00 : f32
    %22 = vector.broadcast %cst_17 : f32 to vector<8x256xf32>
    %23 = arith.maximumf %21, %22 : vector<8x256xf32>
    %24 = arith.truncf %23 : vector<8x256xf32> to vector<8x256xbf16>
    %c0_18 = arith.constant 0 : index
    %c0_19 = arith.constant 0 : index
    %25 = vector.load %arg4[%c0_18, %c0_19] : memref<256x128xbf16, #tpu.memory_space<vmem>>, vector<256x128xbf16>
    %cst_20 = arith.constant dense<0.000000e+00> : vector<8x128xf32>
    %26 = tpu.matmul %24, %25, %cst_20 {dimension_numbers = #tpu.dot_dimension_numbers<[1], [0], [0], [1], [0, 0, 1, 1], [], []>} : vector<8x256xbf16>, vector<256x128xbf16>, vector<8x128xf32> -> vector<8x128xf32>
    %c0_21 = arith.constant 0 : index
    %c0_22 = arith.constant 0 : index
    %27 = vector.load %arg18[%c0_21, %c0_22] : memref<1x128xf32, #tpu.memory_space<vmem>>, vector<1x128xf32>
    %28 = vector.broadcast %27 : vector<1x128xf32> to vector<8x128xf32>
    %29 = arith.addf %26, %28 : vector<8x128xf32>
    %cst_23 = arith.constant 0.000000e+00 : f32
    %30 = vector.broadcast %cst_23 : f32 to vector<8x128xf32>
    %31 = arith.maximumf %29, %30 : vector<8x128xf32>
    %32 = arith.truncf %31 : vector<8x128xf32> to vector<8x128xbf16>
    %c0_24 = arith.constant 0 : index
    %c0_25 = arith.constant 0 : index
    %33 = vector.load %arg5[%c0_24, %c0_25] : memref<128x128xbf16, #tpu.memory_space<vmem>>, vector<128x128xbf16>
    %cst_26 = arith.constant dense<0.000000e+00> : vector<8x128xf32>
    %34 = tpu.matmul %32, %33, %cst_26 {dimension_numbers = #tpu.dot_dimension_numbers<[1], [0], [0], [1], [0, 0, 1, 1], [], []>} : vector<8x128xbf16>, vector<128x128xbf16>, vector<8x128xf32> -> vector<8x128xf32>
    %c0_27 = arith.constant 0 : index
    %c0_28 = arith.constant 0 : index
    %35 = vector.load %arg19[%c0_27, %c0_28] : memref<1x128xf32, #tpu.memory_space<vmem>>, vector<1x128xf32>
    %36 = vector.broadcast %35 : vector<1x128xf32> to vector<8x128xf32>
    %37 = arith.addf %34, %36 : vector<8x128xf32>
    %cst_29 = arith.constant 0.000000e+00 : f32
    %38 = vector.broadcast %cst_29 : f32 to vector<8x128xf32>
    %39 = arith.maximumf %37, %38 : vector<8x128xf32>
    %40 = arith.truncf %39 : vector<8x128xf32> to vector<8x128xbf16>
    %c0_30 = arith.constant 0 : index
    %c0_31 = arith.constant 0 : index
    %41 = vector.load %arg6[%c0_30, %c0_31] : memref<128x128xbf16, #tpu.memory_space<vmem>>, vector<128x128xbf16>
    %cst_32 = arith.constant dense<0.000000e+00> : vector<8x128xf32>
    %42 = tpu.matmul %40, %41, %cst_32 {dimension_numbers = #tpu.dot_dimension_numbers<[1], [0], [0], [1], [0, 0, 1, 1], [], []>} : vector<8x128xbf16>, vector<128x128xbf16>, vector<8x128xf32> -> vector<8x128xf32>
    %c0_33 = arith.constant 0 : index
    %c0_34 = arith.constant 0 : index
    %43 = vector.load %arg20[%c0_33, %c0_34] : memref<1x128xf32, #tpu.memory_space<vmem>>, vector<1x128xf32>
    %44 = vector.broadcast %43 : vector<1x128xf32> to vector<8x128xf32>
    %45 = arith.addf %42, %44 : vector<8x128xf32>
    %cst_35 = arith.constant 0.000000e+00 : f32
    %46 = vector.broadcast %cst_35 : f32 to vector<8x128xf32>
    %47 = arith.maximumf %45, %46 : vector<8x128xf32>
    %48 = arith.truncf %47 : vector<8x128xf32> to vector<8x128xbf16>
    %c0_36 = arith.constant 0 : index
    %c0_37 = arith.constant 0 : index
    %49 = vector.load %arg7[%c0_36, %c0_37] : memref<128x128xbf16, #tpu.memory_space<vmem>>, vector<128x128xbf16>
    %cst_38 = arith.constant dense<0.000000e+00> : vector<8x128xf32>
    %50 = tpu.matmul %48, %49, %cst_38 {dimension_numbers = #tpu.dot_dimension_numbers<[1], [0], [0], [1], [0, 0, 1, 1], [], []>} : vector<8x128xbf16>, vector<128x128xbf16>, vector<8x128xf32> -> vector<8x128xf32>
    %c0_39 = arith.constant 0 : index
    %c0_40 = arith.constant 0 : index
    %51 = vector.load %arg21[%c0_39, %c0_40] : memref<1x128xf32, #tpu.memory_space<vmem>>, vector<1x128xf32>
    %52 = vector.broadcast %51 : vector<1x128xf32> to vector<8x128xf32>
    %53 = arith.addf %50, %52 : vector<8x128xf32>
    %c0_41 = arith.constant 0 : index
    %c0_42 = arith.constant 0 : index
    %54 = vector.load %arg30[%c0_41, %c0_42] : memref<8x128xf32, #tpu.memory_space<vmem>>, vector<8x128xf32>
    tpu.vector_store %arg30[%c0_41, %c0_42], %53 {strides = array<i32>} : memref<8x128xf32, #tpu.memory_space<vmem>>, vector<8x128xf32>,
    %55 = arith.truncf %53 : vector<8x128xf32> to vector<8x128xbf16>
    %c0_43 = arith.constant 0 : index
    %c0_44 = arith.constant 0 : index
    %56 = vector.load %arg8[%c0_43, %c0_44] : memref<128x128xbf16, #tpu.memory_space<vmem>>, vector<128x128xbf16>
    %cst_45 = arith.constant dense<0.000000e+00> : vector<8x128xf32>
    %57 = tpu.matmul %55, %56, %cst_45 {dimension_numbers = #tpu.dot_dimension_numbers<[1], [0], [0], [1], [0, 0, 1, 1], [], []>} : vector<8x128xbf16>, vector<128x128xbf16>, vector<8x128xf32> -> vector<8x128xf32>
    %c0_46 = arith.constant 0 : index
    %c0_47 = arith.constant 0 : index
    %58 = vector.load %arg22[%c0_46, %c0_47] : memref<1x128xf32, #tpu.memory_space<vmem>>, vector<1x128xf32>
    %59 = vector.broadcast %58 : vector<1x128xf32> to vector<8x128xf32>
    %60 = arith.addf %57, %59 : vector<8x128xf32>
    %cst_48 = arith.constant 0.000000e+00 : f32
    %61 = vector.broadcast %cst_48 : f32 to vector<8x128xf32>
    %62 = arith.maximumf %60, %61 : vector<8x128xf32>
    %63 = arith.truncf %62 : vector<8x128xf32> to vector<8x128xbf16>
    %c0_49 = arith.constant 0 : index
    %c0_50 = arith.constant 0 : index
    %64 = vector.load %arg9[%c0_49, %c0_50] : memref<128x128xbf16, #tpu.memory_space<vmem>>, vector<128x128xbf16>
    %cst_51 = arith.constant dense<0.000000e+00> : vector<8x128xf32>
    %65 = tpu.matmul %63, %64, %cst_51 {dimension_numbers = #tpu.dot_dimension_numbers<[1], [0], [0], [1], [0, 0, 1, 1], [], []>} : vector<8x128xbf16>, vector<128x128xbf16>, vector<8x128xf32> -> vector<8x128xf32>
    %c0_52 = arith.constant 0 : index
    %c0_53 = arith.constant 0 : index
    %66 = vector.load %arg23[%c0_52, %c0_53] : memref<1x128xf32, #tpu.memory_space<vmem>>, vector<1x128xf32>
    %67 = vector.broadcast %66 : vector<1x128xf32> to vector<8x128xf32>
    %68 = arith.addf %65, %67 : vector<8x128xf32>
    %cst_54 = arith.constant 0.000000e+00 : f32
    %69 = vector.broadcast %cst_54 : f32 to vector<8x128xf32>
    %70 = arith.maximumf %68, %69 : vector<8x128xf32>
    %71 = arith.truncf %70 : vector<8x128xf32> to vector<8x128xbf16>
    %c0_55 = arith.constant 0 : index
    %c0_56 = arith.constant 0 : index
    %72 = vector.load %arg10[%c0_55, %c0_56] : memref<128x128xbf16, #tpu.memory_space<vmem>>, vector<128x128xbf16>
    %cst_57 = arith.constant dense<0.000000e+00> : vector<8x128xf32>
    %73 = tpu.matmul %71, %72, %cst_57 {dimension_numbers = #tpu.dot_dimension_numbers<[1], [0], [0], [1], [0, 0, 1, 1], [], []>} : vector<8x128xbf16>, vector<128x128xbf16>, vector<8x128xf32> -> vector<8x128xf32>
    %c0_58 = arith.constant 0 : index
    %c0_59 = arith.constant 0 : index
    %74 = vector.load %arg24[%c0_58, %c0_59] : memref<1x128xf32, #tpu.memory_space<vmem>>, vector<1x128xf32>
    %75 = vector.broadcast %74 : vector<1x128xf32> to vector<8x128xf32>
    %76 = arith.addf %73, %75 : vector<8x128xf32>
    %cst_60 = arith.constant 0.000000e+00 : f32
    %77 = vector.broadcast %cst_60 : f32 to vector<8x128xf32>
    %78 = arith.maximumf %76, %77 : vector<8x128xf32>
    %79 = arith.truncf %78 : vector<8x128xf32> to vector<8x128xbf16>
    %c0_61 = arith.constant 0 : index
    %c0_62 = arith.constant 0 : index
    %80 = vector.load %arg11[%c0_61, %c0_62] : memref<128x256xbf16, #tpu.memory_space<vmem>>, vector<128x256xbf16>
    %cst_63 = arith.constant dense<0.000000e+00> : vector<8x256xf32>
    %81 = tpu.matmul %79, %80, %cst_63 {dimension_numbers = #tpu.dot_dimension_numbers<[1], [0], [0], [1], [0, 0, 1, 1], [], []>} : vector<8x128xbf16>, vector<128x256xbf16>, vector<8x256xf32> -> vector<8x256xf32>
    %c0_64 = arith.constant 0 : index
    %c0_65 = arith.constant 0 : index
    %82 = vector.load %arg25[%c0_64, %c0_65] : memref<1x256xf32, #tpu.memory_space<vmem>>, vector<1x256xf32>
    %83 = vector.broadcast %82 : vector<1x256xf32> to vector<8x256xf32>
    %84 = arith.addf %81, %83 : vector<8x256xf32>
    %cst_66 = arith.constant 0.000000e+00 : f32
    %85 = vector.broadcast %cst_66 : f32 to vector<8x256xf32>
    %86 = arith.maximumf %84, %85 : vector<8x256xf32>
    %87 = arith.truncf %86 : vector<8x256xf32> to vector<8x256xbf16>
    %c0_67 = arith.constant 0 : index
    %c0_68 = arith.constant 0 : index
    %88 = vector.load %arg12[%c0_67, %c0_68] : memref<256x512xbf16, #tpu.memory_space<vmem>>, vector<256x512xbf16>
    %cst_69 = arith.constant dense<0.000000e+00> : vector<8x512xf32>
    %89 = tpu.matmul %87, %88, %cst_69 {dimension_numbers = #tpu.dot_dimension_numbers<[1], [0], [0], [1], [0, 0, 1, 1], [], []>} : vector<8x256xbf16>, vector<256x512xbf16>, vector<8x512xf32> -> vector<8x512xf32>
    %c0_70 = arith.constant 0 : index
    %c0_71 = arith.constant 0 : index
    %90 = vector.load %arg26[%c0_70, %c0_71] : memref<1x512xf32, #tpu.memory_space<vmem>>, vector<1x512xf32>
    %91 = vector.broadcast %90 : vector<1x512xf32> to vector<8x512xf32>
    %92 = arith.addf %89, %91 : vector<8x512xf32>
    %cst_72 = arith.constant 0.000000e+00 : f32
    %93 = vector.broadcast %cst_72 : f32 to vector<8x512xf32>
    %94 = arith.maximumf %92, %93 : vector<8x512xf32>
    %95 = arith.truncf %94 : vector<8x512xf32> to vector<8x512xbf16>
    %c0_73 = arith.constant 0 : index
    %c0_74 = arith.constant 0 : index
    %96 = vector.load %arg13[%c0_73, %c0_74] : memref<512x1024xbf16, #tpu.memory_space<vmem>>, vector<512x1024xbf16>
    %cst_75 = arith.constant dense<0.000000e+00> : vector<8x1024xf32>
    %97 = tpu.matmul %95, %96, %cst_75 {dimension_numbers = #tpu.dot_dimension_numbers<[1], [0], [0], [1], [0, 0, 1, 1], [], []>} : vector<8x512xbf16>, vector<512x1024xbf16>, vector<8x1024xf32> -> vector<8x1024xf32>
    %c0_76 = arith.constant 0 : index
    %c0_77 = arith.constant 0 : index
    %98 = vector.load %arg27[%c0_76, %c0_77] : memref<1x1024xf32, #tpu.memory_space<vmem>>, vector<1x1024xf32>
    %99 = vector.broadcast %98 : vector<1x1024xf32> to vector<8x1024xf32>
    %100 = arith.addf %97, %99 : vector<8x1024xf32>
    %cst_78 = arith.constant 0.000000e+00 : f32
    %101 = vector.broadcast %cst_78 : f32 to vector<8x1024xf32>
    %102 = arith.maximumf %100, %101 : vector<8x1024xf32>
    %103 = arith.truncf %102 : vector<8x1024xf32> to vector<8x1024xbf16>
    %c0_79 = arith.constant 0 : index
    %c0_80 = arith.constant 0 : index
    %104 = vector.load %arg14[%c0_79, %c0_80] : memref<1024x896xbf16, #tpu.memory_space<vmem>>, vector<1024x896xbf16>
    %cst_81 = arith.constant dense<0.000000e+00> : vector<8x896xf32>
    %105 = tpu.matmul %103, %104, %cst_81 {dimension_numbers = #tpu.dot_dimension_numbers<[1], [0], [0], [1], [0, 0, 1, 1], [], []>} : vector<8x1024xbf16>, vector<1024x896xbf16>, vector<8x896xf32> -> vector<8x896xf32>
    %c0_82 = arith.constant 0 : index
    %c0_83 = arith.constant 0 : index
    %106 = vector.load %arg28[%c0_82, %c0_83] : memref<1x896xf32, #tpu.memory_space<vmem>>, vector<1x896xf32>
    %107 = vector.broadcast %106 : vector<1x896xf32> to vector<8x896xf32>
    %108 = arith.addf %105, %107 : vector<8x896xf32>
    %109 = math.tanh %108 : vector<8x896xf32>
    %c0_84 = arith.constant 0 : index
    %c0_85 = arith.constant 0 : index
    %110 = vector.load %arg29[%c0_84, %c0_85] : memref<8x896xf32, #tpu.memory_space<vmem>>, vector<8x896xf32>
    tpu.vector_store %arg29[%c0_84, %c0_85], %109 {strides = array<i32>} : memref<8x896xf32, #tpu.memory_space<vmem>>, vector<8x896xf32>,
    return
  }
}

</mosaic_0001>

<bundles_post_ra>
// kernel: autoencoder_forward.1
= control target key start
LH: loop header
LB: loop body
LE: loop exit
PB: predicated region body
PF: predicated region fallthrough
CT: control target
= control target key end

     0   :  { %s17188_s6 = smov 1   ;;  %s17189_s10 = smov 2   ;;  %s17927_s0 = inlined_call_operand.smem [shape: u32[31], index: -1, kind: input, shape index: {}] }
   0x1   :  { %s17267_s5 = sld [smem:[%s17927_s0]]   ;;  %s17190_s14 = smov 3  }
   0x2   :  { %s17272_s9 = sld [smem:[%s17927_s0 + %s17188_s6]]   ;;  %s17191_s18 = smov 4  }
   0x3   :  { %s17277_s13 = sld [smem:[%s17927_s0 + %s17189_s10]]   ;;  %s17192_s22 = smov 5  }
   0x4   :  { %s17282_s17 = sld [smem:[%s17927_s0 + %s17190_s14]]   ;;  %s17193_s26 = smov 6  }
   0x5   :  { %s17287_s21 = sld [smem:[%s17927_s0 + %s17191_s18]]   ;;  %s17194_s30 = smov 7  }
   0x6   :  { %s17292_s25 = sld [smem:[%s17927_s0 + %s17192_s22]]   ;;  %s17195_s4 = smov 8  }
   0x7   :  { %17929 = sst [smem:[#allocation60_spill]] %s17267_s5  ;;  %s17196_s10 = smov 9  }
   0x8   :  { %s17297_s29 = sld [smem:[%s17927_s0 + %s17193_s26]]   ;;  %s17197_s15 = smov 10  }
   0x9   :  { %s17302_s3 = sld [smem:[%s17927_s0 + %s17194_s30]]   ;;  %s17198_s20 = smov 11  }
   0xa   :  { %17930 = sst [smem:[#allocation61_spill]] %s17282_s17  ;;  %s17199_s26 = smov 12  }
   0xb   :  { %s17307_s8 = sld [smem:[%s17927_s0 + %s17195_s4]]   ;;  %s17200_s1 = smov 13  }
   0xc   :  { %17931 = sst [smem:[#allocation62_spill]] %s17292_s25  ;;  %s17201_s7 = smov 14  }
   0xd   :  { %s17312_s14 = sld [smem:[%s17927_s0 + %s17196_s10]]   ;;  %s17203_s22 = smov 16  }
   0xe   :  { %s17317_s19 = sld [smem:[%s17927_s0 + %s17197_s15]]   ;;  %s17202_s15 = smov 15  }
   0xf   :  { %17932 = sst [smem:[#allocation63_spill]] %s17302_s3  ;;  %s17204_s28 = smov 17  }
  0x10   :  { %s17322_s24 = sld [smem:[%s17927_s0 + %s17198_s20]]  }
  0x11   :  { %s17327_s30 = sld [smem:[%s17927_s0 + %s17199_s26]]  }
  0x12   :  { %s17332_s6 = sld [smem:[%s17927_s0 + %s17200_s1]]  }
  0x13   :  { %17933 = sst [smem:[#allocation64_spill]] %s17312_s14 }
  0x14   :  { %s17337_s12 = sld [smem:[%s17927_s0 + %s17201_s7]]   ;;  %s17205_s7 = smov 18  }
  0x15   :  { %s17342_s20 = sld [smem:[%s17927_s0 + %s17202_s15]]   ;;  %s17206_s15 = smov 19  }
  0x16   :  { %17934 = sst [smem:[#allocation65_spill]] %s17322_s24 }
  0x17   :  { %s17347_s27 = sld [smem:[%s17927_s0 + %s17203_s22]]   ;;  %s17207_s22 = smov 20  }
  0x18   :  { %17935 = sst [smem:[#allocation66_spill]] %s17332_s6 }
  0x19   :  { %s17352_s4 = sld [smem:[%s17927_s0 + %s17204_s28]]   ;;  %s17208_s28 = smov 21  }
  0x1a   :  { %s17357_s5 = sld [smem:[%s17927_s0 + %s17205_s7]]   ;;  %s17209_s7 = smov 22  }
  0x1b   :  { %17936 = sst [smem:[#allocation67_spill]] %s17342_s20 }
  0x1c   :  { %s17362_s20 = sld [smem:[%s17927_s0 + %s17206_s15]]   ;;  %s17210_s15 = smov 23  }
  0x1d   :  { %s17367_s6 = sld [smem:[%s17927_s0 + %s17207_s22]]   ;;  %s17211_s22 = smov 24  }
  0x1e   :  { %s17377_s24 = sld [smem:[%s17927_s0 + %s17209_s7]]   ;;  %s17213_s7 = smov 26  }
  0x1f   :  { %17937 = sst [smem:[#allocation68_spill]] %s17352_s4 }
  0x20   :  { %s17372_s4 = sld [smem:[%s17927_s0 + %s17208_s28]]   ;;  %s17212_s28 = smov 25  }
  0x21   :  { %s17387_s14 = sld [smem:[%s17927_s0 + %s17211_s22]]   ;;  %s17215_s22 = smov 28  }
  0x22   :  { %17938 = sst [smem:[#allocation69_spill]] %s17362_s20 }
  0x23   :  { %s17382_s20 = sld [smem:[%s17927_s0 + %s17210_s15]]   ;;  %s17214_s15 = smov 27  }
  0x24   :  { %s17397_s3 = sld [smem:[%s17927_s0 + %s17213_s7]]   ;;  %s17217_s7 = smov 30  }
  0x25   :  { %s17407_s25 = sld [smem:[%s17927_s0 + %s17215_s22]]  }
  0x26   :  { %17939 = sst [smem:[#allocation70_spill]] %s17372_s4 }
  0x27   :  { %s17392_s4 = sld [smem:[%s17927_s0 + %s17212_s28]]   ;;  %s17216_s28 = smov 29  }
  0x28   :  { %s17417_s17 = sld [smem:[%s17927_s0 + %s17217_s7]]  }
  0x29   :  { %17940 = sst [smem:[#allocation71_spill]] %s17382_s20 }
  0x2a   :  { %s17402_s20 = sld [smem:[%s17927_s0 + %s17214_s15]]  }
  0x2d   :  { %17941 = sst [smem:[#allocation72_spill]] %s17392_s4 }
  0x2e   :  { %s17412_s4 = sld [smem:[%s17927_s0 + %s17216_s28]]  }
  0x2f   :  { %67 = vsyncpa [#allocation3], 0 }
  0x30   :  { %68 = vsyncpa [#allocation5], 0 }
  0x31   :  { %69 = vsyncpa [#allocation8], 0 }
  0x32   :  { %70 = vsyncpa [#allocation11], 0 }
  0x33   :  { %71 = vsyncpa [#allocation14], 0 }
  0x34   :  { %72 = vsyncpa [#allocation17], 0 }
  0x35   :  { %73 = vsyncpa [#allocation20], 0 }
  0x36   :  { %74 = vsyncpa [#allocation23], 0 }
  0x37   :  { %75 = vsyncpa [#allocation26], 0 }
  0x38   :  { %76 = vsyncpa [#allocation29], 0 }
  0x39   :  { %77 = vsyncpa [#allocation32], 0 }
  0x3a   :  { %78 = vsyncpa [#allocation35], 0 }
  0x3b   :  { %79 = vsyncpa [#allocation38], 0 }
  0x3c   :  { %80 = vsyncpa [#allocation41], 0 }
  0x3d   :  { %81 = vsyncpa [#allocation44], 0  ;;  %s17218_s15 = smov [#allocation4]  }
  0x3e   :  { %s101_s16 = sshll.u32 %s17218_s15, 4  ;;  %s102_s16 = int_to_ptr.vmem [resolvable:$true] %s101_s16 }
  0x3f   :  { %s16606_s0 = scalar_lea.vmem %s102_s16, 32768  ;;  %p16611_p1 = scmp.lt.s32.totalorder %s102_s16, %s102_s16 }
  0x40   :  { %p16607_p0 = scmp.ne.s32.totalorder %s102_s16, %s16606_s0  ;;  %p16612_p2 = scmp.lt.s32.totalorder %s16606_s0, %s16606_s0 }
  0x42   :  { %p16613_p3 = por %p16612_p2, %p16611_p1 }
  0x44   :  { %p16614_p4 = pnand %p16613_p3, %p16607_p0 }
  0x46   :  { %16617 = shalt.err (!%p16614_p4)
}
  0x47   :  { %s17219_s18 = smov 256   ;;  %s17220_s22 = smov 16  }
  0x48   :  { %107 = dma.hbm_to_vmem [thread:$0]  %s17277_s13, 32768, %s102_s16, [#allocation5], %s17219_s18, %s17219_s18, %s17220_s22  }
  0x49   :  { %s17221_s23 = smov [#allocation7]  }
  0x4a   :  { %s125_s26 = sshll.u32 %s17221_s23, 4  ;;  %s126_s26 = int_to_ptr.vmem [resolvable:$true] %s125_s26 }
  0x4b   :  { %s16626_s28 = scalar_lea.vmem %s126_s26, 2048  ;;  %p16631_p6 = scmp.lt.s32.totalorder %s126_s26, %s126_s26 }
  0x4c   :  { %p16627_p5 = scmp.ne.s32.totalorder %s126_s26, %s16626_s28  ;;  %p16632_p7 = scmp.lt.s32.totalorder %s16626_s28, %s16626_s28 }
  0x4e   :  { %p16633_p8 = por %p16632_p7, %p16631_p6 }
  0x50   :  { %p16634_p9 = pnand %p16633_p8, %p16627_p5 }
  0x52   :  { %16637 = shalt.err (!%p16634_p9)
}
  0x53   :  { %s17222_s1 = smov 64   ;;  %s17223_s2 = smov 4  }
  0x54   :  { %131 = dma.hbm_to_vmem [thread:$0]  %s17287_s21, 2048, %s126_s26, [#allocation8], %s17222_s1, %s17222_s1, %s17223_s2  }
  0x55   :  { %s17224_s7 = smov [#allocation10]   ;;  %s17225_s13 = smov [#allocation13]  }
  0x56   :  { %s149_s10 = sshll.u32 %s17224_s7, 4  ;;  %s173_s11 = sshll.u32 %s17225_s13, 4  ;;  %s150_s10 = int_to_ptr.vmem [resolvable:$true] %s149_s10  ;;  %s174_s11 = int_to_ptr.vmem [resolvable:$true] %s173_s11 }
  0x57   :  { %s16646_s15 = scalar_lea.vmem %s150_s10, 1024  ;;  %p16651_p11 = scmp.lt.s32.totalorder %s150_s10, %s150_s10 }
  0x58   :  { %p16647_p10 = scmp.ne.s32.totalorder %s150_s10, %s16646_s15  ;;  %p16652_p12 = scmp.lt.s32.totalorder %s16646_s15, %s16646_s15 }
  0x5a   :  { %p16653_p13 = por %p16652_p12, %p16651_p11 }
  0x5c   :  { %p16654_p0 = pnand %p16653_p13, %p16647_p10 }
  0x5e   :  { %16657 = shalt.err (!%p16654_p0)
}
  0x5f   :  { %155 = dma.hbm_to_vmem [thread:$0]  %s17297_s29, 1024, %s150_s10, [#allocation11], %s17222_s1, %s17222_s1, %s17223_s2  }
  0x60   :  { %s16666_s16 = scalar_lea.vmem %s174_s11, 1024  ;;  %p16671_p2 = scmp.lt.s32.totalorder %s174_s11, %s174_s11 }
  0x61   :  { %p16667_p1 = scmp.ne.s32.totalorder %s174_s11, %s16666_s16  ;;  %p16672_p3 = scmp.lt.s32.totalorder %s16666_s16, %s16666_s16 }
  0x63   :  { %p16673_p4 = por %p16672_p3, %p16671_p2 }
  0x65   :  { %p16674_p5 = pnand %p16673_p4, %p16667_p1 }
  0x67   :  { %16677 = shalt.err (!%p16674_p5)
}
  0x68   :  { %179 = dma.hbm_to_vmem [thread:$0]  %s17307_s8, 1024, %s174_s11, [#allocation14], %s17222_s1, %s17222_s1, %s17223_s2  }
  0x69   :  { %s17226_s21 = smov [#allocation16]   ;;  %s17227_s23 = smov [#allocation19]  }
  0x6a   :  { %s197_s0 = sshll.u32 %s17226_s21, 4  ;;  %s221_s26 = sshll.u32 %s17227_s23, 4  ;;  %s198_s0 = int_to_ptr.vmem [resolvable:$true] %s197_s0  ;;  %s222_s26 = int_to_ptr.vmem [resolvable:$true] %s221_s26 }
  0x6b   :  { %s16686_s28 = scalar_lea.vmem %s198_s0, 1024  ;;  %p16691_p7 = scmp.lt.s32.totalorder %s198_s0, %s198_s0 }
  0x6c   :  { %p16687_p6 = scmp.ne.s32.totalorder %s198_s0, %s16686_s28  ;;  %p16692_p8 = scmp.lt.s32.totalorder %s16686_s28, %s16686_s28 }
  0x6e   :  { %p16693_p9 = por %p16692_p8, %p16691_p7 }
  0x70   :  { %p16694_p10 = pnand %p16693_p9, %p16687_p6 }
  0x72   :  { %16697 = shalt.err (!%p16694_p10)
}
  0x73   :  { %203 = dma.hbm_to_vmem [thread:$0]  %s17317_s19, 1024, %s198_s0, [#allocation17], %s17222_s1, %s17222_s1, %s17223_s2  }
  0x74   :  { %s16706_s29 = scalar_lea.vmem %s222_s26, 8192  ;;  %p16711_p12 = scmp.lt.s32.totalorder %s222_s26, %s222_s26 }
  0x75   :  { %p16707_p11 = scmp.ne.s32.totalorder %s222_s26, %s16706_s29  ;;  %p16712_p13 = scmp.lt.s32.totalorder %s16706_s29, %s16706_s29 }
  0x77   :  { %p16713_p0 = por %p16712_p13, %p16711_p12 }
  0x79   :  { %p16714_p1 = pnand %p16713_p0, %p16707_p11 }
  0x7b   :  { %16717 = shalt.err (!%p16714_p1)
}
  0x7c   :  { %227 = dma.hbm_to_vmem [thread:$0]  %s17327_s30, 8192, %s222_s26, [#allocation20], %s17219_s18, %s17219_s18, %s17220_s22  }
  0x7d   :  { %s17228_s8 = smov [#allocation22]  }
  0x7e   :  { %s245_s7 = sshll.u32 %s17228_s8, 4  ;;  %s246_s7 = int_to_ptr.vmem [resolvable:$true] %s245_s7 }
  0x7f   :  { %s16726_s10 = scalar_lea.vmem %s246_s7, 57344  ;;  %p16731_p3 = scmp.lt.s32.totalorder %s246_s7, %s246_s7 }
  0x80   :  { %p16727_p2 = scmp.ne.s32.totalorder %s246_s7, %s16726_s10  ;;  %p16732_p4 = scmp.lt.s32.totalorder %s16726_s10, %s16726_s10 }
  0x82   :  { %p16733_p5 = por %p16732_p4, %p16731_p3 }
  0x84   :  { %p16734_p6 = pnand %p16733_p5, %p16727_p2 }
  0x86   :  { %16737 = shalt.err (!%p16734_p6)
}
  0x87   :  { %s17229_s19 = smov 448   ;;  %s17230_s13 = smov 28  }
  0x88   :  { %251 = dma.hbm_to_vmem [thread:$0]  %s17337_s12, 57344, %s246_s7, [#allocation23], %s17229_s19, %s17229_s19, %s17230_s13  }
  0x89   :  { %s17231_s11 = smov [#allocation25]   ;;  %s17232_s16 = smov [#allocation28]  }
  0x8a   :  { %s268_s15 = sshll.u32 %s17231_s11, 4  ;;  %s288_s21 = sshll.u32 %s17232_s16, 4  ;;  %s269_s15 = int_to_ptr.vmem [resolvable:$true] %s268_s15  ;;  %s289_s21 = int_to_ptr.vmem [resolvable:$true] %s288_s21 }
  0x8b   :  { %s16746_s30 = scalar_lea.vmem %s269_s15, 64  ;;  %p16751_p8 = scmp.lt.s32.totalorder %s269_s15, %s269_s15 }
  0x8c   :  { %p16747_p7 = scmp.ne.s32.totalorder %s269_s15, %s16746_s30  ;;  %p16752_p9 = scmp.lt.s32.totalorder %s16746_s30, %s16746_s30 }
  0x8e   :  { %p16753_p10 = por %p16752_p9, %p16751_p8 }
  0x90   :  { %p16754_p11 = pnand %p16753_p10, %p16747_p7 }
  0x92   :  { %16757 = shalt.err (!%p16754_p11)
}
  0x93   :  { %271 = dma.hbm_to_vmem [thread:$0]  %s17347_s27, 64, %s269_s15, [#allocation26]  }
  0x94   :  { %s16766_s18 = scalar_lea.vmem %s289_s21, 16  ;;  %s16770_s22 = scalar_lea.vmem %s289_s21, 32 }
  0x95   :  { %p16767_p12 = scmp.ne.s32.totalorder %s289_s21, %s16766_s18  ;;  %p16771_p13 = scmp.lt.s32.totalorder %s289_s21, %s289_s21 }
  0x96   :  { %p16772_p0 = scmp.lt.s32.totalorder %s16770_s22, %s16766_s18 }
  0x98   :  { %p16773_p1 = por %p16772_p0, %p16771_p13 }
  0x9a   :  { %p16774_p2 = pnand %p16773_p1, %p16767_p12 }
  0x9c   :  { %16777 = shalt.err (!%p16774_p2)
}
  0x9d   :  { %291 = dma.hbm_to_vmem [thread:$0]  %s17357_s5, 16, %s289_s21, [#allocation29]  }
  0x9e   :  { %s17233_s12 = smov [#allocation31]   ;;  %s17234_s23 = smov [#allocation34]  }
  0x9f   :  { %s308_s0 = sshll.u32 %s17233_s12, 4  ;;  %s328_s26 = sshll.u32 %s17234_s23, 4  ;;  %s309_s0 = int_to_ptr.vmem [resolvable:$true] %s308_s0  ;;  %s329_s26 = int_to_ptr.vmem [resolvable:$true] %s328_s26 }
  0xa0   :  { %s16786_s28 = scalar_lea.vmem %s309_s0, 16  ;;  %s16790_s29 = scalar_lea.vmem %s309_s0, 32 }
  0xa1   :  { %p16787_p3 = scmp.ne.s32.totalorder %s309_s0, %s16786_s28  ;;  %p16791_p4 = scmp.lt.s32.totalorder %s309_s0, %s309_s0 }
  0xa2   :  { %p16792_p5 = scmp.lt.s32.totalorder %s16790_s29, %s16786_s28 }
  0xa4   :  { %p16793_p6 = por %p16792_p5, %p16791_p4 }
  0xa6   :  { %p16794_p7 = pnand %p16793_p6, %p16787_p3 }
  0xa8   :  { %16797 = shalt.err (!%p16794_p7)
}
  0xa9   :  { %311 = dma.hbm_to_vmem [thread:$0]  %s17367_s6, 16, %s309_s0, [#allocation32]  }
  0xaa   :  { %s16806_s27 = scalar_lea.vmem %s329_s26, 16  ;;  %s16810_s8 = scalar_lea.vmem %s329_s26, 32 }
  0xab   :  { %p16807_p8 = scmp.ne.s32.totalorder %s329_s26, %s16806_s27  ;;  %p16811_p9 = scmp.lt.s32.totalorder %s329_s26, %s329_s26 }
  0xac   :  { %p16812_p10 = scmp.lt.s32.totalorder %s16810_s8, %s16806_s27 }
  0xae   :  { %p16813_p11 = por %p16812_p10, %p16811_p9 }
  0xb0   :  { %p16814_p12 = pnand %p16813_p11, %p16807_p8 }
  0xb2   :  { %16817 = shalt.err (!%p16814_p12)
}
  0xb3   :  { %331 = dma.hbm_to_vmem [thread:$0]  %s17377_s24, 16, %s329_s26, [#allocation35]  }
  0xb4   :  { %s17235_s5 = smov [#allocation37]   ;;  %s17236_s10 = smov [#allocation40]  }
  0xb5   :  { %s348_s7 = sshll.u32 %s17235_s5, 4  ;;  %s368_s19 = sshll.u32 %s17236_s10, 4  ;;  %s349_s7 = int_to_ptr.vmem [resolvable:$true] %s348_s7  ;;  %s369_s19 = int_to_ptr.vmem [resolvable:$true] %s368_s19 }
  0xb6   :  { %s16826_s13 = scalar_lea.vmem %s349_s7, 16  ;;  %s16830_s11 = scalar_lea.vmem %s349_s7, 32 }
  0xb7   :  { %p16827_p13 = scmp.ne.s32.totalorder %s349_s7, %s16826_s13  ;;  %p16831_p0 = scmp.lt.s32.totalorder %s349_s7, %s349_s7 }
  0xb8   :  { %p16832_p1 = scmp.lt.s32.totalorder %s16830_s11, %s16826_s13 }
  0xba   :  { %p16833_p2 = por %p16832_p1, %p16831_p0 }
  0xbc   :  { %p16834_p3 = pnand %p16833_p2, %p16827_p13 }
  0xbe   :  { %16837 = shalt.err (!%p16834_p3)
}
  0xbf   :  { %351 = dma.hbm_to_vmem [thread:$0]  %s17387_s14, 16, %s349_s7, [#allocation38]  }
  0xc0   :  { %s16846_s6 = scalar_lea.vmem %s369_s19, 64  ;;  %p16851_p5 = scmp.lt.s32.totalorder %s369_s19, %s369_s19 }
  0xc1   :  { %p16847_p4 = scmp.ne.s32.totalorder %s369_s19, %s16846_s6  ;;  %p16852_p6 = scmp.lt.s32.totalorder %s16846_s6, %s16846_s6 }
  0xc3   :  { %p16853_p7 = por %p16852_p6, %p16851_p5 }
  0xc5   :  { %p16854_p8 = pnand %p16853_p7, %p16847_p4 }
  0xc7   :  { %16857 = shalt.err (!%p16854_p8)
}
  0xc8   :  { %371 = dma.hbm_to_vmem [thread:$0]  %s17397_s3, 64, %s369_s19, [#allocation41]  }
  0xc9   :  { %s17237_s24 = smov [#allocation2]  }
  0xca   :  { %s89_s15 = sshll.u32 %s17237_s24, 4  ;;  %s90_s15 = int_to_ptr.vmem [resolvable:$true] %s89_s15 }
  0xcb   :  { %s16866_s16 = scalar_lea.vmem %s90_s15, 57344  ;;  %p16871_p10 = scmp.lt.s32.totalorder %s90_s15, %s90_s15 }
  0xcc   :  { %p16867_p9 = scmp.ne.s32.totalorder %s90_s15, %s16866_s16  ;;  %p16872_p11 = scmp.lt.s32.totalorder %s16866_s16, %s16866_s16 }
  0xce   :  { %p16873_p12 = por %p16872_p11, %p16871_p10 }
  0xd0   :  { %p16874_p13 = pnand %p16873_p12, %p16867_p9 }
  0xd2   :  { %16877 = shalt.err (!%p16874_p13)
}
  0xd3   :  { %s17238_s14 = smov 512   ;;  %s17239_s21 = smov 32  }
  0xd4   :  { %95 = dma.hbm_to_vmem [thread:$0]  %s17272_s9, 57344, %s90_s15, [#allocation3], %s17238_s14, %s17238_s14, %s17239_s21  }
  0xd5   :  { %s17240_s30 = smov [#allocation6]  }
  0xd6   :  { %s113_s18 = sshll.u32 %s17240_s30, 4  ;;  %s114_s18 = int_to_ptr.vmem [resolvable:$true] %s113_s18 }
  0xd7   :  { %s16886_s3 = scalar_lea.vmem %s114_s18, 8192  ;;  %p16891_p1 = scmp.lt.s32.totalorder %s114_s18, %s114_s18 }
  0xd8   :  { %p16887_p0 = scmp.ne.s32.totalorder %s114_s18, %s16886_s3  ;;  %p16892_p2 = scmp.lt.s32.totalorder %s16886_s3, %s16886_s3 }
  0xda   :  { %p16893_p3 = por %p16892_p2, %p16891_p1 }
  0xdc   :  { %p16894_p4 = pnand %p16893_p3, %p16887_p0 }
  0xde   :  { %16897 = shalt.err (!%p16894_p4)
}
  0xdf   :  { %s17241_s22 = smov 128   ;;  %s17942_s12 = sld [smem:[#allocation61_spill]] }
  0xe0   :  { %s17242_s0 = smov 8   ;;  %s17243_s23 = smov [#allocation9]  }
  0xe1   :  { %s137_s26 = sshll.u32 %s17243_s23, 4  ;;  %s17244_s9 = smov [#allocation12]   ;;  %s138_s26 = int_to_ptr.vmem [resolvable:$true] %s137_s26 }
  0xe2   :  { %s161_s28 = sshll.u32 %s17244_s9, 4  ;;  %s16906_s29 = scalar_lea.vmem %s138_s26, 1024  ;;  %s162_s28 = int_to_ptr.vmem [resolvable:$true] %s161_s28 }
  0xe3   :  { %p16907_p5 = scmp.ne.s32.totalorder %s138_s26, %s16906_s29  ;;  %p16911_p6 = scmp.lt.s32.totalorder %s138_s26, %s138_s26 }
  0xe4   :  { %p16912_p7 = scmp.lt.s32.totalorder %s16906_s29, %s16906_s29 }
  0xe5   :  { %119 = dma.hbm_to_vmem [thread:$0]  %s17942_s12, 8192, %s114_s18, [#allocation5], %s17241_s22, %s17241_s22, %s17242_s0  }
  0xe6   :  { %p16913_p8 = por %p16912_p7, %p16911_p6 }
  0xe8   :  { %p16914_p9 = pnand %p16913_p8, %p16907_p5 }
  0xea   :  { %16917 = shalt.err (!%p16914_p9)
}
  0xeb   :  { %s17943_s27 = sld [smem:[#allocation62_spill]]  ;;  %s16926_s8 = scalar_lea.vmem %s162_s28, 1024 }
  0xec   :  { %p16927_p10 = scmp.ne.s32.totalorder %s162_s28, %s16926_s8  ;;  %p16931_p11 = scmp.lt.s32.totalorder %s162_s28, %s162_s28 }
  0xed   :  { %p16932_p12 = scmp.lt.s32.totalorder %s16926_s8, %s16926_s8 }
  0xef   :  { %p16933_p13 = por %p16932_p12, %p16931_p11 }
  0xf1   :  { %143 = dma.hbm_to_vmem [thread:$0]  %s17943_s27, 1024, %s138_s26, [#allocation8], %s17222_s1, %s17222_s1, %s17223_s2  }
  0xf2   :  { %p16934_p0 = pnand %p16933_p13, %p16927_p10 }
  0xf4   :  { %16937 = shalt.err (!%p16934_p0)
}
  0xf5   :  { %s17944_s5 = sld [smem:[#allocation63_spill]]  ;;  %s17245_s7 = smov [#allocation15]  }
  0xf6   :  { %s185_s10 = sshll.u32 %s17245_s7, 4  ;;  %s17246_s19 = smov [#allocation18]   ;;  %s186_s10 = int_to_ptr.vmem [resolvable:$true] %s185_s10 }
  0xf7   :  { %s209_s13 = sshll.u32 %s17246_s19, 4  ;;  %s16946_s11 = scalar_lea.vmem %s186_s10, 1024  ;;  %s210_s13 = int_to_ptr.vmem [resolvable:$true] %s209_s13 }
  0xf8   :  { %p16947_p1 = scmp.ne.s32.totalorder %s186_s10, %s16946_s11  ;;  %p16951_p2 = scmp.lt.s32.totalorder %s186_s10, %s186_s10 }
  0xf9   :  { %p16952_p3 = scmp.lt.s32.totalorder %s16946_s11, %s16946_s11 }
  0xfb   :  { %167 = dma.hbm_to_vmem [thread:$0]  %s17944_s5, 1024, %s162_s28, [#allocation11], %s17222_s1, %s17222_s1, %s17223_s2  }
  0xfc   :  { %p16953_p4 = por %p16952_p3, %p16951_p2 }
  0xfe   :  { %p16954_p5 = pnand %p16953_p4, %p16947_p1 }
 0x100   :  { %16957 = shalt.err (!%p16954_p5)
}
 0x101   :  { %s17945_s6 = sld [smem:[#allocation64_spill]]  ;;  %s16966_s24 = scalar_lea.vmem %s210_s13, 2048 }
 0x102   :  { %p16967_p6 = scmp.ne.s32.totalorder %s210_s13, %s16966_s24  ;;  %p16971_p7 = scmp.lt.s32.totalorder %s210_s13, %s210_s13 }
 0x103   :  { %p16972_p8 = scmp.lt.s32.totalorder %s16966_s24, %s16966_s24 }
 0x105   :  { %p16973_p9 = por %p16972_p8, %p16971_p7 }
 0x107   :  { %191 = dma.hbm_to_vmem [thread:$0]  %s17945_s6, 1024, %s186_s10, [#allocation14], %s17222_s1, %s17222_s1, %s17223_s2  }
 0x108   :  { %p16974_p10 = pnand %p16973_p9, %p16967_p6 }
 0x10a   :  { %16977 = shalt.err (!%p16974_p10)
}
 0x10b   :  { %s17946_s15 = sld [smem:[#allocation65_spill]]  ;;  %s17247_s16 = smov [#allocation21]  }
 0x10c   :  { %s233_s30 = sshll.u32 %s17247_s16, 4  ;;  %s17248_s18 = smov [#allocation24]   ;;  %s234_s30 = int_to_ptr.vmem [resolvable:$true] %s233_s30 }
 0x10d   :  { %s258_s3 = sshll.u32 %s17248_s18, 4  ;;  %s16986_s12 = scalar_lea.vmem %s234_s30, 32768  ;;  %s259_s3 = int_to_ptr.vmem [resolvable:$true] %s258_s3 }
 0x10e   :  { %p16987_p11 = scmp.ne.s32.totalorder %s234_s30, %s16986_s12  ;;  %p16991_p12 = scmp.lt.s32.totalorder %s234_s30, %s234_s30 }
 0x10f   :  { %p16992_p13 = scmp.lt.s32.totalorder %s16986_s12, %s16986_s12 }
 0x111   :  { %215 = dma.hbm_to_vmem [thread:$0]  %s17946_s15, 2048, %s210_s13, [#allocation17], %s17241_s22, %s17241_s22, %s17242_s0  }
 0x112   :  { %p16993_p0 = por %p16992_p13, %p16991_p12 }
 0x114   :  { %p16994_p1 = pnand %p16993_p0, %p16987_p11 }
 0x116   :  { %16997 = shalt.err (!%p16994_p1)
}
 0x117   :  { %s17947_s1 = sld [smem:[#allocation66_spill]]  ;;  %s17006_s2 = scalar_lea.vmem %s259_s3, 128 }
 0x118   :  { %p17007_p2 = scmp.ne.s32.totalorder %s259_s3, %s17006_s2  ;;  %p17011_p3 = scmp.lt.s32.totalorder %s259_s3, %s259_s3 }
 0x119   :  { %p17012_p4 = scmp.lt.s32.totalorder %s17006_s2, %s17006_s2 }
 0x11b   :  { %p17013_p5 = por %p17012_p4, %p17011_p3 }
 0x11d   :  { %239 = dma.hbm_to_vmem [thread:$0]  %s17947_s1, 32768, %s234_s30, [#allocation20], %s17238_s14, %s17238_s14, %s17239_s21  }
 0x11e   :  { %p17014_p6 = pnand %p17013_p5, %p17007_p2 }
 0x120   :  { %17017 = shalt.err (!%p17014_p6)
}
 0x121   :  { %s17948_s22 = sld [smem:[#allocation67_spill]]  ;;  %s17249_s0 = smov [#allocation27]  }
 0x122   :  { %s278_s23 = sshll.u32 %s17249_s0, 4  ;;  %s17250_s26 = smov [#allocation30]   ;;  %s279_s23 = int_to_ptr.vmem [resolvable:$true] %s278_s23 }
 0x123   :  { %s298_s9 = sshll.u32 %s17250_s26, 4  ;;  %s17026_s28 = scalar_lea.vmem %s279_s23, 32  ;;  %s299_s9 = int_to_ptr.vmem [resolvable:$true] %s298_s9 }
 0x124   :  { %p17027_p7 = scmp.ne.s32.totalorder %s279_s23, %s17026_s28  ;;  %p17031_p8 = scmp.lt.s32.totalorder %s279_s23, %s279_s23 }
 0x125   :  { %p17032_p9 = scmp.lt.s32.totalorder %s17026_s28, %s17026_s28 }
 0x127   :  { %261 = dma.hbm_to_vmem [thread:$0]  %s17948_s22, 128, %s259_s3, [#allocation23]  }
 0x128   :  { %p17033_p10 = por %p17032_p9, %p17031_p8 }
 0x12a   :  { %p17034_p11 = pnand %p17033_p10, %p17027_p7 }
 0x12c   :  { %17037 = shalt.err (!%p17034_p11)
}
 0x12d   :  { %s17949_s14 = sld [smem:[#allocation68_spill]]  ;;  %s17046_s21 = scalar_lea.vmem %s299_s9, 16 }
 0x12e   :  { %p17047_p12 = scmp.ne.s32.totalorder %s299_s9, %s17046_s21  ;;  %s17050_s29 = scalar_lea.vmem %s299_s9, 32 }
 0x12f   :  { %p17051_p13 = scmp.lt.s32.totalorder %s299_s9, %s299_s9  ;;  %p17052_p0 = scmp.lt.s32.totalorder %s17050_s29, %s17046_s21 }
 0x131   :  { %p17053_p1 = por %p17052_p0, %p17051_p13 }
 0x133   :  { %281 = dma.hbm_to_vmem [thread:$0]  %s17949_s14, 32, %s279_s23, [#allocation26]  }
 0x134   :  { %p17054_p2 = pnand %p17053_p1, %p17047_p12 }
 0x136   :  { %17057 = shalt.err (!%p17054_p2)
}
 0x137   :  { %s17950_s27 = sld [smem:[#allocation69_spill]]  ;;  %s17251_s8 = smov [#allocation33]  }
 0x138   :  { %s318_s5 = sshll.u32 %s17251_s8, 4  ;;  %s17252_s7 = smov [#allocation36]   ;;  %s319_s5 = int_to_ptr.vmem [resolvable:$true] %s318_s5 }
 0x139   :  { %s338_s10 = sshll.u32 %s17252_s7, 4  ;;  %s17066_s19 = scalar_lea.vmem %s319_s5, 16  ;;  %s339_s10 = int_to_ptr.vmem [resolvable:$true] %s338_s10 }
 0x13a   :  { %p17067_p3 = scmp.ne.s32.totalorder %s319_s5, %s17066_s19  ;;  %s17070_s13 = scalar_lea.vmem %s319_s5, 32 }
 0x13b   :  { %p17071_p4 = scmp.lt.s32.totalorder %s319_s5, %s319_s5  ;;  %p17072_p5 = scmp.lt.s32.totalorder %s17070_s13, %s17066_s19 }
 0x13d   :  { %301 = dma.hbm_to_vmem [thread:$0]  %s17950_s27, 16, %s299_s9, [#allocation29]  }
 0x13e   :  { %p17073_p6 = por %p17072_p5, %p17071_p4 }
 0x140   :  { %p17074_p7 = pnand %p17073_p6, %p17067_p3 }
 0x142   :  { %17077 = shalt.err (!%p17074_p7)
}
 0x143   :  { %s17951_s11 = sld [smem:[#allocation70_spill]]  ;;  %s17086_s6 = scalar_lea.vmem %s339_s10, 16 }
 0x144   :  { %p17087_p8 = scmp.ne.s32.totalorder %s339_s10, %s17086_s6  ;;  %s17090_s24 = scalar_lea.vmem %s339_s10, 32 }
 0x145   :  { %p17091_p9 = scmp.lt.s32.totalorder %s339_s10, %s339_s10  ;;  %p17092_p10 = scmp.lt.s32.totalorder %s17090_s24, %s17086_s6 }
 0x147   :  { %p17093_p11 = por %p17092_p10, %p17091_p9 }
 0x149   :  { %321 = dma.hbm_to_vmem [thread:$0]  %s17951_s11, 16, %s319_s5, [#allocation32]  }
 0x14a   :  { %p17094_p12 = pnand %p17093_p11, %p17087_p8 }
 0x14c   :  { %17097 = shalt.err (!%p17094_p12)
}
 0x14d   :  { %s17952_s15 = sld [smem:[#allocation71_spill]]  ;;  %s17253_s16 = smov [#allocation39]  }
 0x14e   :  { %s358_s30 = sshll.u32 %s17253_s16, 4  ;;  %s17254_s18 = smov [#allocation42]   ;;  %s359_s30 = int_to_ptr.vmem [resolvable:$true] %s358_s30 }
 0x14f   :  { %s378_s3 = sshll.u32 %s17254_s18, 4  ;;  %s17106_s12 = scalar_lea.vmem %s359_s30, 32  ;;  %s379_s3 = int_to_ptr.vmem [resolvable:$true] %s378_s3 }
 0x150   :  { %p17107_p13 = scmp.ne.s32.totalorder %s359_s30, %s17106_s12  ;;  %p17111_p0 = scmp.lt.s32.totalorder %s359_s30, %s359_s30 }
 0x151   :  { %p17112_p1 = scmp.lt.s32.totalorder %s17106_s12, %s17106_s12 }
 0x153   :  { %341 = dma.hbm_to_vmem [thread:$0]  %s17952_s15, 16, %s339_s10, [#allocation35]  }
 0x154   :  { %p17113_p2 = por %p17112_p1, %p17111_p0 }
 0x156   :  { %p17114_p3 = pnand %p17113_p2, %p17107_p13 }
 0x158   :  { %17117 = shalt.err (!%p17114_p3)
}
 0x159   :  { %s17953_s1 = sld [smem:[#allocation72_spill]]  ;;  %s17126_s2 = scalar_lea.vmem %s379_s3, 128 }
 0x15a   :  { %p17127_p4 = scmp.ne.s32.totalorder %s379_s3, %s17126_s2  ;;  %p17131_p5 = scmp.lt.s32.totalorder %s379_s3, %s379_s3 }
 0x15b   :  { %p17132_p6 = scmp.lt.s32.totalorder %s17126_s2, %s17126_s2 }
 0x15d   :  { %p17133_p7 = por %p17132_p6, %p17131_p5 }
 0x15f   :  { %361 = dma.hbm_to_vmem [thread:$0]  %s17953_s1, 32, %s359_s30, [#allocation38]  }
 0x160   :  { %p17134_p8 = pnand %p17133_p7, %p17127_p4 }
 0x162   :  { %17137 = shalt.err (!%p17134_p8)
}
 0x163   :  { %381 = dma.hbm_to_vmem [thread:$0]  %s17402_s20, 128, %s379_s3, [#allocation41]  }
 0x164   :  { %s17255_s22 = smov [#allocation43]  }
 0x165   :  { %s388_s0 = sshll.u32 %s17255_s22, 4  ;;  %s389_s0 = int_to_ptr.vmem [resolvable:$true] %s388_s0 }
 0x166   :  { %s17146_s23 = scalar_lea.vmem %s389_s0, 112  ;;  %s17150_s26 = scalar_lea.vmem %s389_s0, 128 }
 0x167   :  { %p17147_p9 = scmp.ne.s32.totalorder %s389_s0, %s17146_s23  ;;  %p17151_p10 = scmp.lt.s32.totalorder %s389_s0, %s389_s0 }
 0x168   :  { %p17152_p11 = scmp.lt.s32.totalorder %s17150_s26, %s17146_s23 }
 0x16a   :  { %p17153_p12 = por %p17152_p11, %p17151_p10 }
 0x16c   :  { %p17154_p13 = pnand %p17153_p12, %p17147_p9 }
 0x16e   :  { %17157 = shalt.err (!%p17154_p13)
}
 0x16f   :  { %391 = dma.hbm_to_vmem [thread:$0]  %s17407_s25, 112, %s389_s0, [#allocation44]  }
 0x170   :  { %17158 = dma.done.wait [#allocation3], 57344  }
 0x171   :  { %17159 = vsyncadd [#allocation3], 4294909952 }
 0x172   :  { %17160 = dma.done.wait [#allocation5], 40960  }
 0x173   :  { %17161 = vsyncadd [#allocation5], 4294926336 }
 0x174   :  { %17162 = dma.done.wait [#allocation8], 3072  }
 0x175   :  { %17163 = vsyncadd [#allocation8], 4294964224 }
 0x176   :  { %17164 = dma.done.wait [#allocation11], 2048  }
 0x177   :  { %17165 = vsyncadd [#allocation11], 4294965248 }
 0x178   :  { %17166 = dma.done.wait [#allocation14], 2048  }
 0x179   :  { %17167 = vsyncadd [#allocation14], 4294965248 }
 0x17a   :  { %17168 = dma.done.wait [#allocation17], 3072  }
 0x17b   :  { %17169 = vsyncadd [#allocation17], 4294964224 }
 0x17c   :  { %17170 = dma.done.wait [#allocation20], 40960  }
 0x17d   :  { %17171 = vsyncadd [#allocation20], 4294926336 }
 0x17e   :  { %17172 = dma.done.wait [#allocation23], 57472  }
 0x17f   :  { %17173 = vsyncadd [#allocation23], 4294909824 }
 0x180   :  { %17174 = dma.done.wait [#allocation26], 96  }
 0x181   :  { %17175 = vsyncadd [#allocation26], 4294967200 }
 0x182   :  { %17176 = dma.done.wait [#allocation29], 32  }
 0x183   :  { %17177 = vsyncadd [#allocation29], 4294967264 }
 0x184   :  { %17178 = dma.done.wait [#allocation32], 32  }
 0x185   :  { %17179 = vsyncadd [#allocation32], 4294967264 }
 0x186   :  { %17180 = dma.done.wait [#allocation35], 32  }
 0x187   :  { %17181 = vsyncadd [#allocation35], 4294967264 }
 0x188   :  { %17182 = dma.done.wait [#allocation38], 48  }
 0x189   :  { %17183 = vsyncadd [#allocation38], 4294967248 }
 0x18a   :  { %17184 = dma.done.wait [#allocation41], 192  }
 0x18b   :  { %17185 = vsyncadd [#allocation41], 4294967104 }
 0x18c   :  { %17186 = dma.done.wait [#allocation44], 112  }
 0x18d   :  { %17187 = vsyncadd [#allocation44], 4294967184  ;;  %v537_v0 = vld [vmem:[#allocation2 + $0x1c0] sm:$0xff]  ;;  %s17954_s25 = sld [smem:[#allocation60_spill]]  ;;  %vm17258_vm0 = vmmov 0  }
 0x18e   :  { %v541_v1 = vld [vmem:[#allocation2 + $0x1e0] sm:$0xff] }
 0x18f   :  { %v665_v2 = vld [vmem:[#allocation2 + $0x5c0] sm:$0xff]  ;;  %v13346_v3 = vcombine.high %v537_v0, %v541_v1  ;;  %v13345_v5 = vcombine.low %v537_v0, %v541_v1 }
 0x190   :  { %v669_v4 = vld [vmem:[#allocation2 + $0x5e0] sm:$0xff] }
 0x191   :  { %v529_v6 = vld [vmem:[#allocation2 + $0x180] sm:$0xff]  ;;  %v13474_v8 = vcombine.high %v665_v2, %v669_v4  ;;  %v13473_v9 = vcombine.low %v665_v2, %v669_v4  ;;  %3236 = vmatprep.subr.bf16.mxu0 %v13346_v3 }
 0x192   :  { %v533_v7 = vld [vmem:[#allocation2 + $0x1a0] sm:$0xff]  ;;  %3237 = vmatpush1.bf16.msra.mxu0 %v13345_v5 }
 0x193   :  { %v13338_v10 = vcombine.high %v529_v6, %v533_v7  ;;  %v657_v11 = vld [vmem:[#allocation2 + $0x580] sm:$0xff]  ;;  %3277 = vmatprep.subr.bf16.mxu1 %v13474_v8  ;;  %v13337_v18 = vcombine.low %v529_v6, %v533_v7  ;;  %v17490_v54 = vld [vmem:[%s17954_s25 + $0x8] sm:$0xff] }
 0x194   :  { %v661_v12 = vld [vmem:[#allocation2 + $0x5a0] sm:$0xff]  ;;  %3278 = vmatpush1.bf16.msra.mxu1 %v13473_v9  ;;  %v17498_v59 = vcombine.high %v17490_v54, %v17490_v54 }
 0x195   :  { %v521_v13 = vld [vmem:[#allocation2 + $0x140] sm:$0xff]  ;;  %v13466_v14 = vcombine.high %v657_v11, %v661_v12  ;;  %3238 = vmatprep.subr.bf16.mxu0 %v13338_v10  ;;  %v13465_v19 = vcombine.low %v657_v11, %v661_v12 }
 0x196   :  { %v525_v15 = vld [vmem:[#allocation2 + $0x160] sm:$0xff]  ;;  %3239 = vmatpush1.bf16.msra.mxu0 %v13337_v18  ;;  %3309 = vmatprep.mubr.bf16.mxu1 %v17498_v59 }
 0x197   :  { %v649_v16 = vld [vmem:[#allocation2 + $0x540] sm:$0xff]  ;;  %v13330_v20 = vcombine.high %v521_v13, %v525_v15  ;;  %3279 = vmatprep.subr.bf16.mxu1 %v13466_v14  ;;  %v13329_v26 = vcombine.low %v521_v13, %v525_v15 }
 0x198   :  { %v653_v17 = vld [vmem:[#allocation2 + $0x560] sm:$0xff]  ;;  %3280 = vmatpush1.bf16.msra.mxu1 %v13465_v19 }
 0x199   :  { %v13458_v21 = vcombine.high %v649_v16, %v653_v17  ;;  %v513_v22 = vld [vmem:[#allocation2 + $0x100] sm:$0xff]  ;;  %3240 = vmatprep.subr.bf16.mxu0 %v13330_v20  ;;  %v13457_v27 = vcombine.low %v649_v16, %v653_v17 }
 0x19a   :  { %v517_v23 = vld [vmem:[#allocation2 + $0x120] sm:$0xff]  ;;  %3241 = vmatpush1.bf16.msra.mxu0 %v13329_v26 }
 0x19b   :  { %v641_v24 = vld [vmem:[#allocation2 + $0x500] sm:$0xff]  ;;  %v13322_v28 = vcombine.high %v513_v22, %v517_v23  ;;  %3281 = vmatprep.subr.bf16.mxu1 %v13458_v21  ;;  %v13321_v34 = vcombine.low %v513_v22, %v517_v23 }
 0x19c   :  { %v645_v25 = vld [vmem:[#allocation2 + $0x520] sm:$0xff]  ;;  %3282 = vmatpush1.bf16.msra.mxu1 %v13457_v27 }
 0x19d   :  { %v13450_v29 = vcombine.high %v641_v24, %v645_v25  ;;  %v505_v30 = vld [vmem:[#allocation2 + $0xc0] sm:$0xff]  ;;  %3242 = vmatprep.subr.bf16.mxu0 %v13322_v28  ;;  %v13449_v35 = vcombine.low %v641_v24, %v645_v25 }
 0x19e   :  { %v509_v31 = vld [vmem:[#allocation2 + $0xe0] sm:$0xff]  ;;  %3243 = vmatpush1.bf16.msra.mxu0 %v13321_v34 }
 0x19f   :  { %v633_v32 = vld [vmem:[#allocation2 + $0x4c0] sm:$0xff]  ;;  %v13314_v36 = vcombine.high %v505_v30, %v509_v31  ;;  %3283 = vmatprep.subr.bf16.mxu1 %v13450_v29  ;;  %v13313_v42 = vcombine.low %v505_v30, %v509_v31 }
 0x1a0   :  { %v637_v33 = vld [vmem:[#allocation2 + $0x4e0] sm:$0xff]  ;;  %3284 = vmatpush1.bf16.msra.mxu1 %v13449_v35 }
 0x1a1   :  { %v13442_v37 = vcombine.high %v633_v32, %v637_v33  ;;  %v497_v38 = vld [vmem:[#allocation2 + $0x80] sm:$0xff]  ;;  %3244 = vmatprep.subr.bf16.mxu0 %v13314_v36  ;;  %v13441_v43 = vcombine.low %v633_v32, %v637_v33 }
 0x1a2   :  { %v501_v39 = vld [vmem:[#allocation2 + $0xa0] sm:$0xff]  ;;  %3245 = vmatpush1.bf16.msra.mxu0 %v13313_v42 }
 0x1a3   :  { %v625_v40 = vld [vmem:[#allocation2 + $0x480] sm:$0xff]  ;;  %v13306_v44 = vcombine.high %v497_v38, %v501_v39  ;;  %3285 = vmatprep.subr.bf16.mxu1 %v13442_v37  ;;  %v13305_v50 = vcombine.low %v497_v38, %v501_v39 }
 0x1a4   :  { %v629_v41 = vld [vmem:[#allocation2 + $0x4a0] sm:$0xff]  ;;  %3286 = vmatpush1.bf16.msra.mxu1 %v13441_v43 }
 0x1a5   :  { %v13434_v45 = vcombine.high %v625_v40, %v629_v41  ;;  %v489_v46 = vld [vmem:[#allocation2 + $0x40] sm:$0xff]  ;;  %3246 = vmatprep.subr.bf16.mxu0 %v13306_v44  ;;  %v13433_v51 = vcombine.low %v625_v40, %v629_v41 }
 0x1a6   :  { %v493_v47 = vld [vmem:[#allocation2 + $0x60] sm:$0xff]  ;;  %3247 = vmatpush1.bf16.msra.mxu0 %v13305_v50 }
 0x1a7   :  { %v617_v48 = vld [vmem:[#allocation2 + $0x440] sm:$0xff]  ;;  %v13298_v52 = vcombine.high %v489_v46, %v493_v47  ;;  %3287 = vmatprep.subr.bf16.mxu1 %v13434_v45  ;;  %v13297_v62 = vcombine.low %v489_v46, %v493_v47 }
 0x1a8   :  { %v621_v49 = vld [vmem:[#allocation2 + $0x460] sm:$0xff]  ;;  %3288 = vmatpush1.bf16.msra.mxu1 %v13433_v51 }
 0x1a9   :  { %v17487_v53 = vld [vmem:[%s17954_s25] sm:$0xff]  ;;  %v13426_v55 = vcombine.high %v617_v48, %v621_v49  ;;  %3248 = vmatprep.subr.bf16.mxu0 %v13298_v52  ;;  %v13425_v63 = vcombine.low %v617_v48, %v621_v49 }
 0x1aa   :  { %v481_v56 = vld [vmem:[#allocation2] sm:$0xff]  ;;  %v17494_v58 = vcombine.high %v17487_v53, %v17487_v53  ;;  %3249 = vmatpush1.bf16.msra.mxu0 %v13297_v62 }
 0x1ab   :  { %v485_v57 = vld [vmem:[#allocation2 + $0x20] sm:$0xff]  ;;  %3289 = vmatprep.subr.bf16.mxu1 %v13426_v55 }
 0x1ac   :  { %v609_v60 = vld [vmem:[#allocation2 + $0x400] sm:$0xff]  ;;  %3268 = vmatprep.mubr.bf16.mxu0 %v17494_v58  ;;  %v13290_v0 = vcombine.high %v481_v56, %v485_v57  ;;  %v13289_v6 = vcombine.low %v481_v56, %v485_v57  ;;  %3290 = vmatpush1.bf16.msra.mxu1 %v13425_v63 }
 0x1ad   :  { %v613_v61 = vld [vmem:[#allocation2 + $0x420] sm:$0xff] }
 0x1ae   :  { %v13418_v1 = vcombine.high %v609_v60, %v613_v61  ;;  %v601_v2 = vld [vmem:[#allocation2 + $0x3c0] sm:$0xff]  ;;  %3250 = vmatprep.subr.bf16.mxu0 %v13290_v0  ;;  %v13417_v7 = vcombine.low %v609_v60, %v613_v61 }
 0x1af   :  { %v605_v3 = vld [vmem:[#allocation2 + $0x3e0] sm:$0xff]  ;;  %3251 = vmatpush1.bf16.msra.mxu0 %v13289_v6 }
 0x1b0   :  { %v729_v4 = vld [vmem:[#allocation2 + $0x7c0] sm:$0xff]  ;;  %v13410_v8 = vcombine.high %v601_v2, %v605_v3  ;;  %3291 = vmatprep.subr.bf16.mxu1 %v13418_v1  ;;  %v13409_v14 = vcombine.low %v601_v2, %v605_v3 }
 0x1b1   :  { %v733_v5 = vld [vmem:[#allocation2 + $0x7e0] sm:$0xff]  ;;  %3292 = vmatpush1.bf16.msra.mxu1 %v13417_v7 }
 0x1b2   :  { %v13538_v9 = vcombine.high %v729_v4, %v733_v5  ;;  %v593_v10 = vld [vmem:[#allocation2 + $0x380] sm:$0xff]  ;;  %3252 = vmatprep.subr.bf16.mxu0 %v13410_v8  ;;  %v13537_v15 = vcombine.low %v729_v4, %v733_v5 }
 0x1b3   :  { %v597_v11 = vld [vmem:[#allocation2 + $0x3a0] sm:$0xff]  ;;  %3253 = vmatpush2.bf16.msra.mxu0 %v13409_v14 }
 0x1b4   :  { %v721_v12 = vld [vmem:[#allocation2 + $0x780] sm:$0xff]  ;;  %v13402_v16 = vcombine.high %v593_v10, %v597_v11  ;;  %3293 = vmatprep.subr.bf16.mxu1 %v13538_v9  ;;  %v13401_v22 = vcombine.low %v593_v10, %v597_v11 }
 0x1b5   :  { %v725_v13 = vld [vmem:[#allocation2 + $0x7a0] sm:$0xff]  ;;  %3294 = vmatpush2.bf16.msra.mxu1 %v13537_v15 }
 0x1b6   :  { %v13530_v17 = vcombine.high %v721_v12, %v725_v13  ;;  %v585_v18 = vld [vmem:[#allocation2 + $0x340] sm:$0xff]  ;;  %3254 = vmatprep.subr.bf16.mxu0 %v13402_v16  ;;  %v13529_v23 = vcombine.low %v721_v12, %v725_v13  ;;  %v17504_v16 = vcombine.low %v17487_v53, %v17487_v53 }
 0x1b7   :  { %v589_v19 = vld [vmem:[#allocation2 + $0x360] sm:$0xff]  ;;  %3255 = vmatpush2.bf16.msra.mxu0 %v13401_v22 }
 0x1b8   :  { %v713_v20 = vld [vmem:[#allocation2 + $0x740] sm:$0xff]  ;;  %v13394_v24 = vcombine.high %v585_v18, %v589_v19  ;;  %3295 = vmatprep.subr.bf16.mxu1 %v13530_v17  ;;  %v13393_v30 = vcombine.low %v585_v18, %v589_v19  ;;  %v17508_v19 = vcombine.low %v17490_v54, %v17490_v54 }
 0x1b9   :  { %v717_v21 = vld [vmem:[#allocation2 + $0x760] sm:$0xff]  ;;  %3296 = vmatpush2.bf16.msra.mxu1 %v13529_v23 }
 0x1ba   :  { %v13522_v25 = vcombine.high %v713_v20, %v717_v21  ;;  %v577_v26 = vld [vmem:[#allocation2 + $0x300] sm:$0xff]  ;;  %3256 = vmatprep.subr.bf16.mxu0 %v13394_v24  ;;  %v13521_v31 = vcombine.low %v713_v20, %v717_v21  ;;  %v17511_v21 = vld [vmem:[%s17954_s25 + $0x10] sm:$0xff] }
 0x1bb   :  { %v581_v27 = vld [vmem:[#allocation2 + $0x320] sm:$0xff]  ;;  %3257 = vmatpush2.bf16.msra.mxu0 %v13393_v30 }
 0x1bc   :  { %v705_v28 = vld [vmem:[#allocation2 + $0x700] sm:$0xff]  ;;  %v13386_v32 = vcombine.high %v577_v26, %v581_v27  ;;  %3297 = vmatprep.subr.bf16.mxu1 %v13522_v25  ;;  %v13385_v38 = vcombine.low %v577_v26, %v581_v27 }
 0x1bd   :  { %v709_v29 = vld [vmem:[#allocation2 + $0x720] sm:$0xff]  ;;  %3298 = vmatpush2.bf16.msra.mxu1 %v13521_v31 }
 0x1be   :  { %v13514_v33 = vcombine.high %v705_v28, %v709_v29  ;;  %v569_v34 = vld [vmem:[#allocation2 + $0x2c0] sm:$0xff]  ;;  %3258 = vmatprep.subr.bf16.mxu0 %v13386_v32  ;;  %v13513_v39 = vcombine.low %v705_v28, %v709_v29  ;;  %v17516_v28 = vcombine.high %v17511_v21, %v17511_v21 }
 0x1bf   :  { %v573_v35 = vld [vmem:[#allocation2 + $0x2e0] sm:$0xff]  ;;  %3259 = vmatpush2.bf16.msra.mxu0 %v13385_v38 }
 0x1c0   :  { %v697_v36 = vld [vmem:[#allocation2 + $0x6c0] sm:$0xff]  ;;  %v13378_v40 = vcombine.high %v569_v34, %v573_v35  ;;  %3299 = vmatprep.subr.bf16.mxu1 %v13514_v33  ;;  %v13377_v46 = vcombine.low %v569_v34, %v573_v35 }
 0x1c1   :  { %v701_v37 = vld [vmem:[#allocation2 + $0x6e0] sm:$0xff]  ;;  %3300 = vmatpush2.bf16.msra.mxu1 %v13513_v39 }
 0x1c2   :  { %v13506_v41 = vcombine.high %v697_v36, %v701_v37  ;;  %v561_v42 = vld [vmem:[#allocation2 + $0x280] sm:$0xff]  ;;  %3260 = vmatprep.subr.bf16.mxu0 %v13378_v40  ;;  %v13505_v47 = vcombine.low %v697_v36, %v701_v37  ;;  %v17256_v36 = vmov 0  }
 0x1c3   :  { %v565_v43 = vld [vmem:[#allocation2 + $0x2a0] sm:$0xff]  ;;  %3261 = vmatpush2.bf16.msra.mxu0 %v13377_v46 }
 0x1c4   :  { %v689_v44 = vld [vmem:[#allocation2 + $0x680] sm:$0xff]  ;;  %v13370_v48 = vcombine.high %v561_v42, %v565_v43  ;;  %3301 = vmatprep.subr.bf16.mxu1 %v13506_v41  ;;  %v13369_v56 = vcombine.low %v561_v42, %v565_v43 }
 0x1c5   :  { %v693_v45 = vld [vmem:[#allocation2 + $0x6a0] sm:$0xff]  ;;  %3302 = vmatpush2.bf16.msra.mxu1 %v13505_v47 }
 0x1c6   :  { %v13498_v49 = vcombine.high %v689_v44, %v693_v45  ;;  %v553_v50 = vld [vmem:[#allocation2 + $0x240] sm:$0xff]  ;;  %3262 = vmatprep.subr.bf16.mxu0 %v13370_v48  ;;  %v13497_v57 = vcombine.low %v689_v44, %v693_v45 }
 0x1c7   :  { %v557_v51 = vld [vmem:[#allocation2 + $0x260] sm:$0xff]  ;;  %3263 = vmatpush2.bf16.msra.mxu0 %v13369_v56 }
 0x1c8   :  { %v681_v52 = vld [vmem:[#allocation2 + $0x640] sm:$0xff]  ;;  %v13362_v60 = vcombine.high %v553_v50, %v557_v51  ;;  %3303 = vmatprep.subr.bf16.mxu1 %v13498_v49  ;;  %v13361_v2 = vcombine.low %v553_v50, %v557_v51 }
 0x1c9   :  { %v685_v55 = vld [vmem:[#allocation2 + $0x660] sm:$0xff]  ;;  %3304 = vmatpush2.bf16.msra.mxu1 %v13497_v57 }
 0x1ca   :  { %v13490_v61 = vcombine.high %v681_v52, %v685_v55  ;;  %v545_v62 = vld [vmem:[#allocation2 + $0x200] sm:$0xff]  ;;  %3264 = vmatprep.subr.bf16.mxu0 %v13362_v60  ;;  %v13489_v3 = vcombine.low %v681_v52, %v685_v55 }
 0x1cb   :  { %v549_v63 = vld [vmem:[#allocation2 + $0x220] sm:$0xff]  ;;  %3265 = vmatpush2.bf16.msra.mxu0 %v13361_v2 }
 0x1cc   :  { %v673_v0 = vld [vmem:[#allocation2 + $0x600] sm:$0xff]  ;;  %v13354_v4 = vcombine.high %v545_v62, %v549_v63  ;;  %3305 = vmatprep.subr.bf16.mxu1 %v13490_v61  ;;  %v13353_v10 = vcombine.low %v545_v62, %v549_v63 }
 0x1cd   :  { %v677_v1 = vld [vmem:[#allocation2 + $0x620] sm:$0xff]  ;;  %3306 = vmatpush2.bf16.msra.mxu1 %v13489_v3 }
 0x1ce   :  { %v13482_v5 = vcombine.high %v673_v0, %v677_v1  ;;  %v793_v6 = vld [vmem:[#allocation2 + $0x9c0] sm:$0xff]  ;;  %3266 = vmatprep.subr.bf16.mxu0 %v13354_v4  ;;  %v13481_v11 = vcombine.low %v673_v0, %v677_v1 }
 0x1cf   :  { %v797_v7 = vld [vmem:[#allocation2 + $0x9e0] sm:$0xff]  ;;  %3267 = vmatpush2.bf16.msra.mxu0 %v13353_v10 }
 0x1d0   :  { %v921_v8 = vld [vmem:[#allocation2 + $0xdc0] sm:$0xff]  ;;  %v13602_v12 = vcombine.high %v793_v6, %v797_v7  ;;  %3307 = vmatprep.subr.bf16.mxu1 %v13482_v5  ;;  %v13601_v20 = vcombine.low %v793_v6, %v797_v7 }
 0x1d1   :  { %v925_v9 = vld [vmem:[#allocation2 + $0xde0] sm:$0xff]  ;;  %3308 = vmatpush2.bf16.msra.mxu1 %v13481_v11 }
 0x1d2   :  { %v13730_v13 = vcombine.high %v921_v8, %v925_v9  ;;  %v785_v14 = vld [vmem:[#allocation2 + $0x980] sm:$0xff]  ;;  %3318 = vmatprep.subr.bf16.mxu0 %v13602_v12  ;;  %v13729_v22 = vcombine.low %v921_v8, %v925_v9  ;;  %3269 = vmatmul.mubr.bf16.vlgmr.msra.gmra.mxu0 %v17504_v16 }
 0x1d3   :  { %v789_v15 = vld [vmem:[#allocation2 + $0x9a0] sm:$0xff]  ;;  %3319 = vmatpush1.bf16.msra.mxu0 %v13601_v20  ;;  %3350 = vmatprep.mubr.bf16.mxu0 %v17516_v28 }
 0x1d4   :  { %v913_v17 = vld [vmem:[#allocation2 + $0xd80] sm:$0xff]  ;;  %v13594_v23 = vcombine.high %v785_v14, %v789_v15  ;;  %3359 = vmatprep.subr.bf16.mxu1 %v13730_v13  ;;  %3310 = vmatmul.mubr.bf16.vlgmr.msra.gmra.mxu1 %v17508_v19  ;;  %v13593_v54 = vcombine.low %v785_v14, %v789_v15  ;;  %v538_v14 = vld [vmem:[#allocation2 + $0x1c8] sm:$0xff] }
 0x1d5   :  { %v917_v18 = vld [vmem:[#allocation2 + $0xda0] sm:$0xff]  ;;  %3360 = vmatpush1.bf16.msra.mxu1 %v13729_v22  ;;  %3391 = vmatprep.mubr.bf16.mxu1 %v17256_v36 }
 0x1d6   :  { %v777_v24 = vld [vmem:[#allocation2 + $0x940] sm:$0xff]  ;;  %v13722_v25 = vcombine.high %v913_v17, %v917_v18  ;;  %3320 = vmatprep.subr.bf16.mxu0 %v13594_v23  ;;  %v13721_v29 = vcombine.low %v913_v17, %v917_v18  ;;  %v542_v17 = vld [vmem:[#allocation2 + $0x1e8] sm:$0xff] }
 0x1d7   :  { %v781_v26 = vld [vmem:[#allocation2 + $0x960] sm:$0xff]  ;;  %3321 = vmatpush1.bf16.msra.mxu0 %v13593_v54 }
 0x1d8   :  { %v905_v53 = vld [vmem:[#allocation2 + $0xd40] sm:$0xff]  ;;  %v13586_v30 = vcombine.high %v777_v24, %v781_v26  ;;  %3361 = vmatprep.subr.bf16.mxu1 %v13722_v25  ;;  %v13585_v37 = vcombine.low %v777_v24, %v781_v26  ;;  %v530_v25 = vld [vmem:[#allocation2 + $0x188] sm:$0xff]  ;;  %v15271_v26 = vld [vmem:[%s17954_s25 + $0x18] ss:$0 sps:$4 sm:$0xff]  }
 0x1d9   :  { %v909_v27 = vld [vmem:[#allocation2 + $0xd60] sm:$0xff]  ;;  %3362 = vmatpush1.bf16.msra.mxu1 %v13721_v29  ;;  %v13347_v29 = vcombine.low %v538_v14, %v542_v17 }
 0x1da   :  { %v769_v31 = vld [vmem:[#allocation2 + $0x900] sm:$0xff]  ;;  %v13714_v34 = vcombine.high %v905_v53, %v909_v27  ;;  %3322 = vmatprep.subr.bf16.mxu0 %v13586_v30  ;;  %v13713_v38 = vcombine.low %v905_v53, %v909_v27  ;;  %v13348_v53 = vcombine.high %v538_v14, %v542_v17  ;;  %v534_v27 = vld [vmem:[#allocation2 + $0x1a8] sm:$0xff] }
 0x1db   :  { %v773_v32 = vld [vmem:[#allocation2 + $0x920] sm:$0xff]  ;;  %3323 = vmatpush1.bf16.msra.mxu0 %v13585_v37  ;;  %v482_v14 = vld [vmem:[#allocation2 + $0x8] sm:$0xff] }
 0x1dc   :  { %v897_v33 = vld [vmem:[#allocation2 + $0xd00] sm:$0xff]  ;;  %v13578_v39 = vcombine.high %v769_v31, %v773_v32  ;;  %3363 = vmatprep.subr.bf16.mxu1 %v13714_v34  ;;  %v13577_v45 = vcombine.low %v769_v31, %v773_v32  ;;  %v13340_v34 = vcombine.high %v530_v25, %v534_v27  ;;  %v486_v17 = vld [vmem:[#allocation2 + $0x28] sm:$0xff] }
 0x1dd   :  { %v901_v35 = vld [vmem:[#allocation2 + $0xd20] sm:$0xff]  ;;  %3364 = vmatpush1.bf16.msra.mxu1 %v13713_v38  ;;  %v13339_v38 = vcombine.low %v530_v25, %v534_v27  ;;  %v666_v25 = vld [vmem:[#allocation2 + $0x5c8] sm:$0xff] }
 0x1de   :  { %v761_v40 = vld [vmem:[#allocation2 + $0x8c0] sm:$0xff]  ;;  %v13706_v43 = vcombine.high %v897_v33, %v901_v35  ;;  %3324 = vmatprep.subr.bf16.mxu0 %v13578_v39  ;;  %v13705_v46 = vcombine.low %v897_v33, %v901_v35  ;;  %v522_v33 = vld [vmem:[#allocation2 + $0x148] sm:$0xff] }
 0x1df   :  { %v765_v41 = vld [vmem:[#allocation2 + $0x8e0] sm:$0xff]  ;;  %3325 = vmatpush1.bf16.msra.mxu0 %v13577_v45  ;;  %v526_v35 = vld [vmem:[#allocation2 + $0x168] sm:$0xff] }
 0x1e0   :  { %v889_v42 = vld [vmem:[#allocation2 + $0xcc0] sm:$0xff]  ;;  %v13570_v47 = vcombine.high %v761_v40, %v765_v41  ;;  %3365 = vmatprep.subr.bf16.mxu1 %v13706_v43  ;;  %v13569_v55 = vcombine.low %v761_v40, %v765_v41  ;;  %v13332_v43 = vcombine.high %v522_v33, %v526_v35 }
 0x1e1   :  { %v893_v44 = vld [vmem:[#allocation2 + $0xce0] sm:$0xff]  ;;  %3366 = vmatpush1.bf16.msra.mxu1 %v13705_v46  ;;  %v13331_v46 = vcombine.low %v522_v33, %v526_v35  ;;  %v17525_v35 = vcombine.low %v17511_v21, %v17511_v21 }
 0x1e2   :  { %v753_v48 = vld [vmem:[#allocation2 + $0x880] sm:$0xff]  ;;  %v13698_v51 = vcombine.high %v889_v42, %v893_v44  ;;  %3326 = vmatprep.subr.bf16.mxu0 %v13570_v47  ;;  %v13697_v56 = vcombine.low %v889_v42, %v893_v44  ;;  %v514_v42 = vld [vmem:[#allocation2 + $0x108] sm:$0xff] }
 0x1e3   :  { %v757_v49 = vld [vmem:[#allocation2 + $0x8a0] sm:$0xff]  ;;  %3327 = vmatpush1.bf16.msra.mxu0 %v13569_v55  ;;  %v518_v44 = vld [vmem:[#allocation2 + $0x128] sm:$0xff] }
 0x1e4   :  { %v881_v50 = vld [vmem:[#allocation2 + $0xc80] sm:$0xff]  ;;  %v13562_v57 = vcombine.high %v753_v48, %v757_v49  ;;  %3367 = vmatprep.subr.bf16.mxu1 %v13698_v51  ;;  %v13561_v1 = vcombine.low %v753_v48, %v757_v49  ;;  %v13324_v51 = vcombine.high %v514_v42, %v518_v44 }
 0x1e5   :  { %v885_v52 = vld [vmem:[#allocation2 + $0xca0] sm:$0xff]  ;;  %3368 = vmatpush1.bf16.msra.mxu1 %v13697_v56  ;;  %v13323_v56 = vcombine.low %v514_v42, %v518_v44  ;;  %v654_v44 = vld [vmem:[#allocation2 + $0x568] sm:$0xff] }
 0x1e6   :  { %v745_v60 = vld [vmem:[#allocation2 + $0x840] sm:$0xff]  ;;  %v13690_v63 = vcombine.high %v881_v50, %v885_v52  ;;  %3328 = vmatprep.subr.bf16.mxu0 %v13562_v57  ;;  %v13689_v2 = vcombine.low %v881_v50, %v885_v52  ;;  %v506_v50 = vld [vmem:[#allocation2 + $0xc8] sm:$0xff] }
 0x1e7   :  { %v749_v61 = vld [vmem:[#allocation2 + $0x860] sm:$0xff]  ;;  %3329 = vmatpush1.bf16.msra.mxu0 %v13561_v1  ;;  %v510_v52 = vld [vmem:[#allocation2 + $0xe8] sm:$0xff] }
 0x1e8   :  { %v873_v62 = vld [vmem:[#allocation2 + $0xc40] sm:$0xff]  ;;  %v13554_v3 = vcombine.high %v745_v60, %v749_v61  ;;  %3369 = vmatprep.subr.bf16.mxu1 %v13690_v63  ;;  %v13553_v9 = vcombine.low %v745_v60, %v749_v61  ;;  %v13316_v63 = vcombine.high %v506_v50, %v510_v52 }
 0x1e9   :  { %v877_v0 = vld [vmem:[#allocation2 + $0xc60] sm:$0xff]  ;;  %3370 = vmatpush1.bf16.msra.mxu1 %v13689_v2  ;;  %v13315_v2 = vcombine.low %v506_v50, %v510_v52 }
 0x1ea   :  { %v737_v4 = vld [vmem:[#allocation2 + $0x800] sm:$0xff]  ;;  %v13682_v7 = vcombine.high %v873_v62, %v877_v0  ;;  %3330 = vmatprep.subr.bf16.mxu0 %v13554_v3  ;;  %v13681_v10 = vcombine.low %v873_v62, %v877_v0  ;;  %v498_v62 = vld [vmem:[#allocation2 + $0x88] sm:$0xff] }
 0x1eb   :  { %v741_v5 = vld [vmem:[#allocation2 + $0x820] sm:$0xff]  ;;  %3331 = vmatpush1.bf16.msra.mxu0 %v13553_v9  ;;  %v502_v0 = vld [vmem:[#allocation2 + $0xa8] sm:$0xff] }
 0x1ec   :  { %v865_v6 = vld [vmem:[#allocation2 + $0xc00] sm:$0xff]  ;;  %v13546_v11 = vcombine.high %v737_v4, %v741_v5  ;;  %3371 = vmatprep.subr.bf16.mxu1 %v13682_v7  ;;  %v13545_v18 = vcombine.low %v737_v4, %v741_v5  ;;  %v13308_v7 = vcombine.high %v498_v62, %v502_v0 }
 0x1ed   :  { %v869_v8 = vld [vmem:[#allocation2 + $0xc20] sm:$0xff]  ;;  %3372 = vmatpush1.bf16.msra.mxu1 %v13681_v10  ;;  %v13307_v10 = vcombine.low %v498_v62, %v502_v0 }
 0x1ee   :  { %v857_v12 = vld [vmem:[#allocation2 + $0xbc0] sm:$0xff]  ;;  %v13674_v15 = vcombine.high %v865_v6, %v869_v8  ;;  %3332 = vmatprep.subr.bf16.mxu0 %v13546_v11  ;;  %v13673_v20 = vcombine.low %v865_v6, %v869_v8  ;;  %v490_v6 = vld [vmem:[#allocation2 + $0x48] sm:$0xff] }
 0x1ef   :  { %v861_v13 = vld [vmem:[#allocation2 + $0xbe0] sm:$0xff]  ;;  %3333 = vmatpush1.bf16.msra.mxu0 %v13545_v18  ;;  %v494_v8 = vld [vmem:[#allocation2 + $0x68] sm:$0xff] }
 0x1f0   :  { %v13666_v22 = vcombine.high %v857_v12, %v861_v13  ;;  %v849_v23 = vld [vmem:[#allocation2 + $0xb80] sm:$0xff]  ;;  %3373 = vmatprep.subr.bf16.mxu1 %v13674_v15  ;;  %v13665_v54 = vcombine.low %v857_v12, %v861_v13  ;;  %v13300_v15 = vcombine.high %v490_v6, %v494_v8 }
 0x1f1   :  { %v853_v24 = vld [vmem:[#allocation2 + $0xba0] sm:$0xff]  ;;  %3374 = vmatpush1.bf16.msra.mxu1 %v13673_v20  ;;  %v13299_v20 = vcombine.low %v490_v6, %v494_v8 }
 0x1f2   :  { %3334 = vmatprep.subr.bf16.mxu0 %v13666_v22  ;;  %v13658_v30 = vcombine.high %v849_v23, %v853_v24  ;;  %v841_v31 = vld [vmem:[#allocation2 + $0xb40] sm:$0xff]  ;;  %3400 = vmatprep.subr.bf16.mxu1 %v13348_v53  ;;  %v13657_v37 = vcombine.low %v849_v23, %v853_v24  ;;  %v602_v23 = vld [vmem:[#allocation2 + $0x3c8] sm:$0xff] }
 0x1f3   :  { %v845_v32 = vld [vmem:[#allocation2 + $0xb60] sm:$0xff]  ;;  %3335 = vmatpush2.bf16.msra.mxu0 %v13665_v54  ;;  %v606_v24 = vld [vmem:[#allocation2 + $0x3e8] sm:$0xff]  ;;  %v13291_v54 = vcombine.low %v482_v14, %v486_v17 }
 0x1f4   :  { %3392 = vmatmul.mubr.bf16.vlgmr.msra.gmra.mxu1 %v15271_v26  ;;  %3336 = vmatprep.subr.bf16.mxu0 %v13658_v30  ;;  %v13650_v39 = vcombine.high %v841_v31, %v845_v32  ;;  %v833_v40 = vld [vmem:[#allocation2 + $0xb00] sm:$0xff]  ;;  %v13649_v45 = vcombine.low %v841_v31, %v845_v32  ;;  %v13292_v26 = vcombine.high %v482_v14, %v486_v17  ;;  %v670_v53 = vld [vmem:[#allocation2 + $0x5e8] sm:$0xff] }
 0x1f5   :  { %3401 = vmatpush1.bf16.msra.mxu1 %v13347_v29  ;;  %v837_v41 = vld [vmem:[#allocation2 + $0xb20] sm:$0xff]  ;;  %3432 = vmatprep.mubr.bf16.mxu1 %v17494_v58  ;;  %v13476_v29 = vcombine.high %v666_v25, %v670_v53  ;;  %v594_v30 = vld [vmem:[#allocation2 + $0x388] sm:$0xff]  ;;  %v13412_v33 = vcombine.high %v602_v23, %v606_v24 }
 0x1f6   :  { %3402 = vmatprep.subr.bf16.mxu1 %v13340_v34  ;;  %v13642_v47 = vcombine.high %v833_v40, %v837_v41  ;;  %v825_v48 = vld [vmem:[#allocation2 + $0xac0] sm:$0xff]  ;;  %v13641_v55 = vcombine.low %v833_v40, %v837_v41  ;;  %v598_v31 = vld [vmem:[#allocation2 + $0x3a8] sm:$0xff] }
 0x1f7   :  { %3337 = vmatpush2.bf16.msra.mxu0 %v13657_v37  ;;  %v829_v49 = vld [vmem:[#allocation2 + $0xae0] sm:$0xff]  ;;  %v658_v32 = vld [vmem:[#allocation2 + $0x588] sm:$0xff]  ;;  %v13475_v37 = vcombine.low %v666_v25, %v670_v53  ;;  %v13404_v42 = vcombine.high %v594_v30, %v598_v31  ;;  %v13403_v21 = vcombine.low %v594_v30, %v598_v31 }
 0x1f8   :  { %3338 = vmatprep.subr.bf16.mxu0 %v13650_v39  ;;  %v13634_v57 = vcombine.high %v825_v48, %v829_v49  ;;  %v817_v60 = vld [vmem:[#allocation2 + $0xa80] sm:$0xff]  ;;  %v13633_v1 = vcombine.low %v825_v48, %v829_v49  ;;  %v662_v34 = vld [vmem:[#allocation2 + $0x5a8] sm:$0xff] }
 0x1f9   :  { %3403 = vmatpush1.bf16.msra.mxu1 %v13339_v38  ;;  %v821_v61 = vld [vmem:[#allocation2 + $0xaa0] sm:$0xff]  ;;  %v13411_v38 = vcombine.low %v602_v23, %v606_v24  ;;  %v13468_v39 = vcombine.high %v658_v32, %v662_v34  ;;  %v586_v40 = vld [vmem:[#allocation2 + $0x348] sm:$0xff] }
 0x1fa   :  { %3404 = vmatprep.subr.bf16.mxu1 %v13332_v43  ;;  %v13626_v3 = vcombine.high %v817_v60, %v821_v61  ;;  %v809_v4 = vld [vmem:[#allocation2 + $0xa40] sm:$0xff]  ;;  %v13625_v9 = vcombine.low %v817_v60, %v821_v61  ;;  %v590_v41 = vld [vmem:[#allocation2 + $0x368] sm:$0xff] }
 0x1fb   :  { %3339 = vmatpush2.bf16.msra.mxu0 %v13649_v45  ;;  %v813_v5 = vld [vmem:[#allocation2 + $0xa60] sm:$0xff]  ;;  %v650_v43 = vld [vmem:[#allocation2 + $0x548] sm:$0xff]  ;;  %v13467_v45 = vcombine.low %v658_v32, %v662_v34  ;;  %v13396_v50 = vcombine.high %v586_v40, %v590_v41 }
 0x1fc   :  { %3340 = vmatprep.subr.bf16.mxu0 %v13642_v47  ;;  %v13618_v11 = vcombine.high %v809_v4, %v813_v5  ;;  %v801_v12 = vld [vmem:[#allocation2 + $0xa00] sm:$0xff]  ;;  %v13617_v18 = vcombine.low %v809_v4, %v813_v5  ;;  %v578_v47 = vld [vmem:[#allocation2 + $0x308] sm:$0xff]  ;;  %v13459_v52 = vcombine.low %v650_v43, %v654_v44 }
 0x1fd   :  { %3405 = vmatpush1.bf16.msra.mxu1 %v13331_v46  ;;  %v805_v13 = vld [vmem:[#allocation2 + $0xa20] sm:$0xff]  ;;  %v13460_v46 = vcombine.high %v650_v43, %v654_v44  ;;  %v582_v48 = vld [vmem:[#allocation2 + $0x328] sm:$0xff] }
 0x1fe   :  { %3406 = vmatprep.subr.bf16.mxu1 %v13324_v51  ;;  %v13610_v22 = vcombine.high %v801_v12, %v805_v13  ;;  %v13609_v27 = vcombine.low %v801_v12, %v805_v13  ;;  %v642_v49 = vld [vmem:[#allocation2 + $0x508] sm:$0xff]  ;;  %v13388_v62 = vcombine.high %v578_v47, %v582_v48 }
 0x1ff   :  { %3341 = vmatpush2.bf16.msra.mxu0 %v13641_v55  ;;  %v646_v51 = vld [vmem:[#allocation2 + $0x528] sm:$0xff]  ;;  %v13395_v55 = vcombine.low %v586_v40, %v590_v41 }
 0x200   :  { %3342 = vmatprep.subr.bf16.mxu0 %v13634_v57  ;;  %v570_v57 = vld [vmem:[#allocation2 + $0x2c8] sm:$0xff]  ;;  %v13451_v0 = vcombine.low %v642_v49, %v646_v51 }
 0x201   :  { %3407 = vmatpush1.bf16.msra.mxu1 %v13323_v56  ;;  %v13452_v56 = vcombine.high %v642_v49, %v646_v51  ;;  %v574_v60 = vld [vmem:[#allocation2 + $0x2e8] sm:$0xff] }
 0x202   :  { %3408 = vmatprep.subr.bf16.mxu1 %v13316_v63  ;;  %v634_v61 = vld [vmem:[#allocation2 + $0x4c8] sm:$0xff]  ;;  %v13380_v6 = vcombine.high %v570_v57, %v574_v60 }
 0x203   :  { %3343 = vmatpush2.bf16.msra.mxu0 %v13633_v1  ;;  %v638_v63 = vld [vmem:[#allocation2 + $0x4e8] sm:$0xff]  ;;  %v13387_v1 = vcombine.low %v578_v47, %v582_v48 }
 0x204   :  { %3344 = vmatprep.subr.bf16.mxu0 %v13626_v3  ;;  %v562_v3 = vld [vmem:[#allocation2 + $0x288] sm:$0xff]  ;;  %v13443_v8 = vcombine.low %v634_v61, %v638_v63 }
 0x205   :  { %3409 = vmatpush1.bf16.msra.mxu1 %v13315_v2  ;;  %v13444_v2 = vcombine.high %v634_v61, %v638_v63  ;;  %v566_v4 = vld [vmem:[#allocation2 + $0x2a8] sm:$0xff] }
 0x206   :  { %3410 = vmatprep.subr.bf16.mxu1 %v13308_v7  ;;  %v626_v5 = vld [vmem:[#allocation2 + $0x488] sm:$0xff]  ;;  %v13372_v14 = vcombine.high %v562_v3, %v566_v4 }
 0x207   :  { %3345 = vmatpush2.bf16.msra.mxu0 %v13625_v9  ;;  %v630_v7 = vld [vmem:[#allocation2 + $0x4a8] sm:$0xff]  ;;  %v13379_v9 = vcombine.low %v570_v57, %v574_v60 }
 0x208   :  { %3346 = vmatprep.subr.bf16.mxu0 %v13618_v11  ;;  %v554_v11 = vld [vmem:[#allocation2 + $0x248] sm:$0xff]  ;;  %v13435_v17 = vcombine.low %v626_v5, %v630_v7 }
 0x209   :  { %3411 = vmatpush1.bf16.msra.mxu1 %v13307_v10  ;;  %v13436_v10 = vcombine.high %v626_v5, %v630_v7  ;;  %v558_v12 = vld [vmem:[#allocation2 + $0x268] sm:$0xff] }
 0x20a   :  { %3412 = vmatprep.subr.bf16.mxu1 %v13300_v15  ;;  %v618_v13 = vld [vmem:[#allocation2 + $0x448] sm:$0xff]  ;;  %v13364_v25 = vcombine.high %v554_v11, %v558_v12 }
 0x20b   :  { %3347 = vmatpush2.bf16.msra.mxu0 %v13617_v18  ;;  %v622_v15 = vld [vmem:[#allocation2 + $0x468] sm:$0xff]  ;;  %v13371_v18 = vcombine.low %v562_v3, %v566_v4 }
 0x20c   :  { %3348 = vmatprep.subr.bf16.mxu0 %v13610_v22  ;;  %v546_v22 = vld [vmem:[#allocation2 + $0x208] sm:$0xff]  ;;  %v13427_v53 = vcombine.low %v618_v13, %v622_v15 }
 0x20d   :  { %3413 = vmatpush1.bf16.msra.mxu1 %v13299_v20  ;;  %v13428_v20 = vcombine.high %v618_v13, %v622_v15  ;;  %v550_v23 = vld [vmem:[#allocation2 + $0x228] sm:$0xff] }
 0x20e   :  { %3414 = vmatprep.subr.bf16.mxu1 %v13292_v26  ;;  %v610_v24 = vld [vmem:[#allocation2 + $0x408] sm:$0xff]  ;;  %v13356_v32 = vcombine.high %v546_v22, %v550_v23 }
 0x20f   :  { %3349 = vmatpush2.bf16.msra.mxu0 %v13609_v27  ;;  %v614_v26 = vld [vmem:[#allocation2 + $0x428] sm:$0xff]  ;;  %v13363_v27 = vcombine.low %v554_v11, %v558_v12 }
 0x210   :  { %3441 = vmatprep.subr.bf16.mxu0 %v13476_v29  ;;  %v730_v29 = vld [vmem:[#allocation2 + $0x7c8] sm:$0xff]  ;;  %v13419_v34 = vcombine.low %v610_v24, %v614_v26 }
 0x211   :  { %3415 = vmatpush1.bf16.msra.mxu1 %v13291_v54  ;;  %v13420_v54 = vcombine.high %v610_v24, %v614_v26  ;;  %v734_v30 = vld [vmem:[#allocation2 + $0x7e8] sm:$0xff] }
 0x212   :  { %3416 = vmatprep.subr.bf16.mxu1 %v13412_v33  ;;  %3351 = vmatmul.mubr.bf16.vlgmr.msra.gmra.mxu0 %v17525_v35  ;;  %v794_v31 = vld [vmem:[#allocation2 + $0x9c8] sm:$0xff]  ;;  %v13539_v44 = vcombine.low %v730_v29, %v734_v30 }
 0x213   :  { %3442 = vmatpush1.bf16.msra.mxu0 %v13475_v37  ;;  %3473 = vmatprep.mubr.bf16.mxu0 %v17498_v59  ;;  %v798_v33 = vld [vmem:[#allocation2 + $0x9e8] sm:$0xff]  ;;  %v13355_v37 = vcombine.low %v546_v22, %v550_v23 }
 0x214   :  { %3443 = vmatprep.subr.bf16.mxu0 %v13468_v39  ;;  %v722_v39 = vld [vmem:[#allocation2 + $0x788] sm:$0xff] }
 0x215   :  { %3417 = vmatpush2.bf16.msra.mxu1 %v13411_v38  ;;  %v13540_v38 = vcombine.high %v730_v29, %v734_v30  ;;  %v726_v40 = vld [vmem:[#allocation2 + $0x7a8] sm:$0xff] }
 0x216   :  { %3418 = vmatprep.subr.bf16.mxu1 %v13404_v42  ;;  %v786_v41 = vld [vmem:[#allocation2 + $0x988] sm:$0xff]  ;;  %v13604_v42 = vcombine.high %v794_v31, %v798_v33  ;;  %v13531_v51 = vcombine.low %v722_v39, %v726_v40 }
 0x217   :  { %3444 = vmatpush1.bf16.msra.mxu0 %v13467_v45  ;;  %v790_v43 = vld [vmem:[#allocation2 + $0x9a8] sm:$0xff]  ;;  %v13603_v45 = vcombine.low %v794_v31, %v798_v33 }
 0x218   :  { %3445 = vmatprep.subr.bf16.mxu0 %v13460_v46  ;;  %v714_v46 = vld [vmem:[#allocation2 + $0x748] sm:$0xff]  ;;  %v13596_v49 = vcombine.high %v786_v41, %v790_v43 }
 0x219   :  { %3419 = vmatpush2.bf16.msra.mxu1 %v13403_v21  ;;  %v13532_v21 = vcombine.high %v722_v39, %v726_v40  ;;  %v718_v47 = vld [vmem:[#allocation2 + $0x768] sm:$0xff] }
 0x21a   :  { %3420 = vmatprep.subr.bf16.mxu1 %v13396_v50  ;;  %v778_v48 = vld [vmem:[#allocation2 + $0x948] sm:$0xff]  ;;  %v13523_v63 = vcombine.low %v714_v46, %v718_v47 }
 0x21b   :  { %3446 = vmatpush1.bf16.msra.mxu0 %v13459_v52  ;;  %v782_v50 = vld [vmem:[#allocation2 + $0x968] sm:$0xff]  ;;  %v13595_v52 = vcombine.low %v786_v41, %v790_v43 }
 0x21c   :  { %3447 = vmatprep.subr.bf16.mxu0 %v13452_v56  ;;  %v706_v56 = vld [vmem:[#allocation2 + $0x708] sm:$0xff]  ;;  %v13588_v61 = vcombine.high %v778_v48, %v782_v50 }
 0x21d   :  { %3421 = vmatpush2.bf16.msra.mxu1 %v13395_v55  ;;  %v13524_v55 = vcombine.high %v714_v46, %v718_v47  ;;  %v710_v57 = vld [vmem:[#allocation2 + $0x728] sm:$0xff] }
 0x21e   :  { %3422 = vmatprep.subr.bf16.mxu1 %v13388_v62  ;;  %v770_v60 = vld [vmem:[#allocation2 + $0x908] sm:$0xff]  ;;  %v13515_v7 = vcombine.low %v706_v56, %v710_v57 }
 0x21f   :  { %3448 = vmatpush1.bf16.msra.mxu0 %v13451_v0  ;;  %v774_v62 = vld [vmem:[#allocation2 + $0x928] sm:$0xff]  ;;  %v13587_v0 = vcombine.low %v778_v48, %v782_v50 }
 0x220   :  { %3449 = vmatprep.subr.bf16.mxu0 %v13444_v2  ;;  %v698_v2 = vld [vmem:[#allocation2 + $0x6c8] sm:$0xff]  ;;  %v13580_v5 = vcombine.high %v770_v60, %v774_v62 }
 0x221   :  { %3423 = vmatpush2.bf16.msra.mxu1 %v13387_v1  ;;  %v13516_v1 = vcombine.high %v706_v56, %v710_v57  ;;  %v702_v3 = vld [vmem:[#allocation2 + $0x6e8] sm:$0xff] }
 0x222   :  { %3424 = vmatprep.subr.bf16.mxu1 %v13380_v6  ;;  %v762_v4 = vld [vmem:[#allocation2 + $0x8c8] sm:$0xff]  ;;  %v13507_v15 = vcombine.low %v698_v2, %v702_v3 }
 0x223   :  { %3450 = vmatpush1.bf16.msra.mxu0 %v13443_v8  ;;  %v766_v6 = vld [vmem:[#allocation2 + $0x8e8] sm:$0xff]  ;;  %v13579_v8 = vcombine.low %v770_v60, %v774_v62 }
 0x224   :  { %3451 = vmatprep.subr.bf16.mxu0 %v13436_v10  ;;  %v690_v10 = vld [vmem:[#allocation2 + $0x688] sm:$0xff]  ;;  %v13572_v13 = vcombine.high %v762_v4, %v766_v6 }
 0x225   :  { %3425 = vmatpush2.bf16.msra.mxu1 %v13379_v9  ;;  %v13508_v9 = vcombine.high %v698_v2, %v702_v3  ;;  %v694_v11 = vld [vmem:[#allocation2 + $0x6a8] sm:$0xff] }
 0x226   :  { %3426 = vmatprep.subr.bf16.mxu1 %v13372_v14  ;;  %v754_v12 = vld [vmem:[#allocation2 + $0x888] sm:$0xff]  ;;  %v13499_v26 = vcombine.low %v690_v10, %v694_v11 }
 0x227   :  { %3452 = vmatpush1.bf16.msra.mxu0 %v13435_v17  ;;  %v758_v14 = vld [vmem:[#allocation2 + $0x8a8] sm:$0xff]  ;;  %v13571_v17 = vcombine.low %v762_v4, %v766_v6 }
 0x228   :  { %3453 = vmatprep.subr.bf16.mxu0 %v13428_v20  ;;  %v682_v20 = vld [vmem:[#allocation2 + $0x648] sm:$0xff]  ;;  %v13564_v24 = vcombine.high %v754_v12, %v758_v14 }
 0x229   :  { %3427 = vmatpush2.bf16.msra.mxu1 %v13371_v18  ;;  %v13500_v18 = vcombine.high %v690_v10, %v694_v11  ;;  %v686_v22 = vld [vmem:[#allocation2 + $0x668] sm:$0xff] }
 0x22a   :  { %3428 = vmatprep.subr.bf16.mxu1 %v13364_v25  ;;  %v746_v23 = vld [vmem:[#allocation2 + $0x848] sm:$0xff]  ;;  %v13491_v33 = vcombine.low %v682_v20, %v686_v22 }
 0x22b   :  { %3454 = vmatpush1.bf16.msra.mxu0 %v13427_v53  ;;  %v750_v25 = vld [vmem:[#allocation2 + $0x868] sm:$0xff]  ;;  %v13563_v53 = vcombine.low %v754_v12, %v758_v14 }
 0x22c   :  { %3455 = vmatprep.subr.bf16.mxu0 %v13420_v54  ;;  %v674_v54 = vld [vmem:[#allocation2 + $0x608] sm:$0xff]  ;;  %v13556_v31 = vcombine.high %v746_v23, %v750_v25 }
 0x22d   :  { %3429 = vmatpush2.bf16.msra.mxu1 %v13363_v27  ;;  %v13492_v27 = vcombine.high %v682_v20, %v686_v22  ;;  %v678_v29 = vld [vmem:[#allocation2 + $0x628] sm:$0xff] }
 0x22e   :  { %3430 = vmatprep.subr.bf16.mxu1 %v13356_v32  ;;  %v738_v30 = vld [vmem:[#allocation2 + $0x808] sm:$0xff]  ;;  %v13483_v43 = vcombine.low %v674_v54, %v678_v29 }
 0x22f   :  { %3456 = vmatpush1.bf16.msra.mxu0 %v13419_v34  ;;  %v742_v32 = vld [vmem:[#allocation2 + $0x828] sm:$0xff]  ;;  %v13555_v34 = vcombine.low %v746_v23, %v750_v25 }
 0x230   :  { %3457 = vmatprep.subr.bf16.mxu0 %v13540_v38  ;;  %v858_v38 = vld [vmem:[#allocation2 + $0xbc8] sm:$0xff]  ;;  %v13548_v41 = vcombine.high %v738_v30, %v742_v32 }
 0x231   :  { %3431 = vmatpush2.bf16.msra.mxu1 %v13355_v37  ;;  %v13484_v37 = vcombine.high %v674_v54, %v678_v29  ;;  %v862_v39 = vld [vmem:[#allocation2 + $0xbe8] sm:$0xff] }
 0x232   :  { %3482 = vmatprep.subr.bf16.mxu1 %v13604_v42  ;;  %v922_v40 = vld [vmem:[#allocation2 + $0xdc8] sm:$0xff]  ;;  %v13668_v48 = vcombine.high %v858_v38, %v862_v39 }
 0x233   :  { %3458 = vmatpush2.bf16.msra.mxu0 %v13539_v44  ;;  %v926_v42 = vld [vmem:[#allocation2 + $0xde8] sm:$0xff]  ;;  %v13547_v44 = vcombine.low %v738_v30, %v742_v32 }
 0x234   :  { %3433 = vmatmul.mubr.bf16.vlgmr.msra.gmra.mxu1 %v17504_v16  ;;  %3459 = vmatprep.subr.bf16.mxu0 %v13532_v21  ;;  %v850_v21 = vld [vmem:[#allocation2 + $0xb88] sm:$0xff]  ;;  %v13731_v50 = vcombine.low %v922_v40, %v926_v42 }
 0x235   :  { %3483 = vmatpush1.bf16.msra.mxu1 %v13603_v45  ;;  %3514 = vmatprep.mubr.bf16.mxu1 %v17516_v28  ;;  %v13732_v45 = vcombine.high %v922_v40, %v926_v42  ;;  %v854_v46 = vld [vmem:[#allocation2 + $0xba8] sm:$0xff] }
 0x236   :  { %3484 = vmatprep.subr.bf16.mxu1 %v13596_v49  ;;  %v914_v47 = vld [vmem:[#allocation2 + $0xd88] sm:$0xff]  ;;  %v13660_v60 = vcombine.high %v850_v21, %v854_v46 }
 0x237   :  { %3460 = vmatpush2.bf16.msra.mxu0 %v13531_v51  ;;  %v918_v49 = vld [vmem:[#allocation2 + $0xda8] sm:$0xff]  ;;  %v13667_v51 = vcombine.low %v858_v38, %v862_v39 }
 0x238   :  { %3461 = vmatprep.subr.bf16.mxu0 %v13524_v55  ;;  %v842_v55 = vld [vmem:[#allocation2 + $0xb48] sm:$0xff]  ;;  %v13723_v62 = vcombine.low %v914_v47, %v918_v49 }
 0x239   :  { %3485 = vmatpush1.bf16.msra.mxu1 %v13595_v52  ;;  %v13724_v52 = vcombine.high %v914_v47, %v918_v49  ;;  %v846_v56 = vld [vmem:[#allocation2 + $0xb68] sm:$0xff] }
 0x23a   :  { %3486 = vmatprep.subr.bf16.mxu1 %v13588_v61  ;;  %v906_v57 = vld [vmem:[#allocation2 + $0xd48] sm:$0xff]  ;;  %v13652_v4 = vcombine.high %v842_v55, %v846_v56 }
 0x23b   :  { %3462 = vmatpush2.bf16.msra.mxu0 %v13523_v63  ;;  %v910_v61 = vld [vmem:[#allocation2 + $0xd68] sm:$0xff]  ;;  %v13659_v63 = vcombine.low %v850_v21, %v854_v46  ;;  %v543_v21 = vld [vmem:[#allocation2 + $0x1f0] sm:$0xff] }
 0x23c   :  { %3463 = vmatprep.subr.bf16.mxu0 %v13516_v1  ;;  %v834_v1 = vld [vmem:[#allocation2 + $0xb08] sm:$0xff]  ;;  %v13715_v6 = vcombine.low %v906_v57, %v910_v61  ;;  %v667_v46 = vld [vmem:[#allocation2 + $0x5d0] sm:$0xff] }
 0x23d   :  { %3487 = vmatpush1.bf16.msra.mxu1 %v13587_v0  ;;  %v13716_v0 = vcombine.high %v906_v57, %v910_v61  ;;  %v838_v2 = vld [vmem:[#allocation2 + $0xb28] sm:$0xff] }
 0x23e   :  { %3488 = vmatprep.subr.bf16.mxu1 %v13580_v5  ;;  %v898_v3 = vld [vmem:[#allocation2 + $0xd08] sm:$0xff]  ;;  %v13644_v12 = vcombine.high %v834_v1, %v838_v2 }
 0x23f   :  { %3464 = vmatpush2.bf16.msra.mxu0 %v13515_v7  ;;  %v902_v5 = vld [vmem:[#allocation2 + $0xd28] sm:$0xff]  ;;  %v13651_v7 = vcombine.low %v842_v55, %v846_v56  ;;  %v535_v55 = vld [vmem:[#allocation2 + $0x1b0] sm:$0xff] }
 0x240   :  { %3465 = vmatprep.subr.bf16.mxu0 %v13508_v9  ;;  %v826_v9 = vld [vmem:[#allocation2 + $0xac8] sm:$0xff]  ;;  %v13707_v14 = vcombine.low %v898_v3, %v902_v5  ;;  %v659_v56 = vld [vmem:[#allocation2 + $0x590] sm:$0xff] }
 0x241   :  { %3489 = vmatpush1.bf16.msra.mxu1 %v13579_v8  ;;  %v13708_v8 = vcombine.high %v898_v3, %v902_v5  ;;  %v830_v10 = vld [vmem:[#allocation2 + $0xae8] sm:$0xff]  ;;  %v16592_v5 = vld [vmem:[%s17954_s25 + $0x18] ss:$0 sps:$4 sm:$0xff]  }
 0x242   :  { %3490 = vmatprep.subr.bf16.mxu1 %v13572_v13  ;;  %v890_v11 = vld [vmem:[#allocation2 + $0xcc8] sm:$0xff]  ;;  %v13636_v23 = vcombine.high %v826_v9, %v830_v10 }
 0x243   :  { %3466 = vmatpush2.bf16.msra.mxu0 %v13507_v15  ;;  %v894_v13 = vld [vmem:[#allocation2 + $0xce8] sm:$0xff]  ;;  %v13643_v15 = vcombine.low %v834_v1, %v838_v2  ;;  %v527_v1 = vld [vmem:[#allocation2 + $0x170] sm:$0xff] }
 0x244   :  { %3467 = vmatprep.subr.bf16.mxu0 %v13500_v18  ;;  %v818_v18 = vld [vmem:[#allocation2 + $0xa88] sm:$0xff]  ;;  %v13699_v25 = vcombine.low %v890_v11, %v894_v13  ;;  %v651_v2 = vld [vmem:[#allocation2 + $0x550] sm:$0xff] }
 0x245   :  { %3491 = vmatpush1.bf16.msra.mxu1 %v13571_v17  ;;  %v13700_v17 = vcombine.high %v890_v11, %v894_v13  ;;  %v822_v20 = vld [vmem:[#allocation2 + $0xaa8] sm:$0xff]  ;;  %v643_v11 = vld [vmem:[#allocation2 + $0x510] sm:$0xff] }
 0x246   :  { %3492 = vmatprep.subr.bf16.mxu1 %v13564_v24  ;;  %v882_v22 = vld [vmem:[#allocation2 + $0xc88] sm:$0xff]  ;;  %v13628_v30 = vcombine.high %v818_v18, %v822_v20  ;;  %v647_v13 = vld [vmem:[#allocation2 + $0x530] sm:$0xff] }
 0x247   :  { %3468 = vmatpush2.bf16.msra.mxu0 %v13499_v26  ;;  %v886_v24 = vld [vmem:[#allocation2 + $0xca8] sm:$0xff]  ;;  %v13635_v26 = vcombine.low %v826_v9, %v830_v10  ;;  %v515_v9 = vld [vmem:[#allocation2 + $0x110] sm:$0xff] }
 0x248   :  { %3469 = vmatprep.subr.bf16.mxu0 %v13492_v27  ;;  %v810_v27 = vld [vmem:[#allocation2 + $0xa48] sm:$0xff]  ;;  %v13691_v32 = vcombine.low %v882_v22, %v886_v24  ;;  %v519_v10 = vld [vmem:[#allocation2 + $0x130] sm:$0xff] }
 0x249   :  { %3493 = vmatpush1.bf16.msra.mxu1 %v13563_v53  ;;  %v13692_v53 = vcombine.high %v882_v22, %v886_v24  ;;  %v814_v54 = vld [vmem:[#allocation2 + $0xa68] sm:$0xff]  ;;  %v635_v22 = vld [vmem:[#allocation2 + $0x4d0] sm:$0xff] }
 0x24a   :  { %3494 = vmatprep.subr.bf16.mxu1 %v13556_v31  ;;  %v874_v29 = vld [vmem:[#allocation2 + $0xc48] sm:$0xff]  ;;  %v13620_v40 = vcombine.high %v810_v27, %v814_v54  ;;  %v639_v24 = vld [vmem:[#allocation2 + $0x4f0] sm:$0xff] }
 0x24b   :  { %3470 = vmatpush2.bf16.msra.mxu0 %v13491_v33  ;;  %v878_v31 = vld [vmem:[#allocation2 + $0xc68] sm:$0xff]  ;;  %v13627_v33 = vcombine.low %v818_v18, %v822_v20  ;;  %v507_v18 = vld [vmem:[#allocation2 + $0xd0] sm:$0xff] }
 0x24c   :  { %3471 = vmatprep.subr.bf16.mxu0 %v13484_v37  ;;  %v802_v37 = vld [vmem:[#allocation2 + $0xa08] sm:$0xff]  ;;  %v13683_v42 = vcombine.low %v874_v29, %v878_v31  ;;  %v511_v20 = vld [vmem:[#allocation2 + $0xf0] sm:$0xff] }
 0x24d   :  { %3495 = vmatpush1.bf16.msra.mxu1 %v13555_v34  ;;  %v13684_v34 = vcombine.high %v874_v29, %v878_v31  ;;  %v806_v38 = vld [vmem:[#allocation2 + $0xa28] sm:$0xff]  ;;  %v627_v29 = vld [vmem:[#allocation2 + $0x490] sm:$0xff] }
 0x24e   :  { %3496 = vmatprep.subr.bf16.mxu1 %v13548_v41  ;;  %v866_v39 = vld [vmem:[#allocation2 + $0xc08] sm:$0xff]  ;;  %v13612_v47 = vcombine.high %v802_v37, %v806_v38  ;;  %v631_v31 = vld [vmem:[#allocation2 + $0x4b0] sm:$0xff] }
 0x24f   :  { %3472 = vmatpush2.bf16.msra.mxu0 %v13483_v43  ;;  %v870_v41 = vld [vmem:[#allocation2 + $0xc28] sm:$0xff]  ;;  %v13619_v43 = vcombine.low %v810_v27, %v814_v54  ;;  %v499_v27 = vld [vmem:[#allocation2 + $0x90] sm:$0xff] }
 0x250   :  { %3523 = vmatprep.subr.bf16.mxu0 %v13732_v45  ;;  %v539_v45 = vld [vmem:[#allocation2 + $0x1d0] sm:$0xff]  ;;  %v13675_v49 = vcombine.low %v866_v39, %v870_v41 }
 0x251   :  { %3497 = vmatpush1.bf16.msra.mxu1 %v13547_v44  ;;  %v13676_v44 = vcombine.high %v866_v39, %v870_v41  ;;  %v13349_v61 = vcombine.low %v539_v45, %v543_v21  ;;  %v503_v54 = vld [vmem:[#allocation2 + $0xb0] sm:$0xff] }
 0x252   :  { %3498 = vmatprep.subr.bf16.mxu1 %v13668_v48  ;;  %3474 = vmatmul.mubr.bf16.vlgmr.msra.gmra.mxu0 %v17508_v19  ;;  %v671_v48 = vld [vmem:[#allocation2 + $0x5f0] sm:$0xff] }
 0x253   :  { %3524 = vmatpush1.bf16.msra.mxu0 %v13731_v50  ;;  %3555 = vmatprep.mubr.bf16.mxu0 %v17256_v36  ;;  %v13611_v50 = vcombine.low %v802_v37, %v806_v38  ;;  %v13478_v57 = vcombine.high %v667_v46, %v671_v48  ;;  %v491_v37 = vld [vmem:[#allocation2 + $0x50] sm:$0xff] }
 0x254   :  { %3525 = vmatprep.subr.bf16.mxu0 %v13724_v52  ;;  %v531_v52 = vld [vmem:[#allocation2 + $0x190] sm:$0xff] }
 0x255   :  { %3499 = vmatpush2.bf16.msra.mxu1 %v13667_v51  ;;  %v13350_v51 = vcombine.high %v539_v45, %v543_v21  ;;  %v495_v38 = vld [vmem:[#allocation2 + $0x70] sm:$0xff] }
 0x256   :  { %3500 = vmatprep.subr.bf16.mxu1 %v13660_v60  ;;  %v663_v60 = vld [vmem:[#allocation2 + $0x5b0] sm:$0xff]  ;;  %v13302_v45 = vcombine.high %v491_v37, %v495_v38 }
 0x257   :  { %3526 = vmatpush1.bf16.msra.mxu0 %v13723_v62  ;;  %v13477_v62 = vcombine.low %v667_v46, %v671_v48  ;;  %v13470_v3 = vcombine.high %v659_v56, %v663_v60  ;;  %v619_v39 = vld [vmem:[#allocation2 + $0x450] sm:$0xff] }
 0x258   :  { %3527 = vmatprep.subr.bf16.mxu0 %v13716_v0  ;;  %v523_v0 = vld [vmem:[#allocation2 + $0x150] sm:$0xff] }
 0x259   :  { %3501 = vmatpush2.bf16.msra.mxu1 %v13659_v63  ;;  %v13342_v63 = vcombine.high %v531_v52, %v535_v55  ;;  %v623_v41 = vld [vmem:[#allocation2 + $0x470] sm:$0xff] }
 0x25a   :  { %3502 = vmatprep.subr.bf16.mxu1 %v13652_v4  ;;  %v655_v4 = vld [vmem:[#allocation2 + $0x570] sm:$0xff]  ;;  %v13430_v48 = vcombine.high %v619_v39, %v623_v41 }
 0x25b   :  { %3528 = vmatpush1.bf16.msra.mxu0 %v13715_v6  ;;  %v13341_v6 = vcombine.low %v531_v52, %v535_v55  ;;  %v483_v21 = vld [vmem:[#allocation2 + $0x10] sm:$0xff]  ;;  %v13429_v52 = vcombine.low %v619_v39, %v623_v41 }
 0x25c   :  { %3529 = vmatprep.subr.bf16.mxu0 %v13708_v8  ;;  %v13334_v8 = vcombine.high %v523_v0, %v527_v1  ;;  %v487_v46 = vld [vmem:[#allocation2 + $0x30] sm:$0xff] }
 0x25d   :  { %3503 = vmatpush2.bf16.msra.mxu1 %v13651_v7  ;;  %v13469_v7 = vcombine.low %v659_v56, %v663_v60  ;;  %v13294_v55 = vcombine.high %v483_v21, %v487_v46  ;;  %v603_v56 = vld [vmem:[#allocation2 + $0x3d0] sm:$0xff] }
 0x25e   :  { %3504 = vmatprep.subr.bf16.mxu1 %v13644_v12  ;;  %v13462_v12 = vcombine.high %v651_v2, %v655_v4  ;;  %v731_v60 = vld [vmem:[#allocation2 + $0x7d0] sm:$0xff] }
 0x25f   :  { %3530 = vmatpush1.bf16.msra.mxu0 %v13707_v14  ;;  %v13333_v14 = vcombine.low %v523_v0, %v527_v1  ;;  %v929_v0 = vld [vmem:[#allocation24] sm:$0xff]  ;;  %v13293_v1 = vcombine.low %v483_v21, %v487_v46  ;;  %v571_v21 = vld [vmem:[#allocation2 + $0x2d0] sm:$0xff] }
 0x260   :  { %3531 = vmatprep.subr.bf16.mxu0 %v13700_v17  ;;  %v13326_v17 = vcombine.high %v515_v9, %v519_v10  ;;  %v575_v46 = vld [vmem:[#allocation2 + $0x2f0] sm:$0xff] }
 0x261   :  { %3505 = vmatpush2.bf16.msra.mxu1 %v13643_v15  ;;  %v13461_v15 = vcombine.low %v651_v2, %v655_v4  ;;  %v595_v4 = vld [vmem:[#allocation2 + $0x390] sm:$0xff] }
 0x262   :  { %3506 = vmatprep.subr.bf16.mxu1 %v13636_v23  ;;  %v13454_v23 = vcombine.high %v643_v11, %v647_v13 }
 0x263   :  { %3532 = vmatpush1.bf16.msra.mxu0 %v13699_v25  ;;  %v13325_v25 = vcombine.low %v515_v9, %v519_v10  ;;  %v727_v9 = vld [vmem:[#allocation2 + $0x7b0] sm:$0xff] }
 0x264   :  { %3533 = vmatprep.subr.bf16.mxu0 %v13692_v53  ;;  %v13318_v53 = vcombine.high %v507_v18, %v511_v20 }
 0x265   :  { %3507 = vmatpush2.bf16.msra.mxu1 %v13635_v26  ;;  %v13453_v26 = vcombine.low %v643_v11, %v647_v13 }
 0x266   :  { %3508 = vmatprep.subr.bf16.mxu1 %v13628_v30  ;;  %v13446_v30 = vcombine.high %v635_v22, %v639_v24 }
 0x267   :  { %3534 = vmatpush1.bf16.msra.mxu0 %v13691_v32  ;;  %v13317_v32 = vcombine.low %v507_v18, %v511_v20 }
 0x268   :  { %3535 = vmatprep.subr.bf16.mxu0 %v13684_v34  ;;  %v13310_v34 = vcombine.high %v499_v27, %v503_v54 }
 0x269   :  { %3509 = vmatpush2.bf16.msra.mxu1 %v13627_v33  ;;  %v13445_v33 = vcombine.low %v635_v22, %v639_v24  ;;  %v719_v22 = vld [vmem:[#allocation2 + $0x770] sm:$0xff] }
 0x26a   :  { %3510 = vmatprep.subr.bf16.mxu1 %v13620_v40  ;;  %v13438_v40 = vcombine.high %v627_v29, %v631_v31 }
 0x26b   :  { %3536 = vmatpush1.bf16.msra.mxu0 %v13683_v42  ;;  %v931_v42 = vlaneseq }
 0x26c   :  { %3537 = vmatprep.subr.bf16.mxu0 %v13676_v44  ;;  %v13437_v44 = vcombine.low %v627_v29, %v631_v31  ;;  %v579_v29 = vld [vmem:[#allocation2 + $0x310] sm:$0xff] }
 0x26d   :  { %3511 = vmatpush2.bf16.msra.mxu1 %v13619_v43  ;;  %v13309_v43 = vcombine.low %v499_v27, %v503_v54  ;;  %v707_v31 = vld [vmem:[#allocation2 + $0x710] sm:$0xff] }
 0x26e   :  { %3512 = vmatprep.subr.bf16.mxu1 %v13612_v47  ;;  %v611_v47 = vld [vmem:[#allocation2 + $0x410] sm:$0xff] }
 0x26f   :  { %3538 = vmatpush1.bf16.msra.mxu0 %v13675_v49  ;;  %v615_v49 = vld [vmem:[#allocation2 + $0x430] sm:$0xff] }
 0x270   :  { %3564 = vmatprep.subr.bf16.mxu0 %v13350_v51  ;;  %v13301_v51 = vcombine.low %v491_v37, %v495_v38  ;;  %v13421_v2 = vcombine.low %v611_v47, %v615_v49  ;;  %v711_v38 = vld [vmem:[#allocation2 + $0x730] sm:$0xff] }
 0x271   :  { %3513 = vmatpush2.bf16.msra.mxu1 %v13611_v50  ;;  %v17537_v50 = vshrl.u32 %v931_v42, 7 }
 0x272   :  { %3605 = vmatprep.subr.bf16.mxu1 %v13478_v57  ;;  %3556 = vmatmul.mubr.bf16.vlgmr.msra.gmra.mxu0 %v16592_v5  ;;  %v607_v57 = vld [vmem:[#allocation2 + $0x3f0] sm:$0xff] }
 0x273   :  { %3565 = vmatpush1.bf16.msra.mxu0 %v13349_v61  ;;  %3596 = vmatprep.mubr.bf16.mxu0 %v17494_v58  ;;  %v13422_v61 = vcombine.high %v611_v47, %v615_v49  ;;  %v599_v5 = vld [vmem:[#allocation2 + $0x3b0] sm:$0xff]  ;;  %v13413_v11 = vcombine.low %v603_v56, %v607_v57  ;;  %v13518_v49 = vcombine.high %v707_v31, %v711_v38 }
 0x274   :  { %3515 = vmatmul.mubr.bf16.vlgmr.msra.gmra.mxu1 %v17525_v35  ;;  %3566 = vmatprep.subr.bf16.mxu0 %v13342_v63  ;;  %v735_v63 = vld [vmem:[#allocation2 + $0x7f0] sm:$0xff]  ;;  %v13406_v13 = vcombine.high %v595_v4, %v599_v5 }
 0x275   :  { %3606 = vmatpush1.bf16.msra.mxu1 %v13477_v62  ;;  %3637 = vmatprep.mubr.bf16.mxu1 %v17498_v59  ;;  %v17540_v62 = vsub.s32 0, %v17537_v50  ;;  %v699_v47 = vld [vmem:[#allocation2 + $0x6d0] sm:$0xff] }
 0x276   :  { %3607 = vmatprep.subr.bf16.mxu1 %v13470_v3  ;;  %v13414_v3 = vcombine.high %v603_v56, %v607_v57  ;;  %v13382_v56 = vcombine.high %v571_v21, %v575_v46  ;;  %v563_v57 = vld [vmem:[#allocation2 + $0x290] sm:$0xff] }
 0x277   :  { %3567 = vmatpush1.bf16.msra.mxu0 %v13341_v6  ;;  %v723_v6 = vld [vmem:[#allocation2 + $0x790] sm:$0xff]  ;;  %v934_v10 = vrot.slane %v929_v0, %v17540_v62 }
 0x278   :  { %3568 = vmatprep.subr.bf16.mxu0 %v13334_v8  ;;  %v17543_v8 = vsub.s32 1, %v17537_v50  ;;  %v13534_v20 = vcombine.high %v723_v6, %v727_v9  ;;  %v13533_v27 = vcombine.low %v723_v6, %v727_v9  ;;  %v683_v6 = vld [vmem:[#allocation2 + $0x650] sm:$0xff] }
 0x279   :  { %3608 = vmatpush1.bf16.msra.mxu1 %v13469_v7  ;;  %v13542_v7 = vcombine.high %v731_v60, %v735_v63  ;;  %v687_v9 = vld [vmem:[#allocation2 + $0x670] sm:$0xff] }
 0x27a   :  { %3609 = vmatprep.subr.bf16.mxu1 %v13462_v12  ;;  %v13541_v12 = vcombine.low %v731_v60, %v735_v63  ;;  %v938_v18 = vrot.slane %v929_v0, %v17543_v8  ;;  %v567_v60 = vld [vmem:[#allocation2 + $0x2b0] sm:$0xff] }
 0x27b   :  { %3569 = vmatpush1.bf16.msra.mxu0 %v13333_v14  ;;  %v587_v14 = vld [vmem:[#allocation2 + $0x350] sm:$0xff] }
 0x27c   :  { %3570 = vmatprep.subr.bf16.mxu0 %v13326_v17  ;;  %v715_v17 = vld [vmem:[#allocation2 + $0x750] sm:$0xff] }
 0x27d   :  { %3610 = vmatpush1.bf16.msra.mxu1 %v13461_v15  ;;  %v591_v15 = vld [vmem:[#allocation2 + $0x370] sm:$0xff]  ;;  %v13526_v37 = vcombine.high %v715_v17, %v719_v22 }
 0x27e   :  { %3611 = vmatprep.subr.bf16.mxu1 %v13454_v23  ;;  %v13398_v54 = vcombine.high %v587_v14, %v591_v15  ;;  %v13397_v42 = vcombine.low %v587_v14, %v591_v15  ;;  %v695_v0 = vld [vmem:[#allocation2 + $0x6b0] sm:$0xff] }
 0x27f   :  { %3571 = vmatpush1.bf16.msra.mxu0 %v13325_v25  ;;  %v551_v14 = vld [vmem:[#allocation2 + $0x230] sm:$0xff] }
 0x280   :  { %3572 = vmatprep.subr.bf16.mxu0 %v13318_v53  ;;  %v675_v15 = vld [vmem:[#allocation2 + $0x610] sm:$0xff] }
 0x281   :  { %3612 = vmatpush1.bf16.msra.mxu1 %v13453_v26  ;;  %v13405_v26 = vcombine.low %v595_v4, %v599_v5  ;;  %v555_v4 = vld [vmem:[#allocation2 + $0x250] sm:$0xff] }
 0x282   :  { %3613 = vmatprep.subr.bf16.mxu1 %v13446_v30  ;;  %v583_v30 = vld [vmem:[#allocation2 + $0x330] sm:$0xff] }
 0x283   :  { %3573 = vmatpush1.bf16.msra.mxu0 %v13317_v32  ;;  %v559_v5 = vld [vmem:[#allocation2 + $0x270] sm:$0xff] }
 0x284   :  { %3574 = vmatprep.subr.bf16.mxu0 %v13310_v34 }
 0x285   :  { %3614 = vmatpush1.bf16.msra.mxu1 %v13445_v33 }
 0x286   :  { %3615 = vmatprep.subr.bf16.mxu1 %v13438_v40 }
 0x287   :  { %3575 = vmatpush1.bf16.msra.mxu0 %v13309_v43 }
 0x288   :  { %3576 = vmatprep.subr.bf16.mxu0 %v13302_v45  ;;  %v13390_v45 = vcombine.high %v579_v29, %v583_v30 }
 0x289   :  { %3616 = vmatpush1.bf16.msra.mxu1 %v13437_v44  ;;  %v13525_v44 = vcombine.low %v715_v17, %v719_v22  ;;  %v13494_v17 = vcombine.high %v683_v6, %v687_v9  ;;  %v13493_v22 = vcombine.low %v683_v6, %v687_v9  ;;  %v895_v9 = vld [vmem:[#allocation2 + $0xcf0] sm:$0xff] }
 0x28a   :  { %3617 = vmatprep.subr.bf16.mxu1 %v13430_v48 }
 0x28b   :  { %3577 = vmatpush1.bf16.msra.mxu0 %v13301_v51  ;;  %v703_v51 = vld [vmem:[#allocation2 + $0x6f0] sm:$0xff] }
 0x28c   :  { %3578 = vmatprep.subr.bf16.mxu0 %v13294_v55  ;;  %v13517_v55 = vcombine.low %v707_v31, %v711_v38  ;;  %v13510_v63 = vcombine.high %v699_v47, %v703_v51  ;;  %v787_v31 = vld [vmem:[#allocation2 + $0x990] sm:$0xff] }
 0x28d   :  { %3618 = vmatpush1.bf16.msra.mxu1 %v13429_v52  ;;  %v13389_v52 = vcombine.low %v579_v29, %v583_v30  ;;  %v919_v38 = vld [vmem:[#allocation2 + $0xdb0] sm:$0xff] }
 0x28e   :  { %3619 = vmatprep.subr.bf16.mxu1 %v13422_v61  ;;  %v691_v61 = vld [vmem:[#allocation2 + $0x690] sm:$0xff] }
 0x28f   :  { %3579 = vmatpush1.bf16.msra.mxu0 %v13293_v1  ;;  %v13381_v1 = vcombine.low %v571_v21, %v575_v46  ;;  %v911_v46 = vld [vmem:[#allocation2 + $0xd70] sm:$0xff] }
 0x290   :  { %3580 = vmatprep.subr.bf16.mxu0 %v13414_v3  ;;  %v13374_v3 = vcombine.high %v563_v57, %v567_v60 }
 0x291   :  { %3620 = vmatpush1.bf16.msra.mxu1 %v13421_v2  ;;  %v13509_v2 = vcombine.low %v699_v47, %v703_v51 }
 0x292   :  { %3621 = vmatprep.subr.bf16.mxu1 %v13542_v7  ;;  %v3270_v23 = vpop.f32.mrf.mxu0  ;;  %v13502_v7 = vcombine.high %v691_v61, %v695_v0 }
 0x293   :  { %v3271_v24 = vadd.f32 %v3270_v23, %v934_v10  ;;  %3581 = vmatpush2.bf16.msra.mxu0 %v13413_v11  ;;  %v13373_v10 = vcombine.low %v563_v57, %v567_v60  ;;  %v13501_v11 = vcombine.low %v691_v61, %v695_v0  ;;  %v903_v61 = vld [vmem:[#allocation2 + $0xd30] sm:$0xff] }
 0x294   :  { %v3311_v25 = vpop.f32.mrf.mxu1  ;;  %v3272_v53 = vpop.f32.mrf.mxu0  ;;  %3582 = vmatprep.subr.bf16.mxu0 %v13406_v13  ;;  %v547_v13 = vld [vmem:[#allocation2 + $0x210] sm:$0xff] }
 0x295   :  { %3622 = vmatpush2.bf16.msra.mxu1 %v13541_v12  ;;  %v17547_v32 = vadd.f32 %v3311_v25, %v3271_v24  ;;  %v3273_v33 = vadd.f32 %v3272_v53, %v938_v18  ;;  %v13366_v12 = vcombine.high %v555_v4, %v559_v5  ;;  %v679_v18 = vld [vmem:[#allocation2 + $0x630] sm:$0xff]  ;;  %v13358_v23 = vcombine.high %v547_v13, %v551_v14 }
 0x296   :  { %v3313_v34 = vpop.f32.mrf.mxu1  ;;  %3623 = vmatprep.subr.bf16.mxu1 %v13534_v20  ;;  %v3274_v39 = vpop.f32.mrf.mxu0  ;;  %v13365_v20 = vcombine.low %v555_v4, %v559_v5  ;;  %v795_v24 = vld [vmem:[#allocation2 + $0x9d0] sm:$0xff]  ;;  %v13486_v53 = vcombine.high %v675_v15, %v679_v18  ;;  %v13485_v29 = vcombine.low %v675_v15, %v679_v18 }
 0x297   :  { %v17549_v40 = vadd.f32 %v3313_v34, %v3273_v33  ;;  %3583 = vmatpush2.bf16.msra.mxu0 %v13405_v26  ;;  %v799_v25 = vld [vmem:[#allocation2 + $0x9f0] sm:$0xff] }
 0x298   :  { %v3315_v41 = vpop.f32.mrf.mxu1  ;;  %v3275_v43 = vpop.f32.mrf.mxu0  ;;  %3584 = vmatprep.subr.bf16.mxu0 %v13398_v54  ;;  %v923_v26 = vld [vmem:[#allocation2 + $0xdd0] sm:$0xff]  ;;  %v13357_v54 = vcombine.low %v547_v13, %v551_v14  ;;  %v13606_v30 = vcombine.high %v795_v24, %v799_v25  ;;  %v13605_v39 = vcombine.low %v795_v24, %v799_v25 }
 0x299   :  { %3624 = vmatpush2.bf16.msra.mxu1 %v13533_v27  ;;  %v927_v27 = vld [vmem:[#allocation2 + $0xdf0] sm:$0xff] }
 0x29a   :  { %v3316_v48 = vpop.f32.mrf.mxu1  ;;  %3625 = vmatprep.subr.bf16.mxu1 %v13526_v37  ;;  %v791_v33 = vld [vmem:[#allocation2 + $0x9b0] sm:$0xff]  ;;  %v13734_v37 = vcombine.high %v923_v26, %v927_v27  ;;  %v13733_v41 = vcombine.low %v923_v26, %v927_v27 }
 0x29b   :  { %3585 = vmatpush2.bf16.msra.mxu0 %v13397_v42  ;;  %v915_v34 = vld [vmem:[#allocation2 + $0xd90] sm:$0xff]  ;;  %v13598_v42 = vcombine.high %v787_v31, %v791_v33  ;;  %v13597_v48 = vcombine.low %v787_v31, %v791_v33 }
 0x29c   :  { %3586 = vmatprep.subr.bf16.mxu0 %v13390_v45  ;;  %v779_v43 = vld [vmem:[#allocation2 + $0x950] sm:$0xff]  ;;  %v13726_v21 = vcombine.high %v915_v34, %v919_v38 }
 0x29d   :  { %3626 = vmatpush2.bf16.msra.mxu1 %v13525_v44  ;;  %v783_v44 = vld [vmem:[#allocation2 + $0x970] sm:$0xff] }
 0x29e   :  { %3627 = vmatprep.subr.bf16.mxu1 %v13518_v49  ;;  %v907_v45 = vld [vmem:[#allocation2 + $0xd50] sm:$0xff]  ;;  %v13725_v49 = vcombine.low %v915_v34, %v919_v38  ;;  %v13590_v51 = vcombine.high %v779_v43, %v783_v44  ;;  %v13589_v0 = vcombine.low %v779_v43, %v783_v44 }
 0x29f   :  { %3587 = vmatpush2.bf16.msra.mxu0 %v13389_v52  ;;  %v771_v52 = vld [vmem:[#allocation2 + $0x910] sm:$0xff]  ;;  %v13718_v60 = vcombine.high %v907_v45, %v911_v46 }
 0x2a0   :  { %3588 = vmatprep.subr.bf16.mxu0 %v13382_v56  ;;  %v899_v56 = vld [vmem:[#allocation2 + $0xd10] sm:$0xff] }
 0x2a1   :  { %3628 = vmatpush2.bf16.msra.mxu1 %v13517_v55  ;;  %v775_v55 = vld [vmem:[#allocation2 + $0x930] sm:$0xff] }
 0x2a2   :  { %3629 = vmatprep.subr.bf16.mxu1 %v13510_v63  ;;  %v767_v4 = vld [vmem:[#allocation2 + $0x8f0] sm:$0xff] }
 0x2a3   :  { %3589 = vmatpush2.bf16.msra.mxu0 %v13381_v1  ;;  %v13717_v1 = vcombine.low %v907_v45, %v911_v46  ;;  %v891_v5 = vld [vmem:[#allocation2 + $0xcd0] sm:$0xff]  ;;  %v540_v45 = vld [vmem:[#allocation2 + $0x1d8] sm:$0xff] }
 0x2a4   :  { %3590 = vmatprep.subr.bf16.mxu0 %v13374_v3  ;;  %v763_v3 = vld [vmem:[#allocation2 + $0x8d0] sm:$0xff]  ;;  %v544_v46 = vld [vmem:[#allocation2 + $0x1f8] sm:$0xff] }
 0x2a5   :  { %3630 = vmatpush2.bf16.msra.mxu1 %v13509_v2  ;;  %v13582_v2 = vcombine.high %v771_v52, %v775_v55  ;;  %v755_v13 = vld [vmem:[#allocation2 + $0x890] sm:$0xff] }
 0x2a6   :  { %3631 = vmatprep.subr.bf16.mxu1 %v13502_v7  ;;  %v13710_v7 = vcombine.high %v899_v56, %v903_v61  ;;  %v759_v14 = vld [vmem:[#allocation2 + $0x8b0] sm:$0xff] }
 0x2a7   :  { %3591 = vmatpush2.bf16.msra.mxu0 %v13373_v10  ;;  %v13581_v10 = vcombine.low %v771_v52, %v775_v55  ;;  %v883_v15 = vld [vmem:[#allocation2 + $0xc90] sm:$0xff] }
 0x2a8   :  { %3592 = vmatprep.subr.bf16.mxu0 %v13366_v12  ;;  %v13574_v12 = vcombine.high %v763_v3, %v767_v4  ;;  %v887_v18 = vld [vmem:[#allocation2 + $0xcb0] sm:$0xff] }
 0x2a9   :  { %3632 = vmatpush2.bf16.msra.mxu1 %v13501_v11  ;;  %v13709_v11 = vcombine.low %v899_v56, %v903_v61  ;;  %v747_v24 = vld [vmem:[#allocation2 + $0x850] sm:$0xff]  ;;  %v532_v56 = vld [vmem:[#allocation2 + $0x198] sm:$0xff] }
 0x2aa   :  { %3633 = vmatprep.subr.bf16.mxu1 %v13494_v17  ;;  %v13702_v17 = vcombine.high %v891_v5, %v895_v9  ;;  %v751_v25 = vld [vmem:[#allocation2 + $0x870] sm:$0xff]  ;;  %v536_v61 = vld [vmem:[#allocation2 + $0x1b8] sm:$0xff] }
 0x2ab   :  { %3593 = vmatpush2.bf16.msra.mxu0 %v13365_v20  ;;  %v13573_v20 = vcombine.low %v763_v3, %v767_v4  ;;  %v875_v26 = vld [vmem:[#allocation2 + $0xc50] sm:$0xff] }
 0x2ac   :  { %3594 = vmatprep.subr.bf16.mxu0 %v13358_v23  ;;  %v13566_v23 = vcombine.high %v755_v13, %v759_v14  ;;  %v879_v27 = vld [vmem:[#allocation2 + $0xc70] sm:$0xff] }
 0x2ad   :  { %3634 = vmatpush2.bf16.msra.mxu1 %v13493_v22  ;;  %v13701_v22 = vcombine.low %v891_v5, %v895_v9  ;;  %v739_v31 = vld [vmem:[#allocation2 + $0x810] sm:$0xff] }
 0x2ae   :  { %3635 = vmatprep.subr.bf16.mxu1 %v13486_v53  ;;  %v13694_v53 = vcombine.high %v883_v15, %v887_v18  ;;  %v743_v33 = vld [vmem:[#allocation2 + $0x830] sm:$0xff] }
 0x2af   :  { %3595 = vmatpush2.bf16.msra.mxu0 %v13357_v54  ;;  %v13565_v54 = vcombine.low %v755_v13, %v759_v14  ;;  %v867_v34 = vld [vmem:[#allocation2 + $0xc10] sm:$0xff]  ;;  %v13343_v13 = vcombine.low %v532_v56, %v536_v61 }
 0x2b0   :  { %3646 = vmatprep.subr.bf16.mxu0 %v13606_v30  ;;  %v13558_v30 = vcombine.high %v747_v24, %v751_v25  ;;  %v871_v38 = vld [vmem:[#allocation2 + $0xc30] sm:$0xff] }
 0x2b1   :  { %3636 = vmatpush2.bf16.msra.mxu1 %v13485_v29  ;;  %v13693_v29 = vcombine.low %v883_v15, %v887_v18  ;;  %v859_v43 = vld [vmem:[#allocation2 + $0xbd0] sm:$0xff] }
 0x2b2   :  { %3687 = vmatprep.subr.bf16.mxu1 %v13734_v37  ;;  %3597 = vmatmul.mubr.bf16.vlgmr.msra.gmra.mxu0 %v17504_v16  ;;  %v13686_v37 = vcombine.high %v875_v26, %v879_v27  ;;  %v863_v44 = vld [vmem:[#allocation2 + $0xbf0] sm:$0xff] }
 0x2b3   :  { %3647 = vmatpush1.bf16.msra.mxu0 %v13605_v39  ;;  %3678 = vmatprep.mubr.bf16.mxu0 %v17516_v28  ;;  %v13557_v39 = vcombine.low %v747_v24, %v751_v25  ;;  %v851_v52 = vld [vmem:[#allocation2 + $0xb90] sm:$0xff]  ;;  %v520_v24 = vld [vmem:[#allocation2 + $0x138] sm:$0xff] }
 0x2b4   :  { %v17552_v47 = vpop.f32.mrf.mxu1  ;;  %3638 = vmatmul.mubr.bf16.vlgmr.msra.gmra.mxu1 %v17508_v19  ;;  %3648 = vmatprep.subr.bf16.mxu0 %v13598_v42  ;;  %v13550_v42 = vcombine.high %v739_v31, %v743_v33  ;;  %v855_v55 = vld [vmem:[#allocation2 + $0xbb0] sm:$0xff] }
 0x2b5   :  { %3688 = vmatpush1.bf16.msra.mxu1 %v13733_v41  ;;  %3719 = vmatprep.mubr.bf16.mxu1 %v17256_v36  ;;  %v13685_v41 = vcombine.low %v875_v26, %v879_v27  ;;  %v843_v3 = vld [vmem:[#allocation2 + $0xb50] sm:$0xff] }
 0x2b6   :  { %v17555_v57 = vpop.f32.mrf.mxu1  ;;  %3689 = vmatprep.subr.bf16.mxu1 %v13726_v21  ;;  %v13678_v21 = vcombine.high %v867_v34, %v871_v38  ;;  %v847_v4 = vld [vmem:[#allocation2 + $0xb70] sm:$0xff] }
 0x2b7   :  { %3649 = vmatpush1.bf16.msra.mxu0 %v13597_v48  ;;  %v13549_v48 = vcombine.low %v739_v31, %v743_v33  ;;  %v13654_v14 = vcombine.high %v843_v3, %v847_v4  ;;  %v13653_v26 = vcombine.low %v843_v3, %v847_v4  ;;  %v512_v31 = vld [vmem:[#allocation2 + $0xf8] sm:$0xff] }
 0x2b8   :  { %v3397_v63 = vpop.f32.mrf.mxu1  ;;  %3650 = vmatprep.subr.bf16.mxu0 %v13590_v51  ;;  %v13670_v51 = vcombine.high %v859_v43, %v863_v44  ;;  %v604_v4 = vld [vmem:[#allocation2 + $0x3d8] sm:$0xff] }
 0x2b9   :  { %3690 = vmatpush1.bf16.msra.mxu1 %v13725_v49  ;;  %v13677_v49 = vcombine.low %v867_v34, %v871_v38  ;;  %v13669_v63 = vcombine.low %v859_v43, %v863_v44  ;;  %v819_v34 = vld [vmem:[#allocation2 + $0xa90] sm:$0xff]  ;;  %v500_v38 = vld [vmem:[#allocation2 + $0x98] sm:$0xff] }
 0x2ba   :  { %v3398_v6 = vpop.f32.mrf.mxu1  ;;  %3691 = vmatprep.subr.bf16.mxu1 %v13718_v60  ;;  %v13352_v60 = vcombine.high %v540_v45, %v544_v46 }
 0x2bb   :  { %3651 = vmatpush1.bf16.msra.mxu0 %v13589_v0  ;;  %v13351_v0 = vcombine.low %v540_v45, %v544_v46  ;;  %v524_v6 = vld [vmem:[#allocation2 + $0x158] sm:$0xff]  ;;  %v811_v45 = vld [vmem:[#allocation2 + $0xa50] sm:$0xff] }
 0x2bc   :  { %3652 = vmatprep.subr.bf16.mxu0 %v13582_v2  ;;  %v13344_v2 = vcombine.high %v532_v56, %v536_v61  ;;  %v492_v46 = vld [vmem:[#allocation2 + $0x58] sm:$0xff]  ;;  %v803_v56 = vld [vmem:[#allocation2 + $0xa10] sm:$0xff] }
 0x2bd   :  { %3692 = vmatpush1.bf16.msra.mxu1 %v13717_v1  ;;  %v13662_v1 = vcombine.high %v851_v52, %v855_v55  ;;  %v484_v61 = vld [vmem:[#allocation2 + $0x18] sm:$0xff] }
 0x2be   :  { %3693 = vmatprep.subr.bf16.mxu1 %v13710_v7  ;;  %v528_v7 = vld [vmem:[#allocation2 + $0x178] sm:$0xff] }
 0x2bf   :  { %3653 = vmatpush1.bf16.msra.mxu0 %v13581_v10  ;;  %v16593_v10 = vld [vmem:[%s17954_s25 + $0x18] ss:$0 sps:$4 sm:$0xff]   ;;  %v13336_v18 = vcombine.high %v524_v6, %v528_v7 }
 0x2c0   :  { %3654 = vmatprep.subr.bf16.mxu0 %v13574_v12 }
 0x2c1   :  { %3694 = vmatpush1.bf16.msra.mxu1 %v13709_v11  ;;  %v13661_v11 = vcombine.low %v851_v52, %v855_v55 }
 0x2c2   :  { %3695 = vmatprep.subr.bf16.mxu1 %v13702_v17 }
 0x2c3   :  { %3655 = vmatpush1.bf16.msra.mxu0 %v13573_v20  ;;  %v835_v20 = vld [vmem:[#allocation2 + $0xb10] sm:$0xff] }
 0x2c4   :  { %3656 = vmatprep.subr.bf16.mxu0 %v13566_v23  ;;  %v516_v23 = vld [vmem:[#allocation2 + $0x118] sm:$0xff] }
 0x2c5   :  { %3696 = vmatpush1.bf16.msra.mxu1 %v13701_v22  ;;  %v839_v22 = vld [vmem:[#allocation2 + $0xb30] sm:$0xff]  ;;  %v13327_v33 = vcombine.low %v516_v23, %v520_v24 }
 0x2c6   :  { %3697 = vmatprep.subr.bf16.mxu1 %v13694_v53  ;;  %v13646_v27 = vcombine.high %v835_v20, %v839_v22 }
 0x2c7   :  { %3657 = vmatpush1.bf16.msra.mxu0 %v13565_v54  ;;  %v831_v54 = vld [vmem:[#allocation2 + $0xaf0] sm:$0xff] }
 0x2c8   :  { %3658 = vmatprep.subr.bf16.mxu0 %v13558_v30  ;;  %v13328_v30 = vcombine.high %v516_v23, %v520_v24  ;;  %v652_v23 = vld [vmem:[#allocation2 + $0x558] sm:$0xff] }
 0x2c9   :  { %3698 = vmatpush1.bf16.msra.mxu1 %v13693_v29  ;;  %v508_v29 = vld [vmem:[#allocation2 + $0xd8] sm:$0xff] }
 0x2ca   :  { %3699 = vmatprep.subr.bf16.mxu1 %v13686_v37  ;;  %v823_v37 = vld [vmem:[#allocation2 + $0xab0] sm:$0xff]  ;;  %v13319_v43 = vcombine.low %v508_v29, %v512_v31 }
 0x2cb   :  { %3659 = vmatpush1.bf16.msra.mxu0 %v13557_v39  ;;  %v13320_v39 = vcombine.high %v508_v29, %v512_v31  ;;  %v13630_v44 = vcombine.high %v819_v34, %v823_v37  ;;  %v644_v29 = vld [vmem:[#allocation2 + $0x518] sm:$0xff] }
 0x2cc   :  { %3660 = vmatprep.subr.bf16.mxu0 %v13550_v42 }
 0x2cd   :  { %3700 = vmatpush1.bf16.msra.mxu1 %v13685_v41  ;;  %v504_v41 = vld [vmem:[#allocation2 + $0xb8] sm:$0xff] }
 0x2ce   :  { %3701 = vmatprep.subr.bf16.mxu1 %v13678_v21  ;;  %v815_v21 = vld [vmem:[#allocation2 + $0xa70] sm:$0xff]  ;;  %v13311_v52 = vcombine.low %v500_v38, %v504_v41 }
 0x2cf   :  { %3661 = vmatpush1.bf16.msra.mxu0 %v13549_v48  ;;  %v13312_v48 = vcombine.high %v500_v38, %v504_v41  ;;  %v13622_v55 = vcombine.high %v811_v45, %v815_v21 }
 0x2d0   :  { %3662 = vmatprep.subr.bf16.mxu0 %v13670_v51  ;;  %v13629_v51 = vcombine.low %v819_v34, %v823_v37  ;;  %v580_v34 = vld [vmem:[#allocation2 + $0x318] sm:$0xff] }
 0x2d1   :  { %3702 = vmatpush1.bf16.msra.mxu1 %v13677_v49  ;;  %v496_v49 = vld [vmem:[#allocation2 + $0x78] sm:$0xff] }
 0x2d2   :  { %3728 = vmatprep.subr.bf16.mxu1 %v13352_v60  ;;  %v3352_v5 = vpop.f32.mrf.mxu0  ;;  %v807_v60 = vld [vmem:[#allocation2 + $0xa30] sm:$0xff]  ;;  %v584_v37 = vld [vmem:[#allocation2 + $0x338] sm:$0xff] }
 0x2d3   :  { %v3353_v9 = vadd.f32 %v3352_v5, %v17547_v32  ;;  %3663 = vmatpush2.bf16.msra.mxu0 %v13669_v63  ;;  %v13304_v63 = vcombine.high %v492_v46, %v496_v49  ;;  %v13614_v3 = vcombine.high %v803_v56, %v807_v60  ;;  %v608_v5 = vld [vmem:[#allocation2 + $0x3f8] sm:$0xff] }
 0x2d4   :  { %3720 = vmatmul.mubr.bf16.vlgmr.msra.gmra.mxu1 %v16593_v10  ;;  %v3354_v12 = vpop.f32.mrf.mxu0  ;;  %3664 = vmatprep.subr.bf16.mxu0 %v13662_v1  ;;  %v13621_v1 = vcombine.low %v811_v45, %v815_v21  ;;  %v13613_v10 = vcombine.low %v803_v56, %v807_v60  ;;  %v13415_v24 = vcombine.low %v604_v4, %v608_v5  ;;  %v636_v45 = vld [vmem:[#allocation2 + $0x4d8] sm:$0xff] }
 0x2d5   :  { %3729 = vmatpush1.bf16.msra.mxu1 %v13351_v0  ;;  %v17562_v15 = vadd.f32 %v17552_v47, %v3353_v9  ;;  %v3355_v17 = vadd.f32 %v3354_v12, %v17549_v40  ;;  %3760 = vmatprep.mubr.bf16.mxu1 %v17494_v58  ;;  %v13335_v47 = vcombine.low %v524_v6, %v528_v7  ;;  %v827_v40 = vld [vmem:[#allocation2 + $0xad0] sm:$0xff]  ;;  %v488_v0 = vld [vmem:[#allocation2 + $0x38] sm:$0xff] }
 0x2d6   :  { %3730 = vmatprep.subr.bf16.mxu1 %v13344_v2  ;;  %v3356_v32 = vpop.f32.mrf.mxu0  ;;  %v13645_v58 = vcombine.low %v835_v20, %v839_v22  ;;  %v13637_v42 = vcombine.low %v827_v40, %v831_v54  ;;  %v13303_v2 = vcombine.low %v492_v46, %v496_v49  ;;  %v668_v6 = vld [vmem:[#allocation2 + $0x5d8] sm:$0xff]  ;;  %v13296_v7 = vcombine.high %v484_v61, %v488_v0 }
 0x2d7   :  { %v17567_v25 = vadd.f32 %v17555_v57, %v3355_v17  ;;  %3665 = vmatpush2.bf16.msra.mxu0 %v13661_v11  ;;  %v13638_v57 = vcombine.high %v827_v40, %v831_v54  ;;  %v672_v9 = vld [vmem:[#allocation2 + $0x5f8] sm:$0xff]  ;;  %v13295_v11 = vcombine.low %v484_v61, %v488_v0  ;;  %v13391_v49 = vcombine.low %v580_v34, %v584_v37 }
 0x2d8   :  { %v3357_v53 = vpop.f32.mrf.mxu0  ;;  %3666 = vmatprep.subr.bf16.mxu0 %v13654_v14  ;;  %v13480_v12 = vcombine.high %v668_v6, %v672_v9  ;;  %v600_v14 = vld [vmem:[#allocation2 + $0x3b8] sm:$0xff]  ;;  %v13479_v22 = vcombine.low %v668_v6, %v672_v9 }
 0x2d9   :  { %3731 = vmatpush1.bf16.msra.mxu1 %v13343_v13  ;;  %v596_v13 = vld [vmem:[#allocation2 + $0x398] sm:$0xff] }
 0x2da   :  { %3732 = vmatprep.subr.bf16.mxu1 %v13336_v18  ;;  %v660_v17 = vld [vmem:[#allocation2 + $0x598] sm:$0xff]  ;;  %v13416_v18 = vcombine.high %v604_v4, %v608_v5  ;;  %v13408_v53 = vcombine.high %v596_v13, %v600_v14  ;;  %v13407_v31 = vcombine.low %v596_v13, %v600_v14 }
 0x2db   :  { %3667 = vmatpush2.bf16.msra.mxu0 %v13653_v26  ;;  %v664_v20 = vld [vmem:[#allocation2 + $0x5b8] sm:$0xff] }
 0x2dc   :  { %3668 = vmatprep.subr.bf16.mxu0 %v13646_v27  ;;  %v656_v32 = vld [vmem:[#allocation2 + $0x578] sm:$0xff]  ;;  %v13472_v26 = vcombine.high %v660_v17, %v664_v20  ;;  %v13471_v54 = vcombine.low %v660_v17, %v664_v20 }
 0x2dd   :  { %3733 = vmatpush1.bf16.msra.mxu1 %v13335_v47  ;;  %v588_v47 = vld [vmem:[#allocation2 + $0x358] sm:$0xff] }
 0x2de   :  { %3734 = vmatprep.subr.bf16.mxu1 %v13328_v30  ;;  %v592_v27 = vld [vmem:[#allocation2 + $0x378] sm:$0xff] }
 0x2df   :  { %3669 = vmatpush2.bf16.msra.mxu0 %v13645_v58  ;;  %v648_v30 = vld [vmem:[#allocation2 + $0x538] sm:$0xff]  ;;  %v13464_v58 = vcombine.high %v652_v23, %v656_v32  ;;  %v13399_v41 = vcombine.low %v588_v47, %v592_v27 }
 0x2e0   :  { %3670 = vmatprep.subr.bf16.mxu0 %v13638_v57  ;;  %v13400_v57 = vcombine.high %v588_v47, %v592_v27  ;;  %v640_v21 = vld [vmem:[#allocation2 + $0x4f8] sm:$0xff] }
 0x2e1   :  { %3735 = vmatpush1.bf16.msra.mxu1 %v13327_v33  ;;  %v576_v46 = vld [vmem:[#allocation2 + $0x2f8] sm:$0xff] }
 0x2e2   :  { %3736 = vmatprep.subr.bf16.mxu1 %v13320_v39  ;;  %v13463_v39 = vcombine.low %v652_v23, %v656_v32  ;;  %v628_v56 = vld [vmem:[#allocation2 + $0x498] sm:$0xff] }
 0x2e3   :  { %3671 = vmatpush2.bf16.msra.mxu0 %v13637_v42  ;;  %v13456_v42 = vcombine.high %v644_v29, %v648_v30  ;;  %v632_v61 = vld [vmem:[#allocation2 + $0x4b8] sm:$0xff] }
 0x2e4   :  { %3672 = vmatprep.subr.bf16.mxu0 %v13630_v44  ;;  %v572_v44 = vld [vmem:[#allocation2 + $0x2d8] sm:$0xff] }
 0x2e5   :  { %3737 = vmatpush1.bf16.msra.mxu1 %v13319_v43  ;;  %v13384_v60 = vcombine.high %v572_v44, %v576_v46  ;;  %v13383_v0 = vcombine.low %v572_v44, %v576_v46  ;;  %v620_v4 = vld [vmem:[#allocation2 + $0x458] sm:$0xff] }
 0x2e6   :  { %3738 = vmatprep.subr.bf16.mxu1 %v13312_v48  ;;  %v13455_v48 = vcombine.low %v644_v29, %v648_v30  ;;  %v624_v6 = vld [vmem:[#allocation2 + $0x478] sm:$0xff] }
 0x2e7   :  { %3673 = vmatpush2.bf16.msra.mxu0 %v13629_v51  ;;  %v13448_v51 = vcombine.high %v636_v45, %v640_v21  ;;  %v612_v13 = vld [vmem:[#allocation2 + $0x418] sm:$0xff] }
 0x2e8   :  { %3674 = vmatprep.subr.bf16.mxu0 %v13622_v55  ;;  %v568_v55 = vld [vmem:[#allocation2 + $0x2b8] sm:$0xff] }
 0x2e9   :  { %3739 = vmatpush1.bf16.msra.mxu1 %v13311_v52  ;;  %v564_v52 = vld [vmem:[#allocation2 + $0x298] sm:$0xff] }
 0x2ea   :  { %3740 = vmatprep.subr.bf16.mxu1 %v13304_v63  ;;  %v13447_v63 = vcombine.low %v636_v45, %v640_v21  ;;  %v13376_v5 = vcombine.high %v564_v52, %v568_v55  ;;  %v13375_v9 = vcombine.low %v564_v52, %v568_v55  ;;  %v616_v17 = vld [vmem:[#allocation2 + $0x438] sm:$0xff] }
 0x2eb   :  { %3675 = vmatpush2.bf16.msra.mxu0 %v13621_v1  ;;  %v13440_v1 = vcombine.high %v628_v56, %v632_v61  ;;  %v732_v23 = vld [vmem:[#allocation2 + $0x7d8] sm:$0xff]  ;;  %v13423_v27 = vcombine.low %v612_v13, %v616_v17 }
 0x2ec   :  { %3676 = vmatprep.subr.bf16.mxu0 %v13614_v3  ;;  %v560_v3 = vld [vmem:[#allocation2 + $0x278] sm:$0xff] }
 0x2ed   :  { %3741 = vmatpush1.bf16.msra.mxu1 %v13303_v2  ;;  %v556_v2 = vld [vmem:[#allocation2 + $0x258] sm:$0xff] }
 0x2ee   :  { %3742 = vmatprep.subr.bf16.mxu1 %v13296_v7  ;;  %v13439_v7 = vcombine.low %v628_v56, %v632_v61  ;;  %v13368_v14 = vcombine.high %v556_v2, %v560_v3  ;;  %v13367_v20 = vcombine.low %v556_v2, %v560_v3  ;;  %v736_v32 = vld [vmem:[#allocation2 + $0x7f8] sm:$0xff] }
 0x2ef   :  { %3677 = vmatpush2.bf16.msra.mxu0 %v13613_v10  ;;  %v13432_v10 = vcombine.high %v620_v4, %v624_v6  ;;  %v800_v47 = vld [vmem:[#allocation2 + $0x9f8] sm:$0xff]  ;;  %v13544_v29 = vcombine.high %v732_v23, %v736_v32 }
 0x2f0   :  { %3769 = vmatprep.subr.bf16.mxu0 %v13480_v12  ;;  %v552_v12 = vld [vmem:[#allocation2 + $0x238] sm:$0xff] }
 0x2f1   :  { %3743 = vmatpush1.bf16.msra.mxu1 %v13295_v11  ;;  %v548_v11 = vld [vmem:[#allocation2 + $0x218] sm:$0xff] }
 0x2f2   :  { %3744 = vmatprep.subr.bf16.mxu1 %v13416_v18  ;;  %3679 = vmatmul.mubr.bf16.vlgmr.msra.gmra.mxu0 %v17525_v35  ;;  %v13431_v18 = vcombine.low %v620_v4, %v624_v6  ;;  %v724_v30 = vld [vmem:[#allocation2 + $0x798] sm:$0xff] }
 0x2f3   :  { %3770 = vmatpush1.bf16.msra.mxu0 %v13479_v22  ;;  %3801 = vmatprep.mubr.bf16.mxu0 %v17498_v59  ;;  %v13392_v59 = vcombine.high %v580_v34, %v584_v37  ;;  %v13424_v22 = vcombine.high %v612_v13, %v616_v17  ;;  %v780_v44 = vld [vmem:[#allocation2 + $0x958] sm:$0xff] }
 0x2f4   :  { %v17570_v40 = vpop.f32.mrf.mxu1  ;;  %3771 = vmatprep.subr.bf16.mxu0 %v13472_v26  ;;  %v17576_v26 = vsub.s32 2, %v17537_v50  ;;  %v708_v52 = vld [vmem:[#allocation2 + $0x718] sm:$0xff] }
 0x2f5   :  { %3745 = vmatpush2.bf16.msra.mxu1 %v13415_v24  ;;  %v796_v24 = vld [vmem:[#allocation2 + $0x9d8] sm:$0xff] }
 0x2f6   :  { %v17573_v33 = vpop.f32.mrf.mxu1  ;;  %3746 = vmatprep.subr.bf16.mxu1 %v13408_v53  ;;  %v13360_v53 = vcombine.high %v548_v11, %v552_v12  ;;  %v13608_v37 = vcombine.high %v796_v24, %v800_v47  ;;  %v712_v55 = vld [vmem:[#allocation2 + $0x738] sm:$0xff] }
 0x2f7   :  { %3772 = vmatpush1.bf16.msra.mxu0 %v13471_v54  ;;  %v13359_v54 = vcombine.low %v548_v11, %v552_v12  ;;  %v704_v3 = vld [vmem:[#allocation2 + $0x6f8] sm:$0xff]  ;;  %v13520_v6 = vcombine.high %v708_v52, %v712_v55  ;;  %v13519_v11 = vcombine.low %v708_v52, %v712_v55 }
 0x2f8   :  { %v3438_v38 = vpop.f32.mrf.mxu1  ;;  %3773 = vmatprep.subr.bf16.mxu0 %v13464_v58  ;;  %v788_v58 = vld [vmem:[#allocation2 + $0x998] sm:$0xff] }
 0x2f9   :  { %3747 = vmatpush2.bf16.msra.mxu1 %v13407_v31  ;;  %v728_v31 = vld [vmem:[#allocation2 + $0x7b8] sm:$0xff] }
 0x2fa   :  { %v3439_v43 = vpop.f32.mrf.mxu1  ;;  %3748 = vmatprep.subr.bf16.mxu1 %v13400_v57  ;;  %v17578_v57 = vld [vmem:[#allocation24] sm:$0xff]  ;;  %v792_v38 = vld [vmem:[#allocation2 + $0x9b8] sm:$0xff] }
 0x2fb   :  { %3774 = vmatpush1.bf16.msra.mxu0 %v13463_v39  ;;  %v942_v34 = vrot.slane %v17578_v57, %v17576_v26  ;;  %v13543_v39 = vcombine.low %v732_v23, %v736_v32  ;;  %v13607_v43 = vcombine.low %v796_v24, %v800_v47  ;;  %v13600_v21 = vcombine.high %v788_v58, %v792_v38  ;;  %v692_v12 = vld [vmem:[#allocation2 + $0x698] sm:$0xff] }
 0x2fc   :  { %3775 = vmatprep.subr.bf16.mxu0 %v13456_v42  ;;  %v720_v42 = vld [vmem:[#allocation2 + $0x778] sm:$0xff] }
 0x2fd   :  { %3749 = vmatpush2.bf16.msra.mxu1 %v13399_v41  ;;  %v716_v41 = vld [vmem:[#allocation2 + $0x758] sm:$0xff]  ;;  %v3435_v45 = vadd.f32 %v17570_v40, %v942_v34 }
 0x2fe   :  { %3750 = vmatprep.subr.bf16.mxu1 %v13392_v59  ;;  %v13536_v59 = vcombine.high %v724_v30, %v728_v31  ;;  %v13528_v61 = vcombine.high %v716_v41, %v720_v42  ;;  %v13527_v2 = vcombine.low %v716_v41, %v720_v42  ;;  %v696_v13 = vld [vmem:[#allocation2 + $0x6b8] sm:$0xff] }
 0x2ff   :  { %3776 = vmatpush1.bf16.msra.mxu0 %v13455_v48  ;;  %v784_v48 = vld [vmem:[#allocation2 + $0x978] sm:$0xff] }
 0x300   :  { %3777 = vmatprep.subr.bf16.mxu0 %v13448_v51  ;;  %v13535_v51 = vcombine.low %v724_v30, %v728_v31  ;;  %v13592_v40 = vcombine.high %v780_v44, %v784_v48  ;;  %v756_v17 = vld [vmem:[#allocation2 + $0x898] sm:$0xff] }
 0x301   :  { %3751 = vmatpush2.bf16.msra.mxu1 %v13391_v49  ;;  %v684_v23 = vld [vmem:[#allocation2 + $0x658] sm:$0xff] }
 0x302   :  { %3752 = vmatprep.subr.bf16.mxu1 %v13384_v60  ;;  %v13599_v60 = vcombine.low %v788_v58, %v792_v38  ;;  %v688_v32 = vld [vmem:[#allocation2 + $0x678] sm:$0xff] }
 0x303   :  { %3778 = vmatpush1.bf16.msra.mxu0 %v13447_v63  ;;  %v772_v63 = vld [vmem:[#allocation2 + $0x918] sm:$0xff]  ;;  %v13496_v34 = vcombine.high %v684_v23, %v688_v32  ;;  %v13495_v41 = vcombine.low %v684_v23, %v688_v32 }
 0x304   :  { %3779 = vmatprep.subr.bf16.mxu0 %v13440_v1  ;;  %v776_v1 = vld [vmem:[#allocation2 + $0x938] sm:$0xff] }
 0x305   :  { %3753 = vmatpush2.bf16.msra.mxu1 %v13383_v0  ;;  %v748_v47 = vld [vmem:[#allocation2 + $0x858] sm:$0xff] }
 0x306   :  { %3754 = vmatprep.subr.bf16.mxu1 %v13376_v5  ;;  %v13591_v5 = vcombine.low %v780_v44, %v784_v48  ;;  %v676_v30 = vld [vmem:[#allocation2 + $0x618] sm:$0xff] }
 0x307   :  { %3780 = vmatpush1.bf16.msra.mxu0 %v13439_v7  ;;  %v13584_v7 = vcombine.high %v772_v63, %v776_v1  ;;  %v680_v31 = vld [vmem:[#allocation2 + $0x638] sm:$0xff] }
 0x308   :  { %3781 = vmatprep.subr.bf16.mxu0 %v13432_v10  ;;  %v768_v10 = vld [vmem:[#allocation2 + $0x8f8] sm:$0xff]  ;;  %v13488_v44 = vcombine.high %v676_v30, %v680_v31  ;;  %v13487_v48 = vcombine.low %v676_v30, %v680_v31 }
 0x309   :  { %3755 = vmatpush2.bf16.msra.mxu1 %v13375_v9  ;;  %v764_v9 = vld [vmem:[#allocation2 + $0x8d8] sm:$0xff] }
 0x30a   :  { %3756 = vmatprep.subr.bf16.mxu1 %v13368_v14  ;;  %v13575_v24 = vcombine.low %v764_v9, %v768_v10  ;;  %v744_v38 = vld [vmem:[#allocation2 + $0x838] sm:$0xff] }
 0x30b   :  { %3782 = vmatpush1.bf16.msra.mxu0 %v13431_v18  ;;  %v760_v18 = vld [vmem:[#allocation2 + $0x8b8] sm:$0xff] }
 0x30c   :  { %3783 = vmatprep.subr.bf16.mxu0 %v13424_v22  ;;  %v13567_v58 = vcombine.low %v756_v17, %v760_v18  ;;  %v924_v42 = vld [vmem:[#allocation2 + $0xdd8] sm:$0xff] }
 0x30d   :  { %3757 = vmatpush2.bf16.msra.mxu1 %v13367_v20  ;;  %v13576_v20 = vcombine.high %v764_v9, %v768_v10  ;;  %v920_v52 = vld [vmem:[#allocation2 + $0xdb8] sm:$0xff] }
 0x30e   :  { %3758 = vmatprep.subr.bf16.mxu1 %v13360_v53  ;;  %v13504_v53 = vcombine.high %v692_v12, %v696_v13  ;;  %v840_v32 = vld [vmem:[#allocation2 + $0xb38] sm:$0xff] }
 0x30f   :  { %3784 = vmatpush1.bf16.msra.mxu0 %v13423_v27  ;;  %v752_v27 = vld [vmem:[#allocation2 + $0x878] sm:$0xff] }
 0x310   :  { %3785 = vmatprep.subr.bf16.mxu0 %v13544_v29  ;;  %v13503_v29 = vcombine.low %v692_v12, %v696_v13  ;;  %v904_v12 = vld [vmem:[#allocation2 + $0xd38] sm:$0xff] }
 0x311   :  { %3759 = vmatpush2.bf16.msra.mxu1 %v13359_v54  ;;  %v13568_v54 = vcombine.high %v756_v17, %v760_v18  ;;  %v836_v18 = vld [vmem:[#allocation2 + $0xb18] sm:$0xff] }
 0x312   :  { %3810 = vmatprep.subr.bf16.mxu1 %v13608_v37  ;;  %v3475_v46 = vpop.f32.mrf.mxu0  ;;  %v740_v37 = vld [vmem:[#allocation2 + $0x818] sm:$0xff] }
 0x313   :  { %v17583_v49 = vadd.f32 %v3475_v46, %v3435_v45  ;;  %3786 = vmatpush2.bf16.msra.mxu0 %v13543_v39  ;;  %v13560_v39 = vcombine.high %v748_v47, %v752_v27  ;;  %v860_v45 = vld [vmem:[#allocation2 + $0xbd8] sm:$0xff]  ;;  %v13552_v46 = vcombine.high %v740_v37, %v744_v38  ;;  %v13551_v55 = vcombine.low %v740_v37, %v744_v38 }
 0x314   :  { %3761 = vmatmul.mubr.bf16.vlgmr.msra.gmra.mxu1 %v17504_v16  ;;  %v17586_v56 = vpop.f32.mrf.mxu0  ;;  %3787 = vmatprep.subr.bf16.mxu0 %v13536_v59  ;;  %v700_v16 = vld [vmem:[#allocation2 + $0x6d8] sm:$0xff]  ;;  %v13559_v59 = vcombine.low %v748_v47, %v752_v27  ;;  %v17597_v37 = vsub.s32 3, %v17537_v50 }
 0x315   :  { %3811 = vmatpush1.bf16.msra.mxu1 %v13607_v43  ;;  %3842 = vmatprep.mubr.bf16.mxu1 %v17516_v28  ;;  %v13583_v28 = vcombine.low %v772_v63, %v776_v1  ;;  %v13512_v14 = vcombine.high %v700_v16, %v704_v3  ;;  %v13511_v22 = vcombine.low %v700_v16, %v704_v3  ;;  %v928_v43 = vld [vmem:[#allocation2 + $0xdf8] sm:$0xff] }
 0x316   :  { %3812 = vmatprep.subr.bf16.mxu1 %v13600_v21  ;;  %v3479_v0 = vpop.f32.mrf.mxu0  ;;  %v864_v21 = vld [vmem:[#allocation2 + $0xbf8] sm:$0xff] }
 0x317   :  { %3788 = vmatpush2.bf16.msra.mxu0 %v13535_v51  ;;  %v916_v51 = vld [vmem:[#allocation2 + $0xd98] sm:$0xff]  ;;  %v13735_v0 = vcombine.low %v924_v42, %v928_v43  ;;  %v13671_v16 = vcombine.low %v860_v45, %v864_v21 }
 0x318   :  { %v3480_v4 = vpop.f32.mrf.mxu0  ;;  %3789 = vmatprep.subr.bf16.mxu0 %v13528_v61  ;;  %v852_v61 = vld [vmem:[#allocation2 + $0xb98] sm:$0xff]  ;;  %v13728_v3 = vcombine.high %v916_v51, %v920_v52  ;;  %v13727_v10 = vcombine.low %v916_v51, %v920_v52 }
 0x319   :  { %3813 = vmatpush1.bf16.msra.mxu1 %v13599_v60  ;;  %v13736_v60 = vcombine.high %v924_v42, %v928_v43  ;;  %v856_v63 = vld [vmem:[#allocation2 + $0xbb8] sm:$0xff] }
 0x31a   :  { %3814 = vmatprep.subr.bf16.mxu1 %v13592_v40  ;;  %v13672_v40 = vcombine.high %v860_v45, %v864_v21  ;;  %v908_v1 = vld [vmem:[#allocation2 + $0xd58] sm:$0xff]  ;;  %v946_v21 = vrot.slane %v17578_v57, %v17597_v37 }
 0x31b   :  { %3790 = vmatpush2.bf16.msra.mxu0 %v13527_v2  ;;  %v912_v2 = vld [vmem:[#allocation2 + $0xd78] sm:$0xff] }
 0x31c   :  { %3791 = vmatprep.subr.bf16.mxu0 %v13520_v6  ;;  %v844_v4 = vld [vmem:[#allocation2 + $0xb58] sm:$0xff]  ;;  %v13720_v17 = vcombine.high %v908_v1, %v912_v2 }
 0x31d   :  { %3815 = vmatpush1.bf16.msra.mxu1 %v13591_v5  ;;  %v13664_v5 = vcombine.high %v852_v61, %v856_v63  ;;  %v892_v47 = vld [vmem:[#allocation2 + $0xcd8] sm:$0xff] }
 0x31e   :  { %3816 = vmatprep.subr.bf16.mxu1 %v13584_v7  ;;  %v848_v7 = vld [vmem:[#allocation2 + $0xb78] sm:$0xff] }
 0x31f   :  { %3792 = vmatpush2.bf16.msra.mxu0 %v13519_v11  ;;  %v900_v11 = vld [vmem:[#allocation2 + $0xd18] sm:$0xff] }
 0x320   :  { %3793 = vmatprep.subr.bf16.mxu0 %v13512_v14  ;;  %v13663_v14 = vcombine.low %v852_v61, %v856_v63  ;;  %v896_v27 = vld [vmem:[#allocation2 + $0xcf8] sm:$0xff]  ;;  %v13711_v38 = vcombine.low %v900_v11, %v904_v12 }
 0x321   :  { %3817 = vmatpush1.bf16.msra.mxu1 %v13583_v28  ;;  %v828_v30 = vld [vmem:[#allocation2 + $0xad8] sm:$0xff] }
 0x322   :  { %3818 = vmatprep.subr.bf16.mxu1 %v13576_v20  ;;  %v820_v42 = vld [vmem:[#allocation2 + $0xa98] sm:$0xff] }
 0x323   :  { %3794 = vmatpush2.bf16.msra.mxu0 %v13511_v22  ;;  %v824_v43 = vld [vmem:[#allocation2 + $0xab8] sm:$0xff] }
 0x324   :  { %3795 = vmatprep.subr.bf16.mxu0 %v13504_v53  ;;  %v13719_v53 = vcombine.low %v908_v1, %v912_v2  ;;  %v888_v45 = vld [vmem:[#allocation2 + $0xcb8] sm:$0xff]  ;;  %v13632_v63 = vcombine.high %v820_v42, %v824_v43  ;;  %v13631_v57 = vcombine.low %v820_v42, %v824_v43  ;;  %v15301_v42 = vld [vmem:[#allocation4 + $0x260] ss:$16 sps:$4 sm:$0xff]   ;;  %v15306_v43 = vld [vmem:[#allocation4 + $0x44] ss:$16 sps:$4 sm:$0xff]  }
 0x325   :  { %3819 = vmatpush1.bf16.msra.mxu1 %v13575_v24  ;;  %v880_v51 = vld [vmem:[#allocation2 + $0xc78] sm:$0xff] }
 0x326   :  { %3820 = vmatprep.subr.bf16.mxu1 %v13568_v54  ;;  %v13655_v54 = vcombine.low %v844_v4, %v848_v7  ;;  %v816_v61 = vld [vmem:[#allocation2 + $0xa78] sm:$0xff] }
 0x327   :  { %3796 = vmatpush2.bf16.msra.mxu0 %v13503_v29  ;;  %v13712_v29 = vcombine.high %v900_v11, %v904_v12  ;;  %v868_v1 = vld [vmem:[#allocation2 + $0xc18] sm:$0xff] }
 0x328   :  { %3797 = vmatprep.subr.bf16.mxu0 %v13496_v34  ;;  %v832_v34 = vld [vmem:[#allocation2 + $0xaf8] sm:$0xff] }
 0x329   :  { %3821 = vmatpush1.bf16.msra.mxu1 %v13567_v58  ;;  %v13648_v58 = vcombine.high %v836_v18, %v840_v32  ;;  %v13639_v52 = vcombine.low %v828_v30, %v832_v34  ;;  %v872_v2 = vld [vmem:[#allocation2 + $0xc38] sm:$0xff] }
 0x32a   :  { %3822 = vmatprep.subr.bf16.mxu1 %v13560_v39  ;;  %v13647_v39 = vcombine.low %v836_v18, %v840_v32  ;;  %v15274_v18 = vld [vmem:[#allocation4 + $0xe0] ss:$16 sps:$4 sm:$0xff]   ;;  %v15282_v32 = vld [vmem:[#allocation4 + $0xc4] ss:$16 sps:$4 sm:$0xff]  }
 0x32b   :  { %3798 = vmatpush2.bf16.msra.mxu0 %v13495_v41  ;;  %v13704_v41 = vcombine.high %v892_v47, %v896_v27 }
 0x32c   :  { %3799 = vmatprep.subr.bf16.mxu0 %v13488_v44  ;;  %v884_v44 = vld [vmem:[#allocation2 + $0xc98] sm:$0xff] }
 0x32d   :  { %3823 = vmatpush1.bf16.msra.mxu1 %v13559_v59  ;;  %v13640_v59 = vcombine.high %v828_v30, %v832_v34  ;;  %v15289_v30 = vld [vmem:[#allocation4 + $0x2a0] ss:$16 sps:$4 sm:$0xff]  }
 0x32e   :  { %3824 = vmatprep.subr.bf16.mxu1 %v13552_v46  ;;  %v13703_v46 = vcombine.low %v892_v47, %v896_v27  ;;  %v16595_v47 = vld [vmem:[%s17954_s25 + $0x18] ss:$0 sps:$4 sm:$0xff]   ;;  %v15283_v27 = vld [vmem:[#allocation4 + $0x2c0] ss:$16 sps:$4 sm:$0xff]  }
 0x32f   :  { %3800 = vmatpush2.bf16.msra.mxu0 %v13487_v48  ;;  %v876_v48 = vld [vmem:[#allocation2 + $0xc58] sm:$0xff]  ;;  %v15292_v34 = vld [vmem:[#allocation4 + $0x80] ss:$16 sps:$4 sm:$0xff]  }
 0x330   :  { %3851 = vmatprep.subr.bf16.mxu0 %v13736_v60  ;;  %v812_v60 = vld [vmem:[#allocation2 + $0xa58] sm:$0xff] }
 0x331   :  { %3825 = vmatpush1.bf16.msra.mxu1 %v13551_v55  ;;  %v13696_v55 = vcombine.high %v884_v44, %v888_v45 }
 0x332   :  { %3826 = vmatprep.subr.bf16.mxu1 %v13672_v40  ;;  %v3557_v6 = vpop.f32.mrf.mxu0  ;;  %3802 = vmatmul.mubr.bf16.vlgmr.msra.gmra.mxu0 %v17508_v19  ;;  %v13656_v19 = vcombine.high %v844_v4, %v848_v7  ;;  %v3437_v40 = vadd.f32 %v17573_v33, %v946_v21  ;;  %v808_v4 = vld [vmem:[#allocation2 + $0xa38] sm:$0xff]  ;;  %v13680_v33 = vcombine.high %v868_v1, %v872_v2  ;;  %v15312_v21 = vld [vmem:[#allocation4 + $0x24] ss:$16 sps:$4 sm:$0xff]  }
 0x333   :  { %3852 = vmatpush1.bf16.msra.mxu0 %v13735_v0  ;;  %3883 = vmatprep.mubr.bf16.mxu0 %v17256_v36  ;;  %v13695_v0 = vcombine.low %v884_v44, %v888_v45  ;;  %v15304_v44 = vld [vmem:[#allocation4 + $0x40] ss:$16 sps:$4 sm:$0xff]  }
 0x334   :  { %v3516_v9 = vpop.f32.mrf.mxu1  ;;  %v17592_v28 = vpop.f32.mrf.mxu0  ;;  %3853 = vmatprep.subr.bf16.mxu0 %v13728_v3  ;;  %v804_v3 = vld [vmem:[#allocation2 + $0xa18] sm:$0xff]  ;;  %v15307_v45 = vld [vmem:[#allocation4 + $0x240] ss:$16 sps:$4 sm:$0xff]  }
 0x335   :  { %v3517_v13 = vadd.f32 %v3516_v9, %v17583_v49  ;;  %3827 = vmatpush2.bf16.msra.mxu1 %v13671_v16  ;;  %v13688_v16 = vcombine.high %v876_v48, %v880_v51  ;;  %v13687_v9 = vcombine.low %v876_v48, %v880_v51  ;;  %v13616_v11 = vcombine.high %v804_v3, %v808_v4  ;;  %v15310_v48 = vld [vmem:[#allocation4 + $0x20] ss:$16 sps:$4 sm:$0xff]  }
 0x336   :  { %v3518_v20 = vpop.f32.mrf.mxu1  ;;  %3828 = vmatprep.subr.bf16.mxu1 %v13664_v5  ;;  %v3561_v23 = vpop.f32.mrf.mxu0  ;;  %v3478_v5 = vadd.f32 %v17586_v56, %v3437_v40  ;;  %v13615_v56 = vcombine.low %v804_v3, %v808_v4  ;;  %v15313_v51 = vld [vmem:[#allocation4 + $0x220] ss:$16 sps:$4 sm:$0xff]   ;;  %v15324_v40 = vld [vmem:[#allocation4 + $0x1e4] ss:$16 sps:$4 sm:$0xff]  }
 0x337   :  { %v17594_v22 = vadd.f32 %v3557_v6, %v3517_v13  ;;  %3854 = vmatpush1.bf16.msra.mxu0 %v13727_v10  ;;  %v13624_v6 = vcombine.high %v812_v60, %v816_v61  ;;  %v13623_v10 = vcombine.low %v812_v60, %v816_v61  ;;  %v13679_v13 = vcombine.low %v868_v1, %v872_v2  ;;  %v15316_v60 = vld [vmem:[#allocation4] ss:$16 sps:$4 sm:$0xff]   ;;  %v15330_v3 = vld [vmem:[#allocation4 + $0x1c4] ss:$16 sps:$4 sm:$0xff]  }
 0x338   :  { %v3520_v24 = vpop.f32.mrf.mxu1  ;;  %v3562_v49 = vpop.f32.mrf.mxu0  ;;  %3855 = vmatprep.subr.bf16.mxu0 %v13720_v17  ;;  %v3519_v7 = vadd.f32 %v3518_v20, %v3478_v5  ;;  %v15279_v17 = vld [vmem:[#allocation4 + $0x2e4] ss:$16 sps:$4 sm:$0xff]   ;;  %v3893_v20 = vmax.f32 %v17567_v25, 0.0  ;;  %v15319_v61 = vld [vmem:[#allocation4 + $0x200] ss:$16 sps:$4 sm:$0xff]  }
 0x339   :  { %3829 = vmatpush2.bf16.msra.mxu1 %v13663_v14  ;;  %v15276_v14 = vld [vmem:[#allocation4 + $0xe4] ss:$16 sps:$4 sm:$0xff]   ;;  %v15322_v1 = vld [vmem:[#allocation4 + $0x1e0] ss:$16 sps:$4 sm:$0xff]  }
 0x33a   :  { %v3521_v31 = vpop.f32.mrf.mxu1  ;;  %3830 = vmatprep.subr.bf16.mxu1 %v13656_v19  ;;  %v3560_v12 = vadd.f32 %v17592_v28, %v3519_v7  ;;  %v15277_v19 = vld [vmem:[#allocation4 + $0x2e0] ss:$16 sps:$4 sm:$0xff]   ;;  %v15285_v24 = vld [vmem:[#allocation4 + $0x2c4] ss:$16 sps:$4 sm:$0xff]  }
 0x33b   :  { %3856 = vmatpush1.bf16.msra.mxu0 %v13719_v53  ;;  %v15280_v28 = vld [vmem:[#allocation4 + $0xc0] ss:$16 sps:$4 sm:$0xff]   ;;  %v17605_v53 = vpack.c.bf16 %v3893_v20, %v3893_v20  ;;  %v15288_v49 = vld [vmem:[#allocation4 + $0xa4] ss:$16 sps:$4 sm:$0xff]  }
 0x33c   :  { %3857 = vmatprep.subr.bf16.mxu0 %v13712_v29  ;;  %v3895_v23 = vmax.f32 %v3560_v12, 0.0  ;;  %v15291_v25 = vld [vmem:[#allocation4 + $0x2a4] ss:$16 sps:$4 sm:$0xff]   ;;  %v15286_v29 = vld [vmem:[#allocation4 + $0xa0] ss:$16 sps:$4 sm:$0xff]  }
 0x33d   :  { %3831 = vmatpush2.bf16.msra.mxu1 %v13655_v54  ;;  %v15294_v31 = vld [vmem:[#allocation4 + $0x84] ss:$16 sps:$4 sm:$0xff]   ;;  %v15325_v2 = vld [vmem:[#allocation4 + $0x3e0] ss:$16 sps:$4 sm:$0xff]  }
 0x33e   :  { %3832 = vmatprep.subr.bf16.mxu1 %v13648_v58  ;;  %v17608_v54 = vpack.c.bf16 %v3895_v23, %v3895_v23  ;;  %v15297_v58 = vld [vmem:[#allocation4 + $0x284] ss:$16 sps:$4 sm:$0xff]   ;;  %v15328_v5 = vld [vmem:[#allocation4 + $0x1c0] ss:$16 sps:$4 sm:$0xff]  }
 0x33f   :  { %3858 = vmatpush1.bf16.msra.mxu0 %v13711_v38  ;;  %v15300_v38 = vld [vmem:[#allocation4 + $0x64] ss:$16 sps:$4 sm:$0xff]   ;;  %v15331_v7 = vld [vmem:[#allocation4 + $0x3c0] ss:$16 sps:$4 sm:$0xff]  }
 0x340   :  { %3859 = vmatprep.subr.bf16.mxu0 %v13704_v41  ;;  %v15298_v41 = vld [vmem:[#allocation4 + $0x60] ss:$16 sps:$4 sm:$0xff]   ;;  %v15333_v4 = vld [vmem:[#allocation4 + $0x3c4] ss:$16 sps:$4 sm:$0xff]  }
 0x341   :  { %3833 = vmatpush2.bf16.msra.mxu1 %v13647_v39  ;;  %v15303_v39 = vld [vmem:[#allocation4 + $0x264] ss:$16 sps:$4 sm:$0xff]  }
 0x342   :  { %3834 = vmatprep.subr.bf16.mxu1 %v13640_v59  ;;  %v15309_v59 = vld [vmem:[#allocation4 + $0x244] ss:$16 sps:$4 sm:$0xff]  }
 0x343   :  { %3860 = vmatpush1.bf16.msra.mxu0 %v13703_v46  ;;  %v15315_v46 = vld [vmem:[#allocation4 + $0x224] ss:$16 sps:$4 sm:$0xff]  }
 0x344   :  { %3861 = vmatprep.subr.bf16.mxu0 %v13696_v55  ;;  %v15321_v55 = vld [vmem:[#allocation4 + $0x204] ss:$16 sps:$4 sm:$0xff]  }
 0x345   :  { %3835 = vmatpush2.bf16.msra.mxu1 %v13639_v52  ;;  %v15318_v52 = vld [vmem:[#allocation4 + $0x4] ss:$16 sps:$4 sm:$0xff]  }
 0x346   :  { %3836 = vmatprep.subr.bf16.mxu1 %v13632_v63  ;;  %v17614_v63 = vsub.s32 4, %v17537_v50  ;;  %v15342_v23 = vld [vmem:[#allocation4 + $0x184] ss:$16 sps:$4 sm:$0xff]  }
 0x347   :  { %3862 = vmatpush1.bf16.msra.mxu0 %v13695_v0  ;;  %v15327_v0 = vld [vmem:[#allocation4 + $0x3e4] ss:$16 sps:$4 sm:$0xff]  }
 0x348   :  { %3863 = vmatprep.subr.bf16.mxu0 %v13688_v16 }
 0x349   :  { %3837 = vmatpush2.bf16.msra.mxu1 %v13631_v57  ;;  %v17616_v57 = vld [vmem:[#allocation24] sm:$0xff] }
 0x34a   :  { %3838 = vmatprep.subr.bf16.mxu1 %v13624_v6  ;;  %v950_v16 = vrot.slane %v17616_v57, %v17614_v63 }
 0x34b   :  { %3864 = vmatpush1.bf16.msra.mxu0 %v13687_v9 }
 0x34c   :  { %3865 = vmatprep.subr.bf16.mxu0 %v13680_v33  ;;  %v15336_v33 = vld [vmem:[#allocation4 + $0x1a4] ss:$16 sps:$4 sm:$0xff]  }
 0x34d   :  { %3839 = vmatpush2.bf16.msra.mxu1 %v13623_v10 }
 0x34e   :  { %3840 = vmatprep.subr.bf16.mxu1 %v13616_v11 }
 0x34f   :  { %3866 = vmatpush1.bf16.msra.mxu0 %v13679_v13 }
 0x350   :  { %5466 = vmatprep.subr.bf16.mxu0 %v15276_v14  ;;  %v15339_v14 = vld [vmem:[#allocation4 + $0x3a4] ss:$16 sps:$4 sm:$0xff]  }
 0x351   :  { %3841 = vmatpush2.bf16.msra.mxu1 %v13615_v56  ;;  %v15334_v56 = vld [vmem:[#allocation4 + $0x1a0] ss:$16 sps:$4 sm:$0xff]  }
 0x352   :  { %5507 = vmatprep.subr.bf16.mxu1 %v15279_v17  ;;  %3884 = vmatmul.mubr.bf16.vlgmr.msra.gmra.mxu0 %v16595_v47  ;;  %v15343_v47 = vld [vmem:[#allocation4 + $0x380] ss:$16 sps:$4 sm:$0xff]  }
 0x353   :  { %5467 = vmatpush1.bf16.msra.mxu0 %v15274_v18  ;;  %5498 = vmatprep.mubr.bf16.mxu0 %v17605_v53 }
 0x354   :  { %3843 = vmatmul.mubr.bf16.vlgmr.msra.gmra.mxu1 %v17525_v35  ;;  %5468 = vmatprep.subr.bf16.mxu0 %v15282_v32  ;;  %v15295_v35 = vld [vmem:[#allocation4 + $0x280] ss:$16 sps:$4 sm:$0xff]  }
 0x355   :  { %5508 = vmatpush1.bf16.msra.mxu1 %v15277_v19  ;;  %5539 = vmatprep.mubr.bf16.mxu1 %v17608_v54  ;;  %v15337_v19 = vld [vmem:[#allocation4 + $0x3a0] ss:$16 sps:$4 sm:$0xff]  }
 0x356   :  { %5509 = vmatprep.subr.bf16.mxu1 %v15285_v24  ;;  %v15345_v24 = vld [vmem:[#allocation4 + $0x384] ss:$16 sps:$4 sm:$0xff]  }
 0x357   :  { %5469 = vmatpush1.bf16.msra.mxu0 %v15280_v28  ;;  %v15340_v28 = vld [vmem:[#allocation4 + $0x180] ss:$16 sps:$4 sm:$0xff]  }
 0x358   :  { %5470 = vmatprep.subr.bf16.mxu0 %v15288_v49  ;;  %v15351_v49 = vld [vmem:[#allocation4 + $0x364] ss:$16 sps:$4 sm:$0xff]  }
 0x359   :  { %5510 = vmatpush1.bf16.msra.mxu1 %v15283_v27  ;;  %v15348_v27 = vld [vmem:[#allocation4 + $0x164] ss:$16 sps:$4 sm:$0xff]  }
 0x35a   :  { %5511 = vmatprep.subr.bf16.mxu1 %v15291_v25  ;;  %v15346_v25 = vld [vmem:[#allocation4 + $0x160] ss:$16 sps:$4 sm:$0xff]  }
 0x35b   :  { %5471 = vmatpush1.bf16.msra.mxu0 %v15286_v29  ;;  %v15349_v29 = vld [vmem:[#allocation4 + $0x360] ss:$16 sps:$4 sm:$0xff]  }
 0x35c   :  { %5472 = vmatprep.subr.bf16.mxu0 %v15294_v31  ;;  %v15357_v31 = vld [vmem:[#allocation4 + $0x344] ss:$16 sps:$4 sm:$0xff]  }
 0x35d   :  { %5512 = vmatpush1.bf16.msra.mxu1 %v15289_v30  ;;  %v15354_v30 = vld [vmem:[#allocation4 + $0x144] ss:$16 sps:$4 sm:$0xff]  }
 0x35e   :  { %5513 = vmatprep.subr.bf16.mxu1 %v15297_v58  ;;  %v15352_v58 = vld [vmem:[#allocation4 + $0x140] ss:$16 sps:$4 sm:$0xff]  }
 0x35f   :  { %5473 = vmatpush1.bf16.msra.mxu0 %v15292_v34  ;;  %v15355_v34 = vld [vmem:[#allocation4 + $0x340] ss:$16 sps:$4 sm:$0xff]  }
 0x360   :  { %5474 = vmatprep.subr.bf16.mxu0 %v15300_v38  ;;  %v15363_v38 = vld [vmem:[#allocation4 + $0x324] ss:$16 sps:$4 sm:$0xff]  }
 0x361   :  { %5514 = vmatpush1.bf16.msra.mxu1 %v15295_v35  ;;  %v15360_v35 = vld [vmem:[#allocation4 + $0x124] ss:$16 sps:$4 sm:$0xff]  }
 0x362   :  { %5515 = vmatprep.subr.bf16.mxu1 %v15303_v39  ;;  %v15358_v39 = vld [vmem:[#allocation4 + $0x120] ss:$16 sps:$4 sm:$0xff]  }
 0x363   :  { %5475 = vmatpush1.bf16.msra.mxu0 %v15298_v41  ;;  %v15361_v41 = vld [vmem:[#allocation4 + $0x320] ss:$16 sps:$4 sm:$0xff]  }
 0x364   :  { %5476 = vmatprep.subr.bf16.mxu0 %v15306_v43  ;;  %v15369_v43 = vld [vmem:[#allocation4 + $0x304] ss:$16 sps:$4 sm:$0xff]  }
 0x365   :  { %5516 = vmatpush1.bf16.msra.mxu1 %v15301_v42  ;;  %v15366_v42 = vld [vmem:[#allocation4 + $0x104] ss:$16 sps:$4 sm:$0xff]  }
 0x366   :  { %5517 = vmatprep.subr.bf16.mxu1 %v15309_v59  ;;  %v3892_v59 = vmax.f32 %v17562_v15, 0.0 }
 0x367   :  { %5477 = vmatpush1.bf16.msra.mxu0 %v15304_v44  ;;  %v15364_v44 = vld [vmem:[#allocation4 + $0x100] ss:$16 sps:$4 sm:$0xff]  }
 0x368   :  { %5478 = vmatprep.subr.bf16.mxu0 %v15312_v21  ;;  %v15372_v21 = vld [vmem:[#allocation4 + $0x4e4] ss:$16 sps:$4 sm:$0xff]  }
 0x369   :  { %5518 = vmatpush1.bf16.msra.mxu1 %v15307_v45  ;;  %v15367_v45 = vld [vmem:[#allocation4 + $0x300] ss:$16 sps:$4 sm:$0xff]  }
 0x36a   :  { %5519 = vmatprep.subr.bf16.mxu1 %v15315_v46  ;;  %v15429_v46 = vld [vmem:[#allocation4 + $0x6e4] ss:$16 sps:$4 sm:$0xff]  }
 0x36b   :  { %5479 = vmatpush1.bf16.msra.mxu0 %v15310_v48  ;;  %v3894_v48 = vmax.f32 %v17594_v22, 0.0  ;;  %v15433_v22 = vld [vmem:[#allocation4 + $0x6c0] ss:$16 sps:$4 sm:$0xff]  }
 0x36c   :  { %5480 = vmatprep.subr.bf16.mxu0 %v15318_v52  ;;  %v15375_v52 = vld [vmem:[#allocation4 + $0x4c4] ss:$16 sps:$4 sm:$0xff]  }
 0x36d   :  { %5520 = vmatpush1.bf16.msra.mxu1 %v15313_v51  ;;  %v15370_v51 = vld [vmem:[#allocation4 + $0x4e0] ss:$16 sps:$4 sm:$0xff]   ;;  %v17630_v15 = vpack.c.bf16 %v3894_v48, %v3894_v48 }
 0x36e   :  { %5521 = vmatprep.subr.bf16.mxu1 %v15321_v55  ;;  %v15427_v55 = vld [vmem:[#allocation4 + $0x6e0] ss:$16 sps:$4 sm:$0xff]  }
 0x36f   :  { %5481 = vmatpush1.bf16.msra.mxu0 %v15316_v60  ;;  %v15435_v60 = vld [vmem:[#allocation4 + $0x6c4] ss:$16 sps:$4 sm:$0xff]   ;;  %v15481_v48 = vld [vmem:[#allocation4 + $0x7c0] ss:$16 sps:$4 sm:$0xff]  }
 0x370   :  { %5482 = vmatprep.subr.bf16.mxu0 %v15324_v40  ;;  %v15373_v40 = vld [vmem:[#allocation4 + $0x4c0] ss:$16 sps:$4 sm:$0xff]  }
 0x371   :  { %5522 = vmatpush1.bf16.msra.mxu1 %v15319_v61  ;;  %v17628_v61 = vpack.c.bf16 %v3892_v59, %v3892_v59 }
 0x372   :  { %5523 = vmatprep.subr.bf16.mxu1 %v15327_v0  ;;  %v3598_v6 = vpop.f32.mrf.mxu0  ;;  %v15378_v0 = vld [vmem:[#allocation4 + $0x4a4] ss:$16 sps:$4 sm:$0xff]  }
 0x373   :  { %v3599_v9 = vadd.f32 %v3598_v6, %v950_v16  ;;  %5483 = vmatpush2.bf16.msra.mxu0 %v15322_v1  ;;  %v15441_v16 = vld [vmem:[#allocation4 + $0x6a4] ss:$16 sps:$4 sm:$0xff]   ;;  %v15439_v6 = vld [vmem:[#allocation4 + $0x6a0] ss:$16 sps:$4 sm:$0xff]  }
 0x374   :  { %v3639_v10 = vpop.f32.mrf.mxu1  ;;  %v17620_v11 = vpop.f32.mrf.mxu0  ;;  %5484 = vmatprep.subr.bf16.mxu0 %v15330_v3  ;;  %v15376_v3 = vld [vmem:[#allocation4 + $0x4a0] ss:$16 sps:$4 sm:$0xff]  }
 0x375   :  { %5524 = vmatpush2.bf16.msra.mxu1 %v15325_v2  ;;  %v17622_v12 = vadd.f32 %v3639_v10, %v3599_v9  ;;  %v15447_v9 = vld [vmem:[#allocation4 + $0x684] ss:$16 sps:$4 sm:$0xff]   ;;  %v15379_v10 = vld [vmem:[#allocation4 + $0x480] ss:$16 sps:$4 sm:$0xff]  }
 0x376   :  { %v17624_v13 = vpop.f32.mrf.mxu1  ;;  %5525 = vmatprep.subr.bf16.mxu1 %v15333_v4  ;;  %v3602_v17 = vpop.f32.mrf.mxu0  ;;  %v15381_v4 = vld [vmem:[#allocation4 + $0x484] ss:$16 sps:$4 sm:$0xff]  }
 0x377   :  { %5485 = vmatpush2.bf16.msra.mxu0 %v15328_v5  ;;  %v15453_v17 = vld [vmem:[#allocation4 + $0x664] ss:$16 sps:$4 sm:$0xff]  }
 0x378   :  { %v3643_v18 = vpop.f32.mrf.mxu1  ;;  %v3603_v20 = vpop.f32.mrf.mxu0  ;;  %5486 = vmatprep.subr.bf16.mxu0 %v15336_v33  ;;  %v15384_v33 = vld [vmem:[#allocation4 + $0x464] ss:$16 sps:$4 sm:$0xff]  }
 0x379   :  { %5526 = vmatpush2.bf16.msra.mxu1 %v15331_v7  ;;  %v15387_v18 = vld [vmem:[#allocation4 + $0x444] ss:$16 sps:$4 sm:$0xff]   ;;  %v15451_v20 = vld [vmem:[#allocation4 + $0x660] ss:$16 sps:$4 sm:$0xff]  }
 0x37a   :  { %v3644_v32 = vpop.f32.mrf.mxu1  ;;  %5527 = vmatprep.subr.bf16.mxu1 %v15339_v14  ;;  %v15445_v14 = vld [vmem:[#allocation4 + $0x680] ss:$16 sps:$4 sm:$0xff]  }
 0x37b   :  { %5487 = vmatpush2.bf16.msra.mxu0 %v15334_v56  ;;  %v15382_v56 = vld [vmem:[#allocation4 + $0x460] ss:$16 sps:$4 sm:$0xff]   ;;  %v15390_v32 = vld [vmem:[#allocation4 + $0x424] ss:$16 sps:$4 sm:$0xff]  }
 0x37c   :  { %5488 = vmatprep.subr.bf16.mxu0 %v15342_v23  ;;  %v15385_v23 = vld [vmem:[#allocation4 + $0x440] ss:$16 sps:$4 sm:$0xff]  }
 0x37d   :  { %5528 = vmatpush2.bf16.msra.mxu1 %v15337_v19  ;;  %v15459_v19 = vld [vmem:[#allocation4 + $0x644] ss:$16 sps:$4 sm:$0xff]  }
 0x37e   :  { %5529 = vmatprep.subr.bf16.mxu1 %v15345_v24  ;;  %v17639_v24 = vsub.s32 5, %v17537_v50 }
 0x37f   :  { %5489 = vmatpush2.bf16.msra.mxu0 %v15340_v28  ;;  %v15457_v28 = vld [vmem:[#allocation4 + $0x640] ss:$16 sps:$4 sm:$0xff]  }
 0x380   :  { %5490 = vmatprep.subr.bf16.mxu0 %v15348_v27  ;;  %v15388_v27 = vld [vmem:[#allocation4 + $0x420] ss:$16 sps:$4 sm:$0xff]  }
 0x381   :  { %5530 = vmatpush2.bf16.msra.mxu1 %v15343_v47  ;;  %v15465_v47 = vld [vmem:[#allocation4 + $0x624] ss:$16 sps:$4 sm:$0xff]  }
 0x382   :  { %5531 = vmatprep.subr.bf16.mxu1 %v15351_v49  ;;  %v15393_v49 = vld [vmem:[#allocation4 + $0x404] ss:$16 sps:$4 sm:$0xff]  }
 0x383   :  { %5491 = vmatpush2.bf16.msra.mxu0 %v15346_v25  ;;  %v15463_v25 = vld [vmem:[#allocation4 + $0x620] ss:$16 sps:$4 sm:$0xff]  }
 0x384   :  { %5492 = vmatprep.subr.bf16.mxu0 %v15354_v30  ;;  %v15391_v30 = vld [vmem:[#allocation4 + $0x400] ss:$16 sps:$4 sm:$0xff]  }
 0x385   :  { %5532 = vmatpush2.bf16.msra.mxu1 %v15349_v29  ;;  %v15471_v29 = vld [vmem:[#allocation4 + $0x604] ss:$16 sps:$4 sm:$0xff]  }
 0x386   :  { %5533 = vmatprep.subr.bf16.mxu1 %v15357_v31  ;;  %v954_v31 = vrot.slane %v17616_v57, %v17639_v24 }
 0x387   :  { %5493 = vmatpush2.bf16.msra.mxu0 %v15352_v58  ;;  %v15396_v58 = vld [vmem:[#allocation4 + $0x5e4] ss:$16 sps:$4 sm:$0xff]  }
 0x388   :  { %5494 = vmatprep.subr.bf16.mxu0 %v15360_v35  ;;  %v15477_v35 = vld [vmem:[#allocation4 + $0x7e4] ss:$16 sps:$4 sm:$0xff]  }
 0x389   :  { %5534 = vmatpush2.bf16.msra.mxu1 %v15355_v34  ;;  %v15469_v34 = vld [vmem:[#allocation4 + $0x600] ss:$16 sps:$4 sm:$0xff]  }
 0x38a   :  { %5535 = vmatprep.subr.bf16.mxu1 %v15363_v38  ;;  %v15394_v38 = vld [vmem:[#allocation4 + $0x5e0] ss:$16 sps:$4 sm:$0xff]  }
 0x38b   :  { %5495 = vmatpush2.bf16.msra.mxu0 %v15358_v39  ;;  %v3601_v39 = vadd.f32 %v17620_v11, %v954_v31 }
 0x38c   :  { %5496 = vmatprep.subr.bf16.mxu0 %v15366_v42  ;;  %v15475_v42 = vld [vmem:[#allocation4 + $0x7e0] ss:$16 sps:$4 sm:$0xff]  }
 0x38d   :  { %5536 = vmatpush2.bf16.msra.mxu1 %v15361_v41  ;;  %v15399_v41 = vld [vmem:[#allocation4 + $0x5c4] ss:$16 sps:$4 sm:$0xff]  }
 0x38e   :  { %5537 = vmatprep.subr.bf16.mxu1 %v15369_v43  ;;  %v15483_v43 = vld [vmem:[#allocation4 + $0x7c4] ss:$16 sps:$4 sm:$0xff]  }
 0x38f   :  { %5497 = vmatpush2.bf16.msra.mxu0 %v15364_v44  ;;  %v15397_v44 = vld [vmem:[#allocation4 + $0x5c0] ss:$16 sps:$4 sm:$0xff]  }
 0x390   :  { %5548 = vmatprep.subr.bf16.mxu0 %v15372_v21  ;;  %v15402_v21 = vld [vmem:[#allocation4 + $0x5a4] ss:$16 sps:$4 sm:$0xff]  }
 0x391   :  { %5538 = vmatpush2.bf16.msra.mxu1 %v15367_v45  ;;  %v3642_v45 = vadd.f32 %v17624_v13, %v3601_v39  ;;  %v15495_v13 = vld [vmem:[#allocation4 + $0x784] ss:$16 sps:$4 sm:$0xff]  }
 0x392   :  { %5589 = vmatprep.subr.bf16.mxu1 %v15429_v46  ;;  %5499 = vmatmul.mubr.bf16.vlgmr.msra.gmra.mxu0 %v17628_v61 }
 0x393   :  { %5549 = vmatpush1.bf16.msra.mxu0 %v15370_v51  ;;  %v15489_v51 = vld [vmem:[#allocation4 + $0x7a4] ss:$16 sps:$4 sm:$0xff]  }
 0x394   :  { %v17633_v1 = vpop.f32.mrf.mxu1  ;;  %5540 = vmatmul.mubr.bf16.vlgmr.msra.gmra.mxu1 %v17630_v15  ;;  %5550 = vmatprep.subr.bf16.mxu0 %v15375_v52 }
 0x395   :  { %5590 = vmatpush1.bf16.msra.mxu1 %v15427_v55 }
 0x396   :  { %v17636_v2 = vpop.f32.mrf.mxu1  ;;  %5591 = vmatprep.subr.bf16.mxu1 %v15435_v60  ;;  %v15400_v60 = vld [vmem:[#allocation4 + $0x5a0] ss:$16 sps:$4 sm:$0xff]  }
 0x397   :  { %5551 = vmatpush1.bf16.msra.mxu0 %v15373_v40  ;;  %v15405_v40 = vld [vmem:[#allocation4 + $0x584] ss:$16 sps:$4 sm:$0xff]  }
 0x398   :  { %v3725_v5 = vpop.f32.mrf.mxu1  ;;  %5552 = vmatprep.subr.bf16.mxu0 %v15378_v0 }
 0x399   :  { %5592 = vmatpush1.bf16.msra.mxu1 %v15433_v22  ;;  %v15487_v22 = vld [vmem:[#allocation4 + $0x7a0] ss:$16 sps:$4 sm:$0xff]   ;;  %v15408_v5 = vld [vmem:[#allocation4 + $0x564] ss:$16 sps:$4 sm:$0xff]  }
 0x39a   :  { %v3726_v7 = vpop.f32.mrf.mxu1  ;;  %5593 = vmatprep.subr.bf16.mxu1 %v15441_v16 }
 0x39b   :  { %5553 = vmatpush1.bf16.msra.mxu0 %v15376_v3  ;;  %v15403_v3 = vld [vmem:[#allocation4 + $0x580] ss:$16 sps:$4 sm:$0xff]   ;;  %v15501_v7 = vld [vmem:[#allocation4 + $0x764] ss:$16 sps:$4 sm:$0xff]  }
 0x39c   :  { %5554 = vmatprep.subr.bf16.mxu0 %v15381_v4 }
 0x39d   :  { %5594 = vmatpush1.bf16.msra.mxu1 %v15439_v6  ;;  %v15493_v6 = vld [vmem:[#allocation4 + $0x780] ss:$16 sps:$4 sm:$0xff]  }
 0x39e   :  { %5595 = vmatprep.subr.bf16.mxu1 %v15447_v9  ;;  %v15411_v9 = vld [vmem:[#allocation4 + $0x544] ss:$16 sps:$4 sm:$0xff]  }
 0x39f   :  { %5555 = vmatpush1.bf16.msra.mxu0 %v15379_v10  ;;  %v15499_v10 = vld [vmem:[#allocation4 + $0x760] ss:$16 sps:$4 sm:$0xff]  }
 0x3a0   :  { %5556 = vmatprep.subr.bf16.mxu0 %v15384_v33  ;;  %v15507_v33 = vld [vmem:[#allocation4 + $0x744] ss:$16 sps:$4 sm:$0xff]  }
 0x3a1   :  { %5596 = vmatpush1.bf16.msra.mxu1 %v15445_v14  ;;  %v15409_v14 = vld [vmem:[#allocation4 + $0x540] ss:$16 sps:$4 sm:$0xff]  }
 0x3a2   :  { %5597 = vmatprep.subr.bf16.mxu1 %v15453_v17  ;;  %v15414_v17 = vld [vmem:[#allocation4 + $0x524] ss:$16 sps:$4 sm:$0xff]  }
 0x3a3   :  { %5557 = vmatpush1.bf16.msra.mxu0 %v15382_v56 }
 0x3a4   :  { %5558 = vmatprep.subr.bf16.mxu0 %v15387_v18  ;;  %v15505_v18 = vld [vmem:[#allocation4 + $0x740] ss:$16 sps:$4 sm:$0xff]  }
 0x3a5   :  { %5598 = vmatpush1.bf16.msra.mxu1 %v15451_v20  ;;  %v15513_v20 = vld [vmem:[#allocation4 + $0x724] ss:$16 sps:$4 sm:$0xff]  }
 0x3a6   :  { %5599 = vmatprep.subr.bf16.mxu1 %v15459_v19  ;;  %v15412_v19 = vld [vmem:[#allocation4 + $0x520] ss:$16 sps:$4 sm:$0xff]  }
 0x3a7   :  { %5559 = vmatpush1.bf16.msra.mxu0 %v15385_v23 }
 0x3a8   :  { %5560 = vmatprep.subr.bf16.mxu0 %v15390_v32  ;;  %v15417_v32 = vld [vmem:[#allocation4 + $0x504] ss:$16 sps:$4 sm:$0xff]  }
 0x3a9   :  { %5600 = vmatpush1.bf16.msra.mxu1 %v15457_v28  ;;  %v15511_v28 = vld [vmem:[#allocation4 + $0x720] ss:$16 sps:$4 sm:$0xff]  }
 0x3aa   :  { %5601 = vmatprep.subr.bf16.mxu1 %v15465_v47  ;;  %v15519_v47 = vld [vmem:[#allocation4 + $0x704] ss:$16 sps:$4 sm:$0xff]  }
 0x3ab   :  { %5561 = vmatpush1.bf16.msra.mxu0 %v15388_v27  ;;  %v15415_v27 = vld [vmem:[#allocation4 + $0x500] ss:$16 sps:$4 sm:$0xff]  }
 0x3ac   :  { %5562 = vmatprep.subr.bf16.mxu0 %v15393_v49 }
 0x3ad   :  { %5602 = vmatpush1.bf16.msra.mxu1 %v15463_v25  ;;  %v15517_v25 = vld [vmem:[#allocation4 + $0x700] ss:$16 sps:$4 sm:$0xff]  }
 0x3ae   :  { %5603 = vmatprep.subr.bf16.mxu1 %v15471_v29  ;;  %v15525_v29 = vld [vmem:[#allocation4 + $0x2ec] ss:$16 sps:$4 sm:$0xff]  }
 0x3af   :  { %5563 = vmatpush1.bf16.msra.mxu0 %v15391_v30  ;;  %v15418_v30 = vld [vmem:[#allocation4 + $0xe8] ss:$16 sps:$4 sm:$0xff]  }
 0x3b0   :  { %5564 = vmatprep.subr.bf16.mxu0 %v15396_v58 }
 0x3b1   :  { %5604 = vmatpush1.bf16.msra.mxu1 %v15469_v34  ;;  %v15421_v34 = vld [vmem:[#allocation4 + $0xc8] ss:$16 sps:$4 sm:$0xff]  }
 0x3b2   :  { %5605 = vmatprep.subr.bf16.mxu1 %v15477_v35  ;;  %v3680_v59 = vpop.f32.mrf.mxu0  ;;  %v15426_v35 = vld [vmem:[#allocation4 + $0xac] ss:$16 sps:$4 sm:$0xff]  }
 0x3b3   :  { %5565 = vmatpush2.bf16.msra.mxu0 %v15394_v38  ;;  %v3681_v56 = vadd.f32 %v3680_v59, %v17622_v12  ;;  %v15420_v12 = vld [vmem:[#allocation4 + $0xec] ss:$16 sps:$4 sm:$0xff]   ;;  %v15430_v59 = vld [vmem:[#allocation4 + $0x88] ss:$16 sps:$4 sm:$0xff]  }
 0x3b4   :  { %v3682_v46 = vpop.f32.mrf.mxu0  ;;  %5566 = vmatprep.subr.bf16.mxu0 %v15399_v41  ;;  %v15424_v41 = vld [vmem:[#allocation4 + $0xa8] ss:$16 sps:$4 sm:$0xff]  }
 0x3b5   :  { %5606 = vmatpush2.bf16.msra.mxu1 %v15475_v42  ;;  %v3683_v52 = vadd.f32 %v3682_v46, %v3642_v45  ;;  %v3722_v23 = vadd.f32 %v17633_v1, %v3681_v56  ;;  %v15423_v1 = vld [vmem:[#allocation4 + $0xcc] ss:$16 sps:$4 sm:$0xff]   ;;  %v15436_v45 = vld [vmem:[#allocation4 + $0x68] ss:$16 sps:$4 sm:$0xff]   ;;  %v17660_v56 = vsub.s32 6, %v17537_v50 }
 0x3b6   :  { %5607 = vmatprep.subr.bf16.mxu1 %v15483_v43  ;;  %v3684_v11 = vpop.f32.mrf.mxu0  ;;  %v15432_v42 = vld [vmem:[#allocation4 + $0x8c] ss:$16 sps:$4 sm:$0xff]  }
 0x3b7   :  { %v3724_v55 = vadd.f32 %v17636_v2, %v3683_v52  ;;  %5567 = vmatpush2.bf16.msra.mxu0 %v15397_v44  ;;  %v15406_v2 = vld [vmem:[#allocation4 + $0x560] ss:$16 sps:$4 sm:$0xff]   ;;  %v3896_v49 = vmax.f32 %v3722_v23, 0.0  ;;  %v15438_v44 = vld [vmem:[#allocation4 + $0x6c] ss:$16 sps:$4 sm:$0xff]   ;;  %v958_v23 = vrot.slane %v17616_v57, %v17660_v56 }
 0x3b8   :  { %v3685_v0 = vpop.f32.mrf.mxu0  ;;  %5568 = vmatprep.subr.bf16.mxu0 %v15402_v21  ;;  %v15444_v21 = vld [vmem:[#allocation4 + $0x4c] ss:$16 sps:$4 sm:$0xff]   ;;  %v15454_v52 = vld [vmem:[#allocation4 + $0x8] ss:$16 sps:$4 sm:$0xff]  }
 0x3b9   :  { %5608 = vmatpush2.bf16.msra.mxu1 %v15481_v48  ;;  %v3897_v16 = vmax.f32 %v3724_v55, 0.0  ;;  %v17651_v31 = vpack.c.bf16 %v3896_v49, %v3896_v49  ;;  %v15450_v46 = vld [vmem:[#allocation4 + $0x2c] ss:$16 sps:$4 sm:$0xff]   ;;  %v15448_v48 = vld [vmem:[#allocation4 + $0x28] ss:$16 sps:$4 sm:$0xff]  }
 0x3ba   :  { %5609 = vmatprep.subr.bf16.mxu1 %v15489_v51  ;;  %v15456_v51 = vld [vmem:[#allocation4 + $0xc] ss:$16 sps:$4 sm:$0xff]   ;;  %v15460_v55 = vld [vmem:[#allocation4 + $0x1e8] ss:$16 sps:$4 sm:$0xff]  }
 0x3bb   :  { %v17646_v4 = vpack.c.bf16 %v3897_v16, %v3897_v16  ;;  %5569 = vmatpush2.bf16.msra.mxu0 %v15400_v60  ;;  %v15462_v11 = vld [vmem:[#allocation4 + $0x1ec] ss:$16 sps:$4 sm:$0xff]   ;;  %v15466_v0 = vld [vmem:[#allocation4 + $0x1c8] ss:$16 sps:$4 sm:$0xff]  }
 0x3bc   :  { %5570 = vmatprep.subr.bf16.mxu0 %v15405_v40  ;;  %v15468_v60 = vld [vmem:[#allocation4 + $0x1cc] ss:$16 sps:$4 sm:$0xff]  }
 0x3bd   :  { %5610 = vmatpush2.bf16.msra.mxu1 %v15487_v22  ;;  %5580 = vmatprep.mubr.bf16.mxu0 %v17646_v4  ;;  %v15516_v49 = vld [vmem:[#allocation4 + $0x4cc] ss:$16 sps:$4 sm:$0xff]  }
 0x3be   :  { %5611 = vmatprep.subr.bf16.mxu1 %v15495_v13  ;;  %v15474_v13 = vld [vmem:[#allocation4 + $0x1ac] ss:$16 sps:$4 sm:$0xff]  }
 0x3bf   :  { %5571 = vmatpush2.bf16.msra.mxu0 %v15403_v3  ;;  %v15472_v3 = vld [vmem:[#allocation4 + $0x1a8] ss:$16 sps:$4 sm:$0xff]  }
 0x3c0   :  { %5572 = vmatprep.subr.bf16.mxu0 %v15408_v5 }
 0x3c1   :  { %5612 = vmatpush2.bf16.msra.mxu1 %v15493_v6  ;;  %v15480_v6 = vld [vmem:[#allocation4 + $0x18c] ss:$16 sps:$4 sm:$0xff]  }
 0x3c2   :  { %5613 = vmatprep.subr.bf16.mxu1 %v15501_v7  ;;  %v15478_v7 = vld [vmem:[#allocation4 + $0x188] ss:$16 sps:$4 sm:$0xff]  }
 0x3c3   :  { %5573 = vmatpush2.bf16.msra.mxu0 %v15406_v2  ;;  %v15486_v2 = vld [vmem:[#allocation4 + $0x16c] ss:$16 sps:$4 sm:$0xff]  }
 0x3c4   :  { %5574 = vmatprep.subr.bf16.mxu0 %v15411_v9  ;;  %v15484_v9 = vld [vmem:[#allocation4 + $0x168] ss:$16 sps:$4 sm:$0xff]  }
 0x3c5   :  { %5614 = vmatpush2.bf16.msra.mxu1 %v15499_v10  ;;  %v15492_v10 = vld [vmem:[#allocation4 + $0x14c] ss:$16 sps:$4 sm:$0xff]  }
 0x3c6   :  { %5615 = vmatprep.subr.bf16.mxu1 %v15507_v33  ;;  %v15490_v33 = vld [vmem:[#allocation4 + $0x148] ss:$16 sps:$4 sm:$0xff]  }
 0x3c7   :  { %5575 = vmatpush2.bf16.msra.mxu0 %v15409_v14  ;;  %v15498_v14 = vld [vmem:[#allocation4 + $0x12c] ss:$16 sps:$4 sm:$0xff]  }
 0x3c8   :  { %5576 = vmatprep.subr.bf16.mxu0 %v15414_v17  ;;  %v15496_v17 = vld [vmem:[#allocation4 + $0x128] ss:$16 sps:$4 sm:$0xff]  }
 0x3c9   :  { %5616 = vmatpush2.bf16.msra.mxu1 %v15505_v18  ;;  %v15504_v18 = vld [vmem:[#allocation4 + $0x10c] ss:$16 sps:$4 sm:$0xff]  }
 0x3ca   :  { %5617 = vmatprep.subr.bf16.mxu1 %v15513_v20  ;;  %v961_v20 = vsub.s32 7, %v17537_v50 }
 0x3cb   :  { %5577 = vmatpush2.bf16.msra.mxu0 %v15412_v19  ;;  %v15502_v19 = vld [vmem:[#allocation4 + $0x108] ss:$16 sps:$4 sm:$0xff]  }
 0x3cc   :  { %5578 = vmatprep.subr.bf16.mxu0 %v15417_v32  ;;  %v15510_v32 = vld [vmem:[#allocation4 + $0x4ec] ss:$16 sps:$4 sm:$0xff]  }
 0x3cd   :  { %5618 = vmatpush2.bf16.msra.mxu1 %v15511_v28  ;;  %v962_v28 = vrot.slane %v17616_v57, %v961_v20 }
 0x3ce   :  { %5619 = vmatprep.subr.bf16.mxu1 %v15519_v47  ;;  %v15508_v47 = vld [vmem:[#allocation4 + $0x4e8] ss:$16 sps:$4 sm:$0xff]  }
 0x3cf   :  { %5579 = vmatpush2.bf16.msra.mxu0 %v15415_v27 }
 0x3d0   :  { %5630 = vmatprep.subr.bf16.mxu0 %v15420_v12 }
 0x3d1   :  { %5620 = vmatpush2.bf16.msra.mxu1 %v15517_v25 }
 0x3d2   :  { %5671 = vmatprep.subr.bf16.mxu1 %v15525_v29  ;;  %5581 = vmatmul.mubr.bf16.vlgmr.msra.gmra.mxu0 %v17651_v31 }
 0x3d3   :  { %5631 = vmatpush1.bf16.msra.mxu0 %v15418_v30  ;;  %5662 = vmatprep.mubr.bf16.mxu0 %v17605_v53  ;;  %v15442_v53 = vld [vmem:[#allocation4 + $0x48] ss:$16 sps:$4 sm:$0xff]  }
 0x3d4   :  { %v17654_v58 = vpop.f32.mrf.mxu1  ;;  %5632 = vmatprep.subr.bf16.mxu0 %v15423_v1  ;;  %v15514_v1 = vld [vmem:[#allocation4 + $0x4c8] ss:$16 sps:$4 sm:$0xff]  }
 0x3d5   :  { %v3763_v27 = vadd.f32 %v17654_v58, %v958_v23  ;;  %v15561_v23 = vld [vmem:[#allocation4 + $0x22c] ss:$16 sps:$4 sm:$0xff]  }
 0x3d6   :  { %v17657_v38 = vpop.f32.mrf.mxu1 }
 0x3d7   :  { %5633 = vmatpush1.bf16.msra.mxu0 %v15421_v34  ;;  %v3765_v12 = vadd.f32 %v17657_v38, %v962_v28  ;;  %v15520_v38 = vld [vmem:[#allocation4 + $0x4a8] ss:$16 sps:$4 sm:$0xff]  }
 0x3d8   :  { %v3766_v39 = vpop.f32.mrf.mxu1  ;;  %5634 = vmatprep.subr.bf16.mxu0 %v15426_v35  ;;  %v15559_v28 = vld [vmem:[#allocation4 + $0x228] ss:$16 sps:$4 sm:$0xff]  }
 0x3d9   :  { %v15522_v39 = vld [vmem:[#allocation4 + $0x4ac] ss:$16 sps:$4 sm:$0xff]  }
 0x3da   :  { %v3767_v43 = vpop.f32.mrf.mxu1 }
 0x3db   :  { %5635 = vmatpush1.bf16.msra.mxu0 %v15424_v41 }
 0x3dc   :  { %5636 = vmatprep.subr.bf16.mxu0 %v15432_v42 }
 0x3df   :  { %5637 = vmatpush1.bf16.msra.mxu0 %v15430_v59 }
 0x3e0   :  { %5638 = vmatprep.subr.bf16.mxu0 %v15438_v44 }
 0x3e3   :  { %5639 = vmatpush1.bf16.msra.mxu0 %v15436_v45 }
 0x3e4   :  { %5640 = vmatprep.subr.bf16.mxu0 %v15444_v21 }
 0x3e7   :  { %5641 = vmatpush1.bf16.msra.mxu0 %v15442_v53 }
 0x3e8   :  { %5642 = vmatprep.subr.bf16.mxu0 %v15450_v46  ;;  %v15526_v46 = vld [vmem:[#allocation4 + $0x488] ss:$16 sps:$4 sm:$0xff]  }
 0x3eb   :  { %5643 = vmatpush1.bf16.msra.mxu0 %v15448_v48 }
 0x3ec   :  { %5644 = vmatprep.subr.bf16.mxu0 %v15456_v51  ;;  %v15523_v51 = vld [vmem:[#allocation4 + $0x2e8] ss:$16 sps:$4 sm:$0xff]  }
 0x3ef   :  { %5645 = vmatpush1.bf16.msra.mxu0 %v15454_v52 }
 0x3f0   :  { %5646 = vmatprep.subr.bf16.mxu0 %v15462_v11  ;;  %v15531_v11 = vld [vmem:[#allocation4 + $0x2cc] ss:$16 sps:$4 sm:$0xff]  }
 0x3f2   :  { %v3803_v40 = vpop.f32.mrf.mxu0 }
 0x3f3   :  { %5647 = vmatpush2.bf16.msra.mxu0 %v15460_v55  ;;  %v3804_v25 = vadd.f32 %v3803_v40, %v3763_v27  ;;  %v15534_v55 = vld [vmem:[#allocation4 + $0x46c] ss:$16 sps:$4 sm:$0xff]   ;;  %v15529_v40 = vld [vmem:[#allocation4 + $0x2c8] ss:$16 sps:$4 sm:$0xff]  }
 0x3f4   :  { %v3805_v22 = vpop.f32.mrf.mxu0  ;;  %5648 = vmatprep.subr.bf16.mxu0 %v15468_v60  ;;  %v15532_v60 = vld [vmem:[#allocation4 + $0x468] ss:$16 sps:$4 sm:$0xff]   ;;  %v15567_v27 = vld [vmem:[#allocation4 + $0x20c] ss:$16 sps:$4 sm:$0xff]  }
 0x3f5   :  { %v3806_v34 = vadd.f32 %v3805_v22, %v3765_v12  ;;  %v15537_v22 = vld [vmem:[#allocation4 + $0x2ac] ss:$16 sps:$4 sm:$0xff]   ;;  %v15565_v12 = vld [vmem:[#allocation4 + $0x208] ss:$16 sps:$4 sm:$0xff]  }
 0x3f6   :  { %v3807_v16 = vpop.f32.mrf.mxu0 }
 0x3f7   :  { %5649 = vmatpush2.bf16.msra.mxu0 %v15466_v0  ;;  %v15540_v0 = vld [vmem:[#allocation4 + $0x44c] ss:$16 sps:$4 sm:$0xff]   ;;  %v15535_v16 = vld [vmem:[#allocation4 + $0x2a8] ss:$16 sps:$4 sm:$0xff]  }
 0x3f8   :  { %v3808_v5 = vpop.f32.mrf.mxu0  ;;  %5650 = vmatprep.subr.bf16.mxu0 %v15474_v13  ;;  %v15538_v13 = vld [vmem:[#allocation4 + $0x448] ss:$16 sps:$4 sm:$0xff]  }
 0x3f9   :  { %v15543_v5 = vld [vmem:[#allocation4 + $0x28c] ss:$16 sps:$4 sm:$0xff]  }
 0x3fb   :  { %5651 = vmatpush2.bf16.msra.mxu0 %v15472_v3  ;;  %v15546_v3 = vld [vmem:[#allocation4 + $0x42c] ss:$16 sps:$4 sm:$0xff]  }
 0x3fc   :  { %5652 = vmatprep.subr.bf16.mxu0 %v15480_v6  ;;  %v15544_v6 = vld [vmem:[#allocation4 + $0x428] ss:$16 sps:$4 sm:$0xff]  }
 0x3ff   :  { %5653 = vmatpush2.bf16.msra.mxu0 %v15478_v7  ;;  %v15541_v7 = vld [vmem:[#allocation4 + $0x288] ss:$16 sps:$4 sm:$0xff]  }
 0x400   :  { %5654 = vmatprep.subr.bf16.mxu0 %v15486_v2  ;;  %v15552_v2 = vld [vmem:[#allocation4 + $0x40c] ss:$16 sps:$4 sm:$0xff]  }
 0x403   :  { %5655 = vmatpush2.bf16.msra.mxu0 %v15484_v9  ;;  %v15550_v9 = vld [vmem:[#allocation4 + $0x408] ss:$16 sps:$4 sm:$0xff]  }
 0x404   :  { %5656 = vmatprep.subr.bf16.mxu0 %v15492_v10  ;;  %v15547_v10 = vld [vmem:[#allocation4 + $0x268] ss:$16 sps:$4 sm:$0xff]  }
 0x407   :  { %5657 = vmatpush2.bf16.msra.mxu0 %v15490_v33  ;;  %v15558_v33 = vld [vmem:[#allocation4 + $0x5ec] ss:$16 sps:$4 sm:$0xff]  }
 0x408   :  { %5658 = vmatprep.subr.bf16.mxu0 %v15498_v14  ;;  %v15555_v14 = vld [vmem:[#allocation4 + $0x24c] ss:$16 sps:$4 sm:$0xff]  }
 0x40b   :  { %5659 = vmatpush2.bf16.msra.mxu0 %v15496_v17  ;;  %v15556_v17 = vld [vmem:[#allocation4 + $0x5e8] ss:$16 sps:$4 sm:$0xff]  }
 0x40c   :  { %5660 = vmatprep.subr.bf16.mxu0 %v15504_v18  ;;  %v15553_v18 = vld [vmem:[#allocation4 + $0x248] ss:$16 sps:$4 sm:$0xff]  }
 0x40f   :  { %5661 = vmatpush2.bf16.msra.mxu0 %v15502_v19  ;;  %v15564_v19 = vld [vmem:[#allocation4 + $0x5cc] ss:$16 sps:$4 sm:$0xff]  }
 0x410   :  { %5712 = vmatprep.subr.bf16.mxu0 %v15510_v32  ;;  %v15562_v32 = vld [vmem:[#allocation4 + $0x5c8] ss:$16 sps:$4 sm:$0xff]  }
 0x412   :  { %v3885_v29 = vpop.f32.mrf.mxu0  ;;  %5663 = vmatmul.mubr.bf16.vlgmr.msra.gmra.mxu0 %v17628_v61  ;;  %v15528_v61 = vld [vmem:[#allocation4 + $0x48c] ss:$16 sps:$4 sm:$0xff]  }
 0x413   :  { %5713 = vmatpush1.bf16.msra.mxu0 %v15508_v47  ;;  %5744 = vmatprep.mubr.bf16.mxu0 %v17646_v4  ;;  %v15570_v47 = vld [vmem:[#allocation4 + $0x5ac] ss:$16 sps:$4 sm:$0xff]  }
 0x414   :  { %v3844_v30 = vpop.f32.mrf.mxu1  ;;  %v3887_v57 = vpop.f32.mrf.mxu0  ;;  %5714 = vmatprep.subr.bf16.mxu0 %v15516_v49  ;;  %v15568_v49 = vld [vmem:[#allocation4 + $0x5a8] ss:$16 sps:$4 sm:$0xff]  }
 0x415   :  { %v3845_v35 = vadd.f32 %v3844_v30, %v3804_v25  ;;  %v15576_v25 = vld [vmem:[#allocation4 + $0x58c] ss:$16 sps:$4 sm:$0xff]   ;;  %v15574_v30 = vld [vmem:[#allocation4 + $0x588] ss:$16 sps:$4 sm:$0xff]  }
 0x416   :  { %v3846_v41 = vpop.f32.mrf.mxu1  ;;  %v3889_v43 = vpop.f32.mrf.mxu0 }
 0x417   :  { %v3886_v58 = vadd.f32 %v3885_v29, %v3845_v35  ;;  %v3847_v42 = vadd.f32 %v3846_v41, %v3806_v34  ;;  %5715 = vmatpush1.bf16.msra.mxu0 %v15514_v1  ;;  %v15573_v29 = vld [vmem:[#allocation4 + $0x3ec] ss:$16 sps:$4 sm:$0xff]   ;;  %v15571_v1 = vld [vmem:[#allocation4 + $0x3e8] ss:$16 sps:$4 sm:$0xff]  }
 0x418   :  { %v3848_v59 = vpop.f32.mrf.mxu1  ;;  %v3890_v45 = vpop.f32.mrf.mxu0  ;;  %5716 = vmatprep.subr.bf16.mxu0 %v15522_v39  ;;  %v15582_v34 = vld [vmem:[#allocation4 + $0x56c] ss:$16 sps:$4 sm:$0xff]   ;;  %v15577_v39 = vld [vmem:[#allocation4 + $0x3c8] ss:$16 sps:$4 sm:$0xff]  }
 0x419   :  { %v3888_v44 = vadd.f32 %v3887_v57, %v3847_v42  ;;  %v3898_v21 = vmax.f32 %v3886_v58, 0.0  ;;  %v15579_v35 = vld [vmem:[#allocation4 + $0x3cc] ss:$16 sps:$4 sm:$0xff]   ;;  %v15580_v57 = vld [vmem:[#allocation4 + $0x568] ss:$16 sps:$4 sm:$0xff]  }
 0x41a   :  { %v3849_v53 = vpop.f32.mrf.mxu1  ;;  %v15588_v41 = vld [vmem:[#allocation4 + $0x54c] ss:$16 sps:$4 sm:$0xff]   ;;  %v15586_v42 = vld [vmem:[#allocation4 + $0x548] ss:$16 sps:$4 sm:$0xff]  }
 0x41b   :  { %v3899_v4 = vmax.f32 %v3888_v44, 0.0  ;;  %5717 = vmatpush1.bf16.msra.mxu0 %v15520_v38  ;;  %v17674_v52 = vpack.c.bf16 %v3898_v21, %v3898_v21  ;;  %v15585_v58 = vld [vmem:[#allocation4 + $0x3ac] ss:$16 sps:$4 sm:$0xff]   ;;  %v15583_v43 = vld [vmem:[#allocation4 + $0x3a8] ss:$16 sps:$4 sm:$0xff]  }
 0x41c   :  { %5718 = vmatprep.subr.bf16.mxu0 %v15528_v61  ;;  %v15594_v59 = vld [vmem:[#allocation4 + $0x52c] ss:$16 sps:$4 sm:$0xff]   ;;  %v15592_v44 = vld [vmem:[#allocation4 + $0x528] ss:$16 sps:$4 sm:$0xff]  }
 0x41d   :  { %v17672_v48 = vpack.c.bf16 %v3899_v4, %v3899_v4  ;;  %v15591_v38 = vld [vmem:[#allocation4 + $0x38c] ss:$16 sps:$4 sm:$0xff]   ;;  %v15589_v45 = vld [vmem:[#allocation4 + $0x388] ss:$16 sps:$4 sm:$0xff]  }
 0x41e   :  { %v15600_v61 = vld [vmem:[#allocation4 + $0x50c] ss:$16 sps:$4 sm:$0xff]   ;;  %v15598_v53 = vld [vmem:[#allocation4 + $0x508] ss:$16 sps:$4 sm:$0xff]  }
 0x41f   :  { %5621 = vmatprep.mubr.bf16.mxu1 %v17672_v48  ;;  %5719 = vmatpush1.bf16.msra.mxu0 %v15526_v46  ;;  %v15597_v21 = vld [vmem:[#allocation4 + $0x36c] ss:$16 sps:$4 sm:$0xff]   ;;  %v15595_v4 = vld [vmem:[#allocation4 + $0x368] ss:$16 sps:$4 sm:$0xff]  }
 0x420   :  { %5622 = vmatmul.mubr.bf16.vlgmr.msra.gmra.mxu1 %v17674_v52  ;;  %5720 = vmatprep.subr.bf16.mxu0 %v15534_v55  ;;  %v17679_v46 = vld [vmem:[#allocation25] sm:$0xf] }
 0x421   :  { %5672 = vmatpush1.bf16.msra.mxu1 %v15523_v51  ;;  %5703 = vmatprep.mubr.bf16.mxu1 %v17608_v54  ;;  %v15549_v54 = vld [vmem:[#allocation4 + $0x26c] ss:$16 sps:$4 sm:$0xff]   ;;  %v4169_v55 = vrot.slane %v17679_v46, %v17540_v62 }
 0x422   :  { %5673 = vmatprep.subr.bf16.mxu1 %v15531_v11  ;;  %v15660_v51 = vld [vmem:[#allocation6 + $0x74] ss:$8 sps:$4 sm:$0xff]  }
 0x423   :  { %5721 = vmatpush1.bf16.msra.mxu0 %v15532_v60  ;;  %v15603_v11 = vld [vmem:[#allocation4 + $0x34c] ss:$16 sps:$4 sm:$0xff]   ;;  %v15658_v60 = vld [vmem:[#allocation6 + $0x70] ss:$8 sps:$4 sm:$0xff]  }
 0x424   :  { %5722 = vmatprep.subr.bf16.mxu0 %v15540_v0  ;;  %v15663_v0 = vld [vmem:[#allocation6 + $0x64] ss:$8 sps:$4 sm:$0xff]  }
 0x425   :  { %5674 = vmatpush1.bf16.msra.mxu1 %v15529_v40  ;;  %v15601_v40 = vld [vmem:[#allocation4 + $0x348] ss:$16 sps:$4 sm:$0xff]  }
 0x426   :  { %5675 = vmatprep.subr.bf16.mxu1 %v15537_v22  ;;  %v4173_v22 = vrot.slane %v17679_v46, %v17543_v8 }
 0x427   :  { %5723 = vmatpush1.bf16.msra.mxu0 %v15538_v13  ;;  %v15606_v13 = vld [vmem:[#allocation4 + $0x32c] ss:$16 sps:$4 sm:$0xff]  }
 0x428   :  { %5724 = vmatprep.subr.bf16.mxu0 %v15546_v3 }
 0x429   :  { %5676 = vmatpush1.bf16.msra.mxu1 %v15535_v16 }
 0x42a   :  { %5677 = vmatprep.subr.bf16.mxu1 %v15543_v5 }
 0x42b   :  { %5725 = vmatpush1.bf16.msra.mxu0 %v15544_v6  ;;  %v15661_v6 = vld [vmem:[#allocation6 + $0x60] ss:$8 sps:$4 sm:$0xff]  }
 0x42c   :  { %5726 = vmatprep.subr.bf16.mxu0 %v15552_v2  ;;  %v15604_v2 = vld [vmem:[#allocation4 + $0x328] ss:$16 sps:$4 sm:$0xff]  }
 0x42d   :  { %5678 = vmatpush1.bf16.msra.mxu1 %v15541_v7 }
 0x42e   :  { %5679 = vmatprep.subr.bf16.mxu1 %v15549_v54  ;;  %v15666_v54 = vld [vmem:[#allocation6 + $0x54] ss:$8 sps:$4 sm:$0xff]  }
 0x42f   :  { %5727 = vmatpush1.bf16.msra.mxu0 %v15550_v9 }
 0x430   :  { %5728 = vmatprep.subr.bf16.mxu0 %v15558_v33 }
 0x431   :  { %5680 = vmatpush1.bf16.msra.mxu1 %v15547_v10 }
 0x432   :  { %5681 = vmatprep.subr.bf16.mxu1 %v15555_v14  ;;  %v15609_v14 = vld [vmem:[#allocation4 + $0x30c] ss:$16 sps:$4 sm:$0xff]  }
 0x433   :  { %5729 = vmatpush2.bf16.msra.mxu0 %v15556_v17 }
 0x434   :  { %5730 = vmatprep.subr.bf16.mxu0 %v15564_v19 }
 0x435   :  { %5682 = vmatpush1.bf16.msra.mxu1 %v15553_v18 }
 0x436   :  { %5683 = vmatprep.subr.bf16.mxu1 %v15561_v23 }
 0x437   :  { %5731 = vmatpush2.bf16.msra.mxu0 %v15562_v32  ;;  %v15607_v32 = vld [vmem:[#allocation4 + $0x308] ss:$16 sps:$4 sm:$0xff]  }
 0x438   :  { %5732 = vmatprep.subr.bf16.mxu0 %v15570_v47 }
 0x439   :  { %5684 = vmatpush1.bf16.msra.mxu1 %v15559_v28  ;;  %v15669_v28 = vld [vmem:[#allocation6 + $0x44] ss:$8 sps:$4 sm:$0xff]  }
 0x43a   :  { %5685 = vmatprep.subr.bf16.mxu1 %v15567_v27  ;;  %v15612_v27 = vld [vmem:[#allocation4 + $0x6ec] ss:$16 sps:$4 sm:$0xff]  }
 0x43b   :  { %5733 = vmatpush2.bf16.msra.mxu0 %v15568_v49  ;;  %v15667_v49 = vld [vmem:[#allocation6 + $0x40] ss:$8 sps:$4 sm:$0xff]  }
 0x43c   :  { %5734 = vmatprep.subr.bf16.mxu0 %v15576_v25  ;;  %v15615_v25 = vld [vmem:[#allocation4 + $0x6cc] ss:$16 sps:$4 sm:$0xff]  }
 0x43d   :  { %5686 = vmatpush1.bf16.msra.mxu1 %v15565_v12  ;;  %v15610_v12 = vld [vmem:[#allocation4 + $0x6e8] ss:$16 sps:$4 sm:$0xff]  }
 0x43e   :  { %5687 = vmatprep.subr.bf16.mxu1 %v15573_v29  ;;  %v15672_v29 = vld [vmem:[#allocation6 + $0x34] ss:$8 sps:$4 sm:$0xff]  }
 0x43f   :  { %5735 = vmatpush2.bf16.msra.mxu0 %v15574_v30  ;;  %v15670_v30 = vld [vmem:[#allocation6 + $0x30] ss:$8 sps:$4 sm:$0xff]  }
 0x440   :  { %5736 = vmatprep.subr.bf16.mxu0 %v15582_v34  ;;  %v15675_v34 = vld [vmem:[#allocation6 + $0x24] ss:$8 sps:$4 sm:$0xff]  }
 0x441   :  { %5688 = vmatpush2.bf16.msra.mxu1 %v15571_v1  ;;  %v15613_v1 = vld [vmem:[#allocation4 + $0x6c8] ss:$16 sps:$4 sm:$0xff]  }
 0x442   :  { %5689 = vmatprep.subr.bf16.mxu1 %v15579_v35  ;;  %v15618_v35 = vld [vmem:[#allocation4 + $0x6ac] ss:$16 sps:$4 sm:$0xff]  }
 0x443   :  { %5737 = vmatpush2.bf16.msra.mxu0 %v15580_v57  ;;  %v15673_v57 = vld [vmem:[#allocation6 + $0x20] ss:$8 sps:$4 sm:$0xff]  }
 0x444   :  { %5738 = vmatprep.subr.bf16.mxu0 %v15588_v41  ;;  %v15678_v41 = vld [vmem:[#allocation6 + $0x14] ss:$8 sps:$4 sm:$0xff]  }
 0x445   :  { %5690 = vmatpush2.bf16.msra.mxu1 %v15577_v39  ;;  %v15616_v39 = vld [vmem:[#allocation4 + $0x6a8] ss:$16 sps:$4 sm:$0xff]  }
 0x446   :  { %5691 = vmatprep.subr.bf16.mxu1 %v15585_v58  ;;  %v15621_v58 = vld [vmem:[#allocation4 + $0x68c] ss:$16 sps:$4 sm:$0xff]  }
 0x447   :  { %5739 = vmatpush2.bf16.msra.mxu0 %v15586_v42  ;;  %v15619_v42 = vld [vmem:[#allocation4 + $0x688] ss:$16 sps:$4 sm:$0xff]  }
 0x448   :  { %5740 = vmatprep.subr.bf16.mxu0 %v15594_v59  ;;  %v15679_v59 = vld [vmem:[#allocation6] ss:$8 sps:$4 sm:$0xff]  }
 0x449   :  { %5692 = vmatpush2.bf16.msra.mxu1 %v15583_v43  ;;  %v15681_v43 = vld [vmem:[#allocation6 + $0x4] ss:$8 sps:$4 sm:$0xff]  }
 0x44a   :  { %5693 = vmatprep.subr.bf16.mxu1 %v15591_v38  ;;  %v15622_v38 = vld [vmem:[#allocation4 + $0x668] ss:$16 sps:$4 sm:$0xff]  }
 0x44b   :  { %5741 = vmatpush2.bf16.msra.mxu0 %v15592_v44  ;;  %v15684_v44 = vld [vmem:[#allocation6 + $0xf4] ss:$8 sps:$4 sm:$0xff]  }
 0x44c   :  { %5742 = vmatprep.subr.bf16.mxu0 %v15600_v61  ;;  %v15682_v61 = vld [vmem:[#allocation6 + $0xf0] ss:$8 sps:$4 sm:$0xff]  }
 0x44d   :  { %5694 = vmatpush2.bf16.msra.mxu1 %v15589_v45  ;;  %v15627_v45 = vld [vmem:[#allocation4 + $0x64c] ss:$16 sps:$4 sm:$0xff]  }
 0x44e   :  { %5695 = vmatprep.subr.bf16.mxu1 %v15597_v21  ;;  %v15625_v21 = vld [vmem:[#allocation4 + $0x648] ss:$16 sps:$4 sm:$0xff]  }
 0x44f   :  { %5743 = vmatpush2.bf16.msra.mxu0 %v15598_v53  ;;  %v15687_v53 = vld [vmem:[#allocation6 + $0xe4] ss:$8 sps:$4 sm:$0xff]  }
 0x450   :  { %6198 = vmatprep.subr.bf16.mxu0 %v15660_v51  ;;  %v15685_v51 = vld [vmem:[#allocation6 + $0xe0] ss:$8 sps:$4 sm:$0xff]  }
 0x451   :  { %5696 = vmatpush2.bf16.msra.mxu1 %v15595_v4  ;;  %v15630_v4 = vld [vmem:[#allocation4 + $0x62c] ss:$16 sps:$4 sm:$0xff]  }
 0x452   :  { %5697 = vmatprep.subr.bf16.mxu1 %v15603_v11  ;;  %v5500_v16 = vpop.f32.mrf.mxu0  ;;  %5745 = vmatmul.mubr.bf16.vlgmr.msra.gmra.mxu0 %v17651_v31  ;;  %v15664_v31 = vld [vmem:[#allocation6 + $0x50] ss:$8 sps:$4 sm:$0xff]  }
 0x453   :  { %v5501_v3 = vadd.f32 %v5500_v16, %v4169_v55  ;;  %6199 = vmatpush1.bf16.msra.mxu0 %v15658_v60  ;;  %v15628_v11 = vld [vmem:[#allocation4 + $0x628] ss:$16 sps:$4 sm:$0xff]   ;;  %v15690_v55 = vld [vmem:[#allocation6 + $0xd4] ss:$8 sps:$4 sm:$0xff]  }
 0x454   :  { %v5541_v5 = vpop.f32.mrf.mxu1  ;;  %v5502_v7 = vpop.f32.mrf.mxu0  ;;  %6200 = vmatprep.subr.bf16.mxu0 %v15663_v0  ;;  %v15633_v60 = vld [vmem:[#allocation4 + $0x60c] ss:$16 sps:$4 sm:$0xff]   ;;  %v15631_v0 = vld [vmem:[#allocation4 + $0x608] ss:$16 sps:$4 sm:$0xff]  }
 0x455   :  { %5698 = vmatpush2.bf16.msra.mxu1 %v15601_v40  ;;  %v17686_v9 = vadd.f32 %v5541_v5, %v5501_v3  ;;  %v5503_v10 = vadd.f32 %v5502_v7, %v4173_v22  ;;  %v15688_v40 = vld [vmem:[#allocation6 + $0xd0] ss:$8 sps:$4 sm:$0xff]   ;;  %v15693_v22 = vld [vmem:[#allocation6 + $0xc4] ss:$8 sps:$4 sm:$0xff]   ;;  %v15691_v16 = vld [vmem:[#allocation6 + $0xc0] ss:$8 sps:$4 sm:$0xff]  }
 0x456   :  { %v5543_v33 = vpop.f32.mrf.mxu1  ;;  %5699 = vmatprep.subr.bf16.mxu1 %v15606_v13  ;;  %v5504_v17 = vpop.f32.mrf.mxu0  ;;  %v15636_v13 = vld [vmem:[#allocation4 + $0x7ec] ss:$16 sps:$4 sm:$0xff]   ;;  %v15634_v3 = vld [vmem:[#allocation4 + $0x7e8] ss:$16 sps:$4 sm:$0xff]  }
 0x457   :  { %v17688_v18 = vadd.f32 %v5543_v33, %v5503_v10  ;;  %6201 = vmatpush1.bf16.msra.mxu0 %v15661_v6  ;;  %v15696_v5 = vld [vmem:[#allocation6 + $0xb4] ss:$8 sps:$4 sm:$0xff]   ;;  %v15694_v7 = vld [vmem:[#allocation6 + $0xb0] ss:$8 sps:$4 sm:$0xff]   ;;  %v15697_v33 = vld [vmem:[#allocation6 + $0xa0] ss:$8 sps:$4 sm:$0xff]  }
 0x458   :  { %v5545_v19 = vpop.f32.mrf.mxu1  ;;  %v5505_v23 = vpop.f32.mrf.mxu0  ;;  %6202 = vmatprep.subr.bf16.mxu0 %v15666_v54  ;;  %v15639_v6 = vld [vmem:[#allocation4 + $0x7cc] ss:$16 sps:$4 sm:$0xff]  }
 0x459   :  { %5700 = vmatpush2.bf16.msra.mxu1 %v15604_v2  ;;  %v15637_v2 = vld [vmem:[#allocation4 + $0x7c8] ss:$16 sps:$4 sm:$0xff]   ;;  %v15699_v54 = vld [vmem:[#allocation6 + $0xa4] ss:$8 sps:$4 sm:$0xff]   ;;  %v15702_v17 = vld [vmem:[#allocation6 + $0x94] ss:$8 sps:$4 sm:$0xff]  }
 0x45a   :  { %v5546_v47 = vpop.f32.mrf.mxu1  ;;  %5701 = vmatprep.subr.bf16.mxu1 %v15609_v14  ;;  %v15642_v10 = vld [vmem:[#allocation4 + $0x7ac] ss:$16 sps:$4 sm:$0xff]   ;;  %v15640_v14 = vld [vmem:[#allocation4 + $0x7a8] ss:$16 sps:$4 sm:$0xff]  }
 0x45b   :  { %6203 = vmatpush1.bf16.msra.mxu0 %v15664_v31  ;;  %v15645_v19 = vld [vmem:[#allocation4 + $0x78c] ss:$16 sps:$4 sm:$0xff]   ;;  %v15700_v31 = vld [vmem:[#allocation6 + $0x90] ss:$8 sps:$4 sm:$0xff]   ;;  %v15703_v47 = vld [vmem:[#allocation6 + $0x80] ss:$8 sps:$4 sm:$0xff]  }
 0x45c   :  { %6204 = vmatprep.subr.bf16.mxu0 %v15669_v28  ;;  %v15643_v23 = vld [vmem:[#allocation4 + $0x788] ss:$16 sps:$4 sm:$0xff]   ;;  %v15648_v28 = vld [vmem:[#allocation4 + $0x76c] ss:$16 sps:$4 sm:$0xff]  }
 0x45d   :  { %5702 = vmatpush2.bf16.msra.mxu1 %v15607_v32  ;;  %v15705_v32 = vld [vmem:[#allocation6 + $0x84] ss:$8 sps:$4 sm:$0xff]  }
 0x45e   :  { %5753 = vmatprep.subr.bf16.mxu1 %v15612_v27  ;;  %v15646_v27 = vld [vmem:[#allocation4 + $0x768] ss:$16 sps:$4 sm:$0xff]  }
 0x45f   :  { %6205 = vmatpush1.bf16.msra.mxu0 %v15667_v49  ;;  %v15651_v49 = vld [vmem:[#allocation4 + $0x74c] ss:$16 sps:$4 sm:$0xff]  }
 0x460   :  { %5704 = vmatmul.mubr.bf16.vlgmr.msra.gmra.mxu1 %v17630_v15  ;;  %6206 = vmatprep.subr.bf16.mxu0 %v15672_v29  ;;  %v15676_v15 = vld [vmem:[#allocation6 + $0x10] ss:$8 sps:$4 sm:$0xff]  }
 0x461   :  { %5754 = vmatpush1.bf16.msra.mxu1 %v15610_v12  ;;  %5785 = vmatprep.mubr.bf16.mxu1 %v17672_v48  ;;  %v15624_v48 = vld [vmem:[#allocation4 + $0x66c] ss:$16 sps:$4 sm:$0xff]   ;;  %v15649_v12 = vld [vmem:[#allocation4 + $0x748] ss:$16 sps:$4 sm:$0xff]  }
 0x462   :  { %5755 = vmatprep.subr.bf16.mxu1 %v15615_v25  ;;  %v15654_v25 = vld [vmem:[#allocation4 + $0x72c] ss:$16 sps:$4 sm:$0xff]  }
 0x463   :  { %6207 = vmatpush1.bf16.msra.mxu0 %v15670_v30 }
 0x464   :  { %6208 = vmatprep.subr.bf16.mxu0 %v15675_v34  ;;  %v15652_v34 = vld [vmem:[#allocation4 + $0x728] ss:$16 sps:$4 sm:$0xff]  }
 0x465   :  { %5756 = vmatpush1.bf16.msra.mxu1 %v15613_v1 }
 0x466   :  { %5757 = vmatprep.subr.bf16.mxu1 %v15618_v35 }
 0x467   :  { %6209 = vmatpush1.bf16.msra.mxu0 %v15673_v57  ;;  %v15657_v57 = vld [vmem:[#allocation4 + $0x70c] ss:$16 sps:$4 sm:$0xff]  }
 0x468   :  { %6210 = vmatprep.subr.bf16.mxu0 %v15678_v41 }
 0x469   :  { %5758 = vmatpush1.bf16.msra.mxu1 %v15616_v39 }
 0x46a   :  { %5759 = vmatprep.subr.bf16.mxu1 %v15621_v58  ;;  %v15655_v58 = vld [vmem:[#allocation4 + $0x708] ss:$16 sps:$4 sm:$0xff]  }
 0x46b   :  { %6211 = vmatpush1.bf16.msra.mxu0 %v15676_v15  ;;  %v15706_v15 = vld [vmem:[#allocation6 + $0x170] ss:$8 sps:$4 sm:$0xff]  }
 0x46c   :  { %6212 = vmatprep.subr.bf16.mxu0 %v15681_v43  ;;  %v15709_v43 = vld [vmem:[#allocation6 + $0x160] ss:$8 sps:$4 sm:$0xff]  }
 0x46d   :  { %5760 = vmatpush1.bf16.msra.mxu1 %v15619_v42  ;;  %v15708_v42 = vld [vmem:[#allocation6 + $0x174] ss:$8 sps:$4 sm:$0xff]  }
 0x46e   :  { %5761 = vmatprep.subr.bf16.mxu1 %v15624_v48  ;;  %v15714_v48 = vld [vmem:[#allocation6 + $0x154] ss:$8 sps:$4 sm:$0xff]  }
 0x46f   :  { %6213 = vmatpush1.bf16.msra.mxu0 %v15679_v59  ;;  %v15717_v59 = vld [vmem:[#allocation6 + $0x144] ss:$8 sps:$4 sm:$0xff]  }
 0x470   :  { %6214 = vmatprep.subr.bf16.mxu0 %v15684_v44  ;;  %v15720_v44 = vld [vmem:[#allocation6 + $0x134] ss:$8 sps:$4 sm:$0xff]  }
 0x471   :  { %5762 = vmatpush1.bf16.msra.mxu1 %v15622_v38  ;;  %v15715_v38 = vld [vmem:[#allocation6 + $0x140] ss:$8 sps:$4 sm:$0xff]  }
 0x472   :  { %5763 = vmatprep.subr.bf16.mxu1 %v15627_v45  ;;  %v15718_v45 = vld [vmem:[#allocation6 + $0x130] ss:$8 sps:$4 sm:$0xff]  }
 0x473   :  { %6215 = vmatpush2.bf16.msra.mxu0 %v15682_v61  ;;  %v15721_v61 = vld [vmem:[#allocation6 + $0x120] ss:$8 sps:$4 sm:$0xff]  }
 0x474   :  { %6216 = vmatprep.subr.bf16.mxu0 %v15687_v53  ;;  %v15724_v53 = vld [vmem:[#allocation6 + $0x110] ss:$8 sps:$4 sm:$0xff]  }
 0x475   :  { %5764 = vmatpush1.bf16.msra.mxu1 %v15625_v21  ;;  %v15726_v21 = vld [vmem:[#allocation6 + $0x114] ss:$8 sps:$4 sm:$0xff]  }
 0x476   :  { %5765 = vmatprep.subr.bf16.mxu1 %v15630_v4  ;;  %v15729_v4 = vld [vmem:[#allocation6 + $0x104] ss:$8 sps:$4 sm:$0xff]  }
 0x477   :  { %6217 = vmatpush2.bf16.msra.mxu0 %v15685_v51  ;;  %v15727_v51 = vld [vmem:[#allocation6 + $0x100] ss:$8 sps:$4 sm:$0xff]  }
 0x478   :  { %6218 = vmatprep.subr.bf16.mxu0 %v15690_v55  ;;  %v15730_v55 = vld [vmem:[#allocation6 + $0x1f0] ss:$8 sps:$4 sm:$0xff]  }
 0x479   :  { %5766 = vmatpush1.bf16.msra.mxu1 %v15628_v11  ;;  %v15732_v11 = vld [vmem:[#allocation6 + $0x1f4] ss:$8 sps:$4 sm:$0xff]  }
 0x47a   :  { %5767 = vmatprep.subr.bf16.mxu1 %v15633_v60  ;;  %v15735_v60 = vld [vmem:[#allocation6 + $0x1e4] ss:$8 sps:$4 sm:$0xff]  }
 0x47b   :  { %6219 = vmatpush2.bf16.msra.mxu0 %v15688_v40  ;;  %v15733_v40 = vld [vmem:[#allocation6 + $0x1e0] ss:$8 sps:$4 sm:$0xff]  }
 0x47c   :  { %6220 = vmatprep.subr.bf16.mxu0 %v15693_v22  ;;  %v15736_v22 = vld [vmem:[#allocation6 + $0x1d0] ss:$8 sps:$4 sm:$0xff]  }
 0x47d   :  { %5768 = vmatpush1.bf16.msra.mxu1 %v15631_v0  ;;  %v15738_v0 = vld [vmem:[#allocation6 + $0x1d4] ss:$8 sps:$4 sm:$0xff]  }
 0x47e   :  { %5769 = vmatprep.subr.bf16.mxu1 %v15636_v13  ;;  %v15741_v13 = vld [vmem:[#allocation6 + $0x1c4] ss:$8 sps:$4 sm:$0xff]  }
 0x47f   :  { %6221 = vmatpush2.bf16.msra.mxu0 %v15691_v16  ;;  %v15739_v16 = vld [vmem:[#allocation6 + $0x1c0] ss:$8 sps:$4 sm:$0xff]  }
 0x480   :  { %6222 = vmatprep.subr.bf16.mxu0 %v15696_v5 }
 0x481   :  { %5770 = vmatpush2.bf16.msra.mxu1 %v15634_v3  ;;  %v15744_v3 = vld [vmem:[#allocation6 + $0x1b4] ss:$8 sps:$4 sm:$0xff]  }
 0x482   :  { %5771 = vmatprep.subr.bf16.mxu1 %v15639_v6 }
 0x483   :  { %6223 = vmatpush2.bf16.msra.mxu0 %v15694_v7  ;;  %v15742_v7 = vld [vmem:[#allocation6 + $0x1b0] ss:$8 sps:$4 sm:$0xff]  }
 0x484   :  { %6224 = vmatprep.subr.bf16.mxu0 %v15699_v54 }
 0x485   :  { %5772 = vmatpush2.bf16.msra.mxu1 %v15637_v2  ;;  %v15747_v2 = vld [vmem:[#allocation6 + $0x1a4] ss:$8 sps:$4 sm:$0xff]  }
 0x486   :  { %5773 = vmatprep.subr.bf16.mxu1 %v15642_v10 }
 0x487   :  { %6225 = vmatpush2.bf16.msra.mxu0 %v15697_v33  ;;  %v15745_v33 = vld [vmem:[#allocation6 + $0x1a0] ss:$8 sps:$4 sm:$0xff]  }
 0x488   :  { %6226 = vmatprep.subr.bf16.mxu0 %v15702_v17  ;;  %v15750_v17 = vld [vmem:[#allocation6 + $0x194] ss:$8 sps:$4 sm:$0xff]  }
 0x489   :  { %5774 = vmatpush2.bf16.msra.mxu1 %v15640_v14 }
 0x48a   :  { %5775 = vmatprep.subr.bf16.mxu1 %v15645_v19 }
 0x48b   :  { %6227 = vmatpush2.bf16.msra.mxu0 %v15700_v31  ;;  %v15748_v31 = vld [vmem:[#allocation6 + $0x190] ss:$8 sps:$4 sm:$0xff]  }
 0x48c   :  { %6228 = vmatprep.subr.bf16.mxu0 %v15705_v32 }
 0x48d   :  { %5776 = vmatpush2.bf16.msra.mxu1 %v15643_v23 }
 0x48e   :  { %5777 = vmatprep.subr.bf16.mxu1 %v15648_v28 }
 0x48f   :  { %6229 = vmatpush2.bf16.msra.mxu0 %v15703_v47 }
 0x491   :  { %5778 = vmatpush2.bf16.msra.mxu1 %v15646_v27  ;;  %v15753_v27 = vld [vmem:[#allocation6 + $0x184] ss:$8 sps:$4 sm:$0xff]  }
 0x492   :  { %5779 = vmatprep.subr.bf16.mxu1 %v15651_v49  ;;  %v5582_v29 = vpop.f32.mrf.mxu0 }
 0x493   :  { %v17693_v30 = vadd.f32 %v5582_v29, %v17686_v9  ;;  %v15711_v9 = vld [vmem:[#allocation6 + $0x164] ss:$8 sps:$4 sm:$0xff]  }
 0x494   :  { %v5584_v1 = vpop.f32.mrf.mxu0 }
 0x495   :  { %5780 = vmatpush2.bf16.msra.mxu1 %v15649_v12  ;;  %v17696_v35 = vadd.f32 %v5584_v1, %v17688_v18  ;;  %v15712_v18 = vld [vmem:[#allocation6 + $0x150] ss:$8 sps:$4 sm:$0xff]   ;;  %v15751_v12 = vld [vmem:[#allocation6 + $0x180] ss:$8 sps:$4 sm:$0xff]  }
 0x496   :  { %5781 = vmatprep.subr.bf16.mxu1 %v15654_v25  ;;  %v5586_v39 = vpop.f32.mrf.mxu0 }
 0x498   :  { %v5587_v41 = vpop.f32.mrf.mxu0 }
 0x499   :  { %5782 = vmatpush2.bf16.msra.mxu1 %v15652_v34  ;;  %v4181_v41 = vrot.slane %v17679_v46, %v17597_v37 }
 0x49a   :  { %5783 = vmatprep.subr.bf16.mxu1 %v15657_v57 }
 0x49d   :  { %5784 = vmatpush2.bf16.msra.mxu1 %v15655_v58 }
 0x49e   :  { %6239 = vmatprep.subr.bf16.mxu1 %v15708_v42 }
 0x4a0   :  { %5786 = vmatmul.mubr.bf16.vlgmr.msra.gmra.mxu1 %v17674_v52  ;;  %v15723_v52 = vld [vmem:[#allocation6 + $0x124] ss:$8 sps:$4 sm:$0xff]  }
 0x4a1   :  { %6240 = vmatpush1.bf16.msra.mxu1 %v15706_v15 }
 0x4a2   :  { %6241 = vmatprep.subr.bf16.mxu1 %v15711_v9 }
 0x4a5   :  { %6242 = vmatpush1.bf16.msra.mxu1 %v15709_v43 }
 0x4a6   :  { %6243 = vmatprep.subr.bf16.mxu1 %v15714_v48 }
 0x4a9   :  { %6244 = vmatpush1.bf16.msra.mxu1 %v15712_v18 }
 0x4aa   :  { %6245 = vmatprep.subr.bf16.mxu1 %v15717_v59 }
 0x4ad   :  { %6246 = vmatpush1.bf16.msra.mxu1 %v15715_v38 }
 0x4ae   :  { %6247 = vmatprep.subr.bf16.mxu1 %v15720_v44 }
 0x4b1   :  { %6248 = vmatpush1.bf16.msra.mxu1 %v15718_v45  ;;  %v15754_v45 = vld [vmem:[#allocation7 + $0x78] sm:$0xff]  }
 0x4b2   :  { %6249 = vmatprep.subr.bf16.mxu1 %v15723_v52  ;;  %v15755_v52 = vld [vmem:[#allocation7 + $0x38] sm:$0xff]   ;;  %14912 = vmatprep.subr.bf16.mxu0 %v15754_v45 }
 0x4b3   :  { %v15778_v45 = vld [vmem:[#allocation10 + $0x38] sm:$0xff]  }
 0x4b5   :  { %6250 = vmatpush1.bf16.msra.mxu1 %v15721_v61  ;;  %v15756_v61 = vld [vmem:[#allocation7 + $0x70] sm:$0xff]  }
 0x4b6   :  { %6251 = vmatprep.subr.bf16.mxu1 %v15726_v21  ;;  %v15757_v21 = vld [vmem:[#allocation7 + $0x30] sm:$0xff]  }
 0x4b9   :  { %6252 = vmatpush1.bf16.msra.mxu1 %v15724_v53  ;;  %v15758_v53 = vld [vmem:[#allocation7 + $0x68] sm:$0xff]  }
 0x4ba   :  { %6253 = vmatprep.subr.bf16.mxu1 %v15729_v4  ;;  %v15760_v4 = vld [vmem:[#allocation7 + $0x60] sm:$0xff]  }
 0x4bd   :  { %6254 = vmatpush1.bf16.msra.mxu1 %v15727_v51  ;;  %v15761_v51 = vld [vmem:[#allocation7 + $0x20] sm:$0xff]  }
 0x4be   :  { %6255 = vmatprep.subr.bf16.mxu1 %v15732_v11  ;;  %v15762_v11 = vld [vmem:[#allocation7 + $0x58] sm:$0xff]  }
 0x4c1   :  { %6256 = vmatpush2.bf16.msra.mxu1 %v15730_v55  ;;  %v15763_v55 = vld [vmem:[#allocation7 + $0x18] sm:$0xff]  }
 0x4c2   :  { %6257 = vmatprep.subr.bf16.mxu1 %v15735_v60  ;;  %v15764_v60 = vld [vmem:[#allocation7 + $0x50] sm:$0xff]  }
 0x4c5   :  { %6258 = vmatpush2.bf16.msra.mxu1 %v15733_v40  ;;  %v15765_v40 = vld [vmem:[#allocation7 + $0x10] sm:$0xff]  }
 0x4c6   :  { %6259 = vmatprep.subr.bf16.mxu1 %v15738_v0 }
 0x4c9   :  { %6260 = vmatpush2.bf16.msra.mxu1 %v15736_v22 }
 0x4ca   :  { %6261 = vmatprep.subr.bf16.mxu1 %v15741_v13 }
 0x4cd   :  { %6262 = vmatpush2.bf16.msra.mxu1 %v15739_v16 }
 0x4ce   :  { %6263 = vmatprep.subr.bf16.mxu1 %v15744_v3 }
 0x4d1   :  { %6264 = vmatpush2.bf16.msra.mxu1 %v15742_v7 }
 0x4d2   :  { %v5664_v5 = vpop.f32.mrf.mxu0  ;;  %6265 = vmatprep.subr.bf16.mxu1 %v15747_v2 }
 0x4d4   :  { %v5666_v6 = vpop.f32.mrf.mxu0 }
 0x4d5   :  { %6266 = vmatpush2.bf16.msra.mxu1 %v15745_v33  ;;  %v5667_v42 = vadd.f32 %v5666_v6, %v4181_v41  ;;  %v15766_v33 = vld [vmem:[#allocation7 + $0x48] sm:$0xff]  }
 0x4d6   :  { %v5668_v54 = vpop.f32.mrf.mxu0  ;;  %6267 = vmatprep.subr.bf16.mxu1 %v15750_v17 }
 0x4d8   :  { %v5669_v10 = vpop.f32.mrf.mxu0 }
 0x4d9   :  { %6268 = vmatpush2.bf16.msra.mxu1 %v15748_v31  ;;  %v15768_v31 = vld [vmem:[#allocation7 + $0x40] sm:$0xff]  }
 0x4da   :  { %6269 = vmatprep.subr.bf16.mxu1 %v15753_v27  ;;  %v15771_v27 = vld [vmem:[#allocation9 + $0x30] sm:$0xff]  }
 0x4dd   :  { %6270 = vmatpush2.bf16.msra.mxu1 %v15751_v12  ;;  %v15773_v12 = vld [vmem:[#allocation9 + $0x20] sm:$0xff]  }
 0x4e0   :  { %v5623_v14 = vpop.f32.mrf.mxu1 }
 0x4e1   :  { %v5624_v19 = vadd.f32 %v5623_v14, %v17693_v30  ;;  %v15767_v14 = vld [vmem:[#allocation7 + $0x8] sm:$0xff]  }
 0x4e2   :  { %v5625_v23 = vpop.f32.mrf.mxu1 }
 0x4e3   :  { %v5626_v32 = vadd.f32 %v5625_v23, %v17696_v35  ;;  %v5794_v28 = vmax.f32 %v5624_v19, 0.0  ;;  %v4177_v35 = vrot.slane %v17679_v46, %v17576_v26  ;;  %v15759_v46 = vld [vmem:[#allocation7 + $0x28] sm:$0xff]   ;;  %v15769_v23 = vld [vmem:[#allocation7] sm:$0xff]  }
 0x4e4   :  { %v5627_v47 = vpop.f32.mrf.mxu1 }
 0x4e5   :  { %v5795_v49 = vmax.f32 %v5626_v32, 0.0  ;;  %v5798_v1 = vpack.c.bf16 %v5794_v28, %v5794_v28  ;;  %v5665_v58 = vadd.f32 %v5664_v5, %v4177_v35  ;;  %v15770_v28 = vld [vmem:[#allocation9 + $0x38] sm:$0xff]   ;;  %v17257_v47 = vmov 0.0  }
 0x4e6   :  { %v5628_v25 = vpop.f32.mrf.mxu1  ;;  %15076 = vmatprep.subr.bf16.mxu1 %v17257_v47 }
 0x4e7   :  { %v5799_v29 = vpack.c.bf16 %v5795_v49, %v5795_v49  ;;  %v15772_v49 = vld [vmem:[#allocation9 + $0x28] sm:$0xff]   ;;  %v15774_v25 = vld [vmem:[#allocation9 + $0x18] sm:$0xff]  }
 0x4e9   :  { %6230 = vmatprep.mubr.bf16.mxu0 %v5799_v29  ;;  %v5866_v29 = vld [vmem:[#allocation27] sm:$0x3] }
 0x4ea   :  { %6231 = vmatmul.mubr.bf16.vlgmr.msra.gmra.mxu0 %v5798_v1  ;;  %v5871_v1 = vrot.slane %v5866_v29, %v17540_v62 }
 0x4eb   :  { %14913 = vmatpush3.bf16.msra.mxu0 %v15755_v52  ;;  %v15779_v52 = vld [vmem:[#allocation10 + $0x30] sm:$0xff]  }
 0x4ec   :  { %14914 = vmatprep.subr.bf16.mxu0 %v15756_v61  ;;  %v15780_v61 = vld [vmem:[#allocation10 + $0x28] sm:$0xff]  }
 0x4ef   :  { %14915 = vmatpush3.bf16.msra.mxu0 %v15757_v21  ;;  %v15781_v21 = vld [vmem:[#allocation10 + $0x20] sm:$0xff]  }
 0x4f0   :  { %14916 = vmatprep.subr.bf16.mxu0 %v15758_v53  ;;  %v15782_v53 = vld [vmem:[#allocation10 + $0x18] sm:$0xff]  }
 0x4f3   :  { %14917 = vmatpush3.bf16.msra.mxu0 %v15759_v46  ;;  %v15783_v46 = vld [vmem:[#allocation10 + $0x10] sm:$0xff]  }
 0x4f4   :  { %14918 = vmatprep.subr.bf16.mxu0 %v15760_v4 }
 0x4f7   :  { %14919 = vmatpush3.bf16.msra.mxu0 %v15761_v51  ;;  %v14057_v51 = vld [vmem:[#allocation28] ss:$0 sm:$0xff] }
 0x4f8   :  { %14920 = vmatprep.subr.bf16.mxu0 %v15762_v11 }
 0x4fb   :  { %14921 = vmatpush3.bf16.msra.mxu0 %v15763_v55 }
 0x4fc   :  { %14922 = vmatprep.subr.bf16.mxu0 %v15764_v60 }
 0x4ff   :  { %14923 = vmatpush3.bf16.msra.mxu0 %v15765_v40 }
 0x500   :  { %14924 = vmatprep.subr.bf16.mxu0 %v15766_v33  ;;  %v14074_v33 = vld [vmem:[#allocation30] ss:$0 sm:$0xff] }
 0x503   :  { %14925 = vmatpush3.bf16.msra.mxu0 %v15767_v14 }
 0x504   :  { %14926 = vmatprep.subr.bf16.mxu0 %v15768_v31 }
 0x507   :  { %14927 = vmatpush3.bf16.msra.mxu0 %v15769_v23 }
 0x508   :  { %15096 = vmatprep.subr.bf16.mxu0 %v17257_v47 }
 0x512   :  { %v5746_v34 = vpop.f32.mrf.mxu0 }
 0x514   :  { %v5748_v30 = vpop.f32.mrf.mxu0 }
 0x516   :  { %v5750_v57 = vpop.f32.mrf.mxu0 }
 0x518   :  { %v5751_v39 = vpop.f32.mrf.mxu0 }
 0x520   :  { %v5705_v15 = vpop.f32.mrf.mxu1 }
 0x521   :  { %v5706_v9 = vadd.f32 %v5705_v15, %v5665_v58 }
 0x522   :  { %v5707_v43 = vpop.f32.mrf.mxu1 }
 0x523   :  { %v5708_v48 = vadd.f32 %v5707_v43, %v5667_v42  ;;  %v5747_v18 = vadd.f32 %v5746_v34, %v5706_v9  ;;  %v5875_v34 = vrot.slane %v5866_v29, %v17543_v8  ;;  %v15796_v29 = vld [vmem:[#allocation13 + $0x28] sm:$0xff]  }
 0x524   :  { %v5709_v59 = vpop.f32.mrf.mxu1 }
 0x525   :  { %v5749_v38 = vadd.f32 %v5748_v30, %v5708_v48  ;;  %v15775_v59 = vld [vmem:[#allocation9 + $0x10] sm:$0xff]  }
 0x526   :  { %v5710_v44 = vpop.f32.mrf.mxu1 }
 0x527   :  { %v15777_v44 = vld [vmem:[#allocation9] sm:$0xff]  }
 0x560   :  { %v5787_v0 = vpop.f32.mrf.mxu1 }
 0x561   :  { %v5788_v22 = vadd.f32 %v5787_v0, %v5747_v18 }
 0x562   :  { %v5789_v13 = vpop.f32.mrf.mxu1 }
 0x563   :  { %v5790_v16 = vadd.f32 %v5789_v13, %v5749_v38  ;;  %v5796_v3 = vmax.f32 %v5788_v22, 0.0  ;;  %v15776_v38 = vld [vmem:[#allocation9 + $0x8] sm:$0xff]  }
 0x564   :  { %v5791_v5 = vpop.f32.mrf.mxu1 }
 0x565   :  { %v5797_v6 = vmax.f32 %v5790_v16, 0.0  ;;  %v5800_v54 = vpack.c.bf16 %v5796_v3, %v5796_v3  ;;  %v15784_v16 = vld [vmem:[#allocation10 + $0x8] sm:$0xff]   ;;  %v15785_v3 = vld [vmem:[#allocation10] sm:$0xff]   ;;  %v15786_v5 = vld [vmem:[#allocation12 + $0x38] sm:$0xff]  }
 0x566   :  { %v5792_v7 = vpop.f32.mrf.mxu1 }
 0x567   :  { %v5801_v2 = vpack.c.bf16 %v5797_v6, %v5797_v6  ;;  %v15787_v6 = vld [vmem:[#allocation12 + $0x30] sm:$0xff]   ;;  %v15788_v7 = vld [vmem:[#allocation12 + $0x28] sm:$0xff]  }
 0x569   :  { %6271 = vmatprep.mubr.bf16.mxu1 %v5801_v2  ;;  %v15789_v2 = vld [vmem:[#allocation12 + $0x20] sm:$0xff]  }
 0x56a   :  { %6272 = vmatmul.mubr.bf16.vlgmr.msra.gmra.mxu1 %v5800_v54  ;;  %v15790_v54 = vld [vmem:[#allocation12 + $0x18] sm:$0xff]  }
 0x56b   :  { %15077 = vmatpush3.bf16.msra.mxu1 %v15770_v28  ;;  %15092 = vmatprep.mubr.msk.bf16.mxu1 %vm17258_vm0, %v17257_v47 }
 0x56c   :  { %15078 = vmatprep.subr.bf16.mxu1 %v17257_v47 }
 0x56f   :  { %15079 = vmatpush3.bf16.msra.mxu1 %v15771_v27  ;;  %v15792_v27 = vld [vmem:[#allocation12 + $0x8] sm:$0xff]  }
 0x570   :  { %15080 = vmatprep.subr.bf16.mxu1 %v17257_v47 }
 0x573   :  { %15081 = vmatpush3.bf16.msra.mxu1 %v15772_v49  ;;  %v15793_v49 = vld [vmem:[#allocation12] sm:$0xff]  }
 0x574   :  { %15082 = vmatprep.subr.bf16.mxu1 %v17257_v47 }
 0x577   :  { %15083 = vmatpush3.bf16.msra.mxu1 %v15773_v12  ;;  %v15794_v12 = vld [vmem:[#allocation13 + $0x38] sm:$0xff]  }
 0x578   :  { %15084 = vmatprep.subr.bf16.mxu1 %v17257_v47 }
 0x57b   :  { %15085 = vmatpush3.bf16.msra.mxu1 %v15774_v25  ;;  %v15795_v25 = vld [vmem:[#allocation13 + $0x30] sm:$0xff]  }
 0x57c   :  { %15086 = vmatprep.subr.bf16.mxu1 %v17257_v47 }
 0x57f   :  { %15087 = vmatpush3.bf16.msra.mxu1 %v15775_v59  ;;  %v15803_v59 = vld [vmem:[#allocation15 + $0x30] sm:$0xff]  }
 0x580   :  { %15088 = vmatprep.subr.bf16.mxu1 %v17257_v47 }
 0x583   :  { %15089 = vmatpush3.bf16.msra.mxu1 %v15776_v38  ;;  %v15804_v38 = vld [vmem:[#allocation15 + $0x28] sm:$0xff]  }
 0x584   :  { %15090 = vmatprep.subr.bf16.mxu1 %v17257_v47 }
 0x587   :  { %15091 = vmatpush3.bf16.msra.mxu1 %v15777_v44  ;;  %v15805_v44 = vld [vmem:[#allocation15 + $0x20] sm:$0xff]  }
 0x588   :  { %15116 = vmatprep.subr.bf16.mxu1 %v17257_v47 }
 0x5aa   :  { %v6232_v10 = vpop.f32.mrf.mxu0 }
 0x5ab   :  { %v6233_v30 = vadd.f32 %v6232_v10, %v5871_v1  ;;  %v15791_v10 = vld [vmem:[#allocation12 + $0x10] sm:$0xff]   ;;  %v15797_v1 = vld [vmem:[#allocation13 + $0x20] sm:$0xff]  }
 0x5ac   :  { %v6234_v17 = vpop.f32.mrf.mxu0 }
 0x5ad   :  { %v6235_v39 = vadd.f32 %v6234_v17, %v5875_v34  ;;  %v15798_v34 = vld [vmem:[#allocation13 + $0x18] sm:$0xff]  }
 0x5ae   :  { %v6236_v19 = vpop.f32.mrf.mxu0 }
 0x5b0   :  { %v6237_v32 = vpop.f32.mrf.mxu0 }
 0x62a   :  { %v6273_v57 = vpop.f32.mrf.mxu1 }
 0x62b   :  { %v6274_v35 = vadd.f32 %v6273_v57, %v6233_v30  ;;  %v15799_v30 = vld [vmem:[#allocation13 + $0x10] sm:$0xff]   ;;  %v15800_v57 = vld [vmem:[#allocation13 + $0x8] sm:$0xff]  }
 0x62c   :  { %v6275_v41 = vpop.f32.mrf.mxu1 }
 0x62d   :  { %v6276_v58 = vadd.f32 %v6275_v41, %v6235_v39  ;;  %v6280_v15 = vmax.f32 %v6274_v35, 0.0  ;;  %v14083_v39 = vld [vmem:[#allocation31] ss:$0 sm:$0xff] }
 0x62e   :  { %v6277_v42 = vpop.f32.mrf.mxu1 }
 0x62f   :  { %v6281_v9 = vmax.f32 %v6276_v58, 0.0  ;;  %v6282_v18 = vpack.c.bf16 %v6280_v15, %v6280_v15 }
 0x630   :  { %v6278_v43 = vpop.f32.mrf.mxu1 }
 0x631   :  { %v6283_v48 = vpack.c.bf16 %v6281_v9, %v6281_v9 }
 0x633   :  { %6451 = vmatprep.mubr.bf16.mxu0 %v6283_v48  ;;  %v15801_v48 = vld [vmem:[#allocation13] sm:$0xff]  }
 0x634   :  { %6452 = vmatmul.mubr.bf16.vlgmr.msra.gmra.mxu0 %v6282_v18  ;;  %v15802_v18 = vld [vmem:[#allocation15 + $0x38] sm:$0xff]  }
 0x635   :  { %15112 = vmatprep.mubr.msk.bf16.mxu0 %vm17258_vm0, %v17257_v47  ;;  %15097 = vmatpush3.bf16.msra.mxu0 %v15778_v45  ;;  %v15806_v45 = vld [vmem:[#allocation15 + $0x18] sm:$0xff]  }
 0x636   :  { %15098 = vmatprep.subr.bf16.mxu0 %v17257_v47 }
 0x639   :  { %15099 = vmatpush3.bf16.msra.mxu0 %v15779_v52  ;;  %v15807_v52 = vld [vmem:[#allocation15 + $0x10] sm:$0xff]  }
 0x63a   :  { %15100 = vmatprep.subr.bf16.mxu0 %v17257_v47 }
 0x63d   :  { %15101 = vmatpush3.bf16.msra.mxu0 %v15780_v61  ;;  %v14092_v61 = vld [vmem:[#allocation33] ss:$0 sm:$0xff] }
 0x63e   :  { %15102 = vmatprep.subr.bf16.mxu0 %v17257_v47 }
 0x641   :  { %15103 = vmatpush3.bf16.msra.mxu0 %v15781_v21 }
 0x642   :  { %15104 = vmatprep.subr.bf16.mxu0 %v17257_v47 }
 0x645   :  { %15105 = vmatpush3.bf16.msra.mxu0 %v15782_v53 }
 0x646   :  { %15106 = vmatprep.subr.bf16.mxu0 %v17257_v47 }
 0x649   :  { %15107 = vmatpush3.bf16.msra.mxu0 %v15783_v46 }
 0x64a   :  { %15108 = vmatprep.subr.bf16.mxu0 %v17257_v47 }
 0x64d   :  { %15109 = vmatpush3.bf16.msra.mxu0 %v15784_v16  ;;  %v15814_v16 = vld [vmem:[#allocation16 + $0x18] sm:$0xff]  }
 0x64e   :  { %15110 = vmatprep.subr.bf16.mxu0 %v17257_v47 }
 0x651   :  { %15111 = vmatpush3.bf16.msra.mxu0 %v15785_v3  ;;  %v15815_v3 = vld [vmem:[#allocation16 + $0x10] sm:$0xff]  }
 0x652   :  { %15136 = vmatprep.subr.bf16.mxu0 %v17257_v47 }
 0x6f4   :  { %v14928_v4 = vpop.f32.mrf.mxu0 }
 0x6f6   :  { %v14929_v11 = vpop.f32.mrf.mxu0 }
 0x6f7   :  { %v14930_v55 = vadd.f32 %v14929_v11, %v14928_v4 }
 0x6f8   :  { %v14931_v60 = vpop.f32.mrf.mxu0 }
 0x6f9   :  { %v6454_v40 = vadd.f32 %v14930_v55, %v14057_v51  ;;  %v15808_v55 = vld [vmem:[#allocation15 + $0x8] sm:$0xff]   ;;  %v15809_v60 = vld [vmem:[#allocation15] sm:$0xff]  }
 0x6fa   :  { %v14932_v0 = vpop.f32.mrf.mxu0 }
 0x6fb   :  { %v6459_v22 = vmax.f32 %v6454_v40, 0.0  ;;  %v15810_v40 = vld [vmem:[#allocation16 + $0x38] sm:$0xff]   ;;  %v15811_v0 = vld [vmem:[#allocation16 + $0x30] sm:$0xff]  }
 0x6fd   :  { %v6460_v13 = vpack.c.bf16 %v6459_v22, %v6459_v22  ;;  %v15812_v22 = vld [vmem:[#allocation16 + $0x28] sm:$0xff]  }
 0x6ff   :  { %15093 = vmatmul.mubr.bf16.vlgmr.msra.gmra.mxu1 %v6460_v13  ;;  %v15813_v13 = vld [vmem:[#allocation16 + $0x20] sm:$0xff]  }
 0x700   :  { %15132 = vmatprep.mubr.msk.bf16.mxu1 %vm17258_vm0, %v17257_v47  ;;  %15117 = vmatpush3.bf16.msra.mxu1 %v15786_v5  ;;  %v14101_v5 = vld [vmem:[#allocation34] ss:$0 sm:$0xff] }
 0x701   :  { %15118 = vmatprep.subr.bf16.mxu1 %v17257_v47 }
 0x704   :  { %15119 = vmatpush3.bf16.msra.mxu1 %v15787_v6 }
 0x705   :  { %15120 = vmatprep.subr.bf16.mxu1 %v17257_v47 }
 0x708   :  { %15121 = vmatpush3.bf16.msra.mxu1 %v15788_v7 }
 0x709   :  { %15122 = vmatprep.subr.bf16.mxu1 %v17257_v47 }
 0x70c   :  { %15123 = vmatpush3.bf16.msra.mxu1 %v15789_v2 }
 0x70d   :  { %15124 = vmatprep.subr.bf16.mxu1 %v17257_v47 }
 0x710   :  { %15125 = vmatpush3.bf16.msra.mxu1 %v15790_v54 }
 0x711   :  { %15126 = vmatprep.subr.bf16.mxu1 %v17257_v47 }
 0x714   :  { %15127 = vmatpush3.bf16.msra.mxu1 %v15791_v10 }
 0x715   :  { %15128 = vmatprep.subr.bf16.mxu1 %v17257_v47 }
 0x718   :  { %15129 = vmatpush3.bf16.msra.mxu1 %v15792_v27  ;;  %v15826_v27 = vld [vmem:[#allocation18 + $0x54] ss:$8 sps:$4 sm:$0xff]  }
 0x719   :  { %15130 = vmatprep.subr.bf16.mxu1 %v17257_v47 }
 0x71c   :  { %15131 = vmatpush3.bf16.msra.mxu1 %v15793_v49  ;;  %v15824_v49 = vld [vmem:[#allocation18 + $0x50] ss:$8 sps:$4 sm:$0xff]  }
 0x71d   :  { %15156 = vmatprep.subr.bf16.mxu1 %v17257_v47 }
 0x7bf   :  { %v6566_v14 = vpop.f32.mrf.mxu1 }
 0x7c0   :  { %v6567_v17 = vadd.f32 %v14074_v33, %v6566_v14 }
 0x7c1   :  { %v15094_v19 = vpop.f32.mrf.mxu1 }
 0x7c2   :  { %v6572_v31 = vmax.f32 %v6567_v17, 0.0  ;;  %v15816_v17 = vld [vmem:[#allocation16 + $0x8] sm:$0xff]   ;;  %v15817_v19 = vld [vmem:[#allocation16] sm:$0xff]  }
 0x7c3   :  { %v6569_v23 = vpop.f32.mrf.mxu1 }
 0x7c4   :  { %v6573_v32 = vpack.c.bf16 %v6572_v31, %v6572_v31  ;;  %v15818_v31 = vld [vmem:[#allocation18 + $0x70] ss:$8 sps:$4 sm:$0xff]   ;;  %v15820_v23 = vld [vmem:[#allocation18 + $0x74] ss:$8 sps:$4 sm:$0xff]  }
 0x7c5   :  { %v15095_v28 = vpop.f32.mrf.mxu1 }
 0x7c6   :  { %15113 = vmatmul.mubr.bf16.vlgmr.msra.gmra.mxu0 %v6573_v32  ;;  %v15823_v32 = vld [vmem:[#allocation18 + $0x64] ss:$8 sps:$4 sm:$0xff]   ;;  %v15821_v28 = vld [vmem:[#allocation18 + $0x60] ss:$8 sps:$4 sm:$0xff]  }
 0x7c7   :  { %15152 = vmatprep.mubr.msk.bf16.mxu0 %vm17258_vm0, %v17257_v47  ;;  %15137 = vmatpush3.bf16.msra.mxu0 %v15794_v12  ;;  %v15829_v12 = vld [vmem:[#allocation18 + $0x44] ss:$8 sps:$4 sm:$0xff]  }
 0x7c8   :  { %15138 = vmatprep.subr.bf16.mxu0 %v17257_v47 }
 0x7cb   :  { %15139 = vmatpush3.bf16.msra.mxu0 %v15795_v25  ;;  %v15832_v25 = vld [vmem:[#allocation18 + $0x34] ss:$8 sps:$4 sm:$0xff]  }
 0x7cc   :  { %15140 = vmatprep.subr.bf16.mxu0 %v17257_v47 }
 0x7cf   :  { %15141 = vmatpush3.bf16.msra.mxu0 %v15796_v29  ;;  %v15835_v29 = vld [vmem:[#allocation18 + $0x24] ss:$8 sps:$4 sm:$0xff]  }
 0x7d0   :  { %15142 = vmatprep.subr.bf16.mxu0 %v17257_v47 }
 0x7d3   :  { %15143 = vmatpush3.bf16.msra.mxu0 %v15797_v1  ;;  %v15833_v1 = vld [vmem:[#allocation18 + $0x20] ss:$8 sps:$4 sm:$0xff]  }
 0x7d4   :  { %15144 = vmatprep.subr.bf16.mxu0 %v17257_v47 }
 0x7d7   :  { %15145 = vmatpush3.bf16.msra.mxu0 %v15798_v34  ;;  %v15838_v34 = vld [vmem:[#allocation18 + $0x14] ss:$8 sps:$4 sm:$0xff]  }
 0x7d8   :  { %15146 = vmatprep.subr.bf16.mxu0 %v17257_v47 }
 0x7db   :  { %15147 = vmatpush3.bf16.msra.mxu0 %v15799_v30  ;;  %v15836_v30 = vld [vmem:[#allocation18 + $0x10] ss:$8 sps:$4 sm:$0xff]  }
 0x7dc   :  { %15148 = vmatprep.subr.bf16.mxu0 %v17257_v47 }
 0x7df   :  { %15149 = vmatpush3.bf16.msra.mxu0 %v15800_v57  ;;  %v14110_v57 = vld [vmem:[#allocation36] ss:$0 sm:$0xff] }
 0x7e0   :  { %15150 = vmatprep.subr.bf16.mxu0 %v17257_v47 }
 0x7e3   :  { %15151 = vmatpush3.bf16.msra.mxu0 %v15801_v48  ;;  %v15839_v48 = vld [vmem:[#allocation18] ss:$8 sps:$4 sm:$0xff]  }
 0x7e4   :  { %15176 = vmatprep.subr.bf16.mxu0 %v17257_v47 }
 0x886   :  { %v6679_v35 = vpop.f32.mrf.mxu0 }
 0x887   :  { %v6680_v41 = vadd.f32 %v14083_v39, %v6679_v35 }
 0x888   :  { %v15114_v58 = vpop.f32.mrf.mxu0 }
 0x889   :  { %v6685_v15 = vmax.f32 %v6680_v41, 0.0 }
 0x88a   :  { %v6682_v42 = vpop.f32.mrf.mxu0 }
 0x88b   :  { %v6686_v9 = vpack.c.bf16 %v6685_v15, %v6685_v15 }
 0x88c   :  { %v15115_v43 = vpop.f32.mrf.mxu0 }
 0x88d   :  { %15133 = vmatmul.mubr.bf16.vlgmr.msra.gmra.mxu1 %v6686_v9  ;;  %v15841_v43 = vld [vmem:[#allocation18 + $0x4] ss:$8 sps:$4 sm:$0xff]  }
 0x88e   :  { %15172 = vmatprep.mubr.msk.bf16.mxu1 %vm17258_vm0, %v17257_v47  ;;  %15157 = vmatpush3.bf16.msra.mxu1 %v15802_v18  ;;  %v15842_v18 = vld [vmem:[#allocation19 + $0xe0] ss:$16 sps:$4 sm:$0xff]  }
 0x88f   :  { %15158 = vmatprep.subr.bf16.mxu1 %v17257_v47 }
 0x892   :  { %15159 = vmatpush3.bf16.msra.mxu1 %v15803_v59  ;;  %v15844_v59 = vld [vmem:[#allocation19 + $0xe4] ss:$16 sps:$4 sm:$0xff]  }
 0x893   :  { %15160 = vmatprep.subr.bf16.mxu1 %v17257_v47 }
 0x896   :  { %15161 = vmatpush3.bf16.msra.mxu1 %v15804_v38  ;;  %v15847_v38 = vld [vmem:[#allocation19 + $0xec] ss:$16 sps:$4 sm:$0xff]  }
 0x897   :  { %15162 = vmatprep.subr.bf16.mxu1 %v17257_v47 }
 0x89a   :  { %15163 = vmatpush3.bf16.msra.mxu1 %v15805_v44  ;;  %v15850_v44 = vld [vmem:[#allocation19 + $0xc4] ss:$16 sps:$4 sm:$0xff]  }
 0x89b   :  { %15164 = vmatprep.subr.bf16.mxu1 %v17257_v47 }
 0x89e   :  { %15165 = vmatpush3.bf16.msra.mxu1 %v15806_v45  ;;  %v15848_v45 = vld [vmem:[#allocation19 + $0xc0] ss:$16 sps:$4 sm:$0xff]  }
 0x89f   :  { %15166 = vmatprep.subr.bf16.mxu1 %v17257_v47 }
 0x8a2   :  { %15167 = vmatpush3.bf16.msra.mxu1 %v15807_v52  ;;  %v15856_v52 = vld [vmem:[#allocation19 + $0xa4] ss:$16 sps:$4 sm:$0xff]  }
 0x8a3   :  { %15168 = vmatprep.subr.bf16.mxu1 %v17257_v47 }
 0x8a6   :  { %15169 = vmatpush3.bf16.msra.mxu1 %v15808_v55  ;;  %v15880_v55 = vld [vmem:[#allocation19 + $0x24] ss:$16 sps:$4 sm:$0xff]  }
 0x8a7   :  { %15170 = vmatprep.subr.bf16.mxu1 %v17257_v47 }
 0x8aa   :  { %15171 = vmatpush3.bf16.msra.mxu1 %v15809_v60  ;;  %v15878_v60 = vld [vmem:[#allocation19 + $0x20] ss:$16 sps:$4 sm:$0xff]  }
 0x8ab   :  { %7247 = vmatprep.subr.bf16.mxu1 %v15820_v23 }
 0x94d   :  { %v6792_v21 = vpop.f32.mrf.mxu1 }
 0x94e   :  { %v6793_v53 = vadd.f32 %v14092_v61, %v6792_v21  ;;  %v15854_v61 = vld [vmem:[#allocation19 + $0xa0] ss:$16 sps:$4 sm:$0xff]   ;;  %v15862_v21 = vld [vmem:[#allocation19 + $0x84] ss:$16 sps:$4 sm:$0xff]  }
 0x94f   :  { %v15134_v46 = vpop.f32.mrf.mxu1 }
 0x950   :  { %6798 = vst [vmem:[%s17417_s17] sm:$0xff] %v6793_v53  ;;  %v6799_v4 = vpack.c.bf16 %v6793_v53, %v6793_v53  ;;  %v15860_v53 = vld [vmem:[#allocation19 + $0x80] ss:$16 sps:$4 sm:$0xff]   ;;  %v15868_v46 = vld [vmem:[#allocation19 + $0x64] ss:$16 sps:$4 sm:$0xff]  }
 0x951   :  { %v6795_v51 = vpop.f32.mrf.mxu1 }
 0x952   :  { %15153 = vmatmul.mubr.bf16.vlgmr.msra.gmra.mxu0 %v6799_v4  ;;  %v15866_v4 = vld [vmem:[#allocation19 + $0x60] ss:$16 sps:$4 sm:$0xff]   ;;  %v15874_v51 = vld [vmem:[#allocation19 + $0x44] ss:$16 sps:$4 sm:$0xff]  }
 0x953   :  { %v15135_v11 = vpop.f32.mrf.mxu1  ;;  %15192 = vmatprep.mubr.msk.bf16.mxu0 %vm17258_vm0, %v17257_v47  ;;  %15177 = vmatpush3.bf16.msra.mxu0 %v15810_v40  ;;  %v15886_v40 = vld [vmem:[#allocation19 + $0x4] ss:$16 sps:$4 sm:$0xff]  }
 0x954   :  { %15178 = vmatprep.subr.bf16.mxu0 %v17257_v47  ;;  %v15872_v11 = vld [vmem:[#allocation19 + $0x40] ss:$16 sps:$4 sm:$0xff]  }
 0x957   :  { %15179 = vmatpush3.bf16.msra.mxu0 %v15811_v0  ;;  %v15884_v0 = vld [vmem:[#allocation19] ss:$16 sps:$4 sm:$0xff]  }
 0x958   :  { %15180 = vmatprep.subr.bf16.mxu0 %v17257_v47 }
 0x95b   :  { %15181 = vmatpush3.bf16.msra.mxu0 %v15812_v22  ;;  %v15892_v22 = vld [vmem:[#allocation19 + $0x1e4] ss:$16 sps:$4 sm:$0xff]  }
 0x95c   :  { %15182 = vmatprep.subr.bf16.mxu0 %v17257_v47 }
 0x95f   :  { %15183 = vmatpush3.bf16.msra.mxu0 %v15813_v13  ;;  %v15890_v13 = vld [vmem:[#allocation19 + $0x1e0] ss:$16 sps:$4 sm:$0xff]  }
 0x960   :  { %15184 = vmatprep.subr.bf16.mxu0 %v17257_v47 }
 0x963   :  { %15185 = vmatpush3.bf16.msra.mxu0 %v15814_v16  ;;  %v15898_v16 = vld [vmem:[#allocation19 + $0x1c4] ss:$16 sps:$4 sm:$0xff]  }
 0x964   :  { %15186 = vmatprep.subr.bf16.mxu0 %v17257_v47 }
 0x967   :  { %15187 = vmatpush3.bf16.msra.mxu0 %v15815_v3  ;;  %v15896_v3 = vld [vmem:[#allocation19 + $0x1c0] ss:$16 sps:$4 sm:$0xff]  }
 0x968   :  { %15188 = vmatprep.subr.bf16.mxu0 %v17257_v47 }
 0x96b   :  { %15189 = vmatpush3.bf16.msra.mxu0 %v15816_v17  ;;  %v14119_v17 = vld [vmem:[#allocation37] ss:$0 sm:$0xff] }
 0x96c   :  { %15190 = vmatprep.subr.bf16.mxu0 %v17257_v47  ;;  %v15830_v47 = vld [vmem:[#allocation18 + $0x30] ss:$8 sps:$4 sm:$0xff]  }
 0x96f   :  { %15191 = vmatpush3.bf16.msra.mxu0 %v15817_v19 }
 0x970   :  { %7698 = vmatprep.subr.bf16.mxu0 %v15844_v59  ;;  %v15907_v59 = vld [vmem:[#allocation19 + $0x1ac] ss:$16 sps:$4 sm:$0xff]  }
 0xa12   :  { %v6905_v6 = vpop.f32.mrf.mxu0 }
 0xa13   :  { %v6906_v7 = vadd.f32 %v14101_v5, %v6905_v6  ;;  %v15904_v5 = vld [vmem:[#allocation19 + $0x1a4] ss:$16 sps:$4 sm:$0xff]   ;;  %v15902_v6 = vld [vmem:[#allocation19 + $0x1a0] ss:$16 sps:$4 sm:$0xff]  }
 0xa14   :  { %v15154_v2 = vpop.f32.mrf.mxu0 }
 0xa15   :  { %v6911_v54 = vmax.f32 %v6906_v7, 0.0  ;;  %v15910_v7 = vld [vmem:[#allocation19 + $0x184] ss:$16 sps:$4 sm:$0xff]   ;;  %v15908_v2 = vld [vmem:[#allocation19 + $0x180] ss:$16 sps:$4 sm:$0xff]  }
 0xa16   :  { %v6908_v10 = vpop.f32.mrf.mxu0 }
 0xa17   :  { %v6912_v33 = vpack.c.bf16 %v6911_v54, %v6911_v54  ;;  %v15916_v54 = vld [vmem:[#allocation19 + $0x164] ss:$16 sps:$4 sm:$0xff]   ;;  %v15914_v10 = vld [vmem:[#allocation19 + $0x160] ss:$16 sps:$4 sm:$0xff]  }
 0xa18   :  { %v15155_v14 = vpop.f32.mrf.mxu0 }
 0xa19   :  { %15173 = vmatmul.mubr.bf16.vlgmr.msra.gmra.mxu1 %v6912_v33  ;;  %v15922_v33 = vld [vmem:[#allocation19 + $0x144] ss:$16 sps:$4 sm:$0xff]   ;;  %v15920_v14 = vld [vmem:[#allocation19 + $0x140] ss:$16 sps:$4 sm:$0xff]  }
 0xa1a   :  { %7279 = vmatprep.mubr.bf16.mxu1 %v17256_v36  ;;  %7248 = vmatpush1.bf16.msra.mxu1 %v15818_v31  ;;  %v15827_v36 = vld [vmem:[#allocation18 + $0x40] ss:$8 sps:$4 sm:$0xff]  }
 0xa1b   :  { %7249 = vmatprep.subr.bf16.mxu1 %v15823_v32 }
 0xa1e   :  { %7250 = vmatpush1.bf16.msra.mxu1 %v15821_v28 }
 0xa1f   :  { %7251 = vmatprep.subr.bf16.mxu1 %v15826_v27  ;;  %v15845_v27 = vld [vmem:[#allocation19 + $0xe8] ss:$16 sps:$4 sm:$0xff]  }
 0xa22   :  { %7252 = vmatpush1.bf16.msra.mxu1 %v15824_v49 }
 0xa23   :  { %7253 = vmatprep.subr.bf16.mxu1 %v15829_v12  ;;  %v15853_v12 = vld [vmem:[#allocation19 + $0xcc] ss:$16 sps:$4 sm:$0xff]  }
 0xa26   :  { %7254 = vmatpush1.bf16.msra.mxu1 %v15827_v36 }
 0xa27   :  { %7255 = vmatprep.subr.bf16.mxu1 %v15832_v25  ;;  %v15851_v25 = vld [vmem:[#allocation19 + $0xc8] ss:$16 sps:$4 sm:$0xff]  }
 0xa2a   :  { %7256 = vmatpush1.bf16.msra.mxu1 %v15830_v47  ;;  %v15859_v47 = vld [vmem:[#allocation19 + $0xac] ss:$16 sps:$4 sm:$0xff]  }
 0xa2b   :  { %7257 = vmatprep.subr.bf16.mxu1 %v15835_v29  ;;  %v15857_v29 = vld [vmem:[#allocation19 + $0xa8] ss:$16 sps:$4 sm:$0xff]  }
 0xa2e   :  { %7258 = vmatpush1.bf16.msra.mxu1 %v15833_v1  ;;  %v15865_v1 = vld [vmem:[#allocation19 + $0x8c] ss:$16 sps:$4 sm:$0xff]  }
 0xa2f   :  { %7259 = vmatprep.subr.bf16.mxu1 %v15838_v34  ;;  %v15863_v34 = vld [vmem:[#allocation19 + $0x88] ss:$16 sps:$4 sm:$0xff]  }
 0xa32   :  { %7260 = vmatpush1.bf16.msra.mxu1 %v15836_v30  ;;  %v15871_v30 = vld [vmem:[#allocation19 + $0x6c] ss:$16 sps:$4 sm:$0xff]  }
 0xa33   :  { %7261 = vmatprep.subr.bf16.mxu1 %v15841_v43  ;;  %v15893_v43 = vld [vmem:[#allocation19 + $0x1e8] ss:$16 sps:$4 sm:$0xff]  }
 0xa36   :  { %7262 = vmatpush1.bf16.msra.mxu1 %v15839_v48  ;;  %v15901_v48 = vld [vmem:[#allocation19 + $0x1cc] ss:$16 sps:$4 sm:$0xff]  }
 0xa37   :  { %7739 = vmatprep.subr.bf16.mxu1 %v15847_v38  ;;  %v15905_v38 = vld [vmem:[#allocation19 + $0x1a8] ss:$16 sps:$4 sm:$0xff]  }
 0xad9   :  { %v7018_v39 = vpop.f32.mrf.mxu1 }
 0xada   :  { %v7019_v35 = vadd.f32 %v14110_v57, %v7018_v39  ;;  %v15869_v57 = vld [vmem:[#allocation19 + $0x68] ss:$16 sps:$4 sm:$0xff]   ;;  %v15877_v39 = vld [vmem:[#allocation19 + $0x4c] ss:$16 sps:$4 sm:$0xff]  }
 0xadb   :  { %v15174_v41 = vpop.f32.mrf.mxu1 }
 0xadc   :  { %v7024_v58 = vmax.f32 %v7019_v35, 0.0  ;;  %v15875_v35 = vld [vmem:[#allocation19 + $0x48] ss:$16 sps:$4 sm:$0xff]   ;;  %v15883_v41 = vld [vmem:[#allocation19 + $0x2c] ss:$16 sps:$4 sm:$0xff]  }
 0xadd   :  { %v7021_v15 = vpop.f32.mrf.mxu1 }
 0xade   :  { %v7025_v42 = vpack.c.bf16 %v7024_v58, %v7024_v58  ;;  %v15881_v58 = vld [vmem:[#allocation19 + $0x28] ss:$16 sps:$4 sm:$0xff]   ;;  %v15889_v15 = vld [vmem:[#allocation19 + $0xc] ss:$16 sps:$4 sm:$0xff]  }
 0xadf   :  { %v15175_v9 = vpop.f32.mrf.mxu1 }
 0xae0   :  { %15193 = vmatmul.mubr.bf16.vlgmr.msra.gmra.mxu0 %v7025_v42  ;;  %v15887_v42 = vld [vmem:[#allocation19 + $0x8] ss:$16 sps:$4 sm:$0xff]   ;;  %v15895_v9 = vld [vmem:[#allocation19 + $0x1ec] ss:$16 sps:$4 sm:$0xff]  }
 0xae1   :  { %7699 = vmatpush1.bf16.msra.mxu0 %v15842_v18  ;;  %v15899_v18 = vld [vmem:[#allocation19 + $0x1c8] ss:$16 sps:$4 sm:$0xff]  }
 0xae2   :  { %7700 = vmatprep.subr.bf16.mxu0 %v15850_v44  ;;  %v15913_v44 = vld [vmem:[#allocation19 + $0x18c] ss:$16 sps:$4 sm:$0xff]  }
 0xae5   :  { %7701 = vmatpush1.bf16.msra.mxu0 %v15848_v45  ;;  %v15911_v45 = vld [vmem:[#allocation19 + $0x188] ss:$16 sps:$4 sm:$0xff]  }
 0xae6   :  { %7702 = vmatprep.subr.bf16.mxu0 %v15856_v52  ;;  %v15919_v52 = vld [vmem:[#allocation19 + $0x16c] ss:$16 sps:$4 sm:$0xff]  }
 0xae9   :  { %7703 = vmatpush1.bf16.msra.mxu0 %v15854_v61  ;;  %v15917_v61 = vld [vmem:[#allocation19 + $0x168] ss:$16 sps:$4 sm:$0xff]  }
 0xaea   :  { %7704 = vmatprep.subr.bf16.mxu0 %v15862_v21  ;;  %v15925_v21 = vld [vmem:[#allocation19 + $0x14c] ss:$16 sps:$4 sm:$0xff]  }
 0xaed   :  { %7705 = vmatpush1.bf16.msra.mxu0 %v15860_v53  ;;  %v15923_v53 = vld [vmem:[#allocation19 + $0x148] ss:$16 sps:$4 sm:$0xff]  }
 0xaee   :  { %7706 = vmatprep.subr.bf16.mxu0 %v15868_v46  ;;  %v15928_v46 = vld [vmem:[#allocation19 + $0x124] ss:$16 sps:$4 sm:$0xff]  }
 0xaf1   :  { %7707 = vmatpush1.bf16.msra.mxu0 %v15866_v4  ;;  %v15931_v4 = vld [vmem:[#allocation19 + $0x12c] ss:$16 sps:$4 sm:$0xff]  }
 0xaf2   :  { %7708 = vmatprep.subr.bf16.mxu0 %v15874_v51  ;;  %v15926_v51 = vld [vmem:[#allocation19 + $0x120] ss:$16 sps:$4 sm:$0xff]  }
 0xaf5   :  { %7709 = vmatpush1.bf16.msra.mxu0 %v15872_v11  ;;  %v15929_v11 = vld [vmem:[#allocation19 + $0x128] ss:$16 sps:$4 sm:$0xff]  }
 0xaf6   :  { %7710 = vmatprep.subr.bf16.mxu0 %v15880_v55  ;;  %v15934_v55 = vld [vmem:[#allocation19 + $0x104] ss:$16 sps:$4 sm:$0xff]  }
 0xaf9   :  { %7711 = vmatpush1.bf16.msra.mxu0 %v15878_v60  ;;  %v15937_v60 = vld [vmem:[#allocation19 + $0x10c] ss:$16 sps:$4 sm:$0xff]  }
 0xafa   :  { %7712 = vmatprep.subr.bf16.mxu0 %v15886_v40  ;;  %v15932_v40 = vld [vmem:[#allocation19 + $0x100] ss:$16 sps:$4 sm:$0xff]  }
 0xafd   :  { %7713 = vmatpush1.bf16.msra.mxu0 %v15884_v0  ;;  %v15935_v0 = vld [vmem:[#allocation19 + $0x108] ss:$16 sps:$4 sm:$0xff]  }
 0xafe   :  { %7714 = vmatprep.subr.bf16.mxu0 %v15892_v22  ;;  %v7844_v22 = vld [vmem:[#allocation21 + $0x1c0] sm:$0xff] }
 0xb01   :  { %7715 = vmatpush2.bf16.msra.mxu0 %v15890_v13  ;;  %v7848_v13 = vld [vmem:[#allocation21 + $0x1e0] sm:$0xff] }
 0xb02   :  { %7716 = vmatprep.subr.bf16.mxu0 %v15898_v16  ;;  %v7972_v16 = vld [vmem:[#allocation21 + $0x5c0] sm:$0xff] }
 0xb05   :  { %7717 = vmatpush2.bf16.msra.mxu0 %v15896_v3  ;;  %v14264_v3 = vcombine.low %v7844_v22, %v7848_v13 }
 0xb06   :  { %7718 = vmatprep.subr.bf16.mxu0 %v15904_v5  ;;  %v14265_v5 = vcombine.high %v7844_v22, %v7848_v13 }
 0xb09   :  { %7719 = vmatpush2.bf16.msra.mxu0 %v15902_v6  ;;  %v7976_v6 = vld [vmem:[#allocation21 + $0x5e0] sm:$0xff] }
 0xb0a   :  { %7720 = vmatprep.subr.bf16.mxu0 %v15910_v7  ;;  %v14392_v7 = vcombine.low %v7972_v16, %v7976_v6 }
 0xb0d   :  { %7721 = vmatpush2.bf16.msra.mxu0 %v15908_v2  ;;  %v14393_v2 = vcombine.high %v7972_v16, %v7976_v6  ;;  %v7800_v6 = vld [vmem:[#allocation21 + $0x60] sm:$0xff] }
 0xb0e   :  { %7722 = vmatprep.subr.bf16.mxu0 %v15916_v54  ;;  %v7155_v54 = vld [vmem:[#allocation39] sm:$0x3] }
 0xb11   :  { %7723 = vmatpush2.bf16.msra.mxu0 %v15914_v10  ;;  %v7160_v10 = vrot.slane %v7155_v54, %v17540_v62 }
 0xb12   :  { %7724 = vmatprep.subr.bf16.mxu0 %v15922_v33  ;;  %v7164_v33 = vrot.slane %v7155_v54, %v17543_v8 }
 0xb15   :  { %7725 = vmatpush2.bf16.msra.mxu0 %v15920_v14 }
 0xb16   :  { %7726 = vmatprep.subr.bf16.mxu0 %v15928_v46 }
 0xb19   :  { %7727 = vmatpush2.bf16.msra.mxu0 %v15926_v51 }
 0xb1a   :  { %7728 = vmatprep.subr.bf16.mxu0 %v15934_v55  ;;  %v7804_v55 = vld [vmem:[#allocation21 + $0x80] sm:$0xff] }
 0xb1d   :  { %7729 = vmatpush2.bf16.msra.mxu0 %v15932_v40  ;;  %v7932_v40 = vld [vmem:[#allocation21 + $0x480] sm:$0xff] }
 0xb1e   :  { %9366 = vmatprep.subr.bf16.mxu0 %v14265_v5  ;;  %v7796_v5 = vld [vmem:[#allocation21 + $0x40] sm:$0xff] }
 0xba0   :  { %v7131_v19 = vpop.f32.mrf.mxu0 }
 0xba1   :  { %v7132_v31 = vadd.f32 %v14119_v17, %v7131_v19 }
 0xba2   :  { %v15194_v23 = vpop.f32.mrf.mxu0 }
 0xba3   :  { %v7137_v32 = vmax.f32 %v7132_v31, 0.0 }
 0xba4   :  { %v7134_v28 = vpop.f32.mrf.mxu0 }
 0xba5   :  { %v7138_v49 = vpack.c.bf16 %v7137_v32, %v7137_v32  ;;  %v7836_v28 = vld [vmem:[#allocation21 + $0x180] sm:$0xff] }
 0xba6   :  { %v15195_v36 = vpop.f32.mrf.mxu0 }
 0xba7   :  { %7280 = vmatmul.mubr.bf16.vlgmr.msra.gmra.mxu1 %v7138_v49  ;;  %v7840_v49 = vld [vmem:[#allocation21 + $0x1a0] sm:$0xff] }
 0xba8   :  { %7740 = vmatpush1.bf16.msra.mxu1 %v15845_v27  ;;  %v7968_v36 = vld [vmem:[#allocation21 + $0x5a0] sm:$0xff] }
 0xba9   :  { %7741 = vmatprep.subr.bf16.mxu1 %v15853_v12  ;;  %v7964_v12 = vld [vmem:[#allocation21 + $0x580] sm:$0xff] }
 0xbac   :  { %7742 = vmatpush1.bf16.msra.mxu1 %v15851_v25 }
 0xbad   :  { %7743 = vmatprep.subr.bf16.mxu1 %v15859_v47 }
 0xbb0   :  { %7744 = vmatpush1.bf16.msra.mxu1 %v15857_v29 }
 0xbb1   :  { %7745 = vmatprep.subr.bf16.mxu1 %v15865_v1  ;;  %v14257_v1 = vcombine.high %v7836_v28, %v7840_v49 }
 0xbb4   :  { %7746 = vmatpush1.bf16.msra.mxu1 %v15863_v34  ;;  %v14385_v34 = vcombine.high %v7964_v12, %v7968_v36 }
 0xbb5   :  { %7747 = vmatprep.subr.bf16.mxu1 %v15871_v30  ;;  %v7828_v30 = vld [vmem:[#allocation21 + $0x140] sm:$0xff] }
 0xbb8   :  { %7748 = vmatpush1.bf16.msra.mxu1 %v15869_v57  ;;  %v7832_v57 = vld [vmem:[#allocation21 + $0x160] sm:$0xff] }
 0xbb9   :  { %7749 = vmatprep.subr.bf16.mxu1 %v15877_v39  ;;  %v7956_v39 = vld [vmem:[#allocation21 + $0x540] sm:$0xff] }
 0xbbc   :  { %7750 = vmatpush1.bf16.msra.mxu1 %v15875_v35  ;;  %v7960_v35 = vld [vmem:[#allocation21 + $0x560] sm:$0xff] }
 0xbbd   :  { %7751 = vmatprep.subr.bf16.mxu1 %v15883_v41  ;;  %v14256_v41 = vcombine.low %v7836_v28, %v7840_v49 }
 0xbc0   :  { %7752 = vmatpush1.bf16.msra.mxu1 %v15881_v58  ;;  %v14384_v58 = vcombine.low %v7964_v12, %v7968_v36  ;;  %v7908_v12 = vld [vmem:[#allocation21 + $0x3c0] sm:$0xff] }
 0xbc1   :  { %7753 = vmatprep.subr.bf16.mxu1 %v15889_v15  ;;  %v14249_v15 = vcombine.high %v7828_v30, %v7832_v57  ;;  %v7912_v36 = vld [vmem:[#allocation21 + $0x3e0] sm:$0xff] }
 0xbc4   :  { %7754 = vmatpush1.bf16.msra.mxu1 %v15887_v42  ;;  %v14377_v42 = vcombine.high %v7956_v39, %v7960_v35 }
 0xbc5   :  { %7755 = vmatprep.subr.bf16.mxu1 %v15895_v9  ;;  %v7820_v9 = vld [vmem:[#allocation21 + $0x100] sm:$0xff] }
 0xbc8   :  { %7756 = vmatpush2.bf16.msra.mxu1 %v15893_v43  ;;  %v7824_v43 = vld [vmem:[#allocation21 + $0x120] sm:$0xff] }
 0xbc9   :  { %7757 = vmatprep.subr.bf16.mxu1 %v15901_v48  ;;  %v7948_v48 = vld [vmem:[#allocation21 + $0x500] sm:$0xff]  ;;  %v14240_v46 = vcombine.low %v7820_v9, %v7824_v43 }
 0xbcc   :  { %7758 = vmatpush2.bf16.msra.mxu1 %v15899_v18  ;;  %v7952_v18 = vld [vmem:[#allocation21 + $0x520] sm:$0xff] }
 0xbcd   :  { %7759 = vmatprep.subr.bf16.mxu1 %v15907_v59  ;;  %v14248_v59 = vcombine.low %v7828_v30, %v7832_v57  ;;  %v7900_v57 = vld [vmem:[#allocation21 + $0x380] sm:$0xff] }
 0xbd0   :  { %7760 = vmatpush2.bf16.msra.mxu1 %v15905_v38  ;;  %v14376_v38 = vcombine.low %v7956_v39, %v7960_v35  ;;  %v7904_v39 = vld [vmem:[#allocation21 + $0x3a0] sm:$0xff] }
 0xbd1   :  { %7761 = vmatprep.subr.bf16.mxu1 %v15913_v44  ;;  %v14241_v44 = vcombine.high %v7820_v9, %v7824_v43  ;;  %v8028_v35 = vld [vmem:[#allocation21 + $0x780] sm:$0xff] }
 0xbd2   :  { %v7892_v43 = vld [vmem:[#allocation21 + $0x340] sm:$0xff] }
 0xbd4   :  { %7762 = vmatpush2.bf16.msra.mxu1 %v15911_v45  ;;  %v14369_v45 = vcombine.high %v7948_v48, %v7952_v18 }
 0xbd5   :  { %7763 = vmatprep.subr.bf16.mxu1 %v15919_v52  ;;  %v7812_v52 = vld [vmem:[#allocation21 + $0xc0] sm:$0xff] }
 0xbd8   :  { %7764 = vmatpush2.bf16.msra.mxu1 %v15917_v61  ;;  %v7816_v61 = vld [vmem:[#allocation21 + $0xe0] sm:$0xff] }
 0xbd9   :  { %7765 = vmatprep.subr.bf16.mxu1 %v15925_v21  ;;  %v7940_v21 = vld [vmem:[#allocation21 + $0x4c0] sm:$0xff]  ;;  %v14233_v51 = vcombine.high %v7812_v52, %v7816_v61  ;;  %v14232_v22 = vcombine.low %v7812_v52, %v7816_v61 }
 0xbda   :  { %v7884_v61 = vld [vmem:[#allocation21 + $0x300] sm:$0xff] }
 0xbdc   :  { %7766 = vmatpush2.bf16.msra.mxu1 %v15923_v53  ;;  %v7944_v53 = vld [vmem:[#allocation21 + $0x4e0] sm:$0xff] }
 0xbdd   :  { %7767 = vmatprep.subr.bf16.mxu1 %v15931_v4  ;;  %v14368_v4 = vcombine.low %v7948_v48, %v7952_v18  ;;  %v14360_v13 = vcombine.low %v7940_v21, %v7944_v53  ;;  %v7896_v48 = vld [vmem:[#allocation21 + $0x360] sm:$0xff] }
 0xbde   :  { %v8020_v18 = vld [vmem:[#allocation21 + $0x740] sm:$0xff] }
 0xbe0   :  { %7768 = vmatpush2.bf16.msra.mxu1 %v15929_v11  ;;  %v14361_v11 = vcombine.high %v7940_v21, %v7944_v53  ;;  %v7888_v21 = vld [vmem:[#allocation21 + $0x320] sm:$0xff] }
 0xbe1   :  { %7769 = vmatprep.subr.bf16.mxu1 %v15937_v60  ;;  %v7808_v60 = vld [vmem:[#allocation21 + $0xa0] sm:$0xff] }
 0xbe2   :  { %v14225_v16 = vcombine.high %v7804_v55, %v7808_v60  ;;  %v14224_v54 = vcombine.low %v7804_v55, %v7808_v60  ;;  %v8012_v53 = vld [vmem:[#allocation21 + $0x700] sm:$0xff] }
 0xbe3   :  { %v7876_v60 = vld [vmem:[#allocation21 + $0x2c0] sm:$0xff] }
 0xbe4   :  { %7770 = vmatpush2.bf16.msra.mxu1 %v15935_v0  ;;  %v7936_v0 = vld [vmem:[#allocation21 + $0x4a0] sm:$0xff] }
 0xbe5   :  { %9407 = vmatprep.subr.bf16.mxu1 %v14393_v2  ;;  %v7928_v2 = vld [vmem:[#allocation21 + $0x460] sm:$0xff] }
 0xc67   :  { %v7281_v14 = vpop.f32.mrf.mxu1 }
 0xc68   :  { %v7282_v17 = vadd.f32 %v7281_v14, %v7160_v10  ;;  %v14352_v10 = vcombine.low %v7932_v40, %v7936_v0 }
 0xc69   :  { %v7283_v19 = vpop.f32.mrf.mxu1 }
 0xc6a   :  { %v7284_v31 = vadd.f32 %v7283_v19, %v7164_v33  ;;  %v7288_v23 = vmax.f32 %v7282_v17, 0.0  ;;  %v14217_v33 = vcombine.high %v7796_v5, %v7800_v6  ;;  %v7788_v17 = vld [vmem:[#allocation21] sm:$0xff] }
 0xc6b   :  { %v7285_v32 = vpop.f32.mrf.mxu1  ;;  %v7792_v19 = vld [vmem:[#allocation21 + $0x20] sm:$0xff] }
 0xc6c   :  { %v7289_v27 = vmax.f32 %v7284_v31, 0.0  ;;  %v7290_v29 = vpack.c.bf16 %v7288_v23, %v7288_v23  ;;  %v7916_v31 = vld [vmem:[#allocation21 + $0x400] sm:$0xff]  ;;  %v14216_v32 = vcombine.low %v7796_v5, %v7800_v6 }
 0xc6d   :  { %v7286_v25 = vpop.f32.mrf.mxu1  ;;  %v7920_v23 = vld [vmem:[#allocation21 + $0x420] sm:$0xff] }
 0xc6e   :  { %v7291_v47 = vpack.c.bf16 %v7289_v27, %v7289_v27  ;;  %v14209_v27 = vcombine.high %v7788_v17, %v7792_v19  ;;  %v14337_v49 = vcombine.high %v7916_v31, %v7920_v23  ;;  %v8036_v25 = vld [vmem:[#allocation21 + $0x7c0] sm:$0xff] }
 0xc6f   :  { %v7868_v6 = vld [vmem:[#allocation21 + $0x280] sm:$0xff] }
 0xc70   :  { %7730 = vmatprep.mubr.bf16.mxu0 %v7291_v47  ;;  %7771 = vmatprep.mubr.bf16.mxu1 %v7291_v47  ;;  %v8040_v47 = vld [vmem:[#allocation21 + $0x7e0] sm:$0xff] }
 0xc71   :  { %7731 = vmatmul.mubr.bf16.vlgmr.msra.gmra.mxu0 %v7290_v29  ;;  %7772 = vmatmul.mubr.bf16.vlgmr.msra.gmra.mxu1 %v7290_v29  ;;  %v14208_v29 = vcombine.low %v7788_v17, %v7792_v19  ;;  %v14457_v30 = vcombine.high %v8036_v25, %v8040_v47 }
 0xc72   :  { %9367 = vmatpush1.bf16.msra.mxu0 %v14264_v3  ;;  %9408 = vmatpush1.bf16.msra.mxu1 %v14392_v7  ;;  %v14353_v3 = vcombine.high %v7932_v40, %v7936_v0  ;;  %v7924_v7 = vld [vmem:[#allocation21 + $0x440] sm:$0xff] }
 0xc73   :  { %9368 = vmatprep.subr.bf16.mxu0 %v14257_v1  ;;  %9409 = vmatprep.subr.bf16.mxu1 %v14385_v34  ;;  %v14345_v14 = vcombine.high %v7924_v7, %v7928_v2  ;;  %v14344_v28 = vcombine.low %v7924_v7, %v7928_v2  ;;  %v14336_v1 = vcombine.low %v7916_v31, %v7920_v23  ;;  %v7880_v40 = vld [vmem:[#allocation21 + $0x2e0] sm:$0xff] }
 0xc74   :  { %v14329_v34 = vcombine.high %v7908_v12, %v7912_v36  ;;  %v8004_v0 = vld [vmem:[#allocation21 + $0x6c0] sm:$0xff] }
 0xc75   :  { %v7872_v7 = vld [vmem:[#allocation21 + $0x2a0] sm:$0xff] }
 0xc76   :  { %9369 = vmatpush1.bf16.msra.mxu0 %v14256_v41  ;;  %9410 = vmatpush1.bf16.msra.mxu1 %v14384_v58  ;;  %v8032_v41 = vld [vmem:[#allocation21 + $0x7a0] sm:$0xff]  ;;  %v14328_v58 = vcombine.low %v7908_v12, %v7912_v36  ;;  %v14288_v19 = vcombine.low %v7868_v6, %v7872_v7 }
 0xc77   :  { %9370 = vmatprep.subr.bf16.mxu0 %v14249_v15  ;;  %9411 = vmatprep.subr.bf16.mxu1 %v14377_v42  ;;  %v14456_v15 = vcombine.low %v8036_v25, %v8040_v47  ;;  %v14321_v42 = vcombine.high %v7900_v57, %v7904_v39  ;;  %v14449_v9 = vcombine.high %v8028_v35, %v8032_v41  ;;  %v7996_v2 = vld [vmem:[#allocation21 + $0x680] sm:$0xff] }
 0xc78   :  { %v7860_v23 = vld [vmem:[#allocation21 + $0x240] sm:$0xff] }
 0xc79   :  { %v7852_v47 = vld [vmem:[#allocation21 + $0x200] sm:$0xff] }
 0xc7a   :  { %9371 = vmatpush1.bf16.msra.mxu0 %v14248_v59  ;;  %9412 = vmatpush1.bf16.msra.mxu1 %v14376_v38  ;;  %v8024_v59 = vld [vmem:[#allocation21 + $0x760] sm:$0xff]  ;;  %v14320_v38 = vcombine.low %v7900_v57, %v7904_v39 }
 0xc7b   :  { %9372 = vmatprep.subr.bf16.mxu0 %v14241_v44  ;;  %9413 = vmatprep.subr.bf16.mxu1 %v14369_v45  ;;  %v14448_v44 = vcombine.low %v8028_v35, %v8032_v41  ;;  %v14313_v45 = vcombine.high %v7892_v43, %v7896_v48  ;;  %v14441_v52 = vcombine.high %v8020_v18, %v8024_v59  ;;  %v7845_v41 = vld [vmem:[#allocation21 + $0x1c8] sm:$0xff] }
 0xc7e   :  { %9373 = vmatpush1.bf16.msra.mxu0 %v14240_v46  ;;  %9414 = vmatpush1.bf16.msra.mxu1 %v14368_v4  ;;  %v8016_v46 = vld [vmem:[#allocation21 + $0x720] sm:$0xff]  ;;  %v14312_v4 = vcombine.low %v7892_v43, %v7896_v48 }
 0xc7f   :  { %9374 = vmatprep.subr.bf16.mxu0 %v14233_v51  ;;  %9415 = vmatprep.subr.bf16.mxu1 %v14361_v11  ;;  %v14440_v51 = vcombine.low %v8020_v18, %v8024_v59  ;;  %v14305_v11 = vcombine.high %v7884_v61, %v7888_v21  ;;  %v14433_v55 = vcombine.high %v8012_v53, %v8016_v46  ;;  %v7356_v59 = vld [vmem:[#allocation40] sm:$0xf] }
 0xc82   :  { %9375 = vmatpush1.bf16.msra.mxu0 %v14232_v22  ;;  %9416 = vmatpush1.bf16.msra.mxu1 %v14360_v13  ;;  %v8008_v22 = vld [vmem:[#allocation21 + $0x6e0] sm:$0xff]  ;;  %v14304_v13 = vcombine.low %v7884_v61, %v7888_v21 }
 0xc83   :  { %9376 = vmatprep.subr.bf16.mxu0 %v14225_v16  ;;  %9417 = vmatprep.subr.bf16.mxu1 %v14353_v3  ;;  %v14432_v16 = vcombine.low %v8012_v53, %v8016_v46  ;;  %v14297_v3 = vcombine.high %v7876_v60, %v7880_v40  ;;  %v14425_v5 = vcombine.high %v8004_v0, %v8008_v22 }
 0xc86   :  { %9377 = vmatpush1.bf16.msra.mxu0 %v14224_v54  ;;  %9418 = vmatpush1.bf16.msra.mxu1 %v14352_v10  ;;  %v8000_v54 = vld [vmem:[#allocation21 + $0x6a0] sm:$0xff]  ;;  %v14296_v10 = vcombine.low %v7876_v60, %v7880_v40 }
 0xc87   :  { %9378 = vmatprep.subr.bf16.mxu0 %v14217_v33  ;;  %9419 = vmatprep.subr.bf16.mxu1 %v14345_v14  ;;  %v14424_v33 = vcombine.low %v8004_v0, %v8008_v22  ;;  %v14289_v14 = vcombine.high %v7868_v6, %v7872_v7  ;;  %v14417_v17 = vcombine.high %v7996_v2, %v8000_v54  ;;  %v7841_v7 = vld [vmem:[#allocation21 + $0x1a8] sm:$0xff] }
 0xc88   :  { %v14416_v31 = vcombine.low %v7996_v2, %v8000_v54  ;;  %v7965_v2 = vld [vmem:[#allocation21 + $0x588] sm:$0xff] }
 0xc89   :  { %v7969_v54 = vld [vmem:[#allocation21 + $0x5a8] sm:$0xff] }
 0xc8a   :  { %9379 = vmatpush1.bf16.msra.mxu0 %v14216_v32  ;;  %9420 = vmatpush1.bf16.msra.mxu1 %v14344_v28  ;;  %v7864_v32 = vld [vmem:[#allocation21 + $0x260] sm:$0xff] }
 0xc8b   :  { %9380 = vmatprep.subr.bf16.mxu0 %v14209_v27  ;;  %9421 = vmatprep.subr.bf16.mxu1 %v14337_v49  ;;  %v7988_v28 = vld [vmem:[#allocation21 + $0x640] sm:$0xff]  ;;  %v14281_v27 = vcombine.high %v7860_v23, %v7864_v32  ;;  %v14280_v12 = vcombine.low %v7860_v23, %v7864_v32  ;;  %v14387_v23 = vcombine.high %v7965_v2, %v7969_v54  ;;  %v7833_v32 = vld [vmem:[#allocation21 + $0x168] sm:$0xff] }
 0xc8c   :  { %v7992_v49 = vld [vmem:[#allocation21 + $0x660] sm:$0xff] }
 0xc8d   :  { %v14408_v36 = vcombine.low %v7988_v28, %v7992_v49  ;;  %v14409_v25 = vcombine.high %v7988_v28, %v7992_v49  ;;  %v7957_v28 = vld [vmem:[#allocation21 + $0x548] sm:$0xff] }
 0xc8e   :  { %9381 = vmatpush1.bf16.msra.mxu0 %v14208_v29  ;;  %9422 = vmatpush1.bf16.msra.mxu1 %v14336_v1  ;;  %v7856_v29 = vld [vmem:[#allocation21 + $0x220] sm:$0xff] }
 0xc8f   :  { %9382 = vmatprep.subr.bf16.mxu0 %v14329_v34  ;;  %9423 = vmatprep.subr.bf16.mxu1 %v14457_v30  ;;  %v7980_v1 = vld [vmem:[#allocation21 + $0x600] sm:$0xff]  ;;  %v14273_v34 = vcombine.high %v7852_v47, %v7856_v29  ;;  %v14272_v57 = vcombine.low %v7852_v47, %v7856_v29  ;;  %v7821_v47 = vld [vmem:[#allocation21 + $0x108] sm:$0xff] }
 0xc90   :  { %v7984_v30 = vld [vmem:[#allocation21 + $0x620] sm:$0xff]  ;;  %v7825_v29 = vld [vmem:[#allocation21 + $0x128] sm:$0xff] }
 0xc91   :  { %v14400_v39 = vcombine.low %v7980_v1, %v7984_v30  ;;  %v14401_v35 = vcombine.high %v7980_v1, %v7984_v30  ;;  %v7949_v1 = vld [vmem:[#allocation21 + $0x508] sm:$0xff] }
 0xc92   :  { %9383 = vmatpush2.bf16.msra.mxu0 %v14328_v58  ;;  %9424 = vmatpush2.bf16.msra.mxu1 %v14456_v15  ;;  %v7849_v58 = vld [vmem:[#allocation21 + $0x1e8] sm:$0xff] }
 0xc93   :  { %9384 = vmatprep.subr.bf16.mxu0 %v14321_v42  ;;  %9425 = vmatprep.subr.bf16.mxu1 %v14449_v9  ;;  %v7973_v15 = vld [vmem:[#allocation21 + $0x5c8] sm:$0xff]  ;;  %v14267_v42 = vcombine.high %v7845_v41, %v7849_v58  ;;  %v14266_v43 = vcombine.low %v7845_v41, %v7849_v58 }
 0xc94   :  { %v7977_v9 = vld [vmem:[#allocation21 + $0x5e8] sm:$0xff] }
 0xc95   :  { %v14394_v48 = vcombine.low %v7973_v15, %v7977_v9  ;;  %v14395_v18 = vcombine.high %v7973_v15, %v7977_v9  ;;  %v7813_v41 = vld [vmem:[#allocation21 + $0xc8] sm:$0xff]  ;;  %v14242_v9 = vcombine.low %v7821_v47, %v7825_v29 }
 0xc96   :  { %9385 = vmatpush2.bf16.msra.mxu0 %v14320_v38  ;;  %9426 = vmatpush2.bf16.msra.mxu1 %v14448_v44  ;;  %v7361_v38 = vrot.slane %v7356_v59, %v17540_v62  ;;  %v7369_v44 = vrot.slane %v7356_v59, %v17576_v26  ;;  %v7817_v58 = vld [vmem:[#allocation21 + $0xe8] sm:$0xff] }
 0xc97   :  { %9386 = vmatprep.subr.bf16.mxu0 %v14313_v45  ;;  %9427 = vmatprep.subr.bf16.mxu1 %v14441_v52  ;;  %v7365_v45 = vrot.slane %v7356_v59, %v17543_v8  ;;  %v7373_v52 = vrot.slane %v7356_v59, %v17597_v37  ;;  %v7941_v15 = vld [vmem:[#allocation21 + $0x4c8] sm:$0xff] }
 0xc98   :  { %v7805_v59 = vld [vmem:[#allocation21 + $0x88] sm:$0xff] }
 0xc9a   :  { %9387 = vmatpush2.bf16.msra.mxu0 %v14312_v4  ;;  %9428 = vmatpush2.bf16.msra.mxu1 %v14440_v51 }
 0xc9b   :  { %9388 = vmatprep.subr.bf16.mxu0 %v14305_v11  ;;  %9429 = vmatprep.subr.bf16.mxu1 %v14433_v55 }
 0xc9e   :  { %9389 = vmatpush2.bf16.msra.mxu0 %v14304_v13  ;;  %9430 = vmatpush2.bf16.msra.mxu1 %v14432_v16 }
 0xc9f   :  { %9390 = vmatprep.subr.bf16.mxu0 %v14297_v3  ;;  %9431 = vmatprep.subr.bf16.mxu1 %v14425_v5  ;;  %v7837_v3 = vld [vmem:[#allocation21 + $0x188] sm:$0xff] }
 0xca0   :  { %v14258_v49 = vcombine.low %v7837_v3, %v7841_v7 }
 0xca2   :  { %9391 = vmatpush2.bf16.msra.mxu0 %v14296_v10  ;;  %9432 = vmatpush2.bf16.msra.mxu1 %v14424_v33 }
 0xca3   :  { %9392 = vmatprep.subr.bf16.mxu0 %v14289_v14  ;;  %9433 = vmatprep.subr.bf16.mxu1 %v14417_v17 }
 0xca6   :  { %9393 = vmatpush2.bf16.msra.mxu0 %v14288_v19  ;;  %9434 = vmatpush2.bf16.msra.mxu1 %v14416_v31  ;;  %v7829_v19 = vld [vmem:[#allocation21 + $0x148] sm:$0xff]  ;;  %v14259_v31 = vcombine.high %v7837_v3, %v7841_v7 }
 0xca7   :  { %9394 = vmatprep.subr.bf16.mxu0 %v14281_v27  ;;  %9435 = vmatprep.subr.bf16.mxu1 %v14409_v25  ;;  %v7961_v27 = vld [vmem:[#allocation21 + $0x568] sm:$0xff]  ;;  %v14250_v30 = vcombine.low %v7829_v19, %v7833_v32 }
 0xca8   :  { %v14379_v25 = vcombine.high %v7957_v28, %v7961_v27  ;;  %v7921_v3 = vld [vmem:[#allocation21 + $0x428] sm:$0xff] }
 0xcaa   :  { %9395 = vmatpush2.bf16.msra.mxu0 %v14280_v12  ;;  %9436 = vmatpush2.bf16.msra.mxu1 %v14408_v36  ;;  %v14386_v12 = vcombine.low %v7965_v2, %v7969_v54  ;;  %v14251_v36 = vcombine.high %v7829_v19, %v7833_v32  ;;  %v7909_v54 = vld [vmem:[#allocation21 + $0x3c8] sm:$0xff] }
 0xcab   :  { %9396 = vmatprep.subr.bf16.mxu0 %v14273_v34  ;;  %9437 = vmatprep.subr.bf16.mxu1 %v14401_v35  ;;  %v7953_v34 = vld [vmem:[#allocation21 + $0x528] sm:$0xff] }
 0xcac   :  { %v14371_v35 = vcombine.high %v7949_v1, %v7953_v34  ;;  %v7913_v19 = vld [vmem:[#allocation21 + $0x3e8] sm:$0xff] }
 0xcae   :  { %9397 = vmatpush2.bf16.msra.mxu0 %v14272_v57  ;;  %9438 = vmatpush2.bf16.msra.mxu1 %v14400_v39  ;;  %v14378_v57 = vcombine.low %v7957_v28, %v7961_v27  ;;  %v14243_v39 = vcombine.high %v7821_v47, %v7825_v29  ;;  %v14331_v27 = vcombine.high %v7909_v54, %v7913_v19  ;;  %v8033_v47 = vld [vmem:[#allocation21 + $0x7a8] sm:$0xff] }
 0xcaf   :  { %9448 = vmatprep.subr.bf16.mxu0 %v14267_v42  ;;  %9489 = vmatprep.subr.bf16.mxu1 %v14395_v18  ;;  %v7945_v42 = vld [vmem:[#allocation21 + $0x4e8] sm:$0xff]  ;;  %v14330_v29 = vcombine.low %v7909_v54, %v7913_v19 }
 0xcb0   :  { %v14363_v18 = vcombine.high %v7941_v15, %v7945_v42  ;;  %v7993_v54 = vld [vmem:[#allocation21 + $0x668] sm:$0xff] }
 0xd31   :  { %v7732_v61 = vpop.f32.mrf.mxu0  ;;  %v7773_v21 = vpop.f32.mrf.mxu1 }
 0xd32   :  { %v7733_v53 = vadd.f32 %v7732_v61, %v7361_v38  ;;  %v7774_v46 = vadd.f32 %v7773_v21, %v7369_v44  ;;  %v7809_v38 = vld [vmem:[#allocation21 + $0xa8] sm:$0xff]  ;;  %v14362_v61 = vcombine.low %v7941_v15, %v7945_v42 }
 0xd33   :  { %v7734_v4 = vpop.f32.mrf.mxu0  ;;  %v7775_v51 = vpop.f32.mrf.mxu1  ;;  %v7933_v44 = vld [vmem:[#allocation21 + $0x488] sm:$0xff]  ;;  %v14227_v21 = vcombine.high %v7805_v59, %v7809_v38 }
 0xd34   :  { %v7735_v11 = vadd.f32 %v7734_v4, %v7365_v45  ;;  %v7776_v55 = vadd.f32 %v7775_v51, %v7373_v52  ;;  %v7780_v60 = vmax.f32 %v7733_v53, 0.0  ;;  %v7782_v40 = vmax.f32 %v7774_v46, 0.0  ;;  %v7937_v45 = vld [vmem:[#allocation21 + $0x4a8] sm:$0xff] }
 0xd35   :  { %v7736_v0 = vpop.f32.mrf.mxu0  ;;  %v7777_v22 = vpop.f32.mrf.mxu1  ;;  %v14234_v52 = vcombine.low %v7813_v41, %v7817_v58  ;;  %v14355_v53 = vcombine.high %v7933_v44, %v7937_v45  ;;  %v7797_v46 = vld [vmem:[#allocation21 + $0x48] sm:$0xff] }
 0xd36   :  { %v7781_v13 = vmax.f32 %v7735_v11, 0.0  ;;  %v7783_v16 = vmax.f32 %v7776_v55, 0.0  ;;  %v17779_v14 = vpack.c.bf16 %v7780_v60, %v7780_v60  ;;  %v17781_v17 = vpack.c.bf16 %v7782_v40, %v7782_v40  ;;  %v7801_v4 = vld [vmem:[#allocation21 + $0x68] sm:$0xff] }
 0xd37   :  { %v7737_v5 = vpop.f32.mrf.mxu0  ;;  %v7778_v6 = vpop.f32.mrf.mxu1  ;;  %v7925_v51 = vld [vmem:[#allocation21 + $0x448] sm:$0xff]  ;;  %v14226_v55 = vcombine.low %v7805_v59, %v7809_v38  ;;  %v14354_v60 = vcombine.low %v7933_v44, %v7937_v45  ;;  %v14219_v40 = vcombine.high %v7797_v46, %v7801_v4 }
 0xd38   :  { %v17775_v10 = vpack.c.bf16 %v7781_v13, %v7781_v13  ;;  %v17777_v33 = vpack.c.bf16 %v7783_v16, %v7783_v16  ;;  %v7929_v11 = vld [vmem:[#allocation21 + $0x468] sm:$0xff]  ;;  %v14218_v5 = vcombine.low %v7797_v46, %v7801_v4 }
 0xd39   :  { %v14347_v0 = vcombine.high %v7925_v51, %v7929_v11  ;;  %v7789_v22 = vld [vmem:[#allocation21 + $0x8] sm:$0xff]  ;;  %v14346_v6 = vcombine.low %v7925_v51, %v7929_v11 }
 0xd3a   :  { %9398 = vmatprep.mubr.bf16.mxu0 %v17775_v10  ;;  %9439 = vmatprep.mubr.bf16.mxu1 %v17777_v33  ;;  %v7793_v13 = vld [vmem:[#allocation21 + $0x28] sm:$0xff] }
 0xd3b   :  { %9399 = vmatmul.mubr.bf16.vlgmr.msra.gmra.mxu0 %v17779_v14  ;;  %9440 = vmatmul.mubr.bf16.vlgmr.msra.gmra.mxu1 %v17781_v17  ;;  %v7917_v16 = vld [vmem:[#allocation21 + $0x408] sm:$0xff]  ;;  %v14211_v7 = vcombine.high %v7789_v22, %v7793_v13  ;;  %v14210_v32 = vcombine.low %v7789_v22, %v7793_v13 }
 0xd3c   :  { %9449 = vmatpush1.bf16.msra.mxu0 %v14266_v43  ;;  %9490 = vmatpush1.bf16.msra.mxu1 %v14394_v48  ;;  %v14370_v43 = vcombine.low %v7949_v1, %v7953_v34  ;;  %v14235_v48 = vcombine.high %v7813_v41, %v7817_v58  ;;  %v14339_v2 = vcombine.high %v7917_v16, %v7921_v3  ;;  %v8025_v41 = vld [vmem:[#allocation21 + $0x768] sm:$0xff] }
 0xd3d   :  { %9480 = vmatprep.mubr.bf16.mxu0 %v17775_v10  ;;  %9521 = vmatprep.mubr.bf16.mxu1 %v17777_v33  ;;  %v14338_v28 = vcombine.low %v7917_v16, %v7921_v3  ;;  %v8017_v59 = vld [vmem:[#allocation21 + $0x728] sm:$0xff] }
 0xd3e   :  { %9450 = vmatprep.subr.bf16.mxu0 %v14259_v31  ;;  %9491 = vmatprep.subr.bf16.mxu1 %v14387_v23  ;;  %v8037_v31 = vld [vmem:[#allocation21 + $0x7c8] sm:$0xff] }
 0xd3f   :  { %v8041_v23 = vld [vmem:[#allocation21 + $0x7e8] sm:$0xff] }
 0xd40   :  { %9451 = vmatpush1.bf16.msra.mxu0 %v14258_v49  ;;  %9492 = vmatpush1.bf16.msra.mxu1 %v14386_v12  ;;  %v14459_v49 = vcombine.high %v8037_v31, %v8041_v23  ;;  %v7901_v12 = vld [vmem:[#allocation21 + $0x388] sm:$0xff]  ;;  %v14458_v1 = vcombine.low %v8037_v31, %v8041_v23 }
 0xd41   :  { %9452 = vmatprep.subr.bf16.mxu0 %v14251_v36  ;;  %9493 = vmatprep.subr.bf16.mxu1 %v14379_v25  ;;  %v7905_v36 = vld [vmem:[#allocation21 + $0x3a8] sm:$0xff] }
 0xd42   :  { %v8029_v25 = vld [vmem:[#allocation21 + $0x788] sm:$0xff]  ;;  %v14323_v34 = vcombine.high %v7901_v12, %v7905_v36  ;;  %v14322_v58 = vcombine.low %v7901_v12, %v7905_v36 }
 0xd43   :  { %v14450_v15 = vcombine.low %v8029_v25, %v8033_v47  ;;  %v8009_v46 = vld [vmem:[#allocation21 + $0x6e8] sm:$0xff] }
 0xd44   :  { %9453 = vmatpush1.bf16.msra.mxu0 %v14250_v30  ;;  %9494 = vmatpush1.bf16.msra.mxu1 %v14378_v57  ;;  %v14451_v30 = vcombine.high %v8029_v25, %v8033_v47  ;;  %v7893_v57 = vld [vmem:[#allocation21 + $0x348] sm:$0xff] }
 0xd45   :  { %9454 = vmatprep.subr.bf16.mxu0 %v14243_v39  ;;  %9495 = vmatprep.subr.bf16.mxu1 %v14371_v35  ;;  %v7897_v39 = vld [vmem:[#allocation21 + $0x368] sm:$0xff] }
 0xd46   :  { %v8021_v35 = vld [vmem:[#allocation21 + $0x748] sm:$0xff]  ;;  %v14315_v42 = vcombine.high %v7893_v57, %v7897_v39  ;;  %v14314_v38 = vcombine.low %v7893_v57, %v7897_v39  ;;  %v7978_v57 = vld [vmem:[#allocation21 + $0x5f0] sm:$0xff] }
 0xd47   :  { %v14442_v44 = vcombine.low %v8021_v35, %v8025_v41  ;;  %v8001_v22 = vld [vmem:[#allocation21 + $0x6a8] sm:$0xff] }
 0xd48   :  { %9455 = vmatpush1.bf16.msra.mxu0 %v14242_v9  ;;  %9496 = vmatpush1.bf16.msra.mxu1 %v14370_v43  ;;  %v14443_v9 = vcombine.high %v8021_v35, %v8025_v41  ;;  %v7885_v43 = vld [vmem:[#allocation21 + $0x308] sm:$0xff] }
 0xd49   :  { %9456 = vmatprep.subr.bf16.mxu0 %v14235_v48  ;;  %9497 = vmatprep.subr.bf16.mxu1 %v14363_v18  ;;  %v7889_v48 = vld [vmem:[#allocation21 + $0x328] sm:$0xff] }
 0xd4a   :  { %v8013_v18 = vld [vmem:[#allocation21 + $0x708] sm:$0xff]  ;;  %v14307_v45 = vcombine.high %v7885_v43, %v7889_v48  ;;  %v14306_v4 = vcombine.low %v7885_v43, %v7889_v48  ;;  %v7970_v43 = vld [vmem:[#allocation21 + $0x5b0] sm:$0xff] }
 0xd4b   :  { %v14434_v51 = vcombine.low %v8013_v18, %v8017_v59  ;;  %v7985_v12 = vld [vmem:[#allocation21 + $0x628] sm:$0xff] }
 0xd4c   :  { %9457 = vmatpush1.bf16.msra.mxu0 %v14234_v52  ;;  %9498 = vmatpush1.bf16.msra.mxu1 %v14362_v61  ;;  %v14435_v52 = vcombine.high %v8013_v18, %v8017_v59  ;;  %v7877_v61 = vld [vmem:[#allocation21 + $0x2c8] sm:$0xff] }
 0xd4d   :  { %9458 = vmatprep.subr.bf16.mxu0 %v14227_v21  ;;  %9499 = vmatprep.subr.bf16.mxu1 %v14355_v53  ;;  %v7881_v21 = vld [vmem:[#allocation21 + $0x2e8] sm:$0xff] }
 0xd4e   :  { %v8005_v53 = vld [vmem:[#allocation21 + $0x6c8] sm:$0xff]  ;;  %v14299_v11 = vcombine.high %v7877_v61, %v7881_v21  ;;  %v14298_v13 = vcombine.low %v7877_v61, %v7881_v21  ;;  %v7962_v61 = vld [vmem:[#allocation21 + $0x570] sm:$0xff] }
 0xd4f   :  { %v14426_v16 = vcombine.low %v8005_v53, %v8009_v46 }
 0xd50   :  { %9459 = vmatpush1.bf16.msra.mxu0 %v14226_v55  ;;  %9500 = vmatpush1.bf16.msra.mxu1 %v14354_v60  ;;  %v14427_v55 = vcombine.high %v8005_v53, %v8009_v46  ;;  %v7869_v60 = vld [vmem:[#allocation21 + $0x288] sm:$0xff] }
 0xd51   :  { %9460 = vmatprep.subr.bf16.mxu0 %v14219_v40  ;;  %9501 = vmatprep.subr.bf16.mxu1 %v14347_v0  ;;  %v7873_v40 = vld [vmem:[#allocation21 + $0x2a8] sm:$0xff] }
 0xd52   :  { %v7997_v0 = vld [vmem:[#allocation21 + $0x688] sm:$0xff]  ;;  %v14291_v3 = vcombine.high %v7869_v60, %v7873_v40  ;;  %v14290_v19 = vcombine.low %v7869_v60, %v7873_v40  ;;  %v7954_v60 = vld [vmem:[#allocation21 + $0x530] sm:$0xff] }
 0xd53   :  { %v14418_v31 = vcombine.low %v7997_v0, %v8001_v22 }
 0xd54   :  { %9461 = vmatpush1.bf16.msra.mxu0 %v14218_v5  ;;  %9502 = vmatpush1.bf16.msra.mxu1 %v14346_v6  ;;  %v14419_v5 = vcombine.high %v7997_v0, %v8001_v22  ;;  %v7861_v6 = vld [vmem:[#allocation21 + $0x248] sm:$0xff] }
 0xd55   :  { %9462 = vmatprep.subr.bf16.mxu0 %v14211_v7  ;;  %9503 = vmatprep.subr.bf16.mxu1 %v14339_v2  ;;  %v7865_v7 = vld [vmem:[#allocation21 + $0x268] sm:$0xff] }
 0xd56   :  { %v7989_v2 = vld [vmem:[#allocation21 + $0x648] sm:$0xff]  ;;  %v14283_v23 = vcombine.high %v7861_v6, %v7865_v7  ;;  %v14282_v36 = vcombine.low %v7861_v6, %v7865_v7  ;;  %v7946_v6 = vld [vmem:[#allocation21 + $0x4f0] sm:$0xff] }
 0xd57   :  { %v14410_v25 = vcombine.low %v7989_v2, %v7993_v54 }
 0xd58   :  { %9463 = vmatpush1.bf16.msra.mxu0 %v14210_v32  ;;  %9504 = vmatpush1.bf16.msra.mxu1 %v14338_v28  ;;  %v14411_v32 = vcombine.high %v7989_v2, %v7993_v54  ;;  %v7853_v28 = vld [vmem:[#allocation21 + $0x208] sm:$0xff] }
 0xd59   :  { %9464 = vmatprep.subr.bf16.mxu0 %v14331_v27  ;;  %9505 = vmatprep.subr.bf16.mxu1 %v14459_v49  ;;  %v7857_v27 = vld [vmem:[#allocation21 + $0x228] sm:$0xff] }
 0xd5a   :  { %v7981_v49 = vld [vmem:[#allocation21 + $0x608] sm:$0xff]  ;;  %v14275_v47 = vcombine.high %v7853_v28, %v7857_v27  ;;  %v14274_v39 = vcombine.low %v7853_v28, %v7857_v27  ;;  %v7938_v28 = vld [vmem:[#allocation21 + $0x4b0] sm:$0xff] }
 0xd5b   :  { %v14402_v35 = vcombine.low %v7981_v49, %v7985_v12 }
 0xd5c   :  { %9465 = vmatpush2.bf16.msra.mxu0 %v14330_v29  ;;  %9506 = vmatpush2.bf16.msra.mxu1 %v14458_v1  ;;  %v14403_v29 = vcombine.high %v7981_v49, %v7985_v12  ;;  %v7846_v1 = vld [vmem:[#allocation21 + $0x1d0] sm:$0xff] }
 0xd5d   :  { %9466 = vmatprep.subr.bf16.mxu0 %v14323_v34  ;;  %9507 = vmatprep.subr.bf16.mxu1 %v14451_v30  ;;  %v7850_v34 = vld [vmem:[#allocation21 + $0x1f0] sm:$0xff] }
 0xd5e   :  { %v7974_v30 = vld [vmem:[#allocation21 + $0x5d0] sm:$0xff]  ;;  %v14269_v41 = vcombine.high %v7846_v1, %v7850_v34  ;;  %v14268_v48 = vcombine.low %v7846_v1, %v7850_v34 }
 0xd5f   :  { %v14396_v18 = vcombine.low %v7974_v30, %v7978_v57  ;;  %v7930_v1 = vld [vmem:[#allocation21 + $0x470] sm:$0xff] }
 0xd60   :  { %9467 = vmatpush2.bf16.msra.mxu0 %v14322_v58  ;;  %9508 = vmatpush2.bf16.msra.mxu1 %v14450_v15  ;;  %v14397_v58 = vcombine.high %v7974_v30, %v7978_v57  ;;  %v7838_v15 = vld [vmem:[#allocation21 + $0x190] sm:$0xff] }
 0xd61   :  { %9468 = vmatprep.subr.bf16.mxu0 %v14315_v42  ;;  %9509 = vmatprep.subr.bf16.mxu1 %v14443_v9  ;;  %v7842_v42 = vld [vmem:[#allocation21 + $0x1b0] sm:$0xff] }
 0xd62   :  { %v7966_v9 = vld [vmem:[#allocation21 + $0x590] sm:$0xff]  ;;  %v14261_v59 = vcombine.high %v7838_v15, %v7842_v42  ;;  %v14260_v21 = vcombine.low %v7838_v15, %v7842_v42 }
 0xd63   :  { %v14388_v53 = vcombine.low %v7966_v9, %v7970_v43  ;;  %v7922_v15 = vld [vmem:[#allocation21 + $0x430] sm:$0xff] }
 0xd64   :  { %9469 = vmatpush2.bf16.msra.mxu0 %v14314_v38  ;;  %9510 = vmatpush2.bf16.msra.mxu1 %v14442_v44  ;;  %v14389_v38 = vcombine.high %v7966_v9, %v7970_v43  ;;  %v7830_v44 = vld [vmem:[#allocation21 + $0x150] sm:$0xff] }
 0xd65   :  { %9470 = vmatprep.subr.bf16.mxu0 %v14307_v45  ;;  %9511 = vmatprep.subr.bf16.mxu1 %v14435_v52  ;;  %v7834_v45 = vld [vmem:[#allocation21 + $0x170] sm:$0xff] }
 0xd66   :  { %v7958_v52 = vld [vmem:[#allocation21 + $0x550] sm:$0xff]  ;;  %v14253_v46 = vcombine.high %v7830_v44, %v7834_v45  ;;  %v14252_v40 = vcombine.low %v7830_v44, %v7834_v45 }
 0xd67   :  { %v14380_v0 = vcombine.low %v7958_v52, %v7962_v61  ;;  %v8042_v44 = vld [vmem:[#allocation21 + $0x7f0] sm:$0xff] }
 0xd68   :  { %9471 = vmatpush2.bf16.msra.mxu0 %v14306_v4  ;;  %9512 = vmatpush2.bf16.msra.mxu1 %v14434_v51  ;;  %v14381_v4 = vcombine.high %v7958_v52, %v7962_v61  ;;  %v7822_v51 = vld [vmem:[#allocation21 + $0x110] sm:$0xff] }
 0xd69   :  { %9472 = vmatprep.subr.bf16.mxu0 %v14299_v11  ;;  %9513 = vmatprep.subr.bf16.mxu1 %v14427_v55  ;;  %v7826_v11 = vld [vmem:[#allocation21 + $0x130] sm:$0xff] }
 0xd6a   :  { %v7950_v55 = vld [vmem:[#allocation21 + $0x510] sm:$0xff]  ;;  %v14245_v22 = vcombine.high %v7822_v51, %v7826_v11  ;;  %v14244_v7 = vcombine.low %v7822_v51, %v7826_v11 }
 0xd6b   :  { %v14372_v2 = vcombine.low %v7950_v55, %v7954_v60  ;;  %v8034_v51 = vld [vmem:[#allocation21 + $0x7b0] sm:$0xff] }
 0xd6c   :  { %9473 = vmatpush2.bf16.msra.mxu0 %v14298_v13  ;;  %9514 = vmatpush2.bf16.msra.mxu1 %v14426_v16  ;;  %v14373_v13 = vcombine.high %v7950_v55, %v7954_v60  ;;  %v7814_v16 = vld [vmem:[#allocation21 + $0xd0] sm:$0xff] }
 0xd6d   :  { %9474 = vmatprep.subr.bf16.mxu0 %v14291_v3  ;;  %9515 = vmatprep.subr.bf16.mxu1 %v14419_v5  ;;  %v7818_v3 = vld [vmem:[#allocation21 + $0xf0] sm:$0xff] }
 0xd6e   :  { %v7942_v5 = vld [vmem:[#allocation21 + $0x4d0] sm:$0xff]  ;;  %v14237_v54 = vcombine.high %v7814_v16, %v7818_v3  ;;  %v14236_v27 = vcombine.low %v7814_v16, %v7818_v3 }
 0xd6f   :  { %v14364_v49 = vcombine.low %v7942_v5, %v7946_v6  ;;  %v8026_v16 = vld [vmem:[#allocation21 + $0x770] sm:$0xff] }
 0xd70   :  { %9475 = vmatpush2.bf16.msra.mxu0 %v14290_v19  ;;  %9516 = vmatpush2.bf16.msra.mxu1 %v14418_v31  ;;  %v14365_v19 = vcombine.high %v7942_v5, %v7946_v6  ;;  %v7806_v31 = vld [vmem:[#allocation21 + $0x90] sm:$0xff] }
 0xd71   :  { %9476 = vmatprep.subr.bf16.mxu0 %v14283_v23  ;;  %9517 = vmatprep.subr.bf16.mxu1 %v14411_v32  ;;  %v7810_v23 = vld [vmem:[#allocation21 + $0xb0] sm:$0xff] }
 0xd72   :  { %v7934_v32 = vld [vmem:[#allocation21 + $0x490] sm:$0xff]  ;;  %v14229_v12 = vcombine.high %v7806_v31, %v7810_v23  ;;  %v14228_v34 = vcombine.low %v7806_v31, %v7810_v23 }
 0xd73   :  { %v14356_v30 = vcombine.low %v7934_v32, %v7938_v28  ;;  %v8018_v31 = vld [vmem:[#allocation21 + $0x730] sm:$0xff] }
 0xd74   :  { %9477 = vmatpush2.bf16.msra.mxu0 %v14282_v36  ;;  %9518 = vmatpush2.bf16.msra.mxu1 %v14410_v25  ;;  %v14357_v36 = vcombine.high %v7934_v32, %v7938_v28  ;;  %v7798_v25 = vld [vmem:[#allocation21 + $0x50] sm:$0xff] }
 0xd75   :  { %9478 = vmatprep.subr.bf16.mxu0 %v14275_v47  ;;  %9519 = vmatprep.subr.bf16.mxu1 %v14403_v29  ;;  %v7802_v47 = vld [vmem:[#allocation21 + $0x70] sm:$0xff] }
 0xd76   :  { %v7926_v29 = vld [vmem:[#allocation21 + $0x450] sm:$0xff]  ;;  %v14221_v57 = vcombine.high %v7798_v25, %v7802_v47  ;;  %v14220_v42 = vcombine.low %v7798_v25, %v7802_v47 }
 0xd77   :  { %v14348_v9 = vcombine.low %v7926_v29, %v7930_v1  ;;  %v8010_v25 = vld [vmem:[#allocation21 + $0x6f0] sm:$0xff] }
 0xd78   :  { %9479 = vmatpush2.bf16.msra.mxu0 %v14274_v39  ;;  %9520 = vmatpush2.bf16.msra.mxu1 %v14402_v35  ;;  %v14349_v39 = vcombine.high %v7926_v29, %v7930_v1  ;;  %v7790_v35 = vld [vmem:[#allocation21 + $0x10] sm:$0xff] }
 0xd79   :  { %9530 = vmatprep.subr.bf16.mxu0 %v14269_v41  ;;  %9571 = vmatprep.subr.bf16.mxu1 %v14397_v58  ;;  %v7794_v41 = vld [vmem:[#allocation21 + $0x30] sm:$0xff] }
 0xd7a   :  { %v7918_v58 = vld [vmem:[#allocation21 + $0x410] sm:$0xff]  ;;  %v14213_v43 = vcombine.high %v7790_v35, %v7794_v41  ;;  %v14212_v45 = vcombine.low %v7790_v35, %v7794_v41 }
 0xd7b   :  { %9481 = vmatmul.mubr.bf16.vlgmr.msra.gmra.mxu0 %v17779_v14  ;;  %9522 = vmatmul.mubr.bf16.vlgmr.msra.gmra.mxu1 %v17781_v17  ;;  %v14340_v52 = vcombine.low %v7918_v58, %v7922_v15  ;;  %v8002_v35 = vld [vmem:[#allocation21 + $0x6b0] sm:$0xff] }
 0xd7c   :  { %9531 = vmatpush1.bf16.msra.mxu0 %v14268_v48  ;;  %9562 = vmatprep.mubr.bf16.mxu0 %v17775_v10  ;;  %v14341_v48 = vcombine.high %v7918_v58, %v7922_v15 }
 0xd7d   :  { %9572 = vmatpush1.bf16.msra.mxu1 %v14396_v18  ;;  %9603 = vmatprep.mubr.bf16.mxu1 %v17777_v33  ;;  %v7910_v18 = vld [vmem:[#allocation21 + $0x3d0] sm:$0xff] }
 0xd7e   :  { %9532 = vmatprep.subr.bf16.mxu0 %v14261_v59  ;;  %9573 = vmatprep.subr.bf16.mxu1 %v14389_v38  ;;  %v7914_v59 = vld [vmem:[#allocation21 + $0x3f0] sm:$0xff] }
 0xd7f   :  { %v8038_v38 = vld [vmem:[#allocation21 + $0x7d0] sm:$0xff]  ;;  %v14333_v61 = vcombine.high %v7910_v18, %v7914_v59  ;;  %v14332_v11 = vcombine.low %v7910_v18, %v7914_v59 }
 0xd80   :  { %9533 = vmatpush1.bf16.msra.mxu0 %v14260_v21  ;;  %v14461_v21 = vcombine.high %v8038_v38, %v8042_v44  ;;  %v14460_v55 = vcombine.low %v8038_v38, %v8042_v44  ;;  %v7994_v18 = vld [vmem:[#allocation21 + $0x670] sm:$0xff] }
 0xd81   :  { %9574 = vmatpush1.bf16.msra.mxu1 %v14388_v53  ;;  %9534 = vmatprep.subr.bf16.mxu0 %v14253_v46  ;;  %v7902_v53 = vld [vmem:[#allocation21 + $0x390] sm:$0xff] }
 0xd82   :  { %9575 = vmatprep.subr.bf16.mxu1 %v14381_v4  ;;  %v7906_v46 = vld [vmem:[#allocation21 + $0x3b0] sm:$0xff] }
 0xd83   :  { %v8030_v4 = vld [vmem:[#allocation21 + $0x790] sm:$0xff]  ;;  %v14325_v60 = vcombine.high %v7902_v53, %v7906_v46  ;;  %v14324_v3 = vcombine.low %v7902_v53, %v7906_v46 }
 0xd84   :  { %9535 = vmatpush1.bf16.msra.mxu0 %v14252_v40  ;;  %v14453_v40 = vcombine.high %v8030_v4, %v8034_v51  ;;  %v14452_v5 = vcombine.low %v8030_v4, %v8034_v51  ;;  %v7986_v53 = vld [vmem:[#allocation21 + $0x630] sm:$0xff] }
 0xd85   :  { %9576 = vmatpush1.bf16.msra.mxu1 %v14380_v0  ;;  %9536 = vmatprep.subr.bf16.mxu0 %v14245_v22  ;;  %v7894_v0 = vld [vmem:[#allocation21 + $0x350] sm:$0xff] }
 0xd86   :  { %9577 = vmatprep.subr.bf16.mxu1 %v14373_v13  ;;  %v7898_v22 = vld [vmem:[#allocation21 + $0x370] sm:$0xff] }
 0xd87   :  { %v8022_v13 = vld [vmem:[#allocation21 + $0x750] sm:$0xff]  ;;  %v14317_v6 = vcombine.high %v7894_v0, %v7898_v22  ;;  %v14316_v23 = vcombine.low %v7894_v0, %v7898_v22  ;;  %v7979_v0 = vld [vmem:[#allocation21 + $0x5f8] sm:$0xff] }
 0xd88   :  { %9537 = vmatpush1.bf16.msra.mxu0 %v14244_v7  ;;  %v14445_v7 = vcombine.high %v8022_v13, %v8026_v16  ;;  %v14444_v32 = vcombine.low %v8022_v13, %v8026_v16 }
 0xd89   :  { %9578 = vmatpush1.bf16.msra.mxu1 %v14372_v2  ;;  %9538 = vmatprep.subr.bf16.mxu0 %v14237_v54  ;;  %v7886_v2 = vld [vmem:[#allocation21 + $0x310] sm:$0xff] }
 0xd8a   :  { %9579 = vmatprep.subr.bf16.mxu1 %v14365_v19  ;;  %v7890_v54 = vld [vmem:[#allocation21 + $0x330] sm:$0xff] }
 0xd8b   :  { %v8014_v19 = vld [vmem:[#allocation21 + $0x710] sm:$0xff]  ;;  %v14309_v28 = vcombine.high %v7886_v2, %v7890_v54  ;;  %v14308_v47 = vcombine.low %v7886_v2, %v7890_v54  ;;  %v7967_v2 = vld [vmem:[#allocation21 + $0x598] sm:$0xff] }
 0xd8c   :  { %9539 = vmatpush1.bf16.msra.mxu0 %v14236_v27  ;;  %v14437_v27 = vcombine.high %v8014_v19, %v8018_v31  ;;  %v14436_v29 = vcombine.low %v8014_v19, %v8018_v31  ;;  %v7971_v54 = vld [vmem:[#allocation21 + $0x5b8] sm:$0xff] }
 0xd8d   :  { %9580 = vmatpush1.bf16.msra.mxu1 %v14364_v49  ;;  %9540 = vmatprep.subr.bf16.mxu0 %v14229_v12  ;;  %v7878_v49 = vld [vmem:[#allocation21 + $0x2d0] sm:$0xff] }
 0xd8e   :  { %9581 = vmatprep.subr.bf16.mxu1 %v14357_v36  ;;  %v7882_v12 = vld [vmem:[#allocation21 + $0x2f0] sm:$0xff] }
 0xd8f   :  { %v8006_v36 = vld [vmem:[#allocation21 + $0x6d0] sm:$0xff]  ;;  %v14301_v1 = vcombine.high %v7878_v49, %v7882_v12  ;;  %v14300_v41 = vcombine.low %v7878_v49, %v7882_v12  ;;  %v7963_v49 = vld [vmem:[#allocation21 + $0x578] sm:$0xff] }
 0xd90   :  { %9541 = vmatpush1.bf16.msra.mxu0 %v14228_v34  ;;  %v14429_v34 = vcombine.high %v8006_v36, %v8010_v25  ;;  %v14428_v58 = vcombine.low %v8006_v36, %v8010_v25  ;;  %v14390_v36 = vcombine.low %v7967_v2, %v7971_v54 }
 0xd91   :  { %9582 = vmatpush1.bf16.msra.mxu1 %v14356_v30  ;;  %9542 = vmatprep.subr.bf16.mxu0 %v14221_v57  ;;  %v7870_v30 = vld [vmem:[#allocation21 + $0x290] sm:$0xff] }
 0xd92   :  { %9583 = vmatprep.subr.bf16.mxu1 %v14349_v39  ;;  %v7874_v57 = vld [vmem:[#allocation21 + $0x2b0] sm:$0xff] }
 0xd93   :  { %v7998_v39 = vld [vmem:[#allocation21 + $0x690] sm:$0xff]  ;;  %v14293_v15 = vcombine.high %v7870_v30, %v7874_v57  ;;  %v14292_v59 = vcombine.low %v7870_v30, %v7874_v57  ;;  %v7955_v30 = vld [vmem:[#allocation21 + $0x538] sm:$0xff] }
 0xd94   :  { %9543 = vmatpush1.bf16.msra.mxu0 %v14220_v42  ;;  %v14421_v42 = vcombine.high %v7998_v39, %v8002_v35  ;;  %v14420_v38 = vcombine.low %v7998_v39, %v8002_v35 }
 0xd95   :  { %9584 = vmatpush1.bf16.msra.mxu1 %v14348_v9  ;;  %9544 = vmatprep.subr.bf16.mxu0 %v14213_v43  ;;  %v7862_v9 = vld [vmem:[#allocation21 + $0x250] sm:$0xff] }
 0xd96   :  { %9585 = vmatprep.subr.bf16.mxu1 %v14341_v48  ;;  %v7866_v43 = vld [vmem:[#allocation21 + $0x270] sm:$0xff] }
 0xd97   :  { %v7990_v48 = vld [vmem:[#allocation21 + $0x650] sm:$0xff]  ;;  %v14285_v44 = vcombine.high %v7862_v9, %v7866_v43  ;;  %v14284_v46 = vcombine.low %v7862_v9, %v7866_v43 }
 0xd98   :  { %9545 = vmatpush1.bf16.msra.mxu0 %v14212_v45  ;;  %v14413_v45 = vcombine.high %v7990_v48, %v7994_v18  ;;  %v14412_v4 = vcombine.low %v7990_v48, %v7994_v18  ;;  %v7807_v18 = vld [vmem:[#allocation21 + $0x98] sm:$0xff] }
 0xd99   :  { %9586 = vmatpush1.bf16.msra.mxu1 %v14340_v52  ;;  %9546 = vmatprep.subr.bf16.mxu0 %v14333_v61  ;;  %v7854_v52 = vld [vmem:[#allocation21 + $0x210] sm:$0xff] }
 0xd9a   :  { %9587 = vmatprep.subr.bf16.mxu1 %v14461_v21  ;;  %v7858_v61 = vld [vmem:[#allocation21 + $0x230] sm:$0xff] }
 0xd9b   :  { %v7982_v21 = vld [vmem:[#allocation21 + $0x610] sm:$0xff]  ;;  %v14277_v51 = vcombine.high %v7854_v52, %v7858_v61  ;;  %v14276_v22 = vcombine.low %v7854_v52, %v7858_v61 }
 0xd9c   :  { %9547 = vmatpush2.bf16.msra.mxu0 %v14332_v11  ;;  %v14405_v11 = vcombine.high %v7982_v21, %v7986_v53  ;;  %v14404_v13 = vcombine.low %v7982_v21, %v7986_v53  ;;  %v7799_v53 = vld [vmem:[#allocation21 + $0x58] sm:$0xff] }
 0xd9d   :  { %9588 = vmatpush2.bf16.msra.mxu1 %v14460_v55  ;;  %9548 = vmatprep.subr.bf16.mxu0 %v14325_v60  ;;  %v7847_v55 = vld [vmem:[#allocation21 + $0x1d8] sm:$0xff] }
 0xd9e   :  { %9589 = vmatprep.subr.bf16.mxu1 %v14453_v40  ;;  %v7851_v60 = vld [vmem:[#allocation21 + $0x1f8] sm:$0xff] }
 0xd9f   :  { %v7975_v40 = vld [vmem:[#allocation21 + $0x5d8] sm:$0xff]  ;;  %v14271_v16 = vcombine.high %v7847_v55, %v7851_v60 }
 0xda0   :  { %9549 = vmatpush2.bf16.msra.mxu0 %v14324_v3  ;;  %v14399_v3 = vcombine.high %v7975_v40, %v7979_v0  ;;  %v14398_v19 = vcombine.low %v7975_v40, %v7979_v0  ;;  %v7791_v0 = vld [vmem:[#allocation21 + $0x18] sm:$0xff] }
 0xda1   :  { %9590 = vmatpush2.bf16.msra.mxu1 %v14452_v5  ;;  %9550 = vmatprep.subr.bf16.mxu0 %v14317_v6  ;;  %v7839_v5 = vld [vmem:[#allocation21 + $0x198] sm:$0xff] }
 0xda2   :  { %9591 = vmatprep.subr.bf16.mxu1 %v14445_v7  ;;  %v7843_v6 = vld [vmem:[#allocation21 + $0x1b8] sm:$0xff]  ;;  %v14270_v7 = vcombine.low %v7847_v55, %v7851_v60 }
 0xda3   :  { %v14263_v31 = vcombine.high %v7839_v5, %v7843_v6  ;;  %v14262_v12 = vcombine.low %v7839_v5, %v7843_v6 }
 0xda4   :  { %9551 = vmatpush2.bf16.msra.mxu0 %v14316_v23  ;;  %v7831_v23 = vld [vmem:[#allocation21 + $0x158] sm:$0xff] }
 0xda5   :  { %9592 = vmatpush2.bf16.msra.mxu1 %v14444_v32  ;;  %9552 = vmatprep.subr.bf16.mxu0 %v14309_v28  ;;  %v7835_v32 = vld [vmem:[#allocation21 + $0x178] sm:$0xff]  ;;  %v14391_v28 = vcombine.high %v7967_v2, %v7971_v54 }
 0xda6   :  { %9593 = vmatprep.subr.bf16.mxu1 %v14437_v27  ;;  %v7959_v27 = vld [vmem:[#allocation21 + $0x558] sm:$0xff]  ;;  %v14255_v25 = vcombine.high %v7831_v23, %v7835_v32  ;;  %v14254_v57 = vcombine.low %v7831_v23, %v7835_v32 }
 0xda7   :  { %v14382_v39 = vcombine.low %v7959_v27, %v7963_v49  ;;  %v7911_v2 = vld [vmem:[#allocation21 + $0x3d8] sm:$0xff] }
 0xda8   :  { %9553 = vmatpush2.bf16.msra.mxu0 %v14308_v47  ;;  %v14383_v47 = vcombine.high %v7959_v27, %v7963_v49  ;;  %v7915_v54 = vld [vmem:[#allocation21 + $0x3f8] sm:$0xff] }
 0xda9   :  { %9594 = vmatpush2.bf16.msra.mxu1 %v14436_v29  ;;  %9554 = vmatprep.subr.bf16.mxu0 %v14301_v1  ;;  %v7823_v29 = vld [vmem:[#allocation21 + $0x118] sm:$0xff] }
 0xdaa   :  { %9595 = vmatprep.subr.bf16.mxu1 %v14429_v34  ;;  %v7827_v1 = vld [vmem:[#allocation21 + $0x138] sm:$0xff] }
 0xdab   :  { %v7951_v34 = vld [vmem:[#allocation21 + $0x518] sm:$0xff]  ;;  %v14247_v35 = vcombine.high %v7823_v29, %v7827_v1 }
 0xdac   :  { %9555 = vmatpush2.bf16.msra.mxu0 %v14300_v41  ;;  %v7815_v41 = vld [vmem:[#allocation21 + $0xd8] sm:$0xff]  ;;  %v14374_v9 = vcombine.low %v7951_v34, %v7955_v30 }
 0xdad   :  { %9596 = vmatpush2.bf16.msra.mxu1 %v14428_v58  ;;  %9556 = vmatprep.subr.bf16.mxu0 %v14293_v15  ;;  %v7819_v58 = vld [vmem:[#allocation21 + $0xf8] sm:$0xff] }
 0xdae   :  { %9597 = vmatprep.subr.bf16.mxu1 %v14421_v42  ;;  %v7943_v15 = vld [vmem:[#allocation21 + $0x4d8] sm:$0xff]  ;;  %v14239_v43 = vcombine.high %v7815_v41, %v7819_v58 }
 0xdaf   :  { %v7947_v42 = vld [vmem:[#allocation21 + $0x4f8] sm:$0xff] }
 0xdb0   :  { %9557 = vmatpush2.bf16.msra.mxu0 %v14292_v59  ;;  %v14367_v48 = vcombine.high %v7943_v15, %v7947_v42  ;;  %v7811_v59 = vld [vmem:[#allocation21 + $0xb8] sm:$0xff]  ;;  %v14366_v52 = vcombine.low %v7943_v15, %v7947_v42 }
 0xdb1   :  { %9598 = vmatpush2.bf16.msra.mxu1 %v14420_v38  ;;  %9558 = vmatprep.subr.bf16.mxu0 %v14285_v44  ;;  %v7935_v38 = vld [vmem:[#allocation21 + $0x498] sm:$0xff]  ;;  %v14231_v61 = vcombine.high %v7807_v18, %v7811_v59 }
 0xdb2   :  { %9599 = vmatprep.subr.bf16.mxu1 %v14413_v45  ;;  %v7939_v44 = vld [vmem:[#allocation21 + $0x4b8] sm:$0xff]  ;;  %v14238_v45 = vcombine.low %v7815_v41, %v7819_v58 }
 0xdb3   :  { %v14359_v21 = vcombine.high %v7935_v38, %v7939_v44  ;;  %v14358_v55 = vcombine.low %v7935_v38, %v7939_v44  ;;  %v7903_v49 = vld [vmem:[#allocation21 + $0x398] sm:$0xff] }
 0xdb4   :  { %9559 = vmatpush2.bf16.msra.mxu0 %v14284_v46  ;;  %v7803_v46 = vld [vmem:[#allocation21 + $0x78] sm:$0xff] }
 0xdb5   :  { %9600 = vmatpush2.bf16.msra.mxu1 %v14412_v4  ;;  %9560 = vmatprep.subr.bf16.mxu0 %v14277_v51  ;;  %v7927_v4 = vld [vmem:[#allocation21 + $0x458] sm:$0xff]  ;;  %v14223_v60 = vcombine.high %v7799_v53, %v7803_v46 }
 0xdb6   :  { %9601 = vmatprep.subr.bf16.mxu1 %v14405_v11  ;;  %v7931_v51 = vld [vmem:[#allocation21 + $0x478] sm:$0xff]  ;;  %v14230_v11 = vcombine.low %v7807_v18, %v7811_v59 }
 0xdb7   :  { %v14351_v40 = vcombine.high %v7927_v4, %v7931_v51  ;;  %v14350_v5 = vcombine.low %v7927_v4, %v7931_v51  ;;  %v7887_v42 = vld [vmem:[#allocation21 + $0x318] sm:$0xff] }
 0xdb8   :  { %9561 = vmatpush2.bf16.msra.mxu0 %v14276_v22  ;;  %v7795_v22 = vld [vmem:[#allocation21 + $0x38] sm:$0xff] }
 0xdb9   :  { %9602 = vmatpush2.bf16.msra.mxu1 %v14404_v13  ;;  %9612 = vmatprep.subr.bf16.mxu0 %v14271_v16  ;;  %v7919_v13 = vld [vmem:[#allocation21 + $0x418] sm:$0xff]  ;;  %v14215_v6 = vcombine.high %v7791_v0, %v7795_v22  ;;  %v14214_v23 = vcombine.low %v7791_v0, %v7795_v22 }
 0xdba   :  { %9653 = vmatprep.subr.bf16.mxu1 %v14399_v3  ;;  %v7923_v16 = vld [vmem:[#allocation21 + $0x438] sm:$0xff]  ;;  %v14222_v3 = vcombine.low %v7799_v53, %v7803_v46 }
 0xdbb   :  { %9563 = vmatmul.mubr.bf16.vlgmr.msra.gmra.mxu0 %v17779_v14  ;;  %v14342_v32 = vcombine.low %v7919_v13, %v7923_v16  ;;  %v7879_v44 = vld [vmem:[#allocation21 + $0x2d8] sm:$0xff] }
 0xdbc   :  { %9604 = vmatmul.mubr.bf16.vlgmr.msra.gmra.mxu1 %v17781_v17  ;;  %9613 = vmatpush1.bf16.msra.mxu0 %v14270_v7  ;;  %v14343_v7 = vcombine.high %v7919_v13, %v7923_v16  ;;  %v7871_v51 = vld [vmem:[#allocation21 + $0x298] sm:$0xff] }
 0xdbd   :  { %9644 = vmatprep.mubr.bf16.mxu0 %v17775_v10  ;;  %9654 = vmatpush1.bf16.msra.mxu1 %v14398_v19  ;;  %v14375_v10 = vcombine.high %v7951_v34, %v7955_v30  ;;  %v8039_v19 = vld [vmem:[#allocation21 + $0x7d8] sm:$0xff] }
 0xdbe   :  { %9685 = vmatprep.mubr.bf16.mxu1 %v17777_v33  ;;  %9614 = vmatprep.subr.bf16.mxu0 %v14263_v31  ;;  %v14246_v33 = vcombine.low %v7823_v29, %v7827_v1  ;;  %v8043_v31 = vld [vmem:[#allocation21 + $0x7f8] sm:$0xff] }
 0xdbf   :  { %9655 = vmatprep.subr.bf16.mxu1 %v14391_v28  ;;  %v14335_v28 = vcombine.high %v7911_v2, %v7915_v54  ;;  %v14463_v27 = vcombine.high %v8039_v19, %v8043_v31  ;;  %v14462_v29 = vcombine.low %v8039_v19, %v8043_v31  ;;  %v7895_v30 = vld [vmem:[#allocation21 + $0x358] sm:$0xff] }
 0xdc0   :  { %9615 = vmatpush1.bf16.msra.mxu0 %v14262_v12  ;;  %v7907_v12 = vld [vmem:[#allocation21 + $0x3b8] sm:$0xff] }
 0xdc1   :  { %9656 = vmatpush1.bf16.msra.mxu1 %v14390_v36  ;;  %9616 = vmatprep.subr.bf16.mxu0 %v14255_v25  ;;  %v8031_v36 = vld [vmem:[#allocation21 + $0x798] sm:$0xff]  ;;  %v14327_v1 = vcombine.high %v7903_v49, %v7907_v12 }
 0xdc2   :  { %9657 = vmatprep.subr.bf16.mxu1 %v14383_v47  ;;  %v8035_v25 = vld [vmem:[#allocation21 + $0x7b8] sm:$0xff]  ;;  %v14334_v47 = vcombine.low %v7911_v2, %v7915_v54 }
 0xdc3   :  { %v14455_v34 = vcombine.high %v8031_v36, %v8035_v25  ;;  %v14454_v41 = vcombine.low %v8031_v36, %v8035_v25  ;;  %v7863_v16 = vld [vmem:[#allocation21 + $0x258] sm:$0xff] }
 0xdc4   :  { %9617 = vmatpush1.bf16.msra.mxu0 %v14254_v57  ;;  %v7899_v57 = vld [vmem:[#allocation21 + $0x378] sm:$0xff] }
 0xdc5   :  { %9658 = vmatpush1.bf16.msra.mxu1 %v14382_v39  ;;  %9618 = vmatprep.subr.bf16.mxu0 %v14247_v35  ;;  %v8023_v39 = vld [vmem:[#allocation21 + $0x758] sm:$0xff]  ;;  %v14319_v58 = vcombine.high %v7895_v30, %v7899_v57 }
 0xdc6   :  { %9659 = vmatprep.subr.bf16.mxu1 %v14375_v10  ;;  %v8027_v35 = vld [vmem:[#allocation21 + $0x778] sm:$0xff]  ;;  %v14326_v10 = vcombine.low %v7903_v49, %v7907_v12 }
 0xdc7   :  { %v14447_v15 = vcombine.high %v8023_v39, %v8027_v35  ;;  %v14446_v18 = vcombine.low %v8023_v39, %v8027_v35  ;;  %v7855_v31 = vld [vmem:[#allocation21 + $0x218] sm:$0xff]  ;;  %v15950_v39 = vld [vmem:[#allocation22 + $0x508] ss:$28 sps:$4 sm:$0xff]  }
 0xdc8   :  { %9619 = vmatpush1.bf16.msra.mxu0 %v14246_v33  ;;  %v7891_v33 = vld [vmem:[#allocation21 + $0x338] sm:$0xff] }
 0xdc9   :  { %9660 = vmatpush1.bf16.msra.mxu1 %v14374_v9  ;;  %9620 = vmatprep.subr.bf16.mxu0 %v14239_v43  ;;  %v8015_v9 = vld [vmem:[#allocation21 + $0x718] sm:$0xff]  ;;  %v14311_v59 = vcombine.high %v7887_v42, %v7891_v33 }
 0xdca   :  { %9661 = vmatprep.subr.bf16.mxu1 %v14367_v48  ;;  %v8019_v43 = vld [vmem:[#allocation21 + $0x738] sm:$0xff]  ;;  %v14318_v48 = vcombine.low %v7895_v30, %v7899_v57  ;;  %v17797_v30 = vld [vmem:[#allocation42] sm:$0xff]  ;;  %v15943_v57 = vld [vmem:[#allocation22 + $0x154] ss:$28 sps:$4 sm:$0xff]  }
 0xdcb   :  { %v14439_v38 = vcombine.high %v8015_v9, %v8019_v43  ;;  %v14438_v53 = vcombine.low %v8015_v9, %v8019_v43  ;;  %v8053_v35 = vrot.slane %v17797_v30, %v17543_v8  ;;  %v15946_v9 = vld [vmem:[#allocation22 + $0x11c] ss:$28 sps:$4 sm:$0xff]   ;;  %v15956_v43 = vld [vmem:[#allocation22 + $0x4d0] ss:$28 sps:$4 sm:$0xff]  }
 0xdcc   :  { %9621 = vmatpush1.bf16.msra.mxu0 %v14238_v45  ;;  %v7883_v45 = vld [vmem:[#allocation21 + $0x2f8] sm:$0xff] }
 0xdcd   :  { %9662 = vmatpush1.bf16.msra.mxu1 %v14366_v52  ;;  %9622 = vmatprep.subr.bf16.mxu0 %v14231_v61  ;;  %v8007_v52 = vld [vmem:[#allocation21 + $0x6d8] sm:$0xff]  ;;  %v14303_v46 = vcombine.high %v7879_v44, %v7883_v45 }
 0xdce   :  { %9663 = vmatprep.subr.bf16.mxu1 %v14359_v21  ;;  %v8011_v61 = vld [vmem:[#allocation21 + $0x6f8] sm:$0xff]  ;;  %v14310_v21 = vcombine.low %v7887_v42, %v7891_v33 }
 0xdcf   :  { %v14431_v4 = vcombine.high %v8007_v52, %v8011_v61  ;;  %v14430_v0 = vcombine.low %v8007_v52, %v8011_v61  ;;  %v15962_v61 = vld [vmem:[#allocation22 + $0x498] ss:$28 sps:$4 sm:$0xff]  }
 0xdd0   :  { %9623 = vmatpush1.bf16.msra.mxu0 %v14230_v11  ;;  %v7875_v11 = vld [vmem:[#allocation21 + $0x2b8] sm:$0xff] }
 0xdd1   :  { %9664 = vmatpush1.bf16.msra.mxu1 %v14358_v55  ;;  %9624 = vmatprep.subr.bf16.mxu0 %v14223_v60  ;;  %v7999_v55 = vld [vmem:[#allocation21 + $0x698] sm:$0xff]  ;;  %v14295_v22 = vcombine.high %v7871_v51, %v7875_v11 }
 0xdd2   :  { %9665 = vmatprep.subr.bf16.mxu1 %v14351_v40  ;;  %v8003_v60 = vld [vmem:[#allocation21 + $0x6b8] sm:$0xff]  ;;  %v14302_v40 = vcombine.low %v7879_v44, %v7883_v45 }
 0xdd3   :  { %v14423_v13 = vcombine.high %v7999_v55, %v8003_v60  ;;  %v14422_v2 = vcombine.low %v7999_v55, %v8003_v60  ;;  %v15944_v44 = vld [vmem:[#allocation22 + $0x118] ss:$28 sps:$4 sm:$0xff]   ;;  %v15976_v55 = vld [vmem:[#allocation22 + $0x42c] ss:$28 sps:$4 sm:$0xff]  }
 0xdd4   :  { %9625 = vmatpush1.bf16.msra.mxu0 %v14222_v3  ;;  %v7867_v3 = vld [vmem:[#allocation21 + $0x278] sm:$0xff]  ;;  %v15953_v60 = vld [vmem:[#allocation22 + $0xa8] ss:$28 sps:$4 sm:$0xff]  }
 0xdd5   :  { %9666 = vmatpush1.bf16.msra.mxu1 %v14350_v5  ;;  %9626 = vmatprep.subr.bf16.mxu0 %v14215_v6  ;;  %v7991_v5 = vld [vmem:[#allocation21 + $0x658] sm:$0xff]  ;;  %v14287_v54 = vcombine.high %v7863_v16, %v7867_v3 }
 0xdd6   :  { %9667 = vmatprep.subr.bf16.mxu1 %v14343_v7  ;;  %v7995_v6 = vld [vmem:[#allocation21 + $0x678] sm:$0xff]  ;;  %v14294_v7 = vcombine.low %v7871_v51, %v7875_v11  ;;  %v15955_v51 = vld [vmem:[#allocation22 + $0xac] ss:$28 sps:$4 sm:$0xff]  }
 0xdd7   :  { %v14415_v19 = vcombine.high %v7991_v5, %v7995_v6  ;;  %v14414_v49 = vcombine.low %v7991_v5, %v7995_v6  ;;  %v15968_v11 = vld [vmem:[#allocation22 + $0x460] ss:$28 sps:$4 sm:$0xff]   ;;  %v15965_v6 = vld [vmem:[#allocation22 + $0x38] ss:$28 sps:$4 sm:$0xff]  }
 0xdd8   :  { %9627 = vmatpush1.bf16.msra.mxu0 %v14214_v23  ;;  %v7859_v23 = vld [vmem:[#allocation21 + $0x238] sm:$0xff] }
 0xdd9   :  { %9668 = vmatpush1.bf16.msra.mxu1 %v14342_v32  ;;  %9628 = vmatprep.subr.bf16.mxu0 %v14335_v28  ;;  %v7983_v32 = vld [vmem:[#allocation21 + $0x618] sm:$0xff]  ;;  %v14279_v12 = vcombine.high %v7855_v31, %v7859_v23  ;;  %v14278_v25 = vcombine.low %v7855_v31, %v7859_v23  ;;  %v15979_v31 = vld [vmem:[#allocation22 + $0x34c] ss:$28 sps:$4 sm:$0xff]  }
 0xdda   :  { %9669 = vmatprep.subr.bf16.mxu1 %v14463_v27  ;;  %v7987_v28 = vld [vmem:[#allocation21 + $0x638] sm:$0xff]  ;;  %v14286_v27 = vcombine.low %v7863_v16, %v7867_v3  ;;  %v15980_v3 = vld [vmem:[#allocation22 + $0x3f0] ss:$28 sps:$4 sm:$0xff]  }
 0xddb   :  { %v14407_v36 = vcombine.high %v7983_v32, %v7987_v28  ;;  %v15967_v16 = vld [vmem:[#allocation22 + $0x3c] ss:$28 sps:$4 sm:$0xff]  }
 0xddc   :  { %9629 = vmatpush2.bf16.msra.mxu0 %v14334_v47  ;;  %v14406_v47 = vcombine.low %v7983_v32, %v7987_v28  ;;  %v15988_v5 = vld [vmem:[#allocation22 + $0x3bc] ss:$28 sps:$4 sm:$0xff]   ;;  %v16000_v32 = vld [vmem:[#allocation22 + $0x6cc] ss:$28 sps:$4 sm:$0xff]  }
 0xddd   :  { %9670 = vmatpush2.bf16.msra.mxu1 %v14462_v29  ;;  %9630 = vmatprep.subr.bf16.mxu0 %v14327_v1  ;;  %v15940_v29 = vld [vmem:[#allocation22 + $0x18c] ss:$28 sps:$4 sm:$0xff]   ;;  %v15992_v23 = vld [vmem:[#allocation22 + $0x380] ss:$28 sps:$4 sm:$0xff]  }
 0xdde   :  { %9671 = vmatprep.subr.bf16.mxu1 %v14455_v34  ;;  %v15952_v1 = vld [vmem:[#allocation22 + $0x50c] ss:$28 sps:$4 sm:$0xff]  }
 0xddf   :  { %v15938_v34 = vld [vmem:[#allocation22 + $0x188] ss:$28 sps:$4 sm:$0xff]  }
 0xde0   :  { %9631 = vmatpush2.bf16.msra.mxu0 %v14326_v10  ;;  %v15958_v10 = vld [vmem:[#allocation22 + $0x4d4] ss:$28 sps:$4 sm:$0xff]   ;;  %v15977_v28 = vld [vmem:[#allocation22 + $0x348] ss:$28 sps:$4 sm:$0xff]  }
 0xde1   :  { %9672 = vmatpush2.bf16.msra.mxu1 %v14454_v41  ;;  %9632 = vmatprep.subr.bf16.mxu0 %v14319_v58 }
 0xde2   :  { %9673 = vmatprep.subr.bf16.mxu1 %v14447_v15  ;;  %v15941_v15 = vld [vmem:[#allocation22 + $0x150] ss:$28 sps:$4 sm:$0xff]  }
 0xde4   :  { %9633 = vmatpush2.bf16.msra.mxu0 %v14318_v48 }
 0xde5   :  { %9674 = vmatpush2.bf16.msra.mxu1 %v14446_v18  ;;  %9634 = vmatprep.subr.bf16.mxu0 %v14311_v59  ;;  %v15964_v18 = vld [vmem:[#allocation22 + $0x49c] ss:$28 sps:$4 sm:$0xff]  }
 0xde6   :  { %9675 = vmatprep.subr.bf16.mxu1 %v14439_v38 }
 0xde8   :  { %9635 = vmatpush2.bf16.msra.mxu0 %v14310_v21 }
 0xde9   :  { %9676 = vmatpush2.bf16.msra.mxu1 %v14438_v53  ;;  %9636 = vmatprep.subr.bf16.mxu0 %v14303_v46  ;;  %v15970_v53 = vld [vmem:[#allocation22 + $0x464] ss:$28 sps:$4 sm:$0xff]  }
 0xdea   :  { %9677 = vmatprep.subr.bf16.mxu1 %v14431_v4  ;;  %v15947_v4 = vld [vmem:[#allocation22 + $0xe0] ss:$28 sps:$4 sm:$0xff]  }
 0xdec   :  { %9637 = vmatpush2.bf16.msra.mxu0 %v14302_v40  ;;  %v15961_v40 = vld [vmem:[#allocation22 + $0x74] ss:$28 sps:$4 sm:$0xff]  }
 0xded   :  { %9678 = vmatpush2.bf16.msra.mxu1 %v14430_v0  ;;  %9638 = vmatprep.subr.bf16.mxu0 %v14295_v22  ;;  %v15974_v0 = vld [vmem:[#allocation22 + $0x428] ss:$28 sps:$4 sm:$0xff]   ;;  %v15982_v22 = vld [vmem:[#allocation22 + $0x3f4] ss:$28 sps:$4 sm:$0xff]  }
 0xdee   :  { %9679 = vmatprep.subr.bf16.mxu1 %v14423_v13  ;;  %v15959_v13 = vld [vmem:[#allocation22 + $0x70] ss:$28 sps:$4 sm:$0xff]  }
 0xdf0   :  { %9639 = vmatpush2.bf16.msra.mxu0 %v14294_v7  ;;  %v15973_v7 = vld [vmem:[#allocation22 + $0x4] ss:$28 sps:$4 sm:$0xff]  }
 0xdf1   :  { %9680 = vmatpush2.bf16.msra.mxu1 %v14422_v2  ;;  %9640 = vmatprep.subr.bf16.mxu0 %v14287_v54  ;;  %v15986_v2 = vld [vmem:[#allocation22 + $0x3b8] ss:$28 sps:$4 sm:$0xff]   ;;  %v15994_v54 = vld [vmem:[#allocation22 + $0x384] ss:$28 sps:$4 sm:$0xff]  }
 0xdf2   :  { %9681 = vmatprep.subr.bf16.mxu1 %v14415_v19  ;;  %v15971_v19 = vld [vmem:[#allocation22] ss:$28 sps:$4 sm:$0xff]  }
 0xdf4   :  { %9641 = vmatpush2.bf16.msra.mxu0 %v14286_v27  ;;  %v15985_v27 = vld [vmem:[#allocation22 + $0x314] ss:$28 sps:$4 sm:$0xff]  }
 0xdf5   :  { %9682 = vmatpush2.bf16.msra.mxu1 %v14414_v49  ;;  %9642 = vmatprep.subr.bf16.mxu0 %v14279_v12  ;;  %v15998_v49 = vld [vmem:[#allocation22 + $0x6c8] ss:$28 sps:$4 sm:$0xff]   ;;  %v16006_v12 = vld [vmem:[#allocation22 + $0x694] ss:$28 sps:$4 sm:$0xff]  }
 0xdf6   :  { %9683 = vmatprep.subr.bf16.mxu1 %v14407_v36  ;;  %v15983_v36 = vld [vmem:[#allocation22 + $0x310] ss:$28 sps:$4 sm:$0xff]  }
 0xdf8   :  { %9643 = vmatpush2.bf16.msra.mxu0 %v14278_v25  ;;  %v15991_v25 = vld [vmem:[#allocation22 + $0x2dc] ss:$28 sps:$4 sm:$0xff]  }
 0xdf9   :  { %9684 = vmatpush2.bf16.msra.mxu1 %v14406_v47  ;;  %12563 = vmatprep.subr.bf16.mxu0 %v15940_v29  ;;  %v16004_v47 = vld [vmem:[#allocation22 + $0x690] ss:$28 sps:$4 sm:$0xff]   ;;  %v16012_v29 = vld [vmem:[#allocation22 + $0x65c] ss:$28 sps:$4 sm:$0xff]  }
 0xdfa   :  { %12604 = vmatprep.subr.bf16.mxu1 %v15952_v1  ;;  %v15989_v1 = vld [vmem:[#allocation22 + $0x2d8] ss:$28 sps:$4 sm:$0xff]  }
 0xdfb   :  { %9645 = vmatmul.mubr.bf16.vlgmr.msra.gmra.mxu0 %v17779_v14  ;;  %v17802_v41 = vpop.f32.mrf.mxu0  ;;  %v17804_v58 = vpop.f32.mrf.mxu1 }
 0xdfc   :  { %9686 = vmatmul.mubr.bf16.vlgmr.msra.gmra.mxu1 %v17781_v17  ;;  %12564 = vmatpush1.bf16.msra.mxu0 %v15938_v34  ;;  %v15949_v17 = vld [vmem:[#allocation22 + $0xe4] ss:$28 sps:$4 sm:$0xff]  }
 0xdfd   :  { %v9402_v42 = vpop.f32.mrf.mxu0  ;;  %v9443_v33 = vpop.f32.mrf.mxu1  ;;  %12565 = vmatprep.subr.bf16.mxu0 %v15943_v57  ;;  %12605 = vmatpush1.bf16.msra.mxu1 %v15950_v39  ;;  %v15997_v34 = vld [vmem:[#allocation22 + $0x2a4] ss:$28 sps:$4 sm:$0xff]   ;;  %v16010_v57 = vld [vmem:[#allocation22 + $0x658] ss:$28 sps:$4 sm:$0xff]  }
 0xdfe   :  { %v9403_v48 = vadd.f32 %v9402_v42, %v8053_v35  ;;  %12606 = vmatprep.subr.bf16.mxu1 %v15958_v10  ;;  %v16018_v39 = vld [vmem:[#allocation22 + $0x624] ss:$28 sps:$4 sm:$0xff]   ;;  %v16003_v10 = vld [vmem:[#allocation22 + $0x26c] ss:$28 sps:$4 sm:$0xff]  }
 0xdff   :  { %v9404_v59 = vpop.f32.mrf.mxu0  ;;  %v9445_v38 = vpop.f32.mrf.mxu1  ;;  %v15995_v35 = vld [vmem:[#allocation22 + $0x2a0] ss:$28 sps:$4 sm:$0xff]   ;;  %v16024_v42 = vld [vmem:[#allocation22 + $0x5ec] ss:$28 sps:$4 sm:$0xff]  }
 0xe00   :  { %v9444_v14 = vadd.f32 %v9443_v33, %v9403_v48  ;;  %12566 = vmatpush1.bf16.msra.mxu0 %v15941_v15  ;;  %v16016_v15 = vld [vmem:[#allocation22 + $0x620] ss:$28 sps:$4 sm:$0xff]   ;;  %v16001_v33 = vld [vmem:[#allocation22 + $0x268] ss:$28 sps:$4 sm:$0xff]   ;;  %v16007_v59 = vld [vmem:[#allocation22 + $0x230] ss:$28 sps:$4 sm:$0xff]  }
 0xe01   :  { %v9405_v45 = vpop.f32.mrf.mxu0  ;;  %v9446_v52 = vpop.f32.mrf.mxu1  ;;  %12567 = vmatprep.subr.bf16.mxu0 %v15946_v9  ;;  %12607 = vmatpush1.bf16.msra.mxu1 %v15956_v43  ;;  %v8049_v9 = vrot.slane %v17797_v30, %v17540_v62  ;;  %v16009_v43 = vld [vmem:[#allocation22 + $0x234] ss:$28 sps:$4 sm:$0xff]   ;;  %v16022_v48 = vld [vmem:[#allocation22 + $0x5e8] ss:$28 sps:$4 sm:$0xff]  }
 0xe02   :  { %v9695_v21 = vmax.f32 %v9444_v14, 0.0  ;;  %12608 = vmatprep.subr.bf16.mxu1 %v15964_v18  ;;  %v16027_v18 = vld [vmem:[#allocation22 + $0x5b4] ss:$28 sps:$4 sm:$0xff]   ;;  %v16015_v14 = vld [vmem:[#allocation22 + $0x1fc] ss:$28 sps:$4 sm:$0xff]  }
 0xe03   :  { %v9401_v38 = vadd.f32 %v17802_v41, %v8049_v9  ;;  %v16030_v45 = vld [vmem:[#allocation22 + $0x57c] ss:$28 sps:$4 sm:$0xff]  }
 0xe04   :  { %v17807_v46 = vpack.c.bf16 %v9695_v21, %v9695_v21  ;;  %12568 = vmatpush1.bf16.msra.mxu0 %v15944_v44  ;;  %v16025_v44 = vld [vmem:[#allocation22 + $0x5b0] ss:$28 sps:$4 sm:$0xff]   ;;  %v16013_v52 = vld [vmem:[#allocation22 + $0x1f8] ss:$28 sps:$4 sm:$0xff]   ;;  %v16031_v41 = vld [vmem:[#allocation22 + $0x540] ss:$28 sps:$4 sm:$0xff]  }
 0xe05   :  { %12569 = vmatprep.subr.bf16.mxu0 %v15949_v17  ;;  %12609 = vmatpush1.bf16.msra.mxu1 %v15962_v61  ;;  %v9442_v17 = vadd.f32 %v17804_v58, %v9401_v38  ;;  %v16021_v61 = vld [vmem:[#allocation22 + $0x1c4] ss:$28 sps:$4 sm:$0xff]   ;;  %v16028_v21 = vld [vmem:[#allocation22 + $0x578] ss:$28 sps:$4 sm:$0xff]  }
 0xe06   :  { %12595 = vmatprep.mubr.bf16.mxu0 %v17807_v46  ;;  %12610 = vmatprep.subr.bf16.mxu1 %v15970_v53  ;;  %v16033_v53 = vld [vmem:[#allocation22 + $0x544] ss:$28 sps:$4 sm:$0xff]   ;;  %v16094_v9 = vld [vmem:[#allocation22 + $0xb98] ss:$28 sps:$4 sm:$0xff]  }
 0xe07   :  { %v16034_v58 = vld [vmem:[#allocation22 + $0x888] ss:$28 sps:$4 sm:$0xff]  }
 0xe08   :  { %12570 = vmatpush1.bf16.msra.mxu0 %v15947_v4  ;;  %v16019_v4 = vld [vmem:[#allocation22 + $0x1c0] ss:$28 sps:$4 sm:$0xff]  }
 0xe09   :  { %12571 = vmatprep.subr.bf16.mxu0 %v15955_v51  ;;  %12611 = vmatpush1.bf16.msra.mxu1 %v15968_v11  ;;  %v9694_v51 = vmax.f32 %v9442_v17, 0.0  ;;  %v16036_v11 = vld [vmem:[#allocation22 + $0x88c] ss:$28 sps:$4 sm:$0xff]   ;;  %v16057_v38 = vld [vmem:[#allocation22 + $0x704] ss:$28 sps:$4 sm:$0xff]  }
 0xe0a   :  { %12612 = vmatprep.subr.bf16.mxu1 %v15976_v55  ;;  %v16084_v55 = vld [vmem:[#allocation22 + $0xc0c] ss:$28 sps:$4 sm:$0xff]   ;;  %v16114_v17 = vld [vmem:[#allocation22 + $0xaf4] ss:$28 sps:$4 sm:$0xff]  }
 0xe0c   :  { %12572 = vmatpush1.bf16.msra.mxu0 %v15953_v60  ;;  %v8057_v60 = vrot.slane %v17797_v30, %v17576_v26 }
 0xe0d   :  { %12573 = vmatprep.subr.bf16.mxu0 %v15961_v40  ;;  %12613 = vmatpush1.bf16.msra.mxu1 %v15974_v0  ;;  %v17816_v40 = vpack.c.bf16 %v9694_v51, %v9694_v51  ;;  %v16039_v0 = vld [vmem:[#allocation22 + $0x854] ss:$28 sps:$4 sm:$0xff]  }
 0xe0e   :  { %12614 = vmatprep.subr.bf16.mxu1 %v15982_v22  ;;  %v8061_v22 = vrot.slane %v17797_v30, %v17597_v37  ;;  %v16061_v51 = vld [vmem:[#allocation22 + $0xa10] ss:$28 sps:$4 sm:$0xff]  }
 0xe10   :  { %12574 = vmatpush1.bf16.msra.mxu0 %v15959_v13 }
 0xe11   :  { %12575 = vmatprep.subr.bf16.mxu0 %v15967_v16  ;;  %12615 = vmatpush1.bf16.msra.mxu1 %v15980_v3 }
 0xe12   :  { %12616 = vmatprep.subr.bf16.mxu1 %v15988_v5  ;;  %v16037_v5 = vld [vmem:[#allocation22 + $0x850] ss:$28 sps:$4 sm:$0xff]  }
 0xe14   :  { %12576 = vmatpush1.bf16.msra.mxu0 %v15965_v6 }
 0xe15   :  { %12577 = vmatprep.subr.bf16.mxu0 %v15973_v7  ;;  %12617 = vmatpush1.bf16.msra.mxu1 %v15986_v2  ;;  %v16042_v2 = vld [vmem:[#allocation22 + $0x81c] ss:$28 sps:$4 sm:$0xff]  }
 0xe16   :  { %12618 = vmatprep.subr.bf16.mxu1 %v15994_v54 }
 0xe18   :  { %12578 = vmatpush1.bf16.msra.mxu0 %v15971_v19 }
 0xe19   :  { %12579 = vmatprep.subr.bf16.mxu0 %v15979_v31  ;;  %12619 = vmatpush1.bf16.msra.mxu1 %v15992_v23 }
 0xe1a   :  { %12620 = vmatprep.subr.bf16.mxu1 %v16000_v32 }
 0xe1c   :  { %12580 = vmatpush2.bf16.msra.mxu0 %v15977_v28  ;;  %v16040_v28 = vld [vmem:[#allocation22 + $0x818] ss:$28 sps:$4 sm:$0xff]  }
 0xe1d   :  { %12581 = vmatprep.subr.bf16.mxu0 %v15985_v27  ;;  %12621 = vmatpush2.bf16.msra.mxu1 %v15998_v49 }
 0xe1e   :  { %12622 = vmatprep.subr.bf16.mxu1 %v16006_v12 }
 0xe20   :  { %12582 = vmatpush2.bf16.msra.mxu0 %v15983_v36  ;;  %v16045_v36 = vld [vmem:[#allocation22 + $0x7e4] ss:$28 sps:$4 sm:$0xff]  }
 0xe21   :  { %12583 = vmatprep.subr.bf16.mxu0 %v15991_v25  ;;  %12623 = vmatpush2.bf16.msra.mxu1 %v16004_v47 }
 0xe22   :  { %12624 = vmatprep.subr.bf16.mxu1 %v16012_v29  ;;  %v16043_v29 = vld [vmem:[#allocation22 + $0x7e0] ss:$28 sps:$4 sm:$0xff]  }
 0xe24   :  { %12584 = vmatpush2.bf16.msra.mxu0 %v15989_v1  ;;  %v16082_v1 = vld [vmem:[#allocation22 + $0xc08] ss:$28 sps:$4 sm:$0xff]  }
 0xe25   :  { %12585 = vmatprep.subr.bf16.mxu0 %v15997_v34  ;;  %12625 = vmatpush2.bf16.msra.mxu1 %v16010_v57  ;;  %v16048_v57 = vld [vmem:[#allocation22 + $0x7ac] ss:$28 sps:$4 sm:$0xff]  }
 0xe26   :  { %12626 = vmatprep.subr.bf16.mxu1 %v16018_v39  ;;  %v16090_v39 = vld [vmem:[#allocation22 + $0xbd4] ss:$28 sps:$4 sm:$0xff]  }
 0xe28   :  { %12586 = vmatpush2.bf16.msra.mxu0 %v15995_v35  ;;  %v16046_v35 = vld [vmem:[#allocation22 + $0x7a8] ss:$28 sps:$4 sm:$0xff]  }
 0xe29   :  { %12587 = vmatprep.subr.bf16.mxu0 %v16003_v10  ;;  %12627 = vmatpush2.bf16.msra.mxu1 %v16016_v15  ;;  %v16088_v10 = vld [vmem:[#allocation22 + $0xbd0] ss:$28 sps:$4 sm:$0xff]  }
 0xe2a   :  { %12628 = vmatprep.subr.bf16.mxu1 %v16024_v42  ;;  %v16051_v15 = vld [vmem:[#allocation22 + $0x774] ss:$28 sps:$4 sm:$0xff]   ;;  %v16096_v42 = vld [vmem:[#allocation22 + $0xb9c] ss:$28 sps:$4 sm:$0xff]  }
 0xe2c   :  { %12588 = vmatpush2.bf16.msra.mxu0 %v16001_v33  ;;  %v16049_v33 = vld [vmem:[#allocation22 + $0x770] ss:$28 sps:$4 sm:$0xff]  }
 0xe2d   :  { %12589 = vmatprep.subr.bf16.mxu0 %v16009_v43  ;;  %12629 = vmatpush2.bf16.msra.mxu1 %v16022_v48  ;;  %v16054_v43 = vld [vmem:[#allocation22 + $0x73c] ss:$28 sps:$4 sm:$0xff]   ;;  %v16102_v48 = vld [vmem:[#allocation22 + $0xb64] ss:$28 sps:$4 sm:$0xff]  }
 0xe2e   :  { %12630 = vmatprep.subr.bf16.mxu1 %v16027_v18  ;;  %v16052_v18 = vld [vmem:[#allocation22 + $0x738] ss:$28 sps:$4 sm:$0xff]  }
 0xe30   :  { %12590 = vmatpush2.bf16.msra.mxu0 %v16007_v59  ;;  %v16100_v59 = vld [vmem:[#allocation22 + $0xb60] ss:$28 sps:$4 sm:$0xff]  }
 0xe31   :  { %12591 = vmatprep.subr.bf16.mxu0 %v16015_v14  ;;  %12631 = vmatpush2.bf16.msra.mxu1 %v16025_v44  ;;  %v16108_v14 = vld [vmem:[#allocation22 + $0xb2c] ss:$28 sps:$4 sm:$0xff]   ;;  %v16055_v44 = vld [vmem:[#allocation22 + $0x700] ss:$28 sps:$4 sm:$0xff]  }
 0xe32   :  { %12632 = vmatprep.subr.bf16.mxu1 %v16030_v45  ;;  %v16106_v45 = vld [vmem:[#allocation22 + $0xb28] ss:$28 sps:$4 sm:$0xff]  }
 0xe34   :  { %12592 = vmatpush2.bf16.msra.mxu0 %v16013_v52  ;;  %v16060_v52 = vld [vmem:[#allocation22 + $0xa4c] ss:$28 sps:$4 sm:$0xff]  }
 0xe35   :  { %12593 = vmatprep.subr.bf16.mxu0 %v16021_v61  ;;  %12633 = vmatpush2.bf16.msra.mxu1 %v16028_v21  ;;  %v16058_v61 = vld [vmem:[#allocation22 + $0xa48] ss:$28 sps:$4 sm:$0xff]   ;;  %v16112_v21 = vld [vmem:[#allocation22 + $0xaf0] ss:$28 sps:$4 sm:$0xff]  }
 0xe36   :  { %12634 = vmatprep.subr.bf16.mxu1 %v16033_v53  ;;  %v16063_v53 = vld [vmem:[#allocation22 + $0xa14] ss:$28 sps:$4 sm:$0xff]  }
 0xe38   :  { %12594 = vmatpush2.bf16.msra.mxu0 %v16019_v4  ;;  %v16120_v4 = vld [vmem:[#allocation22 + $0xabc] ss:$28 sps:$4 sm:$0xff]  }
 0xe39   :  { %12635 = vmatpush2.bf16.msra.mxu1 %v16031_v41  ;;  %12645 = vmatprep.subr.bf16.mxu0 %v16036_v11  ;;  %v16118_v41 = vld [vmem:[#allocation22 + $0xab8] ss:$28 sps:$4 sm:$0xff]  }
 0xe3a   :  { %12686 = vmatprep.subr.bf16.mxu1 %v16084_v55  ;;  %v16066_v11 = vld [vmem:[#allocation22 + $0x9dc] ss:$28 sps:$4 sm:$0xff]   ;;  %v16126_v55 = vld [vmem:[#allocation22 + $0xa84] ss:$28 sps:$4 sm:$0xff]  }
 0xe3b   :  { %v9482_v13 = vpop.f32.mrf.mxu0  ;;  %v9523_v16 = vpop.f32.mrf.mxu1  ;;  %12596 = vmatmul.mubr.bf16.vlgmr.msra.gmra.mxu0 %v17816_v40 }
 0xe3c   :  { %v9483_v3 = vadd.f32 %v9482_v13, %v8057_v60  ;;  %12646 = vmatpush1.bf16.msra.mxu0 %v16034_v58  ;;  %v16064_v60 = vld [vmem:[#allocation22 + $0x9d8] ss:$28 sps:$4 sm:$0xff]   ;;  %v16124_v58 = vld [vmem:[#allocation22 + $0xa80] ss:$28 sps:$4 sm:$0xff]  }
 0xe3d   :  { %v9484_v6 = vpop.f32.mrf.mxu0  ;;  %v9525_v7 = vpop.f32.mrf.mxu1  ;;  %12647 = vmatprep.subr.bf16.mxu0 %v16039_v0  ;;  %v16069_v0 = vld [vmem:[#allocation22 + $0x9a4] ss:$28 sps:$4 sm:$0xff]  }
 0xe3e   :  { %v9524_v54 = vadd.f32 %v9523_v16, %v9483_v3  ;;  %v9485_v19 = vadd.f32 %v9484_v6, %v8061_v22  ;;  %v16132_v22 = vld [vmem:[#allocation22 + $0xdcc] ss:$28 sps:$4 sm:$0xff]   ;;  %v16067_v13 = vld [vmem:[#allocation22 + $0x9a0] ss:$28 sps:$4 sm:$0xff]  }
 0xe3f   :  { %v9486_v31 = vpop.f32.mrf.mxu0  ;;  %v9527_v23 = vpop.f32.mrf.mxu1  ;;  %v16130_v16 = vld [vmem:[#allocation22 + $0xdc8] ss:$28 sps:$4 sm:$0xff]  }
 0xe40   :  { %v9526_v32 = vadd.f32 %v9525_v7, %v9485_v19  ;;  %12648 = vmatpush1.bf16.msra.mxu0 %v16037_v5  ;;  %v9696_v27 = vmax.f32 %v9524_v54, 0.0  ;;  %v16072_v3 = vld [vmem:[#allocation22 + $0x96c] ss:$28 sps:$4 sm:$0xff]   ;;  %v16138_v5 = vld [vmem:[#allocation22 + $0xd94] ss:$28 sps:$4 sm:$0xff]  }
 0xe41   :  { %v9487_v49 = vpop.f32.mrf.mxu0  ;;  %v9528_v12 = vpop.f32.mrf.mxu1  ;;  %12649 = vmatprep.subr.bf16.mxu0 %v16042_v2  ;;  %v16070_v6 = vld [vmem:[#allocation22 + $0x968] ss:$28 sps:$4 sm:$0xff]   ;;  %v16136_v7 = vld [vmem:[#allocation22 + $0xd90] ss:$28 sps:$4 sm:$0xff]   ;;  %v16144_v54 = vld [vmem:[#allocation22 + $0xd5c] ss:$28 sps:$4 sm:$0xff]  }
 0xe42   :  { %v9697_v25 = vmax.f32 %v9526_v32, 0.0  ;;  %v17823_v34 = vpack.c.bf16 %v9696_v27, %v9696_v27  ;;  %v16075_v2 = vld [vmem:[#allocation22 + $0x934] ss:$28 sps:$4 sm:$0xff]   ;;  %v16078_v23 = vld [vmem:[#allocation22 + $0x8fc] ss:$28 sps:$4 sm:$0xff]  }
 0xe43   :  { %v16073_v19 = vld [vmem:[#allocation22 + $0x930] ss:$28 sps:$4 sm:$0xff]   ;;  %v16142_v31 = vld [vmem:[#allocation22 + $0xd58] ss:$28 sps:$4 sm:$0xff]   ;;  %v16150_v32 = vld [vmem:[#allocation22 + $0xd24] ss:$28 sps:$4 sm:$0xff]  }
 0xe44   :  { %v17821_v47 = vpack.c.bf16 %v9697_v25, %v9697_v25  ;;  %12650 = vmatpush1.bf16.msra.mxu0 %v16040_v28  ;;  %v16076_v28 = vld [vmem:[#allocation22 + $0x8f8] ss:$28 sps:$4 sm:$0xff]   ;;  %v16148_v27 = vld [vmem:[#allocation22 + $0xd20] ss:$28 sps:$4 sm:$0xff]   ;;  %v16156_v12 = vld [vmem:[#allocation22 + $0xcec] ss:$28 sps:$4 sm:$0xff]  }
 0xe45   :  { %12651 = vmatprep.subr.bf16.mxu0 %v16045_v36  ;;  %v16081_v49 = vld [vmem:[#allocation22 + $0x8c4] ss:$28 sps:$4 sm:$0xff]  }
 0xe46   :  { %12636 = vmatprep.mubr.bf16.mxu1 %v17821_v47  ;;  %v16079_v36 = vld [vmem:[#allocation22 + $0x8c0] ss:$28 sps:$4 sm:$0xff]   ;;  %v16154_v25 = vld [vmem:[#allocation22 + $0xce8] ss:$28 sps:$4 sm:$0xff]  }
 0xe47   :  { %12637 = vmatmul.mubr.bf16.vlgmr.msra.gmra.mxu1 %v17823_v34 }
 0xe48   :  { %12652 = vmatpush1.bf16.msra.mxu0 %v16043_v29  ;;  %12687 = vmatpush1.bf16.msra.mxu1 %v16082_v1  ;;  %v16087_v29 = vld [vmem:[#allocation22 + $0x194] ss:$28 sps:$4 sm:$0xff]  }
 0xe49   :  { %12653 = vmatprep.subr.bf16.mxu0 %v16048_v57  ;;  %12688 = vmatprep.subr.bf16.mxu1 %v16090_v39  ;;  %v16162_v1 = vld [vmem:[#allocation22 + $0xcb4] ss:$28 sps:$4 sm:$0xff]   ;;  %v8065_v57 = vrot.slane %v17797_v30, %v17614_v63 }
 0xe4a   :  { %v16160_v39 = vld [vmem:[#allocation22 + $0xcb0] ss:$28 sps:$4 sm:$0xff]  }
 0xe4c   :  { %12654 = vmatpush1.bf16.msra.mxu0 %v16046_v35  ;;  %12689 = vmatpush1.bf16.msra.mxu1 %v16088_v10  ;;  %v16168_v35 = vld [vmem:[#allocation22 + $0xc7c] ss:$28 sps:$4 sm:$0xff]   ;;  %v8069_v10 = vrot.slane %v17797_v30, %v17639_v24 }
 0xe4d   :  { %12655 = vmatprep.subr.bf16.mxu0 %v16051_v15  ;;  %12690 = vmatprep.subr.bf16.mxu1 %v16096_v42 }
 0xe50   :  { %12656 = vmatpush1.bf16.msra.mxu0 %v16049_v33  ;;  %12691 = vmatpush1.bf16.msra.mxu1 %v16094_v9  ;;  %v16166_v9 = vld [vmem:[#allocation22 + $0xc78] ss:$28 sps:$4 sm:$0xff]  }
 0xe51   :  { %12657 = vmatprep.subr.bf16.mxu0 %v16054_v43  ;;  %12692 = vmatprep.subr.bf16.mxu1 %v16102_v48  ;;  %v16174_v48 = vld [vmem:[#allocation22 + $0xc44] ss:$28 sps:$4 sm:$0xff]  }
 0xe54   :  { %12658 = vmatpush1.bf16.msra.mxu0 %v16052_v18  ;;  %12693 = vmatpush1.bf16.msra.mxu1 %v16100_v59 }
 0xe55   :  { %12659 = vmatprep.subr.bf16.mxu0 %v16057_v38  ;;  %12694 = vmatprep.subr.bf16.mxu1 %v16108_v14 }
 0xe58   :  { %12660 = vmatpush1.bf16.msra.mxu0 %v16055_v44  ;;  %12695 = vmatpush1.bf16.msra.mxu1 %v16106_v45 }
 0xe59   :  { %12661 = vmatprep.subr.bf16.mxu0 %v16060_v52  ;;  %12696 = vmatprep.subr.bf16.mxu1 %v16114_v17  ;;  %v16172_v52 = vld [vmem:[#allocation22 + $0xc40] ss:$28 sps:$4 sm:$0xff]  }
 0xe5c   :  { %12662 = vmatpush2.bf16.msra.mxu0 %v16058_v61  ;;  %12697 = vmatpush1.bf16.msra.mxu1 %v16112_v21  ;;  %v16180_v21 = vld [vmem:[#allocation22 + $0x514] ss:$28 sps:$4 sm:$0xff]  }
 0xe5d   :  { %12663 = vmatprep.subr.bf16.mxu0 %v16063_v53  ;;  %12698 = vmatprep.subr.bf16.mxu1 %v16120_v4 }
 0xe60   :  { %12664 = vmatpush2.bf16.msra.mxu0 %v16061_v51  ;;  %12699 = vmatpush1.bf16.msra.mxu1 %v16118_v41  ;;  %v16085_v41 = vld [vmem:[#allocation22 + $0x190] ss:$28 sps:$4 sm:$0xff]  }
 0xe61   :  { %12665 = vmatprep.subr.bf16.mxu0 %v16066_v11  ;;  %12700 = vmatprep.subr.bf16.mxu1 %v16126_v55  ;;  %v16093_v55 = vld [vmem:[#allocation22 + $0x15c] ss:$28 sps:$4 sm:$0xff]  }
 0xe64   :  { %12666 = vmatpush2.bf16.msra.mxu0 %v16064_v60  ;;  %12701 = vmatpush1.bf16.msra.mxu1 %v16124_v58  ;;  %v16091_v60 = vld [vmem:[#allocation22 + $0x158] ss:$28 sps:$4 sm:$0xff]   ;;  %v16099_v58 = vld [vmem:[#allocation22 + $0x124] ss:$28 sps:$4 sm:$0xff]  }
 0xe65   :  { %12667 = vmatprep.subr.bf16.mxu0 %v16069_v0  ;;  %12702 = vmatprep.subr.bf16.mxu1 %v16132_v22  ;;  %v16097_v0 = vld [vmem:[#allocation22 + $0x120] ss:$28 sps:$4 sm:$0xff]   ;;  %v16105_v22 = vld [vmem:[#allocation22 + $0xec] ss:$28 sps:$4 sm:$0xff]  }
 0xe68   :  { %12668 = vmatpush2.bf16.msra.mxu0 %v16067_v13  ;;  %12703 = vmatpush2.bf16.msra.mxu1 %v16130_v16  ;;  %v16103_v13 = vld [vmem:[#allocation22 + $0xe8] ss:$28 sps:$4 sm:$0xff]   ;;  %v16111_v16 = vld [vmem:[#allocation22 + $0xb4] ss:$28 sps:$4 sm:$0xff]  }
 0xe69   :  { %12669 = vmatprep.subr.bf16.mxu0 %v16072_v3  ;;  %12704 = vmatprep.subr.bf16.mxu1 %v16138_v5  ;;  %v16109_v3 = vld [vmem:[#allocation22 + $0xb0] ss:$28 sps:$4 sm:$0xff]   ;;  %v16117_v5 = vld [vmem:[#allocation22 + $0x7c] ss:$28 sps:$4 sm:$0xff]  }
 0xe6c   :  { %12670 = vmatpush2.bf16.msra.mxu0 %v16070_v6  ;;  %12705 = vmatpush2.bf16.msra.mxu1 %v16136_v7  ;;  %v16115_v6 = vld [vmem:[#allocation22 + $0x78] ss:$28 sps:$4 sm:$0xff]   ;;  %v16123_v7 = vld [vmem:[#allocation22 + $0x44] ss:$28 sps:$4 sm:$0xff]  }
 0xe6d   :  { %12671 = vmatprep.subr.bf16.mxu0 %v16075_v2  ;;  %12706 = vmatprep.subr.bf16.mxu1 %v16144_v54  ;;  %v16121_v2 = vld [vmem:[#allocation22 + $0x40] ss:$28 sps:$4 sm:$0xff]   ;;  %v16129_v54 = vld [vmem:[#allocation22 + $0xc] ss:$28 sps:$4 sm:$0xff]  }
 0xe70   :  { %12672 = vmatpush2.bf16.msra.mxu0 %v16073_v19  ;;  %12707 = vmatpush2.bf16.msra.mxu1 %v16142_v31  ;;  %v16127_v19 = vld [vmem:[#allocation22 + $0x8] ss:$28 sps:$4 sm:$0xff]   ;;  %v16135_v31 = vld [vmem:[#allocation22 + $0x354] ss:$28 sps:$4 sm:$0xff]  }
 0xe71   :  { %12673 = vmatprep.subr.bf16.mxu0 %v16078_v23  ;;  %12708 = vmatprep.subr.bf16.mxu1 %v16150_v32  ;;  %v16133_v23 = vld [vmem:[#allocation22 + $0x350] ss:$28 sps:$4 sm:$0xff]   ;;  %v16141_v32 = vld [vmem:[#allocation22 + $0x31c] ss:$28 sps:$4 sm:$0xff]  }
 0xe74   :  { %12674 = vmatpush2.bf16.msra.mxu0 %v16076_v28  ;;  %12709 = vmatpush2.bf16.msra.mxu1 %v16148_v27  ;;  %v16139_v28 = vld [vmem:[#allocation22 + $0x318] ss:$28 sps:$4 sm:$0xff]   ;;  %v16147_v27 = vld [vmem:[#allocation22 + $0x2e4] ss:$28 sps:$4 sm:$0xff]  }
 0xe75   :  { %12675 = vmatprep.subr.bf16.mxu0 %v16081_v49  ;;  %12710 = vmatprep.subr.bf16.mxu1 %v16156_v12  ;;  %v16145_v49 = vld [vmem:[#allocation22 + $0x2e0] ss:$28 sps:$4 sm:$0xff]   ;;  %v16153_v12 = vld [vmem:[#allocation22 + $0x2ac] ss:$28 sps:$4 sm:$0xff]  }
 0xe78   :  { %12676 = vmatpush2.bf16.msra.mxu0 %v16079_v36  ;;  %12711 = vmatpush2.bf16.msra.mxu1 %v16154_v25  ;;  %v16151_v36 = vld [vmem:[#allocation22 + $0x2a8] ss:$28 sps:$4 sm:$0xff]   ;;  %v16159_v25 = vld [vmem:[#allocation22 + $0x274] ss:$28 sps:$4 sm:$0xff]  }
 0xe79   :  { %12727 = vmatprep.subr.bf16.mxu0 %v16087_v29  ;;  %12712 = vmatprep.subr.bf16.mxu1 %v16162_v1  ;;  %v16157_v29 = vld [vmem:[#allocation22 + $0x270] ss:$28 sps:$4 sm:$0xff]   ;;  %v16165_v1 = vld [vmem:[#allocation22 + $0x23c] ss:$28 sps:$4 sm:$0xff]  }
 0xe7b   :  { %v9564_v15 = vpop.f32.mrf.mxu0 }
 0xe7c   :  { %v9565_v42 = vadd.f32 %v9564_v15, %v8065_v57  ;;  %v9605_v33 = vpop.f32.mrf.mxu1  ;;  %12713 = vmatpush2.bf16.msra.mxu1 %v16160_v39  ;;  %v16163_v57 = vld [vmem:[#allocation22 + $0x238] ss:$28 sps:$4 sm:$0xff]   ;;  %v8073_v39 = vrot.slane %v17797_v30, %v17660_v56 }
 0xe7d   :  { %v9566_v43 = vpop.f32.mrf.mxu0  ;;  %12714 = vmatprep.subr.bf16.mxu1 %v16168_v35  ;;  %v16171_v35 = vld [vmem:[#allocation22 + $0x204] ss:$28 sps:$4 sm:$0xff]  }
 0xe7e   :  { %v9606_v18 = vadd.f32 %v9605_v33, %v9565_v42  ;;  %v9567_v59 = vadd.f32 %v9566_v43, %v8069_v10  ;;  %v9607_v38 = vpop.f32.mrf.mxu1  ;;  %v8077_v10 = vrot.slane %v17797_v30, %v961_v20  ;;  %v16183_v20 = vld [vmem:[#allocation22 + $0x894] ss:$28 sps:$4 sm:$0xff]  }
 0xe7f   :  { %v9568_v14 = vpop.f32.mrf.mxu0 }
 0xe80   :  { %v9608_v44 = vadd.f32 %v9607_v38, %v9567_v59  ;;  %v9609_v45 = vpop.f32.mrf.mxu1  ;;  %12715 = vmatpush2.bf16.msra.mxu1 %v16166_v9  ;;  %v9698_v17 = vmax.f32 %v9606_v18, 0.0  ;;  %v16169_v9 = vld [vmem:[#allocation22 + $0x200] ss:$28 sps:$4 sm:$0xff]  }
 0xe81   :  { %v9569_v61 = vpop.f32.mrf.mxu0  ;;  %12716 = vmatprep.subr.bf16.mxu1 %v16174_v48  ;;  %v16177_v48 = vld [vmem:[#allocation22 + $0x1cc] ss:$28 sps:$4 sm:$0xff]  }
 0xe82   :  { %v9699_v53 = vmax.f32 %v9608_v44, 0.0  ;;  %v9610_v4 = vpop.f32.mrf.mxu1  ;;  %v17833_v11 = vpack.c.bf16 %v9698_v17, %v9698_v17 }
 0xe83   :  { %v16181_v4 = vld [vmem:[#allocation22 + $0x890] ss:$28 sps:$4 sm:$0xff]  }
 0xe84   :  { %v17831_v51 = vpack.c.bf16 %v9699_v53, %v9699_v53  ;;  %12717 = vmatpush2.bf16.msra.mxu1 %v16172_v52  ;;  %v16175_v52 = vld [vmem:[#allocation22 + $0x1c8] ss:$28 sps:$4 sm:$0xff]   ;;  %v16178_v53 = vld [vmem:[#allocation22 + $0x510] ss:$28 sps:$4 sm:$0xff]  }
 0xe85   :  { %12768 = vmatprep.subr.bf16.mxu1 %v16180_v21 }
 0xe86   :  { %12677 = vmatprep.mubr.bf16.mxu0 %v17831_v51 }
 0xe87   :  { %12678 = vmatmul.mubr.bf16.vlgmr.msra.gmra.mxu0 %v17833_v11 }
 0xe88   :  { %12728 = vmatpush1.bf16.msra.mxu0 %v16085_v41  ;;  %12759 = vmatprep.mubr.bf16.mxu0 %v17807_v46 }
 0xe89   :  { %12729 = vmatprep.subr.bf16.mxu0 %v16093_v55  ;;  %v16186_v55 = vld [vmem:[#allocation22 + $0x4dc] ss:$28 sps:$4 sm:$0xff]  }
 0xe8c   :  { %12730 = vmatpush1.bf16.msra.mxu0 %v16091_v60  ;;  %v16189_v60 = vld [vmem:[#allocation22 + $0x85c] ss:$28 sps:$4 sm:$0xff]  }
 0xe8d   :  { %12731 = vmatprep.subr.bf16.mxu0 %v16099_v58  ;;  %v16184_v58 = vld [vmem:[#allocation22 + $0x4d8] ss:$28 sps:$4 sm:$0xff]  }
 0xe90   :  { %12732 = vmatpush1.bf16.msra.mxu0 %v16097_v0  ;;  %v16187_v0 = vld [vmem:[#allocation22 + $0x858] ss:$28 sps:$4 sm:$0xff]  }
 0xe91   :  { %12733 = vmatprep.subr.bf16.mxu0 %v16105_v22  ;;  %v16192_v22 = vld [vmem:[#allocation22 + $0x4a4] ss:$28 sps:$4 sm:$0xff]  }
 0xe94   :  { %12734 = vmatpush1.bf16.msra.mxu0 %v16103_v13  ;;  %v16195_v13 = vld [vmem:[#allocation22 + $0x824] ss:$28 sps:$4 sm:$0xff]  }
 0xe95   :  { %12735 = vmatprep.subr.bf16.mxu0 %v16111_v16  ;;  %v16190_v16 = vld [vmem:[#allocation22 + $0x4a0] ss:$28 sps:$4 sm:$0xff]  }
 0xe98   :  { %12736 = vmatpush1.bf16.msra.mxu0 %v16109_v3  ;;  %v16193_v3 = vld [vmem:[#allocation22 + $0x820] ss:$28 sps:$4 sm:$0xff]  }
 0xe99   :  { %12737 = vmatprep.subr.bf16.mxu0 %v16117_v5  ;;  %v16198_v5 = vld [vmem:[#allocation22 + $0x46c] ss:$28 sps:$4 sm:$0xff]  }
 0xe9c   :  { %12738 = vmatpush1.bf16.msra.mxu0 %v16115_v6  ;;  %v16201_v6 = vld [vmem:[#allocation22 + $0x7ec] ss:$28 sps:$4 sm:$0xff]  }
 0xe9d   :  { %12739 = vmatprep.subr.bf16.mxu0 %v16123_v7  ;;  %v16196_v7 = vld [vmem:[#allocation22 + $0x468] ss:$28 sps:$4 sm:$0xff]  }
 0xea0   :  { %12740 = vmatpush1.bf16.msra.mxu0 %v16121_v2  ;;  %v16199_v2 = vld [vmem:[#allocation22 + $0x7e8] ss:$28 sps:$4 sm:$0xff]  }
 0xea1   :  { %12741 = vmatprep.subr.bf16.mxu0 %v16129_v54  ;;  %v16204_v54 = vld [vmem:[#allocation22 + $0x434] ss:$28 sps:$4 sm:$0xff]  }
 0xea4   :  { %12742 = vmatpush1.bf16.msra.mxu0 %v16127_v19  ;;  %v16207_v19 = vld [vmem:[#allocation22 + $0x7b4] ss:$28 sps:$4 sm:$0xff]  }
 0xea5   :  { %12743 = vmatprep.subr.bf16.mxu0 %v16135_v31  ;;  %v16202_v31 = vld [vmem:[#allocation22 + $0x430] ss:$28 sps:$4 sm:$0xff]  }
 0xea8   :  { %12744 = vmatpush2.bf16.msra.mxu0 %v16133_v23  ;;  %v16205_v23 = vld [vmem:[#allocation22 + $0x7b0] ss:$28 sps:$4 sm:$0xff]  }
 0xea9   :  { %12745 = vmatprep.subr.bf16.mxu0 %v16141_v32  ;;  %v16210_v32 = vld [vmem:[#allocation22 + $0x3fc] ss:$28 sps:$4 sm:$0xff]  }
 0xeac   :  { %12746 = vmatpush2.bf16.msra.mxu0 %v16139_v28  ;;  %v16213_v28 = vld [vmem:[#allocation22 + $0x77c] ss:$28 sps:$4 sm:$0xff]  }
 0xead   :  { %12747 = vmatprep.subr.bf16.mxu0 %v16147_v27  ;;  %v16208_v27 = vld [vmem:[#allocation22 + $0x3f8] ss:$28 sps:$4 sm:$0xff]  }
 0xeb0   :  { %12748 = vmatpush2.bf16.msra.mxu0 %v16145_v49  ;;  %v16211_v49 = vld [vmem:[#allocation22 + $0x778] ss:$28 sps:$4 sm:$0xff]  }
 0xeb1   :  { %12749 = vmatprep.subr.bf16.mxu0 %v16153_v12  ;;  %v16216_v12 = vld [vmem:[#allocation22 + $0x3c4] ss:$28 sps:$4 sm:$0xff]  }
 0xeb4   :  { %12750 = vmatpush2.bf16.msra.mxu0 %v16151_v36  ;;  %v16219_v36 = vld [vmem:[#allocation22 + $0x744] ss:$28 sps:$4 sm:$0xff]  }
 0xeb5   :  { %12751 = vmatprep.subr.bf16.mxu0 %v16159_v25  ;;  %v16214_v25 = vld [vmem:[#allocation22 + $0x3c0] ss:$28 sps:$4 sm:$0xff]  }
 0xeb8   :  { %12752 = vmatpush2.bf16.msra.mxu0 %v16157_v29  ;;  %v16217_v29 = vld [vmem:[#allocation22 + $0x740] ss:$28 sps:$4 sm:$0xff]  }
 0xeb9   :  { %12753 = vmatprep.subr.bf16.mxu0 %v16165_v1  ;;  %v16222_v1 = vld [vmem:[#allocation22 + $0x38c] ss:$28 sps:$4 sm:$0xff]  }
 0xebb   :  { %v9646_v15 = vpop.f32.mrf.mxu0 }
 0xebc   :  { %v9647_v42 = vadd.f32 %v9646_v15, %v8073_v39  ;;  %v9687_v33 = vpop.f32.mrf.mxu1  ;;  %12754 = vmatpush2.bf16.msra.mxu0 %v16163_v57  ;;  %v16225_v57 = vld [vmem:[#allocation22 + $0x70c] ss:$28 sps:$4 sm:$0xff]   ;;  %v16231_v15 = vld [vmem:[#allocation22 + $0xa54] ss:$28 sps:$4 sm:$0xff]  }
 0xebd   :  { %v9648_v43 = vpop.f32.mrf.mxu0  ;;  %12755 = vmatprep.subr.bf16.mxu0 %v16171_v35  ;;  %v16220_v39 = vld [vmem:[#allocation22 + $0x388] ss:$28 sps:$4 sm:$0xff]  }
 0xebe   :  { %v9688_v18 = vadd.f32 %v9687_v33, %v9647_v42  ;;  %v9649_v59 = vadd.f32 %v9648_v43, %v8077_v10  ;;  %v9689_v38 = vpop.f32.mrf.mxu1  ;;  %v16223_v35 = vld [vmem:[#allocation22 + $0x708] ss:$28 sps:$4 sm:$0xff]   ;;  %v16228_v10 = vld [vmem:[#allocation22 + $0x6d4] ss:$28 sps:$4 sm:$0xff]   ;;  %v16237_v43 = vld [vmem:[#allocation22 + $0xa1c] ss:$28 sps:$4 sm:$0xff]  }
 0xebf   :  { %v9650_v14 = vpop.f32.mrf.mxu0  ;;  %v16226_v42 = vld [vmem:[#allocation22 + $0x6d0] ss:$28 sps:$4 sm:$0xff]  }
 0xec0   :  { %v9690_v44 = vadd.f32 %v9689_v38, %v9649_v59  ;;  %v9691_v45 = vpop.f32.mrf.mxu1  ;;  %12756 = vmatpush2.bf16.msra.mxu0 %v16169_v9  ;;  %v9700_v17 = vmax.f32 %v9688_v18, 0.0  ;;  %v16229_v33 = vld [vmem:[#allocation22 + $0xa50] ss:$28 sps:$4 sm:$0xff]   ;;  %v16234_v9 = vld [vmem:[#allocation22 + $0x69c] ss:$28 sps:$4 sm:$0xff]  }
 0xec1   :  { %v9651_v50 = vpop.f32.mrf.mxu0  ;;  %12757 = vmatprep.subr.bf16.mxu0 %v16177_v48  ;;  %v16232_v48 = vld [vmem:[#allocation22 + $0x698] ss:$28 sps:$4 sm:$0xff]   ;;  %v16240_v59 = vld [vmem:[#allocation22 + $0x664] ss:$28 sps:$4 sm:$0xff]   ;;  %v16246_v45 = vld [vmem:[#allocation22 + $0x62c] ss:$28 sps:$4 sm:$0xff]  }
 0xec2   :  { %v9701_v30 = vmax.f32 %v9690_v44, 0.0  ;;  %v9692_v61 = vpop.f32.mrf.mxu1  ;;  %v17845_v41 = vpack.c.bf16 %v9700_v17, %v9700_v17  ;;  %v16235_v18 = vld [vmem:[#allocation22 + $0xa18] ss:$28 sps:$4 sm:$0xff]   ;;  %v16243_v38 = vld [vmem:[#allocation22 + $0x9e4] ss:$28 sps:$4 sm:$0xff]  }
 0xec3   :  { %v16238_v14 = vld [vmem:[#allocation22 + $0x660] ss:$28 sps:$4 sm:$0xff]   ;;  %v16244_v17 = vld [vmem:[#allocation22 + $0x628] ss:$28 sps:$4 sm:$0xff]   ;;  %v16250_v61 = vld [vmem:[#allocation22 + $0x5f0] ss:$28 sps:$4 sm:$0xff]  }
 0xec4   :  { %v17843_v21 = vpack.c.bf16 %v9701_v30, %v9701_v30  ;;  %12758 = vmatpush2.bf16.msra.mxu0 %v16175_v52  ;;  %v16241_v44 = vld [vmem:[#allocation22 + $0x9e0] ss:$28 sps:$4 sm:$0xff]   ;;  %v16249_v52 = vld [vmem:[#allocation22 + $0x9ac] ss:$28 sps:$4 sm:$0xff]   ;;  %v16255_v30 = vld [vmem:[#allocation22 + $0x974] ss:$28 sps:$4 sm:$0xff]  }
 0xec5   :  { %12809 = vmatprep.subr.bf16.mxu0 %v16183_v20  ;;  %v16247_v50 = vld [vmem:[#allocation22 + $0x9a8] ss:$28 sps:$4 sm:$0xff]   ;;  %v16252_v20 = vld [vmem:[#allocation22 + $0x5f4] ss:$28 sps:$4 sm:$0xff]  }
 0xec6   :  { %12718 = vmatprep.mubr.bf16.mxu1 %v17843_v21 }
 0xec7   :  { %12760 = vmatmul.mubr.bf16.vlgmr.msra.gmra.mxu0 %v17816_v40  ;;  %12719 = vmatmul.mubr.bf16.vlgmr.msra.gmra.mxu1 %v17845_v41 }
 0xec8   :  { %12769 = vmatpush1.bf16.msra.mxu1 %v16178_v53  ;;  %12810 = vmatpush1.bf16.msra.mxu0 %v16181_v4  ;;  %v16253_v53 = vld [vmem:[#allocation22 + $0x970] ss:$28 sps:$4 sm:$0xff]   ;;  %v16258_v4 = vld [vmem:[#allocation22 + $0x5bc] ss:$28 sps:$4 sm:$0xff]  }
 0xec9   :  { %12841 = vmatprep.mubr.bf16.mxu0 %v17831_v51  ;;  %12800 = vmatprep.mubr.bf16.mxu1 %v17821_v47 }
 0xeca   :  { %12770 = vmatprep.subr.bf16.mxu1 %v16186_v55  ;;  %12811 = vmatprep.subr.bf16.mxu0 %v16189_v60  ;;  %v16261_v55 = vld [vmem:[#allocation22 + $0x93c] ss:$28 sps:$4 sm:$0xff]  }
 0xecb   :  { %v16256_v60 = vld [vmem:[#allocation22 + $0x5b8] ss:$28 sps:$4 sm:$0xff]  }
 0xecc   :  { %12771 = vmatpush1.bf16.msra.mxu1 %v16184_v58  ;;  %12812 = vmatpush1.bf16.msra.mxu0 %v16187_v0  ;;  %v16259_v58 = vld [vmem:[#allocation22 + $0x938] ss:$28 sps:$4 sm:$0xff]   ;;  %v16264_v0 = vld [vmem:[#allocation22 + $0x584] ss:$28 sps:$4 sm:$0xff]  }
 0xecd   :  { %12772 = vmatprep.subr.bf16.mxu1 %v16192_v22  ;;  %12813 = vmatprep.subr.bf16.mxu0 %v16195_v13  ;;  %v16267_v22 = vld [vmem:[#allocation22 + $0x904] ss:$28 sps:$4 sm:$0xff]  }
 0xed0   :  { %12773 = vmatpush1.bf16.msra.mxu1 %v16190_v16  ;;  %12814 = vmatpush1.bf16.msra.mxu0 %v16193_v3  ;;  %v16262_v16 = vld [vmem:[#allocation22 + $0x580] ss:$28 sps:$4 sm:$0xff]  }
 0xed1   :  { %12774 = vmatprep.subr.bf16.mxu1 %v16198_v5  ;;  %12815 = vmatprep.subr.bf16.mxu0 %v16201_v6  ;;  %v16265_v3 = vld [vmem:[#allocation22 + $0x900] ss:$28 sps:$4 sm:$0xff]   ;;  %v16270_v6 = vld [vmem:[#allocation22 + $0x54c] ss:$28 sps:$4 sm:$0xff]  }
 0xed4   :  { %12775 = vmatpush1.bf16.msra.mxu1 %v16196_v7  ;;  %12816 = vmatpush1.bf16.msra.mxu0 %v16199_v2  ;;  %v16273_v7 = vld [vmem:[#allocation22 + $0x8cc] ss:$28 sps:$4 sm:$0xff]  }
 0xed5   :  { %12776 = vmatprep.subr.bf16.mxu1 %v16204_v54  ;;  %12817 = vmatprep.subr.bf16.mxu0 %v16207_v19  ;;  %v17852_v2 = vld [vmem:[#allocation43] sm:$0xff] }
 0xed6   :  { %v16268_v19 = vld [vmem:[#allocation22 + $0x548] ss:$28 sps:$4 sm:$0xff]  }
 0xed8   :  { %12777 = vmatpush1.bf16.msra.mxu1 %v16202_v31  ;;  %12818 = vmatpush1.bf16.msra.mxu0 %v16205_v23  ;;  %v16271_v31 = vld [vmem:[#allocation22 + $0x8c8] ss:$28 sps:$4 sm:$0xff]  }
 0xed9   :  { %12778 = vmatprep.subr.bf16.mxu1 %v16210_v32  ;;  %12819 = vmatprep.subr.bf16.mxu0 %v16213_v28  ;;  %v16276_v32 = vld [vmem:[#allocation22 + $0xc14] ss:$28 sps:$4 sm:$0xff]   ;;  %v16279_v28 = vld [vmem:[#allocation22 + $0x19c] ss:$28 sps:$4 sm:$0xff]  }
 0xedc   :  { %12779 = vmatpush1.bf16.msra.mxu1 %v16208_v27  ;;  %12820 = vmatpush1.bf16.msra.mxu0 %v16211_v49  ;;  %v10227_v27 = vrot.slane %v17852_v2, %v17540_v62  ;;  %v10231_v49 = vrot.slane %v17852_v2, %v17543_v8  ;;  %v16280_v62 = vld [vmem:[#allocation22 + $0xbd8] ss:$28 sps:$4 sm:$0xff]  }
 0xedd   :  { %12780 = vmatprep.subr.bf16.mxu1 %v16216_v12  ;;  %12821 = vmatprep.subr.bf16.mxu0 %v16219_v36  ;;  %v16274_v12 = vld [vmem:[#allocation22 + $0xc10] ss:$28 sps:$4 sm:$0xff]   ;;  %v16277_v36 = vld [vmem:[#allocation22 + $0x198] ss:$28 sps:$4 sm:$0xff]  }
 0xee0   :  { %12781 = vmatpush1.bf16.msra.mxu1 %v16214_v25  ;;  %12822 = vmatpush1.bf16.msra.mxu0 %v16217_v29  ;;  %v16282_v29 = vld [vmem:[#allocation22 + $0xbdc] ss:$28 sps:$4 sm:$0xff]  }
 0xee1   :  { %12782 = vmatprep.subr.bf16.mxu1 %v16222_v1  ;;  %12823 = vmatprep.subr.bf16.mxu0 %v16225_v57  ;;  %v16285_v1 = vld [vmem:[#allocation22 + $0x164] ss:$28 sps:$4 sm:$0xff]  }
 0xee4   :  { %12783 = vmatpush1.bf16.msra.mxu1 %v16220_v39  ;;  %12824 = vmatpush1.bf16.msra.mxu0 %v16223_v35 }
 0xee5   :  { %12784 = vmatprep.subr.bf16.mxu1 %v16228_v10  ;;  %12825 = vmatprep.subr.bf16.mxu0 %v16231_v15  ;;  %v16283_v10 = vld [vmem:[#allocation22 + $0x160] ss:$28 sps:$4 sm:$0xff]  }
 0xee6   :  { %v16288_v15 = vld [vmem:[#allocation22 + $0xba4] ss:$28 sps:$4 sm:$0xff]  }
 0xee8   :  { %12785 = vmatpush2.bf16.msra.mxu1 %v16226_v42  ;;  %12826 = vmatpush2.bf16.msra.mxu0 %v16229_v33  ;;  %v16291_v33 = vld [vmem:[#allocation22 + $0x12c] ss:$28 sps:$4 sm:$0xff]  }
 0xee9   :  { %12786 = vmatprep.subr.bf16.mxu1 %v16234_v9  ;;  %12827 = vmatprep.subr.bf16.mxu0 %v16237_v43  ;;  %v16286_v43 = vld [vmem:[#allocation22 + $0xba0] ss:$28 sps:$4 sm:$0xff]  }
 0xeec   :  { %12787 = vmatpush2.bf16.msra.mxu1 %v16232_v48  ;;  %12828 = vmatpush2.bf16.msra.mxu0 %v16235_v18  ;;  %v16289_v18 = vld [vmem:[#allocation22 + $0x128] ss:$28 sps:$4 sm:$0xff]  }
 0xeed   :  { %12788 = vmatprep.subr.bf16.mxu1 %v16240_v59  ;;  %12829 = vmatprep.subr.bf16.mxu0 %v16243_v38  ;;  %v16294_v59 = vld [vmem:[#allocation22 + $0xb6c] ss:$28 sps:$4 sm:$0xff]   ;;  %v16297_v38 = vld [vmem:[#allocation22 + $0xf4] ss:$28 sps:$4 sm:$0xff]  }
 0xef0   :  { %12789 = vmatpush2.bf16.msra.mxu1 %v16238_v14  ;;  %12830 = vmatpush2.bf16.msra.mxu0 %v16241_v44  ;;  %v16292_v14 = vld [vmem:[#allocation22 + $0xb68] ss:$28 sps:$4 sm:$0xff]   ;;  %v16295_v44 = vld [vmem:[#allocation22 + $0xf0] ss:$28 sps:$4 sm:$0xff]  }
 0xef1   :  { %12790 = vmatprep.subr.bf16.mxu1 %v16246_v45  ;;  %12831 = vmatprep.subr.bf16.mxu0 %v16249_v52  ;;  %v16300_v45 = vld [vmem:[#allocation22 + $0xb34] ss:$28 sps:$4 sm:$0xff]   ;;  %v16303_v52 = vld [vmem:[#allocation22 + $0xbc] ss:$28 sps:$4 sm:$0xff]  }
 0xef4   :  { %12791 = vmatpush2.bf16.msra.mxu1 %v16244_v17  ;;  %12832 = vmatpush2.bf16.msra.mxu0 %v16247_v50  ;;  %v16298_v17 = vld [vmem:[#allocation22 + $0xb30] ss:$28 sps:$4 sm:$0xff]   ;;  %v16301_v50 = vld [vmem:[#allocation22 + $0xb8] ss:$28 sps:$4 sm:$0xff]  }
 0xef5   :  { %12792 = vmatprep.subr.bf16.mxu1 %v16252_v20  ;;  %12833 = vmatprep.subr.bf16.mxu0 %v16255_v30  ;;  %v16306_v20 = vld [vmem:[#allocation22 + $0xafc] ss:$28 sps:$4 sm:$0xff]   ;;  %v16309_v30 = vld [vmem:[#allocation22 + $0x84] ss:$28 sps:$4 sm:$0xff]  }
 0xef8   :  { %12793 = vmatpush2.bf16.msra.mxu1 %v16250_v61  ;;  %12834 = vmatpush2.bf16.msra.mxu0 %v16253_v53  ;;  %v16304_v61 = vld [vmem:[#allocation22 + $0xaf8] ss:$28 sps:$4 sm:$0xff]   ;;  %v16307_v53 = vld [vmem:[#allocation22 + $0x80] ss:$28 sps:$4 sm:$0xff]  }
 0xef9   :  { %12794 = vmatprep.subr.bf16.mxu1 %v16258_v4  ;;  %12835 = vmatprep.subr.bf16.mxu0 %v16261_v55  ;;  %v16312_v4 = vld [vmem:[#allocation22 + $0xac4] ss:$28 sps:$4 sm:$0xff]   ;;  %v16315_v55 = vld [vmem:[#allocation22 + $0x4c] ss:$28 sps:$4 sm:$0xff]  }
 0xefb   :  { %v12597_v13 = vpop.f32.mrf.mxu0 }
 0xefc   :  { %12795 = vmatpush2.bf16.msra.mxu1 %v16256_v60  ;;  %12836 = vmatpush2.bf16.msra.mxu0 %v16259_v58  ;;  %v12598_v25 = vadd.f32 %v12597_v13, %v10227_v27  ;;  %v16310_v60 = vld [vmem:[#allocation22 + $0xac0] ss:$28 sps:$4 sm:$0xff]   ;;  %v16313_v58 = vld [vmem:[#allocation22 + $0x48] ss:$28 sps:$4 sm:$0xff]  }
 0xefd   :  { %v12599_v5 = vpop.f32.mrf.mxu0  ;;  %12796 = vmatprep.subr.bf16.mxu1 %v16264_v0  ;;  %12837 = vmatprep.subr.bf16.mxu0 %v16267_v22  ;;  %v16318_v0 = vld [vmem:[#allocation22 + $0xa8c] ss:$28 sps:$4 sm:$0xff]   ;;  %v16321_v22 = vld [vmem:[#allocation22 + $0x14] ss:$28 sps:$4 sm:$0xff]   ;;  %v16334_v27 = vld [vmem:[#allocation22 + $0xd60] ss:$28 sps:$4 sm:$0xff]  }
 0xefe   :  { %v12600_v39 = vadd.f32 %v12599_v5, %v10231_v49  ;;  %v16316_v13 = vld [vmem:[#allocation22 + $0xa88] ss:$28 sps:$4 sm:$0xff]   ;;  %v16327_v5 = vld [vmem:[#allocation22 + $0x35c] ss:$28 sps:$4 sm:$0xff]  }
 0xeff   :  { %v12601_v54 = vpop.f32.mrf.mxu0  ;;  %v16337_v49 = vld [vmem:[#allocation22 + $0x2e8] ss:$28 sps:$4 sm:$0xff]  }
 0xf00   :  { %12797 = vmatpush2.bf16.msra.mxu1 %v16262_v16  ;;  %12838 = vmatpush2.bf16.msra.mxu0 %v16265_v3  ;;  %v16319_v16 = vld [vmem:[#allocation22 + $0x10] ss:$28 sps:$4 sm:$0xff]   ;;  %v16330_v54 = vld [vmem:[#allocation22 + $0xd9c] ss:$28 sps:$4 sm:$0xff]  }
 0xf01   :  { %v12602_v23 = vpop.f32.mrf.mxu0  ;;  %12798 = vmatprep.subr.bf16.mxu1 %v16270_v6  ;;  %12839 = vmatprep.subr.bf16.mxu0 %v16273_v7  ;;  %v16324_v3 = vld [vmem:[#allocation22 + $0xdd4] ss:$28 sps:$4 sm:$0xff]  }
 0xf02   :  { %v16322_v6 = vld [vmem:[#allocation22 + $0xdd0] ss:$28 sps:$4 sm:$0xff]   ;;  %v16325_v7 = vld [vmem:[#allocation22 + $0x358] ss:$28 sps:$4 sm:$0xff]   ;;  %v16331_v23 = vld [vmem:[#allocation22 + $0x320] ss:$28 sps:$4 sm:$0xff]  }
 0xf04   :  { %12799 = vmatpush2.bf16.msra.mxu1 %v16268_v19  ;;  %12840 = vmatpush2.bf16.msra.mxu0 %v16271_v31  ;;  %v16333_v19 = vld [vmem:[#allocation22 + $0x324] ss:$28 sps:$4 sm:$0xff]   ;;  %v16328_v31 = vld [vmem:[#allocation22 + $0xd98] ss:$28 sps:$4 sm:$0xff]  }
 0xf05   :  { %12850 = vmatprep.subr.bf16.mxu1 %v16276_v32  ;;  %12891 = vmatprep.subr.bf16.mxu0 %v16279_v28  ;;  %v16336_v32 = vld [vmem:[#allocation22 + $0xd64] ss:$28 sps:$4 sm:$0xff]   ;;  %v16339_v28 = vld [vmem:[#allocation22 + $0x2ec] ss:$28 sps:$4 sm:$0xff]  }
 0xf07   :  { %12801 = vmatmul.mubr.bf16.vlgmr.msra.gmra.mxu1 %v17823_v34  ;;  %12842 = vmatmul.mubr.bf16.vlgmr.msra.gmra.mxu0 %v17833_v11  ;;  %v12638_v57 = vpop.f32.mrf.mxu1 }
 0xf08   :  { %v17860_v35 = vadd.f32 %v12638_v57, %v12598_v25  ;;  %12851 = vmatpush1.bf16.msra.mxu1 %v16274_v12  ;;  %12882 = vmatprep.mubr.bf16.mxu1 %v17843_v21  ;;  %v16342_v12 = vld [vmem:[#allocation22 + $0xd2c] ss:$28 sps:$4 sm:$0xff]   ;;  %v16351_v57 = vld [vmem:[#allocation22 + $0x27c] ss:$28 sps:$4 sm:$0xff]  }
 0xf09   :  { %12892 = vmatpush1.bf16.msra.mxu0 %v16277_v36  ;;  %12923 = vmatprep.mubr.bf16.mxu0 %v17807_v46  ;;  %v12640_v8 = vpop.f32.mrf.mxu1  ;;  %v16345_v36 = vld [vmem:[#allocation22 + $0x2b4] ss:$28 sps:$4 sm:$0xff]   ;;  %v16340_v25 = vld [vmem:[#allocation22 + $0xd28] ss:$28 sps:$4 sm:$0xff]  }
 0xf0a   :  { %v17864_v42 = vadd.f32 %v12640_v8, %v12600_v39  ;;  %12852 = vmatprep.subr.bf16.mxu1 %v16282_v29  ;;  %12893 = vmatprep.subr.bf16.mxu0 %v16285_v1  ;;  %v16343_v29 = vld [vmem:[#allocation22 + $0x2b0] ss:$28 sps:$4 sm:$0xff]   ;;  %v16354_v8 = vld [vmem:[#allocation22 + $0xcbc] ss:$28 sps:$4 sm:$0xff]  }
 0xf0b   :  { %v12642_v9 = vpop.f32.mrf.mxu1  ;;  %v16348_v1 = vld [vmem:[#allocation22 + $0xcf4] ss:$28 sps:$4 sm:$0xff]  }
 0xf0c   :  { %12853 = vmatpush1.bf16.msra.mxu1 %v16280_v62  ;;  %v16346_v39 = vld [vmem:[#allocation22 + $0xcf0] ss:$28 sps:$4 sm:$0xff]   ;;  %v16349_v62 = vld [vmem:[#allocation22 + $0x278] ss:$28 sps:$4 sm:$0xff]   ;;  %v16360_v9 = vld [vmem:[#allocation22 + $0xc84] ss:$28 sps:$4 sm:$0xff]  }
 0xf0d   :  { %12894 = vmatpush1.bf16.msra.mxu0 %v16283_v10  ;;  %v12643_v48 = vpop.f32.mrf.mxu1  ;;  %12854 = vmatprep.subr.bf16.mxu1 %v16288_v15  ;;  %v16357_v10 = vld [vmem:[#allocation22 + $0x244] ss:$28 sps:$4 sm:$0xff]   ;;  %v16352_v15 = vld [vmem:[#allocation22 + $0xcb8] ss:$28 sps:$4 sm:$0xff]  }
 0xf0e   :  { %12895 = vmatprep.subr.bf16.mxu0 %v16291_v33  ;;  %v16355_v33 = vld [vmem:[#allocation22 + $0x240] ss:$28 sps:$4 sm:$0xff]  }
 0xf0f   :  { %v16358_v48 = vld [vmem:[#allocation22 + $0xc80] ss:$28 sps:$4 sm:$0xff]  }
 0xf10   :  { %12855 = vmatpush1.bf16.msra.mxu1 %v16286_v43  ;;  %v16363_v43 = vld [vmem:[#allocation22 + $0x20c] ss:$28 sps:$4 sm:$0xff]  }
 0xf11   :  { %12896 = vmatpush1.bf16.msra.mxu0 %v16289_v18  ;;  %12856 = vmatprep.subr.bf16.mxu1 %v16294_v59  ;;  %v16361_v18 = vld [vmem:[#allocation22 + $0x208] ss:$28 sps:$4 sm:$0xff]  }
 0xf12   :  { %12897 = vmatprep.subr.bf16.mxu0 %v16297_v38  ;;  %v16366_v59 = vld [vmem:[#allocation22 + $0xc4c] ss:$28 sps:$4 sm:$0xff]   ;;  %v16369_v38 = vld [vmem:[#allocation22 + $0x1d4] ss:$28 sps:$4 sm:$0xff]  }
 0xf14   :  { %12857 = vmatpush1.bf16.msra.mxu1 %v16292_v14  ;;  %v16364_v14 = vld [vmem:[#allocation22 + $0xc48] ss:$28 sps:$4 sm:$0xff]  }
 0xf15   :  { %12898 = vmatpush1.bf16.msra.mxu0 %v16295_v44  ;;  %12858 = vmatprep.subr.bf16.mxu1 %v16300_v45  ;;  %v16367_v44 = vld [vmem:[#allocation22 + $0x1d0] ss:$28 sps:$4 sm:$0xff]   ;;  %v16372_v45 = vld [vmem:[#allocation22 + $0x51c] ss:$28 sps:$4 sm:$0xff]  }
 0xf16   :  { %12899 = vmatprep.subr.bf16.mxu0 %v16303_v52  ;;  %v16375_v52 = vld [vmem:[#allocation22 + $0x89c] ss:$28 sps:$4 sm:$0xff]  }
 0xf18   :  { %12859 = vmatpush1.bf16.msra.mxu1 %v16298_v17  ;;  %v16370_v17 = vld [vmem:[#allocation22 + $0x518] ss:$28 sps:$4 sm:$0xff]  }
 0xf19   :  { %12900 = vmatpush1.bf16.msra.mxu0 %v16301_v50  ;;  %12860 = vmatprep.subr.bf16.mxu1 %v16306_v20  ;;  %v16373_v50 = vld [vmem:[#allocation22 + $0x898] ss:$28 sps:$4 sm:$0xff]   ;;  %v16378_v20 = vld [vmem:[#allocation22 + $0x4e4] ss:$28 sps:$4 sm:$0xff]  }
 0xf1a   :  { %12901 = vmatprep.subr.bf16.mxu0 %v16309_v30 }
 0xf1c   :  { %12861 = vmatpush1.bf16.msra.mxu1 %v16304_v61  ;;  %v16381_v61 = vld [vmem:[#allocation22 + $0x864] ss:$28 sps:$4 sm:$0xff]  }
 0xf1d   :  { %12902 = vmatpush1.bf16.msra.mxu0 %v16307_v53  ;;  %12862 = vmatprep.subr.bf16.mxu1 %v16312_v4  ;;  %v16376_v53 = vld [vmem:[#allocation22 + $0x4e0] ss:$28 sps:$4 sm:$0xff]  }
 0xf1e   :  { %12903 = vmatprep.subr.bf16.mxu0 %v16315_v55  ;;  %v16379_v55 = vld [vmem:[#allocation22 + $0x860] ss:$28 sps:$4 sm:$0xff]  }
 0xf20   :  { %12863 = vmatpush1.bf16.msra.mxu1 %v16310_v60  ;;  %v16384_v60 = vld [vmem:[#allocation22 + $0x4ac] ss:$28 sps:$4 sm:$0xff]  }
 0xf21   :  { %12904 = vmatpush1.bf16.msra.mxu0 %v16313_v58  ;;  %12864 = vmatprep.subr.bf16.mxu1 %v16318_v0  ;;  %v16387_v58 = vld [vmem:[#allocation22 + $0x82c] ss:$28 sps:$4 sm:$0xff]  }
 0xf22   :  { %12905 = vmatprep.subr.bf16.mxu0 %v16321_v22  ;;  %v16382_v22 = vld [vmem:[#allocation22 + $0x4a8] ss:$28 sps:$4 sm:$0xff]  }
 0xf24   :  { %12865 = vmatpush1.bf16.msra.mxu1 %v16316_v13 }
 0xf25   :  { %12906 = vmatpush1.bf16.msra.mxu0 %v16319_v16  ;;  %12866 = vmatprep.subr.bf16.mxu1 %v16324_v3  ;;  %v16385_v16 = vld [vmem:[#allocation22 + $0x828] ss:$28 sps:$4 sm:$0xff]   ;;  %v16390_v3 = vld [vmem:[#allocation22 + $0x474] ss:$28 sps:$4 sm:$0xff]  }
 0xf26   :  { %12907 = vmatprep.subr.bf16.mxu0 %v16327_v5  ;;  %v16393_v5 = vld [vmem:[#allocation22 + $0x7f4] ss:$28 sps:$4 sm:$0xff]  }
 0xf28   :  { %12867 = vmatpush2.bf16.msra.mxu1 %v16322_v6  ;;  %v16388_v6 = vld [vmem:[#allocation22 + $0x470] ss:$28 sps:$4 sm:$0xff]  }
 0xf29   :  { %12908 = vmatpush2.bf16.msra.mxu0 %v16325_v7  ;;  %12868 = vmatprep.subr.bf16.mxu1 %v16330_v54  ;;  %v16391_v7 = vld [vmem:[#allocation22 + $0x7f0] ss:$28 sps:$4 sm:$0xff]   ;;  %v16396_v54 = vld [vmem:[#allocation22 + $0x43c] ss:$28 sps:$4 sm:$0xff]  }
 0xf2a   :  { %12909 = vmatprep.subr.bf16.mxu0 %v16333_v19  ;;  %v16399_v19 = vld [vmem:[#allocation22 + $0x7bc] ss:$28 sps:$4 sm:$0xff]  }
 0xf2c   :  { %12869 = vmatpush2.bf16.msra.mxu1 %v16328_v31  ;;  %v16394_v31 = vld [vmem:[#allocation22 + $0x438] ss:$28 sps:$4 sm:$0xff]  }
 0xf2d   :  { %12910 = vmatpush2.bf16.msra.mxu0 %v16331_v23  ;;  %12870 = vmatprep.subr.bf16.mxu1 %v16336_v32  ;;  %v16397_v23 = vld [vmem:[#allocation22 + $0x7b8] ss:$28 sps:$4 sm:$0xff]   ;;  %v16402_v32 = vld [vmem:[#allocation22 + $0x404] ss:$28 sps:$4 sm:$0xff]  }
 0xf2e   :  { %12911 = vmatprep.subr.bf16.mxu0 %v16339_v28  ;;  %v16405_v28 = vld [vmem:[#allocation22 + $0x784] ss:$28 sps:$4 sm:$0xff]  }
 0xf30   :  { %12871 = vmatpush2.bf16.msra.mxu1 %v16334_v27  ;;  %v16400_v27 = vld [vmem:[#allocation22 + $0x400] ss:$28 sps:$4 sm:$0xff]  }
 0xf31   :  { %12912 = vmatpush2.bf16.msra.mxu0 %v16337_v49  ;;  %12872 = vmatprep.subr.bf16.mxu1 %v16342_v12  ;;  %v16403_v49 = vld [vmem:[#allocation22 + $0x780] ss:$28 sps:$4 sm:$0xff]   ;;  %v16408_v12 = vld [vmem:[#allocation22 + $0x3cc] ss:$28 sps:$4 sm:$0xff]  }
 0xf32   :  { %12913 = vmatprep.subr.bf16.mxu0 %v16345_v36  ;;  %v16411_v36 = vld [vmem:[#allocation22 + $0x74c] ss:$28 sps:$4 sm:$0xff]  }
 0xf34   :  { %12873 = vmatpush2.bf16.msra.mxu1 %v16340_v25  ;;  %v16406_v25 = vld [vmem:[#allocation22 + $0x3c8] ss:$28 sps:$4 sm:$0xff]  }
 0xf35   :  { %12914 = vmatpush2.bf16.msra.mxu0 %v16343_v29  ;;  %12874 = vmatprep.subr.bf16.mxu1 %v16348_v1  ;;  %v16409_v29 = vld [vmem:[#allocation22 + $0x748] ss:$28 sps:$4 sm:$0xff]   ;;  %v16414_v1 = vld [vmem:[#allocation22 + $0x394] ss:$28 sps:$4 sm:$0xff]  }
 0xf36   :  { %12915 = vmatprep.subr.bf16.mxu0 %v16351_v57  ;;  %v16417_v57 = vld [vmem:[#allocation22 + $0x714] ss:$28 sps:$4 sm:$0xff]  }
 0xf38   :  { %12875 = vmatpush2.bf16.msra.mxu1 %v16346_v39  ;;  %v16412_v39 = vld [vmem:[#allocation22 + $0x390] ss:$28 sps:$4 sm:$0xff]  }
 0xf39   :  { %12916 = vmatpush2.bf16.msra.mxu0 %v16349_v62  ;;  %12876 = vmatprep.subr.bf16.mxu1 %v16354_v8  ;;  %v16415_v62 = vld [vmem:[#allocation22 + $0x710] ss:$28 sps:$4 sm:$0xff]   ;;  %v16420_v8 = vld [vmem:[#allocation22 + $0x6dc] ss:$28 sps:$4 sm:$0xff]  }
 0xf3a   :  { %12917 = vmatprep.subr.bf16.mxu0 %v16357_v10  ;;  %v16423_v10 = vld [vmem:[#allocation22 + $0xa5c] ss:$28 sps:$4 sm:$0xff]  }
 0xf3c   :  { %12877 = vmatpush2.bf16.msra.mxu1 %v16352_v15  ;;  %v16418_v15 = vld [vmem:[#allocation22 + $0x6d8] ss:$28 sps:$4 sm:$0xff]  }
 0xf3d   :  { %12918 = vmatpush2.bf16.msra.mxu0 %v16355_v33  ;;  %12878 = vmatprep.subr.bf16.mxu1 %v16360_v9  ;;  %v16421_v33 = vld [vmem:[#allocation22 + $0xa58] ss:$28 sps:$4 sm:$0xff]   ;;  %v16426_v9 = vld [vmem:[#allocation22 + $0x6a4] ss:$28 sps:$4 sm:$0xff]  }
 0xf3e   :  { %12919 = vmatprep.subr.bf16.mxu0 %v16363_v43  ;;  %v16429_v43 = vld [vmem:[#allocation22 + $0xa24] ss:$28 sps:$4 sm:$0xff]  }
 0xf40   :  { %12879 = vmatpush2.bf16.msra.mxu1 %v16358_v48  ;;  %v16424_v48 = vld [vmem:[#allocation22 + $0x6a0] ss:$28 sps:$4 sm:$0xff]  }
 0xf41   :  { %12920 = vmatpush2.bf16.msra.mxu0 %v16361_v18  ;;  %12880 = vmatprep.subr.bf16.mxu1 %v16366_v59  ;;  %v16427_v18 = vld [vmem:[#allocation22 + $0xa20] ss:$28 sps:$4 sm:$0xff]   ;;  %v16432_v59 = vld [vmem:[#allocation22 + $0x66c] ss:$28 sps:$4 sm:$0xff]  }
 0xf42   :  { %12921 = vmatprep.subr.bf16.mxu0 %v16369_v38  ;;  %v16435_v38 = vld [vmem:[#allocation22 + $0x9ec] ss:$28 sps:$4 sm:$0xff]  }
 0xf44   :  { %12881 = vmatpush2.bf16.msra.mxu1 %v16364_v14  ;;  %v16430_v14 = vld [vmem:[#allocation22 + $0x668] ss:$28 sps:$4 sm:$0xff]  }
 0xf45   :  { %12922 = vmatpush2.bf16.msra.mxu0 %v16367_v44  ;;  %12932 = vmatprep.subr.bf16.mxu1 %v16372_v45  ;;  %v16433_v44 = vld [vmem:[#allocation22 + $0x9e8] ss:$28 sps:$4 sm:$0xff]   ;;  %v16438_v45 = vld [vmem:[#allocation22 + $0x634] ss:$28 sps:$4 sm:$0xff]  }
 0xf46   :  { %12973 = vmatprep.subr.bf16.mxu0 %v16375_v52  ;;  %v16441_v52 = vld [vmem:[#allocation22 + $0x9b4] ss:$28 sps:$4 sm:$0xff]  }
 0xf47   :  { %12883 = vmatmul.mubr.bf16.vlgmr.msra.gmra.mxu1 %v17845_v41  ;;  %v17867_v30 = vpop.f32.mrf.mxu0 }
 0xf48   :  { %12924 = vmatmul.mubr.bf16.vlgmr.msra.gmra.mxu0 %v17816_v40  ;;  %12933 = vmatpush1.bf16.msra.mxu1 %v16370_v17  ;;  %v16436_v17 = vld [vmem:[#allocation22 + $0x630] ss:$28 sps:$4 sm:$0xff]  }
 0xf49   :  { %12964 = vmatprep.mubr.bf16.mxu1 %v17821_v47  ;;  %12974 = vmatpush1.bf16.msra.mxu0 %v16373_v50  ;;  %v17871_v4 = vpop.f32.mrf.mxu0  ;;  %v16439_v50 = vld [vmem:[#allocation22 + $0x9b0] ss:$28 sps:$4 sm:$0xff]  }
 0xf4a   :  { %13005 = vmatprep.mubr.bf16.mxu0 %v17831_v51  ;;  %12934 = vmatprep.subr.bf16.mxu1 %v16378_v20  ;;  %v16444_v20 = vld [vmem:[#allocation22 + $0x5fc] ss:$28 sps:$4 sm:$0xff]  }
 0xf4b   :  { %12975 = vmatprep.subr.bf16.mxu0 %v16381_v61  ;;  %v12683_v0 = vpop.f32.mrf.mxu0  ;;  %v16447_v61 = vld [vmem:[#allocation22 + $0x97c] ss:$28 sps:$4 sm:$0xff]  }
 0xf4c   :  { %12935 = vmatpush1.bf16.msra.mxu1 %v16376_v53  ;;  %v16442_v53 = vld [vmem:[#allocation22 + $0x5f8] ss:$28 sps:$4 sm:$0xff]   ;;  %v16448_v0 = vld [vmem:[#allocation22 + $0x5c0] ss:$28 sps:$4 sm:$0xff]  }
 0xf4d   :  { %12976 = vmatpush1.bf16.msra.mxu0 %v16379_v55  ;;  %v12684_v13 = vpop.f32.mrf.mxu0  ;;  %12936 = vmatprep.subr.bf16.mxu1 %v16384_v60  ;;  %v16445_v55 = vld [vmem:[#allocation22 + $0x978] ss:$28 sps:$4 sm:$0xff]   ;;  %v16450_v60 = vld [vmem:[#allocation22 + $0x5c4] ss:$28 sps:$4 sm:$0xff]  }
 0xf4e   :  { %12977 = vmatprep.subr.bf16.mxu0 %v16387_v58  ;;  %v16453_v58 = vld [vmem:[#allocation22 + $0x944] ss:$28 sps:$4 sm:$0xff]   ;;  %v16456_v13 = vld [vmem:[#allocation22 + $0x58c] ss:$28 sps:$4 sm:$0xff]  }
 0xf50   :  { %12937 = vmatpush1.bf16.msra.mxu1 %v16382_v22  ;;  %v16451_v22 = vld [vmem:[#allocation22 + $0x940] ss:$28 sps:$4 sm:$0xff]  }
 0xf51   :  { %12978 = vmatpush1.bf16.msra.mxu0 %v16385_v16  ;;  %12938 = vmatprep.subr.bf16.mxu1 %v16390_v3  ;;  %v16459_v16 = vld [vmem:[#allocation22 + $0x90c] ss:$28 sps:$4 sm:$0xff]  }
 0xf52   :  { %12979 = vmatprep.subr.bf16.mxu0 %v16393_v5  ;;  %v16454_v3 = vld [vmem:[#allocation22 + $0x588] ss:$28 sps:$4 sm:$0xff]  }
 0xf53   :  { %v16457_v5 = vld [vmem:[#allocation22 + $0x908] ss:$28 sps:$4 sm:$0xff]  }
 0xf54   :  { %12939 = vmatpush1.bf16.msra.mxu1 %v16388_v6  ;;  %v16462_v6 = vld [vmem:[#allocation22 + $0x554] ss:$28 sps:$4 sm:$0xff]  }
 0xf55   :  { %12980 = vmatpush1.bf16.msra.mxu0 %v16391_v7  ;;  %12940 = vmatprep.subr.bf16.mxu1 %v16396_v54  ;;  %v16465_v7 = vld [vmem:[#allocation22 + $0x8d4] ss:$28 sps:$4 sm:$0xff]  }
 0xf56   :  { %12981 = vmatprep.subr.bf16.mxu0 %v16399_v19  ;;  %v16460_v54 = vld [vmem:[#allocation22 + $0x550] ss:$28 sps:$4 sm:$0xff]  }
 0xf57   :  { %v16463_v19 = vld [vmem:[#allocation22 + $0x8d0] ss:$28 sps:$4 sm:$0xff]  }
 0xf58   :  { %12941 = vmatpush1.bf16.msra.mxu1 %v16394_v31  ;;  %v16468_v31 = vld [vmem:[#allocation22 + $0xc1c] ss:$28 sps:$4 sm:$0xff]  }
 0xf59   :  { %12982 = vmatpush1.bf16.msra.mxu0 %v16397_v23  ;;  %12942 = vmatprep.subr.bf16.mxu1 %v16402_v32  ;;  %v16469_v23 = vld [vmem:[#allocation22 + $0x360] ss:$28 sps:$4 sm:$0xff]   ;;  %v16466_v32 = vld [vmem:[#allocation22 + $0xc18] ss:$28 sps:$4 sm:$0xff]  }
 0xf5a   :  { %12983 = vmatprep.subr.bf16.mxu0 %v16405_v28  ;;  %v16470_v28 = vld [vmem:[#allocation22 + $0x1a0] ss:$28 sps:$4 sm:$0xff]  }
 0xf5c   :  { %12943 = vmatpush1.bf16.msra.mxu1 %v16400_v27  ;;  %v12680_v27 = vadd.f32 %v17867_v30, %v17860_v35 }
 0xf5d   :  { %12984 = vmatpush1.bf16.msra.mxu0 %v16403_v49  ;;  %12944 = vmatprep.subr.bf16.mxu1 %v16408_v12  ;;  %v16473_v49 = vld [vmem:[#allocation22 + $0xbe4] ss:$28 sps:$4 sm:$0xff]  }
 0xf5e   :  { %12985 = vmatprep.subr.bf16.mxu0 %v16411_v36 }
 0xf60   :  { %12945 = vmatpush1.bf16.msra.mxu1 %v16406_v25  ;;  %v16474_v25 = vld [vmem:[#allocation22 + $0x328] ss:$28 sps:$4 sm:$0xff]  }
 0xf61   :  { %12986 = vmatpush1.bf16.msra.mxu0 %v16409_v29  ;;  %12946 = vmatprep.subr.bf16.mxu1 %v16414_v1  ;;  %v12682_v29 = vadd.f32 %v17871_v4, %v17864_v42 }
 0xf62   :  { %12987 = vmatprep.subr.bf16.mxu0 %v16417_v57  ;;  %v16471_v57 = vld [vmem:[#allocation22 + $0xbe0] ss:$28 sps:$4 sm:$0xff]  }
 0xf64   :  { %12947 = vmatpush1.bf16.msra.mxu1 %v16412_v39  ;;  %v16475_v39 = vld [vmem:[#allocation22 + $0x168] ss:$28 sps:$4 sm:$0xff]  }
 0xf65   :  { %12988 = vmatpush1.bf16.msra.mxu0 %v16415_v62  ;;  %12948 = vmatprep.subr.bf16.mxu1 %v16420_v8  ;;  %v16478_v62 = vld [vmem:[#allocation22 + $0xbac] ss:$28 sps:$4 sm:$0xff]  }
 0xf66   :  { %12989 = vmatprep.subr.bf16.mxu0 %v16423_v10  ;;  %v16479_v10 = vld [vmem:[#allocation22 + $0x2f0] ss:$28 sps:$4 sm:$0xff]  }
 0xf68   :  { %12949 = vmatpush2.bf16.msra.mxu1 %v16418_v15  ;;  %v16476_v15 = vld [vmem:[#allocation22 + $0xba8] ss:$28 sps:$4 sm:$0xff]  }
 0xf69   :  { %12990 = vmatpush2.bf16.msra.mxu0 %v16421_v33  ;;  %12950 = vmatprep.subr.bf16.mxu1 %v16426_v9 }
 0xf6a   :  { %12991 = vmatprep.subr.bf16.mxu0 %v16429_v43  ;;  %v16480_v43 = vld [vmem:[#allocation22 + $0x130] ss:$28 sps:$4 sm:$0xff]  }
 0xf6c   :  { %12951 = vmatpush2.bf16.msra.mxu1 %v16424_v48  ;;  %v16483_v48 = vld [vmem:[#allocation22 + $0xb74] ss:$28 sps:$4 sm:$0xff]  }
 0xf6d   :  { %12992 = vmatpush2.bf16.msra.mxu0 %v16427_v18  ;;  %12952 = vmatprep.subr.bf16.mxu1 %v16432_v59  ;;  %v16484_v18 = vld [vmem:[#allocation22 + $0x2b8] ss:$28 sps:$4 sm:$0xff]   ;;  %v16481_v59 = vld [vmem:[#allocation22 + $0xb70] ss:$28 sps:$4 sm:$0xff]  }
 0xf6e   :  { %12993 = vmatprep.subr.bf16.mxu0 %v16435_v38  ;;  %v16488_v38 = vld [vmem:[#allocation22 + $0xb3c] ss:$28 sps:$4 sm:$0xff]  }
 0xf70   :  { %12953 = vmatpush2.bf16.msra.mxu1 %v16430_v14  ;;  %v16489_v14 = vld [vmem:[#allocation22 + $0x280] ss:$28 sps:$4 sm:$0xff]  }
 0xf71   :  { %12994 = vmatpush2.bf16.msra.mxu0 %v16433_v44  ;;  %12954 = vmatprep.subr.bf16.mxu1 %v16438_v45  ;;  %v16486_v44 = vld [vmem:[#allocation22 + $0xb38] ss:$28 sps:$4 sm:$0xff]   ;;  %v16490_v45 = vld [vmem:[#allocation22 + $0xc0] ss:$28 sps:$4 sm:$0xff]  }
 0xf72   :  { %12995 = vmatprep.subr.bf16.mxu0 %v16441_v52  ;;  %v16493_v52 = vld [vmem:[#allocation22 + $0xb04] ss:$28 sps:$4 sm:$0xff]  }
 0xf74   :  { %12955 = vmatpush2.bf16.msra.mxu1 %v16436_v17  ;;  %v16494_v17 = vld [vmem:[#allocation22 + $0x248] ss:$28 sps:$4 sm:$0xff]  }
 0xf75   :  { %12996 = vmatpush2.bf16.msra.mxu0 %v16439_v50  ;;  %12956 = vmatprep.subr.bf16.mxu1 %v16444_v20  ;;  %v16491_v20 = vld [vmem:[#allocation22 + $0xb00] ss:$28 sps:$4 sm:$0xff]  }
 0xf76   :  { %12997 = vmatprep.subr.bf16.mxu0 %v16447_v61 }
 0xf78   :  { %12957 = vmatpush2.bf16.msra.mxu1 %v16442_v53  ;;  %v16495_v53 = vld [vmem:[#allocation22 + $0x88] ss:$28 sps:$4 sm:$0xff]  }
 0xf79   :  { %12998 = vmatpush2.bf16.msra.mxu0 %v16445_v55  ;;  %12958 = vmatprep.subr.bf16.mxu1 %v16450_v60  ;;  %v16498_v55 = vld [vmem:[#allocation22 + $0xacc] ss:$28 sps:$4 sm:$0xff]  }
 0xf7a   :  { %12999 = vmatprep.subr.bf16.mxu0 %v16453_v58  ;;  %v16499_v60 = vld [vmem:[#allocation22 + $0x210] ss:$28 sps:$4 sm:$0xff]   ;;  %v16496_v58 = vld [vmem:[#allocation22 + $0xac8] ss:$28 sps:$4 sm:$0xff]  }
 0xf7c   :  { %12959 = vmatpush2.bf16.msra.mxu1 %v16448_v0  ;;  %v16500_v0 = vld [vmem:[#allocation22 + $0x50] ss:$28 sps:$4 sm:$0xff]  }
 0xf7d   :  { %13000 = vmatpush2.bf16.msra.mxu0 %v16451_v22  ;;  %12960 = vmatprep.subr.bf16.mxu1 %v16456_v13  ;;  %v16503_v22 = vld [vmem:[#allocation22 + $0xa94] ss:$28 sps:$4 sm:$0xff]  }
 0xf7e   :  { %13001 = vmatprep.subr.bf16.mxu0 %v16459_v16  ;;  %v16504_v13 = vld [vmem:[#allocation22 + $0x1d8] ss:$28 sps:$4 sm:$0xff]   ;;  %v16501_v16 = vld [vmem:[#allocation22 + $0xa90] ss:$28 sps:$4 sm:$0xff]  }
 0xf80   :  { %12961 = vmatpush2.bf16.msra.mxu1 %v16454_v3  ;;  %v16505_v3 = vld [vmem:[#allocation22 + $0x18] ss:$28 sps:$4 sm:$0xff]  }
 0xf81   :  { %13002 = vmatpush2.bf16.msra.mxu0 %v16457_v5  ;;  %12962 = vmatprep.subr.bf16.mxu1 %v16462_v6  ;;  %v16508_v5 = vld [vmem:[#allocation22 + $0xddc] ss:$28 sps:$4 sm:$0xff]  }
 0xf82   :  { %13003 = vmatprep.subr.bf16.mxu0 %v16465_v7  ;;  %v16509_v6 = vld [vmem:[#allocation22 + $0xa60] ss:$28 sps:$4 sm:$0xff]   ;;  %v16506_v7 = vld [vmem:[#allocation22 + $0xdd8] ss:$28 sps:$4 sm:$0xff]  }
 0xf84   :  { %12963 = vmatpush2.bf16.msra.mxu1 %v16460_v54  ;;  %v16510_v54 = vld [vmem:[#allocation22 + $0x8a0] ss:$28 sps:$4 sm:$0xff]  }
 0xf85   :  { %13004 = vmatpush2.bf16.msra.mxu0 %v16463_v19  ;;  %13014 = vmatprep.subr.bf16.mxu1 %v16468_v31  ;;  %v16513_v19 = vld [vmem:[#allocation22 + $0xda4] ss:$28 sps:$4 sm:$0xff]  }
 0xf86   :  { %14988 = vmatprep.subr.bf16.mxu0 %v16469_v23  ;;  %v16514_v31 = vld [vmem:[#allocation22 + $0xa28] ss:$28 sps:$4 sm:$0xff]   ;;  %v16511_v23 = vld [vmem:[#allocation22 + $0xda0] ss:$28 sps:$4 sm:$0xff]  }
 0xf87   :  { %v17876_v12 = vpop.f32.mrf.mxu0  ;;  %12965 = vmatmul.mubr.bf16.vlgmr.msra.gmra.mxu1 %v17823_v34  ;;  %v12720_v36 = vpop.f32.mrf.mxu1 }
 0xf88   :  { %13006 = vmatmul.mubr.bf16.vlgmr.msra.gmra.mxu0 %v17833_v11  ;;  %v12721_v1 = vadd.f32 %v12720_v36, %v12680_v27  ;;  %13015 = vmatpush1.bf16.msra.mxu1 %v16466_v32  ;;  %v16515_v32 = vld [vmem:[#allocation22 + $0x868] ss:$28 sps:$4 sm:$0xff]   ;;  %v16519_v27 = vld [vmem:[#allocation22 + $0x9f0] ss:$28 sps:$4 sm:$0xff]  }
 0xf89   :  { %13046 = vmatprep.mubr.bf16.mxu1 %v17843_v21  ;;  %14989 = vmatpush3.bf16.msra.mxu0 %v16470_v28  ;;  %v17883_v35 = vpop.f32.mrf.mxu0  ;;  %v12722_v30 = vpop.f32.mrf.mxu1  ;;  %v16518_v28 = vld [vmem:[#allocation22 + $0xd6c] ss:$28 sps:$4 sm:$0xff]  }
 0xf8a   :  { %16578 = vtanh.f32 %v12721_v1  ;;  %13087 = vmatprep.mubr.bf16.mxu0 %v17807_v46  ;;  %v12723_v8 = vadd.f32 %v12722_v30, %v12682_v29  ;;  %13016 = vmatprep.subr.bf16.mxu1 %v16473_v49  ;;  %v16485_v46 = vld [vmem:[#allocation22 + $0xf8] ss:$28 sps:$4 sm:$0xff]   ;;  %v16516_v49 = vld [vmem:[#allocation22 + $0xd68] ss:$28 sps:$4 sm:$0xff]   ;;  %v16520_v36 = vld [vmem:[#allocation22 + $0x830] ss:$28 sps:$4 sm:$0xff]  }
 0xf8b   :  { %v12765_v42 = vpop.f32.mrf.mxu0  ;;  %14990 = vmatprep.subr.bf16.mxu0 %v16474_v25  ;;  %v12724_v4 = vpop.f32.mrf.mxu1  ;;  %v16523_v25 = vld [vmem:[#allocation22 + $0xd34] ss:$28 sps:$4 sm:$0xff]  }
 0xf8c   :  { %16580 = vtanh.f32 %v12723_v8  ;;  %13017 = vmatpush1.bf16.msra.mxu1 %v16471_v57  ;;  %v16524_v29 = vld [vmem:[#allocation22 + $0x9b8] ss:$28 sps:$4 sm:$0xff]   ;;  %v16534_v8 = vld [vmem:[#allocation22 + $0x948] ss:$28 sps:$4 sm:$0xff]  }
 0xf8d   :  { %14991 = vmatpush3.bf16.msra.mxu0 %v16475_v39  ;;  %v12766_v33 = vpop.f32.mrf.mxu0  ;;  %v12725_v9 = vpop.f32.mrf.mxu1  ;;  %13018 = vmatprep.subr.bf16.mxu1 %v16478_v62  ;;  %v16525_v1 = vld [vmem:[#allocation22 + $0x7f8] ss:$28 sps:$4 sm:$0xff]   ;;  %v16530_v39 = vld [vmem:[#allocation22 + $0x7c0] ss:$28 sps:$4 sm:$0xff]   ;;  %v16535_v42 = vld [vmem:[#allocation22 + $0x788] ss:$28 sps:$4 sm:$0xff]  }
 0xf8e   :  { %14992 = vmatprep.subr.bf16.mxu0 %v16479_v10  ;;  %v16528_v57 = vld [vmem:[#allocation22 + $0xcfc] ss:$28 sps:$4 sm:$0xff]   ;;  %v16533_v62 = vld [vmem:[#allocation22 + $0xcc4] ss:$28 sps:$4 sm:$0xff]   ;;  %v16538_v4 = vld [vmem:[#allocation22 + $0xc8c] ss:$28 sps:$4 sm:$0xff]  }
 0xf8f   :  { %v16526_v30 = vld [vmem:[#allocation22 + $0xcf8] ss:$28 sps:$4 sm:$0xff]   ;;  %v16531_v10 = vld [vmem:[#allocation22 + $0xcc0] ss:$28 sps:$4 sm:$0xff]   ;;  %v16536_v33 = vld [vmem:[#allocation22 + $0xc88] ss:$28 sps:$4 sm:$0xff]  }
 0xf90   :  { %13019 = vmatpush1.bf16.msra.mxu1 %v16476_v15  ;;  %v16539_v15 = vld [vmem:[#allocation22 + $0x910] ss:$28 sps:$4 sm:$0xff]  }
 0xf91   :  { %14993 = vmatpush3.bf16.msra.mxu0 %v16480_v43  ;;  %13020 = vmatprep.subr.bf16.mxu1 %v16483_v48  ;;  %v16540_v9 = vld [vmem:[#allocation22 + $0x750] ss:$28 sps:$4 sm:$0xff]   ;;  %v16544_v48 = vld [vmem:[#allocation22 + $0x8d8] ss:$28 sps:$4 sm:$0xff]  }
 0xf92   :  { %14994 = vmatprep.subr.bf16.mxu0 %v16484_v18  ;;  %v16543_v43 = vld [vmem:[#allocation22 + $0xc54] ss:$28 sps:$4 sm:$0xff]  }
 0xf93   :  { %v16541_v18 = vld [vmem:[#allocation22 + $0xc50] ss:$28 sps:$4 sm:$0xff]  }
 0xf94   :  { %13021 = vmatpush1.bf16.msra.mxu1 %v16481_v59  ;;  %v16545_v59 = vld [vmem:[#allocation22 + $0x718] ss:$28 sps:$4 sm:$0xff]  }
 0xf95   :  { %14995 = vmatpush3.bf16.msra.mxu0 %v16485_v46  ;;  %13022 = vmatprep.subr.bf16.mxu1 %v16488_v38  ;;  %v16546_v46 = vld [vmem:[#allocation22 + $0x6e0] ss:$28 sps:$4 sm:$0xff]  }
 0xf96   :  { %14996 = vmatprep.subr.bf16.mxu0 %v16489_v14  ;;  %v16547_v38 = vld [vmem:[#allocation22 + $0x520] ss:$28 sps:$4 sm:$0xff]   ;;  %v16548_v14 = vld [vmem:[#allocation22 + $0x6a8] ss:$28 sps:$4 sm:$0xff]  }
 0xf97   :  { %v16579_v50 = vpop.eup %16578 }
 0xf98   :  { %13222 = vst [vmem:[%s17412_s4] sm:$0xff] %v16579_v50  ;;  %13023 = vmatpush1.bf16.msra.mxu1 %v16486_v44 }
 0xf99   :  { %v16581_v61 = vpop.eup %16580  ;;  %14997 = vmatpush3.bf16.msra.mxu0 %v16490_v45  ;;  %13024 = vmatprep.subr.bf16.mxu1 %v16493_v52  ;;  %v16549_v52 = vld [vmem:[#allocation22 + $0x4e8] ss:$28 sps:$4 sm:$0xff]  }
 0xf9a   :  { %13223 = vst [vmem:[%s17412_s4 + $0x8] sm:$0xff] %v16581_v61  ;;  %14998 = vmatprep.subr.bf16.mxu0 %v16494_v17 }
 0xf9c   :  { %13025 = vmatpush1.bf16.msra.mxu1 %v16491_v20  ;;  %v16550_v20 = vld [vmem:[#allocation22 + $0x670] ss:$28 sps:$4 sm:$0xff]  }
 0xf9d   :  { %14999 = vmatpush3.bf16.msra.mxu0 %v16495_v53  ;;  %13026 = vmatprep.subr.bf16.mxu1 %v16498_v55  ;;  %v16551_v55 = vld [vmem:[#allocation22 + $0x4b0] ss:$28 sps:$4 sm:$0xff]  }
 0xf9e   :  { %15000 = vmatprep.subr.bf16.mxu0 %v16499_v60 }
 0xfa0   :  { %13027 = vmatpush1.bf16.msra.mxu1 %v16496_v58 }
 0xfa1   :  { %15001 = vmatpush3.bf16.msra.mxu0 %v16500_v0  ;;  %13028 = vmatprep.subr.bf16.mxu1 %v16503_v22  ;;  %v16552_v0 = vld [vmem:[#allocation22 + $0x638] ss:$28 sps:$4 sm:$0xff]   ;;  %v16554_v22 = vld [vmem:[#allocation22 + $0x600] ss:$28 sps:$4 sm:$0xff]  }
 0xfa2   :  { %15002 = vmatprep.subr.bf16.mxu0 %v16504_v13  ;;  %v16556_v13 = vld [vmem:[#allocation22 + $0x5c8] ss:$28 sps:$4 sm:$0xff]  }
 0xfa4   :  { %13029 = vmatpush1.bf16.msra.mxu1 %v16501_v16  ;;  %v16557_v16 = vld [vmem:[#allocation22 + $0x408] ss:$28 sps:$4 sm:$0xff]  }
 0xfa5   :  { %15003 = vmatpush3.bf16.msra.mxu0 %v16505_v3  ;;  %13030 = vmatprep.subr.bf16.mxu1 %v16508_v5  ;;  %v16558_v3 = vld [vmem:[#allocation22 + $0x590] ss:$28 sps:$4 sm:$0xff]  }
 0xfa6   :  { %15032 = vmatprep.subr.bf16.mxu0 %v16509_v6  ;;  %v16559_v5 = vld [vmem:[#allocation22 + $0x3d0] ss:$28 sps:$4 sm:$0xff]   ;;  %v16560_v6 = vld [vmem:[#allocation22 + $0x558] ss:$28 sps:$4 sm:$0xff]  }
 0xfa8   :  { %13088 = vmatmul.mubr.bf16.vlgmr.msra.gmra.mxu0 %v17816_v40  ;;  %13031 = vmatpush2.bf16.msra.mxu1 %v16506_v7  ;;  %v16521_v40 = vld [vmem:[#allocation22 + $0xd30] ss:$28 sps:$4 sm:$0xff]   ;;  %v16561_v7 = vld [vmem:[#allocation22 + $0x398] ss:$28 sps:$4 sm:$0xff]  }
 0xfa9   :  { %15033 = vmatpush3.bf16.msra.mxu0 %v16510_v54  ;;  %13167 = vmatprep.mubr.bf16.mxu0 %v17831_v51  ;;  %v16529_v51 = vld [vmem:[#allocation22 + $0x980] ss:$28 sps:$4 sm:$0xff]  }
 0xfaa   :  { %13032 = vmatprep.subr.bf16.mxu1 %v16513_v19  ;;  %15034 = vmatprep.subr.bf16.mxu0 %v16514_v31  ;;  %v16562_v54 = vld [vmem:[#allocation22 + $0xde0] ss:$28 sps:$4 sm:$0xff]   ;;  %v16564_v31 = vld [vmem:[#allocation22 + $0xda8] ss:$28 sps:$4 sm:$0xff]  }
 0xfab   :  { %v16563_v19 = vld [vmem:[#allocation22 + $0xc20] ss:$28 sps:$4 sm:$0xff]  }
 0xfac   :  { %13033 = vmatpush2.bf16.msra.mxu1 %v16511_v23  ;;  %v16565_v23 = vld [vmem:[#allocation22 + $0xbe8] ss:$28 sps:$4 sm:$0xff]  }
 0xfad   :  { %15035 = vmatpush3.bf16.msra.mxu0 %v16515_v32  ;;  %13034 = vmatprep.subr.bf16.mxu1 %v16518_v28  ;;  %v16566_v32 = vld [vmem:[#allocation22 + $0xd70] ss:$28 sps:$4 sm:$0xff]  }
 0xfae   :  { %15036 = vmatprep.subr.bf16.mxu0 %v16519_v27  ;;  %v16567_v28 = vld [vmem:[#allocation22 + $0xbb0] ss:$28 sps:$4 sm:$0xff]   ;;  %v16568_v27 = vld [vmem:[#allocation22 + $0xd38] ss:$28 sps:$4 sm:$0xff]  }
 0xfb0   :  { %13035 = vmatpush2.bf16.msra.mxu1 %v16516_v49  ;;  %v16569_v49 = vld [vmem:[#allocation22 + $0xb78] ss:$28 sps:$4 sm:$0xff]  }
 0xfb1   :  { %15037 = vmatpush3.bf16.msra.mxu0 %v16520_v36  ;;  %13036 = vmatprep.subr.bf16.mxu1 %v16523_v25  ;;  %v16570_v36 = vld [vmem:[#allocation22 + $0xd00] ss:$28 sps:$4 sm:$0xff]  }
 0xfb2   :  { %15038 = vmatprep.subr.bf16.mxu0 %v16524_v29  ;;  %v16571_v25 = vld [vmem:[#allocation22 + $0xb40] ss:$28 sps:$4 sm:$0xff]   ;;  %v16572_v29 = vld [vmem:[#allocation22 + $0xcc8] ss:$28 sps:$4 sm:$0xff]  }
 0xfb4   :  { %13037 = vmatpush2.bf16.msra.mxu1 %v16521_v40  ;;  %v16574_v40 = vld [vmem:[#allocation22 + $0xc90] ss:$28 sps:$4 sm:$0xff]  }
 0xfb5   :  { %15039 = vmatpush3.bf16.msra.mxu0 %v16525_v1  ;;  %13038 = vmatprep.subr.bf16.mxu1 %v16528_v57  ;;  %v16575_v1 = vld [vmem:[#allocation22 + $0xad0] ss:$28 sps:$4 sm:$0xff]   ;;  %v16576_v57 = vld [vmem:[#allocation22 + $0xc58] ss:$28 sps:$4 sm:$0xff]  }
 0xfb6   :  { %15040 = vmatprep.subr.bf16.mxu0 %v16529_v51  ;;  %v17905_v51 = vld [vmem:[#allocation43] sm:$0xff] }
 0xfb8   :  { %13039 = vmatpush2.bf16.msra.mxu1 %v16526_v30  ;;  %v10239_v30 = vrot.slane %v17905_v51, %v17597_v37 }
 0xfb9   :  { %15041 = vmatpush3.bf16.msra.mxu0 %v16530_v39  ;;  %13040 = vmatprep.subr.bf16.mxu1 %v16533_v62  ;;  %v16577_v62 = vld [vmem:[#allocation22 + $0xa98] ss:$28 sps:$4 sm:$0xff]  }
 0xfba   :  { %15042 = vmatprep.subr.bf16.mxu0 %v16534_v8  ;;  %v12764_v8 = vadd.f32 %v17883_v35, %v10239_v30 }
 0xfbc   :  { %13041 = vmatpush2.bf16.msra.mxu1 %v16531_v10 }
 0xfbd   :  { %15043 = vmatpush3.bf16.msra.mxu0 %v16535_v42  ;;  %13042 = vmatprep.subr.bf16.mxu1 %v16538_v4 }
 0xfbe   :  { %15044 = vmatprep.subr.bf16.mxu0 %v16539_v15 }
 0xfc0   :  { %13043 = vmatpush2.bf16.msra.mxu1 %v16536_v33 }
 0xfc1   :  { %15045 = vmatpush3.bf16.msra.mxu0 %v16540_v9  ;;  %13044 = vmatprep.subr.bf16.mxu1 %v16543_v43 }
 0xfc2   :  { %15046 = vmatprep.subr.bf16.mxu0 %v16544_v48 }
 0xfc4   :  { %13045 = vmatpush2.bf16.msra.mxu1 %v16541_v18 }
 0xfc5   :  { %15047 = vmatpush3.bf16.msra.mxu0 %v16545_v59  ;;  %15010 = vmatprep.subr.bf16.mxu1 %v16546_v46 }
 0xfc7   :  { %v17890_v44 = vpop.f32.mrf.mxu1  ;;  %v17892_v45 = vpop.f32.mrf.mxu0  ;;  %13047 = vmatmul.mubr.bf16.vlgmr.msra.gmra.mxu1 %v17845_v41 }
 0xfc8   :  { %13168 = vmatmul.mubr.bf16.vlgmr.msra.gmra.mxu0 %v17833_v11  ;;  %15011 = vmatpush3.bf16.msra.mxu1 %v16547_v38  ;;  %v16553_v11 = vld [vmem:[#allocation22 + $0x478] ss:$28 sps:$4 sm:$0xff]  }
 0xfc9   :  { %13127 = vmatprep.mubr.bf16.mxu1 %v17821_v47  ;;  %v17897_v17 = vpop.f32.mrf.mxu1  ;;  %v17899_v50 = vpop.f32.mrf.mxu0  ;;  %15012 = vmatprep.subr.bf16.mxu1 %v16548_v14  ;;  %v16555_v47 = vld [vmem:[#allocation22 + $0x440] ss:$28 sps:$4 sm:$0xff]  }
 0xfcb   :  { %v12806_v61 = vpop.f32.mrf.mxu1  ;;  %v12847_v53 = vpop.f32.mrf.mxu0 }
 0xfcc   :  { %15013 = vmatpush3.bf16.msra.mxu1 %v16549_v52 }
 0xfcd   :  { %v12807_v60 = vpop.f32.mrf.mxu1  ;;  %v12848_v58 = vpop.f32.mrf.mxu0  ;;  %15014 = vmatprep.subr.bf16.mxu1 %v16550_v20 }
 0xfce   :  { %v10243_v58 = vrot.slane %v17905_v51, %v17614_v63 }
 0xfd0   :  { %15015 = vmatpush3.bf16.msra.mxu1 %v16551_v55 }
 0xfd1   :  { %15016 = vmatprep.subr.bf16.mxu1 %v16552_v0  ;;  %v10247_v0 = vrot.slane %v17905_v51, %v17639_v24 }
 0xfd4   :  { %15017 = vmatpush3.bf16.msra.mxu1 %v16553_v11 }
 0xfd5   :  { %15018 = vmatprep.subr.bf16.mxu1 %v16554_v22 }
 0xfd8   :  { %15019 = vmatpush3.bf16.msra.mxu1 %v16555_v47 }
 0xfd9   :  { %15020 = vmatprep.subr.bf16.mxu1 %v16556_v13 }
 0xfdc   :  { %15021 = vmatpush3.bf16.msra.mxu1 %v16557_v16 }
 0xfdd   :  { %15022 = vmatprep.subr.bf16.mxu1 %v16558_v3 }
 0xfe0   :  { %15023 = vmatpush3.bf16.msra.mxu1 %v16559_v5 }
 0xfe1   :  { %15024 = vmatprep.subr.bf16.mxu1 %v16560_v6 }
 0xfe4   :  { %15025 = vmatpush3.bf16.msra.mxu1 %v16561_v7 }
 0xfe5   :  { %15054 = vmatprep.subr.bf16.mxu1 %v16562_v54 }
 0xfe7   :  { %13128 = vmatmul.mubr.bf16.vlgmr.msra.gmra.mxu1 %v17823_v34  ;;  %v16573_v34 = vld [vmem:[#allocation22 + $0xb08] ss:$28 sps:$4 sm:$0xff]  }
 0xfe8   :  { %15055 = vmatpush3.bf16.msra.mxu1 %v16563_v19  ;;  %13207 = vmatprep.mubr.bf16.mxu1 %v17843_v21  ;;  %v10235_v21 = vrot.slane %v17852_v2, %v17576_v26  ;;  %v12805_v26 = vadd.f32 %v17897_v17, %v12764_v8 }
 0xfe9   :  { %15056 = vmatprep.subr.bf16.mxu1 %v16564_v31 }
 0xfea   :  { %v12762_v39 = vadd.f32 %v17876_v12, %v10235_v21  ;;  %v12846_v37 = vadd.f32 %v17899_v50, %v12805_v26 }
 0xfec   :  { %15057 = vmatpush3.bf16.msra.mxu1 %v16565_v23  ;;  %v12803_v10 = vadd.f32 %v17890_v44, %v12762_v39 }
 0xfed   :  { %15058 = vmatprep.subr.bf16.mxu1 %v16566_v32 }
 0xfee   :  { %v12844_v2 = vadd.f32 %v17892_v45, %v12803_v10 }
 0xff0   :  { %15059 = vmatpush3.bf16.msra.mxu1 %v16567_v28 }
 0xff1   :  { %15060 = vmatprep.subr.bf16.mxu1 %v16568_v27 }
 0xff4   :  { %15061 = vmatpush3.bf16.msra.mxu1 %v16569_v49 }
 0xff5   :  { %15062 = vmatprep.subr.bf16.mxu1 %v16570_v36 }
 0xff8   :  { %15063 = vmatpush3.bf16.msra.mxu1 %v16571_v25 }
 0xff9   :  { %15064 = vmatprep.subr.bf16.mxu1 %v16572_v29 }
 0xffc   :  { %15065 = vmatpush3.bf16.msra.mxu1 %v16573_v34  ;;  %v10251_v34 = vrot.slane %v17905_v51, %v17660_v56 }
 0xffd   :  { %15066 = vmatprep.subr.bf16.mxu1 %v16574_v40 }
0x1000   :  { %15067 = vmatpush3.bf16.msra.mxu1 %v16575_v1 }
0x1001   :  { %15068 = vmatprep.subr.bf16.mxu1 %v16576_v57 }
0x1004   :  { %15069 = vmatpush3.bf16.msra.mxu1 %v16577_v62 }
0x1007   :  { %v12884_v42 = vpop.f32.mrf.mxu1  ;;  %13208 = vmatmul.mubr.bf16.vlgmr.msra.gmra.mxu1 %v17845_v41 }
0x1008   :  { %v12885_v12 = vadd.f32 %v12884_v42, %v12844_v2  ;;  %v12925_v4 = vpop.f32.mrf.mxu0 }
0x1009   :  { %v12886_v15 = vpop.f32.mrf.mxu1  ;;  %v12926_v11 = vadd.f32 %v12925_v4, %v10243_v58 }
0x100a   :  { %16582 = vtanh.f32 %v12885_v12  ;;  %v12887_v33 = vadd.f32 %v12886_v15, %v12846_v37  ;;  %v12927_v35 = vpop.f32.mrf.mxu0 }
0x100b   :  { %v12888_v9 = vpop.f32.mrf.mxu1  ;;  %v12928_v22 = vadd.f32 %v12927_v35, %v10247_v0 }
0x100c   :  { %16584 = vtanh.f32 %v12887_v33  ;;  %v12929_v43 = vpop.f32.mrf.mxu0 }
0x100d   :  { %v12889_v48 = vpop.f32.mrf.mxu1 }
0x100e   :  { %v12930_v18 = vpop.f32.mrf.mxu0 }
0x1017   :  { %v16583_v59 = vpop.eup %16582 }
0x1018   :  { %13224 = vst [vmem:[%s17412_s4 + $0x10] sm:$0xff] %v16583_v59 }
0x1019   :  { %v16585_v46 = vpop.eup %16584 }
0x101a   :  { %13225 = vst [vmem:[%s17412_s4 + $0x18] sm:$0xff] %v16585_v46 }
0x1047   :  { %v12966_v38 = vpop.f32.mrf.mxu1 }
0x1048   :  { %v13007_v41 = vpop.f32.mrf.mxu0  ;;  %v12967_v47 = vadd.f32 %v12966_v38, %v12926_v11 }
0x1049   :  { %v12968_v14 = vpop.f32.mrf.mxu1 }
0x104a   :  { %v13009_v44 = vpop.f32.mrf.mxu0  ;;  %v12969_v13 = vadd.f32 %v12968_v14, %v12928_v22  ;;  %v13008_v16 = vadd.f32 %v13007_v41, %v12967_v47 }
0x104b   :  { %v12970_v45 = vpop.f32.mrf.mxu1 }
0x104c   :  { %v13011_v52 = vpop.f32.mrf.mxu0  ;;  %v13010_v5 = vadd.f32 %v13009_v44, %v12969_v13 }
0x104d   :  { %v12971_v17 = vpop.f32.mrf.mxu1 }
0x104e   :  { %v13012_v50 = vpop.f32.mrf.mxu0 }
0x1068   :  { %v15004_v20 = vpop.f32.mrf.mxu0 }
0x106a   :  { %v15005_v61 = vpop.f32.mrf.mxu0 }
0x106b   :  { %v15006_v53 = vadd.f32 %v15005_v61, %v15004_v20 }
0x106c   :  { %v15007_v55 = vpop.f32.mrf.mxu0 }
0x106d   :  { %v13090_v21 = vadd.f32 %v15006_v53, %v10251_v34 }
0x106e   :  { %v15008_v60 = vpop.f32.mrf.mxu0 }
0x1087   :  { %v13048_v3 = vpop.f32.mrf.mxu1 }
0x1088   :  { %v13049_v6 = vadd.f32 %v13048_v3, %v13008_v16  ;;  %v15048_v7 = vpop.f32.mrf.mxu0 }
0x1089   :  { %v13050_v54 = vpop.f32.mrf.mxu1 }
0x108a   :  { %16586 = vtanh.f32 %v13049_v6  ;;  %v13051_v19 = vadd.f32 %v13050_v54, %v13010_v5  ;;  %v15049_v31 = vpop.f32.mrf.mxu0 }
0x108b   :  { %v13052_v23 = vpop.f32.mrf.mxu1  ;;  %v15050_v30 = vadd.f32 %v15049_v31, %v15048_v7 }
0x108c   :  { %16588 = vtanh.f32 %v13051_v19  ;;  %v15051_v63 = vpop.f32.mrf.mxu0 }
0x108d   :  { %v13053_v32 = vpop.f32.mrf.mxu1 }
0x108e   :  { %v15052_v24 = vpop.f32.mrf.mxu0 }
0x1097   :  { %v16587_v28 = vpop.eup %16586 }
0x1098   :  { %13226 = vst [vmem:[%s17412_s4 + $0x20] sm:$0xff] %v16587_v28 }
0x1099   :  { %v16589_v27 = vpop.eup %16588 }
0x109a   :  { %13227 = vst [vmem:[%s17412_s4 + $0x28] sm:$0xff] %v16589_v27 }
0x10a7   :  { %v15026_v49 = vpop.f32.mrf.mxu1 }
0x10a9   :  { %v15027_v36 = vpop.f32.mrf.mxu1 }
0x10aa   :  { %v15028_v40 = vadd.f32 %v15027_v36, %v15026_v49 }
0x10ab   :  { %v15029_v25 = vpop.f32.mrf.mxu1 }
0x10ac   :  { %v13130_v1 = vadd.f32 %v15028_v40, %v13090_v21 }
0x10ad   :  { %v15030_v29 = vpop.f32.mrf.mxu1 }
0x10ae   :  { %v13170_v62 = vadd.f32 %v15050_v30, %v13130_v1 }
0x10c7   :  { %v15070_v57 = vpop.f32.mrf.mxu1 }
0x10c9   :  { %v15071_v39 = vpop.f32.mrf.mxu1 }
0x10ca   :  { %v15072_v8 = vadd.f32 %v15071_v39, %v15070_v57 }
0x10cb   :  { %v15073_v10 = vpop.f32.mrf.mxu1 }
0x10cc   :  { %v13210_v26 = vadd.f32 %v15072_v8, %v13170_v62 }
0x10cd   :  { %v15074_v2 = vpop.f32.mrf.mxu1 }
0x10ce   :  { %16590 = vtanh.f32 %v13210_v26 }
0x10db   :  { %v16591_v42 = vpop.eup %16590 }
0x10dc   :  { %13228 = vst [vmem:[%s17412_s4 + $0x30] sm:$0xff] %v16591_v42 }
0x10dd   :  { %13237 = vsyncpa [#allocation3], 1 }
0x10de   :  { %13238 = vsyncpa [#allocation5], 1 }
0x10df   :  { %13239 = vsyncpa [#allocation8], 1 }
0x10e0   :  { %13240 = vsyncpa [#allocation11], 1 }
0x10e1   :  { %13241 = vsyncpa [#allocation14], 1 }
0x10e2   :  { %13242 = vsyncpa [#allocation17], 1 }
0x10e3   :  { %13243 = vsyncpa [#allocation20], 1 }
0x10e4   :  { %13244 = vsyncpa [#allocation23], 1 }
0x10e5   :  { %13245 = vsyncpa [#allocation26], 1 }
0x10e6   :  { %13246 = vsyncpa [#allocation29], 1 }
0x10e7   :  { %13247 = vsyncpa [#allocation32], 1 }
0x10e8   :  { %13248 = vsyncpa [#allocation35], 1 }
0x10e9   :  { %13249 = vsyncpa [#allocation38], 1 }
0x10ea   :  { %13250 = vsyncpa [#allocation41], 1 }
0x10eb   :  { %13251 = vsyncpa [#allocation44], 1 }

</bundles_post_ra>
